<compile_context>
chip_gen: v7x
topology: tpu7x:2x2x1
jax: 0.10.0
libtpu: 0.0.40
codegen_flags: <defaults>
</compile_context>

<pallas_src>
import functools
import math

import jax
import jax.numpy as jnp
from jax.experimental import pallas as pl
from jax.experimental.pallas import tpu as pltpu

LN_EPS = 1e-12        # ViTConfig.layer_norm_eps default
MLP_CHUNK = 512       # lanes per FC1/GELU/FC2 chunk (divides 3072)


# ----------------------------- in-kernel helpers -----------------------------

def _erf(x):
    # Abramowitz & Stegun 7.1.26 polynomial (|err| < 1.5e-7), matching torch's exact
    # erf-GELU.  Exact divide here (approx reciprocal would swamp the polynomial bound).
    a1, a2, a3, a4, a5 = (0.254829592, -0.284496736, 1.421413741,
                          -1.453152027, 1.061405429)
    p = 0.3275911
    ax = jnp.abs(x)
    t = 1.0 / (1.0 + p * ax)
    poly = ((((a5 * t + a4) * t + a3) * t + a2) * t + a1) * t
    y = 1.0 - poly * jnp.exp(-ax * ax)
    return jnp.where(x >= 0.0, y, -y)


def _gelu(x):
    # torch.nn.functional.gelu (exact / erf form), as used by HF "gelu".
    return 0.5 * x * (1.0 + _erf(x * (1.0 / math.sqrt(2.0))))


def _layernorm(x, w, b):
    mu = jnp.mean(x, axis=-1, keepdims=True)
    var = jnp.mean(jnp.square(x - mu), axis=-1, keepdims=True)
    return (x - mu) * jax.lax.rsqrt(var + LN_EPS) * w + b


# ----------------------------- fused encoder kernel ---------------------------

def _vit_encoder_kernel(num_heads, mlp_chunk,
                        patches_ref, pw_ref, base_ref, amask_ref,
                        ln1w_ref, ln1b_ref, wqkv_ref, bqkv_ref, wo_ref, bo_ref,
                        ln2w_ref, ln2b_ref, f1w_ref, f1b_ref, f2w_ref, f2b_ref,
                        flnw_ref, flnb_ref,
                        out_ref, resid_ref, ctx_ref):
    layer = pl.program_id(0)
    n_layers = pl.num_programs(0)
    M, H = resid_ref.shape
    dh = H // num_heads
    inter = f1w_ref.shape[1]

    # ---- first grid step: fused patch-embed + [CLS]/pos/pad token layout ----
    # patches_ref rows: im2col'd patch vectors (zeros in CLS & pad slots);
    # base_ref pre-bakes cls+pos (CLS rows), pos+patch_bias (patch rows), 0 (pad rows),
    # so one matmul + add builds the whole sublane-padded token slab.
    @pl.when(layer == 0)
    def _():
        resid_ref[...] = (
            jnp.dot(patches_ref[...].astype(jnp.bfloat16), pw_ref[...],
                    preferred_element_type=jnp.float32)
            + base_ref[...])

    x = resid_ref[...]                                      # (M, H) f32 residual stream

    # ---------------- attention block ----------------
    h = _layernorm(x, ln1w_ref[...], ln1b_ref[...])         # layernorm_before
    # fused lane-dense QKV projection: one (M,H)@(H,3H) bf16 matmul, f32 accumulation
    qkv = jnp.dot(h.astype(jnp.bfloat16), wqkv_ref[...],
                  preferred_element_type=jnp.float32) + bqkv_ref[...]   # (M, 3H)

    amask = amask_ref[...]        # (M, M) additive mask: batch-block-diag + key padding
    for hd in range(num_heads):   # tiny (M, dh) dots; contexts land in a lane-dense slab
        lo = hd * dh
        qh = qkv[:, lo:lo + dh]                 # 1/sqrt(dh) already folded into wqkv
        kh = qkv[:, H + lo:H + lo + dh]
        vh = qkv[:, 2 * H + lo:2 * H + lo + dh]
        s = jnp.dot(qh, kh.T, preferred_element_type=jnp.float32) + amask
        s = s - jnp.max(s, axis=-1, keepdims=True)
        p = jnp.exp(s)
        p = p * pl.reciprocal(jnp.sum(p, axis=-1, keepdims=True), approx=True)
        ctx_ref[:, lo:lo + dh] = jnp.dot(p, vh, preferred_element_type=jnp.float32)

    attn = jnp.dot(ctx_ref[...].astype(jnp.bfloat16), wo_ref[...],
                   preferred_element_type=jnp.float32) + bo_ref[...]
    x1 = x + attn                                           # residual 1

    # ---------------- MLP block, chunked over the 3072-wide intermediate ----------------
    h2 = _layernorm(x1, ln2w_ref[...], ln2b_ref[...]).astype(jnp.bfloat16)
    acc = jnp.zeros((M, H), jnp.float32)
    for c0 in range(0, inter, mlp_chunk):                   # bounds GELU live temporaries
        c1 = c0 + mlp_chunk
        m = jnp.dot(h2, f1w_ref[:, c0:c1],
                    preferred_element_type=jnp.float32) + f1b_ref[:, c0:c1]
        m = _gelu(m)
        acc = acc + jnp.dot(m.astype(jnp.bfloat16), f2w_ref[c0:c1, :],
                            preferred_element_type=jnp.float32)
    x2 = x1 + acc + f2b_ref[...]                            # residual 2

    resid_ref[...] = x2

    # ---- last grid step: fused final LayerNorm -> last_hidden_state ----
    @pl.when(layer == n_layers - 1)
    def _():
        out_ref[...] = _layernorm(x2, flnw_ref[...], flnb_ref[...]).astype(out_ref.dtype)


# ----------------------------- parameters -------------------------------------

def init_params(key, in_ch, hidden, patch, img,
                num_layers=12, num_heads=12, inter=3072):
    assert hidden % num_heads == 0
    npatch = (img // patch) ** 2
    cpp = in_ch * patch * patch
    q_scale = 1.0 / math.sqrt(hidden // num_heads)

    keys = jax.random.split(key, 3 + num_layers)

    def nrm(k, shape, scale=0.02):
        return (scale * jax.random.normal(k, shape)).astype(jnp.float32)

    params = {
        'patch_w': nrm(keys[0], (cpp, hidden)).astype(jnp.bfloat16),
        'patch_b': jnp.zeros((1, hidden), jnp.float32),
        'cls': nrm(keys[1], (1, 1, hidden)),
        'pos': nrm(keys[2], (1, npatch + 1, hidden)),
        'final_ln_w': jnp.ones((1, hidden), jnp.float32),
        'final_ln_b': jnp.zeros((1, hidden), jnp.float32),
    }

    layer_list = []
    for li in range(num_layers):
        lk = jax.random.split(keys[3 + li], 9)
        # 1/sqrt(dh) folded into the Q third of the fused QKV projection (init-time, free).
        wq = nrm(lk[0], (hidden, hidden)) * q_scale
        wk = nrm(lk[1], (hidden, hidden))
        wv = nrm(lk[2], (hidden, hidden))
        bq = nrm(lk[3], (1, hidden), 0.01) * q_scale
        bk = nrm(lk[4], (1, hidden), 0.01)
        bv = nrm(lk[5], (1, hidden), 0.01)
        layer_list.append({
            'ln1w': jnp.ones((1, hidden), jnp.float32),
            'ln1b': jnp.zeros((1, hidden), jnp.float32),
            'wqkv': jnp.concatenate([wq, wk, wv], axis=1).astype(jnp.bfloat16),
            'bqkv': jnp.concatenate([bq, bk, bv], axis=1),
            'wo': nrm(lk[6], (hidden, hidden)).astype(jnp.bfloat16),
            'bo': jnp.zeros((1, hidden), jnp.float32),
            'ln2w': jnp.ones((1, hidden), jnp.float32),
            'ln2b': jnp.zeros((1, hidden), jnp.float32),
            'f1w': nrm(lk[7], (hidden, inter)).astype(jnp.bfloat16),
            'f1b': jnp.zeros((1, inter), jnp.float32),
            'f2w': nrm(lk[8], (inter, hidden)).astype(jnp.bfloat16),
            'f2b': jnp.zeros((1, hidden), jnp.float32),
        })
    # stack per-layer params on a leading "layer" axis -> indexed by the grid's layer axis
    params['layers'] = jax.tree_util.tree_map(
        lambda *xs: jnp.stack(xs, axis=0), *layer_list)
    return params


# ----------------------------- forward -----------------------------------------

def vit_encoder_forward(x, params, *, patch, num_heads=12):
    # x: (B, C, H, W)  NCHW, like PyTorch pixel_values
    B, C, Hi, Wi = x.shape
    Hp, Wp = Hi // patch, Wi // patch
    Np = Hp * Wp
    CPP = C * patch * patch
    Hd = params['patch_w'].shape[1]
    lp = params['layers']
    L = lp['wqkv'].shape[0]
    inter = lp['f1w'].shape[2]
    chunk = MLP_CHUNK if inter % MLP_CHUNK == 0 else inter

    S_real = Np + 1
    S_pad = ((S_real + 7) // 8) * 8          # sublane-aligned token count
    M = B * S_pad                            # batch folded into matmul rows

    # Conv2d(kernel=stride=patch) == patch extraction + matmul; patch vector ordering
    # is (c, kh, kw) to match Conv2d weight flattening.  CLS & pad rows hold zeros so
    # a single (M, CPP) @ (CPP, H) matmul covers every row.
    patches = x.reshape(B, C, Hp, patch, Wp, patch).transpose(0, 2, 4, 1, 3, 5)
    patches = patches.reshape(B, Np, CPP)
    patches = jnp.pad(patches, ((0, 0), (1, S_pad - S_real), (0, 0))).reshape(M, CPP)

    # base tokens: cls+pos for the CLS row, pos+patch_bias for patch rows, 0 for pad rows.
    row_add = jnp.concatenate(
        [params['cls'].reshape(1, Hd),
         jnp.broadcast_to(params['patch_b'], (Np, Hd))], axis=0)       # (S_real, H)
    base = params['pos'][0] + row_add                                  # (S_real, H)
    base = jnp.pad(base, ((0, S_pad - S_real), (0, 0)))                # (S_pad, H)
    base = jnp.broadcast_to(base[None], (B, S_pad, Hd)).reshape(M, Hd)

    # hoisted additive attention mask: block-diagonal over the batch + key-padding mask
    # (padded token rows are never attended to; they are sliced off at the end).
    row_batch = jnp.arange(M) // S_pad
    key_valid = (jnp.arange(M) % S_pad) < S_real
    amask = jnp.where((row_batch[:, None] == row_batch[None, :]) & key_valid[None, :],
                      0.0, -1e30).astype(jnp.float32)                  # (M, M)

    def const(shape):
        return pl.BlockSpec(shape, lambda l, n=len(shape): (0,) * n)

    def per_layer(shape):
        return pl.BlockSpec((None,) + shape, lambda l, n=len(shape): (l,) + (0,) * n)

    kernel = functools.partial(_vit_encoder_kernel, num_heads, chunk)

    out = pl.pallas_call(
        kernel,
        out_shape=jax.ShapeDtypeStruct((M, Hd), jnp.float32),
        grid=(L,),
        in_specs=[const((M, CPP)),          # packed patches (CLS/pad rows zero)
                  const((CPP, Hd)),         # patch-embed weight (bf16)
                  const((M, Hd)),           # prebaked cls/pos/bias token base
                  const((M, M)),            # hoisted attention mask
                  per_layer((1, Hd)), per_layer((1, Hd)),            # ln1 w/b
                  per_layer((Hd, 3 * Hd)), per_layer((1, 3 * Hd)),   # fused QKV w/b
                  per_layer((Hd, Hd)), per_layer((1, Hd)),           # out-proj w/b
                  per_layer((1, Hd)), per_layer((1, Hd)),            # ln2 w/b
                  per_layer((Hd, inter)), per_layer((1, inter)),     # mlp fc1 w/b
                  per_layer((inter, Hd)), per_layer((1, Hd)),        # mlp fc2 w/b
                  const((1, Hd)), const((1, Hd))],                   # final LN w/b
        out_specs=const((M, Hd)),
        scratch_shapes=[pltpu.VMEM((M, Hd), jnp.float32),   # residual stream (layer-resident)
                        pltpu.VMEM((M, Hd), jnp.float32)],  # per-layer context slab
        compiler_params=pltpu.CompilerParams(
            dimension_semantics=("arbitrary",),
            vmem_limit_bytes=16 * 1024 * 1024),
    )(patches, params['patch_w'], base, amask,
      lp['ln1w'], lp['ln1b'], lp['wqkv'], lp['bqkv'], lp['wo'], lp['bo'],
      lp['ln2w'], lp['ln2b'], lp['f1w'], lp['f1b'], lp['f2w'], lp['f2b'],
      params['final_ln_w'], params['final_ln_b'])

    # last_hidden_state: drop the sublane padding
    return out.reshape(B, S_pad, Hd)[:, :S_real, :]


# ----------------------------- main ---------------------------------------------

if __name__ == "__main__":
    # Small but structurally faithful config: hidden divisible by 12,
    # 12 layers, 12 heads, intermediate 3072 (as hard-coded in ViTEncoder).
    input_channels = 4
    latent_dim = 48                      # latent_dim % 12 == 0
    config = {'patch_size': 8, 'input_size': 16}

    key = jax.random.PRNGKey(0)
    kx, kp = jax.random.split(key)

    x = jax.random.normal(
        kx, (2, input_channels, config['input_size'], config['input_size']),
        dtype=jnp.float32)

    params = init_params(kp, input_channels, latent_dim,
                         config['patch_size'], config['input_size'],
                         num_layers=12, num_heads=12, inter=3072)

    fwd = jax.jit(functools.partial(vit_encoder_forward,
                                    patch=config['patch_size'],
                                    num_heads=12))
    out = fwd(x, params)
    jax.block_until_ready(out)

    num_patches = (config['input_size'] // config['patch_size']) ** 2
    assert out.shape == (2, num_patches + 1, latent_dim), out.shape
    assert bool(jnp.all(jnp.isfinite(out)))
    # TODO(synk): pdb.set_trace() in the reference forward is a debugger hook, omitted.
    print("KERNEL_OK")
</pallas_src>

<mosaic_0001>
module attributes {stable_mosaic.version = 11 : i64} {
  func.func @_vit_encoder_kernel(%arg0: i32, %arg1: memref<16x256xf32, #tpu.memory_space<vmem>>, %arg2: memref<256x48xbf16, #tpu.memory_space<vmem>>, %arg3: memref<16x48xf32, #tpu.memory_space<vmem>>, %arg4: memref<16x16xf32, #tpu.memory_space<vmem>>, %arg5: memref<1x1x48xf32, #tpu.memory_space<vmem>>, %arg6: memref<1x1x48xf32, #tpu.memory_space<vmem>>, %arg7: memref<1x48x144xbf16, #tpu.memory_space<vmem>>, %arg8: memref<1x1x144xf32, #tpu.memory_space<vmem>>, %arg9: memref<1x48x48xbf16, #tpu.memory_space<vmem>>, %arg10: memref<1x1x48xf32, #tpu.memory_space<vmem>>, %arg11: memref<1x1x48xf32, #tpu.memory_space<vmem>>, %arg12: memref<1x1x48xf32, #tpu.memory_space<vmem>>, %arg13: memref<1x48x3072xbf16, #tpu.memory_space<vmem>>, %arg14: memref<1x1x3072xf32, #tpu.memory_space<vmem>>, %arg15: memref<1x3072x48xbf16, #tpu.memory_space<vmem>>, %arg16: memref<1x1x48xf32, #tpu.memory_space<vmem>>, %arg17: memref<1x48xf32, #tpu.memory_space<vmem>>, %arg18: memref<1x48xf32, #tpu.memory_space<vmem>>, %arg19: memref<16x48xf32, #tpu.memory_space<vmem>>, %arg20: memref<16x48xf32, #tpu.memory_space<vmem>>, %arg21: memref<16x48xf32, #tpu.memory_space<vmem>>) attributes {dimension_semantics = [#tpu.dimension_semantics<arbitrary>], iteration_bounds = array<i64: 12>, scalar_prefetch = 0 : i64, scratch_operands = 2 : i64, tpu.core_type = #tpu.core_type<tc>, window_params = [{pipeline_mode = #tpu.pipeline_mode<synchronous>, transform_indices = @transform_0, window_bounds = array<i64: 16, 256>}, {pipeline_mode = #tpu.pipeline_mode<synchronous>, transform_indices = @transform_1, window_bounds = array<i64: 256, 48>}, {pipeline_mode = #tpu.pipeline_mode<synchronous>, transform_indices = @transform_2, window_bounds = array<i64: 16, 48>}, {pipeline_mode = #tpu.pipeline_mode<synchronous>, transform_indices = @transform_3, window_bounds = array<i64: 16, 16>}, {transform_indices = @transform_4, window_bounds = array<i64: 1, 1, 48>}, {transform_indices = @transform_5, window_bounds = array<i64: 1, 1, 48>}, {transform_indices = @transform_6, window_bounds = array<i64: 1, 48, 144>}, {transform_indices = @transform_7, window_bounds = array<i64: 1, 1, 144>}, {transform_indices = @transform_8, window_bounds = array<i64: 1, 48, 48>}, {transform_indices = @transform_9, window_bounds = array<i64: 1, 1, 48>}, {transform_indices = @transform_10, window_bounds = array<i64: 1, 1, 48>}, {transform_indices = @transform_11, window_bounds = array<i64: 1, 1, 48>}, {transform_indices = @transform_12, window_bounds = array<i64: 1, 48, 3072>}, {transform_indices = @transform_13, window_bounds = array<i64: 1, 1, 3072>}, {transform_indices = @transform_14, window_bounds = array<i64: 1, 3072, 48>}, {transform_indices = @transform_15, window_bounds = array<i64: 1, 1, 48>}, {pipeline_mode = #tpu.pipeline_mode<synchronous>, transform_indices = @transform_16, window_bounds = array<i64: 1, 48>}, {pipeline_mode = #tpu.pipeline_mode<synchronous>, transform_indices = @transform_17, window_bounds = array<i64: 1, 48>}, {pipeline_mode = #tpu.pipeline_mode<synchronous>, transform_indices = @transform_18, window_bounds = array<i64: 16, 48>}]} {
    %c0_i32 = arith.constant 0 : i32
    %0 = arith.cmpi eq, %arg0, %c0_i32 : i32
    %1 = arith.extui %0 : i1 to i32
    %c0_i32_0 = arith.constant 0 : i32
    %2 = arith.cmpi ne, %1, %c0_i32_0 : i32
    scf.if %2 {
      %c0_260 = arith.constant 0 : index
      %c0_261 = arith.constant 0 : index
      %614 = vector.load %arg1[%c0_260, %c0_261] : memref<16x256xf32, #tpu.memory_space<vmem>>, vector<16x256xf32>
      %615 = arith.truncf %614 : vector<16x256xf32> to vector<16x256xbf16>
      %c0_262 = arith.constant 0 : index
      %c0_263 = arith.constant 0 : index
      %616 = vector.load %arg2[%c0_262, %c0_263] : memref<256x48xbf16, #tpu.memory_space<vmem>>, vector<256x48xbf16>
      %cst_264 = arith.constant dense<0.000000e+00> : vector<16x48xf32>
      %617 = tpu.matmul %615, %616, %cst_264 {dimension_numbers = #tpu.dot_dimension_numbers<[1], [0], [0], [1], [0, 0, 1, 1], [], []>} : vector<16x256xbf16>, vector<256x48xbf16>, vector<16x48xf32> -> vector<16x48xf32>
      %c0_265 = arith.constant 0 : index
      %c0_266 = arith.constant 0 : index
      %618 = vector.load %arg3[%c0_265, %c0_266] : memref<16x48xf32, #tpu.memory_space<vmem>>, vector<16x48xf32>
      %619 = arith.addf %617, %618 : vector<16x48xf32>
      %c0_267 = arith.constant 0 : index
      %c0_268 = arith.constant 0 : index
      %620 = vector.load %arg20[%c0_267, %c0_268] : memref<16x48xf32, #tpu.memory_space<vmem>>, vector<16x48xf32>
      tpu.vector_store %arg20[%c0_267, %c0_268], %619 {strides = array<i32>} : memref<16x48xf32, #tpu.memory_space<vmem>>, vector<16x48xf32>,
    } else {
    }
    %c0 = arith.constant 0 : index
    %c0_1 = arith.constant 0 : index
    %3 = vector.load %arg20[%c0, %c0_1] : memref<16x48xf32, #tpu.memory_space<vmem>>, vector<16x48xf32>
    %c0_2 = arith.constant 0 : index
    %c0_3 = arith.constant 0 : index
    %c0_4 = arith.constant 0 : index
    %4 = vector.load %arg5[%c0_2, %c0_3, %c0_4] : memref<1x1x48xf32, #tpu.memory_space<vmem>>, vector<1x1x48xf32>
    %5 = vector.shape_cast %4 : vector<1x1x48xf32> to vector<1x48xf32>
    %c0_5 = arith.constant 0 : index
    %c0_6 = arith.constant 0 : index
    %c0_7 = arith.constant 0 : index
    %6 = vector.load %arg6[%c0_5, %c0_6, %c0_7] : memref<1x1x48xf32, #tpu.memory_space<vmem>>, vector<1x1x48xf32>
    %7 = vector.shape_cast %6 : vector<1x1x48xf32> to vector<1x48xf32>
    %cst = arith.constant dense<0.000000e+00> : vector<16xf32>
    %8 = vector.multi_reduction <add>, %3, %cst [1] : vector<16x48xf32> to vector<16xf32>
    %9 = vector.shape_cast %8 : vector<16xf32> to vector<16x1xf32>
    %cst_8 = arith.constant 4.800000e+01 : f32
    %10 = vector.broadcast %cst_8 : f32 to vector<16x1xf32>
    %11 = arith.divf %9, %10 : vector<16x1xf32>
    %12 = vector.broadcast %11 : vector<16x1xf32> to vector<16x48xf32>
    %13 = arith.subf %3, %12 : vector<16x48xf32>
    %14 = arith.mulf %13, %13 : vector<16x48xf32>
    %cst_9 = arith.constant dense<0.000000e+00> : vector<16xf32>
    %15 = vector.multi_reduction <add>, %14, %cst_9 [1] : vector<16x48xf32> to vector<16xf32>
    %16 = vector.shape_cast %15 : vector<16xf32> to vector<16x1xf32>
    %cst_10 = arith.constant 4.800000e+01 : f32
    %17 = vector.broadcast %cst_10 : f32 to vector<16x1xf32>
    %18 = arith.divf %16, %17 : vector<16x1xf32>
    %19 = vector.broadcast %11 : vector<16x1xf32> to vector<16x48xf32>
    %20 = arith.subf %3, %19 : vector<16x48xf32>
    %cst_11 = arith.constant 9.99999996E-13 : f32
    %21 = vector.broadcast %cst_11 : f32 to vector<16x1xf32>
    %22 = arith.addf %18, %21 : vector<16x1xf32>
    %23 = math.rsqrt %22 : vector<16x1xf32>
    %24 = vector.broadcast %23 : vector<16x1xf32> to vector<16x48xf32>
    %25 = arith.mulf %20, %24 : vector<16x48xf32>
    %26 = vector.broadcast %5 : vector<1x48xf32> to vector<16x48xf32>
    %27 = arith.mulf %25, %26 : vector<16x48xf32>
    %28 = vector.broadcast %7 : vector<1x48xf32> to vector<16x48xf32>
    %29 = arith.addf %27, %28 : vector<16x48xf32>
    %30 = arith.truncf %29 : vector<16x48xf32> to vector<16x48xbf16>
    %c0_12 = arith.constant 0 : index
    %c0_13 = arith.constant 0 : index
    %c0_14 = arith.constant 0 : index
    %31 = vector.load %arg7[%c0_12, %c0_13, %c0_14] : memref<1x48x144xbf16, #tpu.memory_space<vmem>>, vector<1x48x144xbf16>
    %32 = vector.shape_cast %31 : vector<1x48x144xbf16> to vector<48x144xbf16>
    %cst_15 = arith.constant dense<0.000000e+00> : vector<16x144xf32>
    %33 = tpu.matmul %30, %32, %cst_15 {dimension_numbers = #tpu.dot_dimension_numbers<[1], [0], [0], [1], [0, 0, 1, 1], [], []>} : vector<16x48xbf16>, vector<48x144xbf16>, vector<16x144xf32> -> vector<16x144xf32>
    %c0_16 = arith.constant 0 : index
    %c0_17 = arith.constant 0 : index
    %c0_18 = arith.constant 0 : index
    %34 = vector.load %arg8[%c0_16, %c0_17, %c0_18] : memref<1x1x144xf32, #tpu.memory_space<vmem>>, vector<1x1x144xf32>
    %35 = vector.shape_cast %34 : vector<1x1x144xf32> to vector<1x144xf32>
    %36 = vector.broadcast %35 : vector<1x144xf32> to vector<16x144xf32>
    %37 = arith.addf %33, %36 : vector<16x144xf32>
    %c0_19 = arith.constant 0 : index
    %c0_20 = arith.constant 0 : index
    %38 = vector.load %arg4[%c0_19, %c0_20] : memref<16x16xf32, #tpu.memory_space<vmem>>, vector<16x16xf32>
    %39 = vector.extract_strided_slice %37 {offsets = [0, 0], sizes = [16, 4], strides = [1, 1]} : vector<16x144xf32> to vector<16x4xf32>
    %40 = vector.extract_strided_slice %37 {offsets = [0, 48], sizes = [16, 4], strides = [1, 1]} : vector<16x144xf32> to vector<16x4xf32>
    %41 = vector.extract_strided_slice %37 {offsets = [0, 96], sizes = [16, 4], strides = [1, 1]} : vector<16x144xf32> to vector<16x4xf32>
    %42 = tpu.transpose %40, [1, 0] : vector<16x4xf32> -> vector<4x16xf32>
    %cst_21 = arith.constant dense<0.000000e+00> : vector<16x16xf32>
    %43 = tpu.matmul %39, %42, %cst_21 {dimension_numbers = #tpu.dot_dimension_numbers<[1], [0], [0], [1], [0, 0, 1, 1], [], []>} : vector<16x4xf32>, vector<4x16xf32>, vector<16x16xf32> -> vector<16x16xf32>
    %44 = arith.addf %43, %38 : vector<16x16xf32>
    %cst_22 = arith.constant dense<0xFF800000> : vector<16xf32>
    %45 = vector.multi_reduction <maximumf>, %44, %cst_22 [1] : vector<16x16xf32> to vector<16xf32>
    %46 = vector.shape_cast %45 : vector<16xf32> to vector<16x1xf32>
    %47 = vector.broadcast %46 : vector<16x1xf32> to vector<16x16xf32>
    %48 = arith.subf %44, %47 : vector<16x16xf32>
    %49 = math.exp %48 : vector<16x16xf32>
    %cst_23 = arith.constant dense<0.000000e+00> : vector<16xf32>
    %50 = vector.multi_reduction <add>, %49, %cst_23 [1] : vector<16x16xf32> to vector<16xf32>
    %51 = vector.shape_cast %50 : vector<16xf32> to vector<16x1xf32>
    %52 = tpu.reciprocal %51 {approx = true} : vector<16x1xf32> -> vector<16x1xf32>
    %53 = vector.broadcast %52 : vector<16x1xf32> to vector<16x16xf32>
    %54 = arith.mulf %49, %53 : vector<16x16xf32>
    %cst_24 = arith.constant dense<0.000000e+00> : vector<16x4xf32>
    %55 = tpu.matmul %54, %41, %cst_24 {dimension_numbers = #tpu.dot_dimension_numbers<[1], [0], [0], [1], [0, 0, 1, 1], [], []>} : vector<16x16xf32>, vector<16x4xf32>, vector<16x4xf32> -> vector<16x4xf32>
    %c0_25 = arith.constant 0 : index
    %c0_26 = arith.constant 0 : index
    %56 = vector.load %arg21[%c0_25, %c0_26] : memref<16x48xf32, #tpu.memory_space<vmem>>, vector<16x4xf32>
    tpu.vector_store %arg21[%c0_25, %c0_26], %55 {strides = array<i32>} : memref<16x48xf32, #tpu.memory_space<vmem>>, vector<16x4xf32>,
    %57 = vector.extract_strided_slice %37 {offsets = [0, 4], sizes = [16, 4], strides = [1, 1]} : vector<16x144xf32> to vector<16x4xf32>
    %58 = vector.extract_strided_slice %37 {offsets = [0, 52], sizes = [16, 4], strides = [1, 1]} : vector<16x144xf32> to vector<16x4xf32>
    %59 = vector.extract_strided_slice %37 {offsets = [0, 100], sizes = [16, 4], strides = [1, 1]} : vector<16x144xf32> to vector<16x4xf32>
    %60 = tpu.transpose %58, [1, 0] : vector<16x4xf32> -> vector<4x16xf32>
    %cst_27 = arith.constant dense<0.000000e+00> : vector<16x16xf32>
    %61 = tpu.matmul %57, %60, %cst_27 {dimension_numbers = #tpu.dot_dimension_numbers<[1], [0], [0], [1], [0, 0, 1, 1], [], []>} : vector<16x4xf32>, vector<4x16xf32>, vector<16x16xf32> -> vector<16x16xf32>
    %62 = arith.addf %61, %38 : vector<16x16xf32>
    %cst_28 = arith.constant dense<0xFF800000> : vector<16xf32>
    %63 = vector.multi_reduction <maximumf>, %62, %cst_28 [1] : vector<16x16xf32> to vector<16xf32>
    %64 = vector.shape_cast %63 : vector<16xf32> to vector<16x1xf32>
    %65 = vector.broadcast %64 : vector<16x1xf32> to vector<16x16xf32>
    %66 = arith.subf %62, %65 : vector<16x16xf32>
    %67 = math.exp %66 : vector<16x16xf32>
    %cst_29 = arith.constant dense<0.000000e+00> : vector<16xf32>
    %68 = vector.multi_reduction <add>, %67, %cst_29 [1] : vector<16x16xf32> to vector<16xf32>
    %69 = vector.shape_cast %68 : vector<16xf32> to vector<16x1xf32>
    %70 = tpu.reciprocal %69 {approx = true} : vector<16x1xf32> -> vector<16x1xf32>
    %71 = vector.broadcast %70 : vector<16x1xf32> to vector<16x16xf32>
    %72 = arith.mulf %67, %71 : vector<16x16xf32>
    %cst_30 = arith.constant dense<0.000000e+00> : vector<16x4xf32>
    %73 = tpu.matmul %72, %59, %cst_30 {dimension_numbers = #tpu.dot_dimension_numbers<[1], [0], [0], [1], [0, 0, 1, 1], [], []>} : vector<16x16xf32>, vector<16x4xf32>, vector<16x4xf32> -> vector<16x4xf32>
    %c0_31 = arith.constant 0 : index
    %c4 = arith.constant 4 : index
    %74 = vector.load %arg21[%c0_31, %c4] : memref<16x48xf32, #tpu.memory_space<vmem>>, vector<16x4xf32>
    tpu.vector_store %arg21[%c0_31, %c4], %73 {strides = array<i32>} : memref<16x48xf32, #tpu.memory_space<vmem>>, vector<16x4xf32>,
    %75 = vector.extract_strided_slice %37 {offsets = [0, 8], sizes = [16, 4], strides = [1, 1]} : vector<16x144xf32> to vector<16x4xf32>
    %76 = vector.extract_strided_slice %37 {offsets = [0, 56], sizes = [16, 4], strides = [1, 1]} : vector<16x144xf32> to vector<16x4xf32>
    %77 = vector.extract_strided_slice %37 {offsets = [0, 104], sizes = [16, 4], strides = [1, 1]} : vector<16x144xf32> to vector<16x4xf32>
    %78 = tpu.transpose %76, [1, 0] : vector<16x4xf32> -> vector<4x16xf32>
    %cst_32 = arith.constant dense<0.000000e+00> : vector<16x16xf32>
    %79 = tpu.matmul %75, %78, %cst_32 {dimension_numbers = #tpu.dot_dimension_numbers<[1], [0], [0], [1], [0, 0, 1, 1], [], []>} : vector<16x4xf32>, vector<4x16xf32>, vector<16x16xf32> -> vector<16x16xf32>
    %80 = arith.addf %79, %38 : vector<16x16xf32>
    %cst_33 = arith.constant dense<0xFF800000> : vector<16xf32>
    %81 = vector.multi_reduction <maximumf>, %80, %cst_33 [1] : vector<16x16xf32> to vector<16xf32>
    %82 = vector.shape_cast %81 : vector<16xf32> to vector<16x1xf32>
    %83 = vector.broadcast %82 : vector<16x1xf32> to vector<16x16xf32>
    %84 = arith.subf %80, %83 : vector<16x16xf32>
    %85 = math.exp %84 : vector<16x16xf32>
    %cst_34 = arith.constant dense<0.000000e+00> : vector<16xf32>
    %86 = vector.multi_reduction <add>, %85, %cst_34 [1] : vector<16x16xf32> to vector<16xf32>
    %87 = vector.shape_cast %86 : vector<16xf32> to vector<16x1xf32>
    %88 = tpu.reciprocal %87 {approx = true} : vector<16x1xf32> -> vector<16x1xf32>
    %89 = vector.broadcast %88 : vector<16x1xf32> to vector<16x16xf32>
    %90 = arith.mulf %85, %89 : vector<16x16xf32>
    %cst_35 = arith.constant dense<0.000000e+00> : vector<16x4xf32>
    %91 = tpu.matmul %90, %77, %cst_35 {dimension_numbers = #tpu.dot_dimension_numbers<[1], [0], [0], [1], [0, 0, 1, 1], [], []>} : vector<16x16xf32>, vector<16x4xf32>, vector<16x4xf32> -> vector<16x4xf32>
    %c0_36 = arith.constant 0 : index
    %c8 = arith.constant 8 : index
    %92 = vector.load %arg21[%c0_36, %c8] : memref<16x48xf32, #tpu.memory_space<vmem>>, vector<16x4xf32>
    tpu.vector_store %arg21[%c0_36, %c8], %91 {strides = array<i32>} : memref<16x48xf32, #tpu.memory_space<vmem>>, vector<16x4xf32>,
    %93 = vector.extract_strided_slice %37 {offsets = [0, 12], sizes = [16, 4], strides = [1, 1]} : vector<16x144xf32> to vector<16x4xf32>
    %94 = vector.extract_strided_slice %37 {offsets = [0, 60], sizes = [16, 4], strides = [1, 1]} : vector<16x144xf32> to vector<16x4xf32>
    %95 = vector.extract_strided_slice %37 {offsets = [0, 108], sizes = [16, 4], strides = [1, 1]} : vector<16x144xf32> to vector<16x4xf32>
    %96 = tpu.transpose %94, [1, 0] : vector<16x4xf32> -> vector<4x16xf32>
    %cst_37 = arith.constant dense<0.000000e+00> : vector<16x16xf32>
    %97 = tpu.matmul %93, %96, %cst_37 {dimension_numbers = #tpu.dot_dimension_numbers<[1], [0], [0], [1], [0, 0, 1, 1], [], []>} : vector<16x4xf32>, vector<4x16xf32>, vector<16x16xf32> -> vector<16x16xf32>
    %98 = arith.addf %97, %38 : vector<16x16xf32>
    %cst_38 = arith.constant dense<0xFF800000> : vector<16xf32>
    %99 = vector.multi_reduction <maximumf>, %98, %cst_38 [1] : vector<16x16xf32> to vector<16xf32>
    %100 = vector.shape_cast %99 : vector<16xf32> to vector<16x1xf32>
    %101 = vector.broadcast %100 : vector<16x1xf32> to vector<16x16xf32>
    %102 = arith.subf %98, %101 : vector<16x16xf32>
    %103 = math.exp %102 : vector<16x16xf32>
    %cst_39 = arith.constant dense<0.000000e+00> : vector<16xf32>
    %104 = vector.multi_reduction <add>, %103, %cst_39 [1] : vector<16x16xf32> to vector<16xf32>
    %105 = vector.shape_cast %104 : vector<16xf32> to vector<16x1xf32>
    %106 = tpu.reciprocal %105 {approx = true} : vector<16x1xf32> -> vector<16x1xf32>
    %107 = vector.broadcast %106 : vector<16x1xf32> to vector<16x16xf32>
    %108 = arith.mulf %103, %107 : vector<16x16xf32>
    %cst_40 = arith.constant dense<0.000000e+00> : vector<16x4xf32>
    %109 = tpu.matmul %108, %95, %cst_40 {dimension_numbers = #tpu.dot_dimension_numbers<[1], [0], [0], [1], [0, 0, 1, 1], [], []>} : vector<16x16xf32>, vector<16x4xf32>, vector<16x4xf32> -> vector<16x4xf32>
    %c0_41 = arith.constant 0 : index
    %c12 = arith.constant 12 : index
    %110 = vector.load %arg21[%c0_41, %c12] : memref<16x48xf32, #tpu.memory_space<vmem>>, vector<16x4xf32>
    tpu.vector_store %arg21[%c0_41, %c12], %109 {strides = array<i32>} : memref<16x48xf32, #tpu.memory_space<vmem>>, vector<16x4xf32>,
    %111 = vector.extract_strided_slice %37 {offsets = [0, 16], sizes = [16, 4], strides = [1, 1]} : vector<16x144xf32> to vector<16x4xf32>
    %112 = vector.extract_strided_slice %37 {offsets = [0, 64], sizes = [16, 4], strides = [1, 1]} : vector<16x144xf32> to vector<16x4xf32>
    %113 = vector.extract_strided_slice %37 {offsets = [0, 112], sizes = [16, 4], strides = [1, 1]} : vector<16x144xf32> to vector<16x4xf32>
    %114 = tpu.transpose %112, [1, 0] : vector<16x4xf32> -> vector<4x16xf32>
    %cst_42 = arith.constant dense<0.000000e+00> : vector<16x16xf32>
    %115 = tpu.matmul %111, %114, %cst_42 {dimension_numbers = #tpu.dot_dimension_numbers<[1], [0], [0], [1], [0, 0, 1, 1], [], []>} : vector<16x4xf32>, vector<4x16xf32>, vector<16x16xf32> -> vector<16x16xf32>
    %116 = arith.addf %115, %38 : vector<16x16xf32>
    %cst_43 = arith.constant dense<0xFF800000> : vector<16xf32>
    %117 = vector.multi_reduction <maximumf>, %116, %cst_43 [1] : vector<16x16xf32> to vector<16xf32>
    %118 = vector.shape_cast %117 : vector<16xf32> to vector<16x1xf32>
    %119 = vector.broadcast %118 : vector<16x1xf32> to vector<16x16xf32>
    %120 = arith.subf %116, %119 : vector<16x16xf32>
    %121 = math.exp %120 : vector<16x16xf32>
    %cst_44 = arith.constant dense<0.000000e+00> : vector<16xf32>
    %122 = vector.multi_reduction <add>, %121, %cst_44 [1] : vector<16x16xf32> to vector<16xf32>
    %123 = vector.shape_cast %122 : vector<16xf32> to vector<16x1xf32>
    %124 = tpu.reciprocal %123 {approx = true} : vector<16x1xf32> -> vector<16x1xf32>
    %125 = vector.broadcast %124 : vector<16x1xf32> to vector<16x16xf32>
    %126 = arith.mulf %121, %125 : vector<16x16xf32>
    %cst_45 = arith.constant dense<0.000000e+00> : vector<16x4xf32>
    %127 = tpu.matmul %126, %113, %cst_45 {dimension_numbers = #tpu.dot_dimension_numbers<[1], [0], [0], [1], [0, 0, 1, 1], [], []>} : vector<16x16xf32>, vector<16x4xf32>, vector<16x4xf32> -> vector<16x4xf32>
    %c0_46 = arith.constant 0 : index
    %c16 = arith.constant 16 : index
    %128 = vector.load %arg21[%c0_46, %c16] : memref<16x48xf32, #tpu.memory_space<vmem>>, vector<16x4xf32>
    tpu.vector_store %arg21[%c0_46, %c16], %127 {strides = array<i32>} : memref<16x48xf32, #tpu.memory_space<vmem>>, vector<16x4xf32>,
    %129 = vector.extract_strided_slice %37 {offsets = [0, 20], sizes = [16, 4], strides = [1, 1]} : vector<16x144xf32> to vector<16x4xf32>
    %130 = vector.extract_strided_slice %37 {offsets = [0, 68], sizes = [16, 4], strides = [1, 1]} : vector<16x144xf32> to vector<16x4xf32>
    %131 = vector.extract_strided_slice %37 {offsets = [0, 116], sizes = [16, 4], strides = [1, 1]} : vector<16x144xf32> to vector<16x4xf32>
    %132 = tpu.transpose %130, [1, 0] : vector<16x4xf32> -> vector<4x16xf32>
    %cst_47 = arith.constant dense<0.000000e+00> : vector<16x16xf32>
    %133 = tpu.matmul %129, %132, %cst_47 {dimension_numbers = #tpu.dot_dimension_numbers<[1], [0], [0], [1], [0, 0, 1, 1], [], []>} : vector<16x4xf32>, vector<4x16xf32>, vector<16x16xf32> -> vector<16x16xf32>
    %134 = arith.addf %133, %38 : vector<16x16xf32>
    %cst_48 = arith.constant dense<0xFF800000> : vector<16xf32>
    %135 = vector.multi_reduction <maximumf>, %134, %cst_48 [1] : vector<16x16xf32> to vector<16xf32>
    %136 = vector.shape_cast %135 : vector<16xf32> to vector<16x1xf32>
    %137 = vector.broadcast %136 : vector<16x1xf32> to vector<16x16xf32>
    %138 = arith.subf %134, %137 : vector<16x16xf32>
    %139 = math.exp %138 : vector<16x16xf32>
    %cst_49 = arith.constant dense<0.000000e+00> : vector<16xf32>
    %140 = vector.multi_reduction <add>, %139, %cst_49 [1] : vector<16x16xf32> to vector<16xf32>
    %141 = vector.shape_cast %140 : vector<16xf32> to vector<16x1xf32>
    %142 = tpu.reciprocal %141 {approx = true} : vector<16x1xf32> -> vector<16x1xf32>
    %143 = vector.broadcast %142 : vector<16x1xf32> to vector<16x16xf32>
    %144 = arith.mulf %139, %143 : vector<16x16xf32>
    %cst_50 = arith.constant dense<0.000000e+00> : vector<16x4xf32>
    %145 = tpu.matmul %144, %131, %cst_50 {dimension_numbers = #tpu.dot_dimension_numbers<[1], [0], [0], [1], [0, 0, 1, 1], [], []>} : vector<16x16xf32>, vector<16x4xf32>, vector<16x4xf32> -> vector<16x4xf32>
    %c0_51 = arith.constant 0 : index
    %c20 = arith.constant 20 : index
    %146 = vector.load %arg21[%c0_51, %c20] : memref<16x48xf32, #tpu.memory_space<vmem>>, vector<16x4xf32>
    tpu.vector_store %arg21[%c0_51, %c20], %145 {strides = array<i32>} : memref<16x48xf32, #tpu.memory_space<vmem>>, vector<16x4xf32>,
    %147 = vector.extract_strided_slice %37 {offsets = [0, 24], sizes = [16, 4], strides = [1, 1]} : vector<16x144xf32> to vector<16x4xf32>
    %148 = vector.extract_strided_slice %37 {offsets = [0, 72], sizes = [16, 4], strides = [1, 1]} : vector<16x144xf32> to vector<16x4xf32>
    %149 = vector.extract_strided_slice %37 {offsets = [0, 120], sizes = [16, 4], strides = [1, 1]} : vector<16x144xf32> to vector<16x4xf32>
    %150 = tpu.transpose %148, [1, 0] : vector<16x4xf32> -> vector<4x16xf32>
    %cst_52 = arith.constant dense<0.000000e+00> : vector<16x16xf32>
    %151 = tpu.matmul %147, %150, %cst_52 {dimension_numbers = #tpu.dot_dimension_numbers<[1], [0], [0], [1], [0, 0, 1, 1], [], []>} : vector<16x4xf32>, vector<4x16xf32>, vector<16x16xf32> -> vector<16x16xf32>
    %152 = arith.addf %151, %38 : vector<16x16xf32>
    %cst_53 = arith.constant dense<0xFF800000> : vector<16xf32>
    %153 = vector.multi_reduction <maximumf>, %152, %cst_53 [1] : vector<16x16xf32> to vector<16xf32>
    %154 = vector.shape_cast %153 : vector<16xf32> to vector<16x1xf32>
    %155 = vector.broadcast %154 : vector<16x1xf32> to vector<16x16xf32>
    %156 = arith.subf %152, %155 : vector<16x16xf32>
    %157 = math.exp %156 : vector<16x16xf32>
    %cst_54 = arith.constant dense<0.000000e+00> : vector<16xf32>
    %158 = vector.multi_reduction <add>, %157, %cst_54 [1] : vector<16x16xf32> to vector<16xf32>
    %159 = vector.shape_cast %158 : vector<16xf32> to vector<16x1xf32>
    %160 = tpu.reciprocal %159 {approx = true} : vector<16x1xf32> -> vector<16x1xf32>
    %161 = vector.broadcast %160 : vector<16x1xf32> to vector<16x16xf32>
    %162 = arith.mulf %157, %161 : vector<16x16xf32>
    %cst_55 = arith.constant dense<0.000000e+00> : vector<16x4xf32>
    %163 = tpu.matmul %162, %149, %cst_55 {dimension_numbers = #tpu.dot_dimension_numbers<[1], [0], [0], [1], [0, 0, 1, 1], [], []>} : vector<16x16xf32>, vector<16x4xf32>, vector<16x4xf32> -> vector<16x4xf32>
    %c0_56 = arith.constant 0 : index
    %c24 = arith.constant 24 : index
    %164 = vector.load %arg21[%c0_56, %c24] : memref<16x48xf32, #tpu.memory_space<vmem>>, vector<16x4xf32>
    tpu.vector_store %arg21[%c0_56, %c24], %163 {strides = array<i32>} : memref<16x48xf32, #tpu.memory_space<vmem>>, vector<16x4xf32>,
    %165 = vector.extract_strided_slice %37 {offsets = [0, 28], sizes = [16, 4], strides = [1, 1]} : vector<16x144xf32> to vector<16x4xf32>
    %166 = vector.extract_strided_slice %37 {offsets = [0, 76], sizes = [16, 4], strides = [1, 1]} : vector<16x144xf32> to vector<16x4xf32>
    %167 = vector.extract_strided_slice %37 {offsets = [0, 124], sizes = [16, 4], strides = [1, 1]} : vector<16x144xf32> to vector<16x4xf32>
    %168 = tpu.transpose %166, [1, 0] : vector<16x4xf32> -> vector<4x16xf32>
    %cst_57 = arith.constant dense<0.000000e+00> : vector<16x16xf32>
    %169 = tpu.matmul %165, %168, %cst_57 {dimension_numbers = #tpu.dot_dimension_numbers<[1], [0], [0], [1], [0, 0, 1, 1], [], []>} : vector<16x4xf32>, vector<4x16xf32>, vector<16x16xf32> -> vector<16x16xf32>
    %170 = arith.addf %169, %38 : vector<16x16xf32>
    %cst_58 = arith.constant dense<0xFF800000> : vector<16xf32>
    %171 = vector.multi_reduction <maximumf>, %170, %cst_58 [1] : vector<16x16xf32> to vector<16xf32>
    %172 = vector.shape_cast %171 : vector<16xf32> to vector<16x1xf32>
    %173 = vector.broadcast %172 : vector<16x1xf32> to vector<16x16xf32>
    %174 = arith.subf %170, %173 : vector<16x16xf32>
    %175 = math.exp %174 : vector<16x16xf32>
    %cst_59 = arith.constant dense<0.000000e+00> : vector<16xf32>
    %176 = vector.multi_reduction <add>, %175, %cst_59 [1] : vector<16x16xf32> to vector<16xf32>
    %177 = vector.shape_cast %176 : vector<16xf32> to vector<16x1xf32>
    %178 = tpu.reciprocal %177 {approx = true} : vector<16x1xf32> -> vector<16x1xf32>
    %179 = vector.broadcast %178 : vector<16x1xf32> to vector<16x16xf32>
    %180 = arith.mulf %175, %179 : vector<16x16xf32>
    %cst_60 = arith.constant dense<0.000000e+00> : vector<16x4xf32>
    %181 = tpu.matmul %180, %167, %cst_60 {dimension_numbers = #tpu.dot_dimension_numbers<[1], [0], [0], [1], [0, 0, 1, 1], [], []>} : vector<16x16xf32>, vector<16x4xf32>, vector<16x4xf32> -> vector<16x4xf32>
    %c0_61 = arith.constant 0 : index
    %c28 = arith.constant 28 : index
    %182 = vector.load %arg21[%c0_61, %c28] : memref<16x48xf32, #tpu.memory_space<vmem>>, vector<16x4xf32>
    tpu.vector_store %arg21[%c0_61, %c28], %181 {strides = array<i32>} : memref<16x48xf32, #tpu.memory_space<vmem>>, vector<16x4xf32>,
    %183 = vector.extract_strided_slice %37 {offsets = [0, 32], sizes = [16, 4], strides = [1, 1]} : vector<16x144xf32> to vector<16x4xf32>
    %184 = vector.extract_strided_slice %37 {offsets = [0, 80], sizes = [16, 4], strides = [1, 1]} : vector<16x144xf32> to vector<16x4xf32>
    %185 = vector.extract_strided_slice %37 {offsets = [0, 128], sizes = [16, 4], strides = [1, 1]} : vector<16x144xf32> to vector<16x4xf32>
    %186 = tpu.transpose %184, [1, 0] : vector<16x4xf32> -> vector<4x16xf32>
    %cst_62 = arith.constant dense<0.000000e+00> : vector<16x16xf32>
    %187 = tpu.matmul %183, %186, %cst_62 {dimension_numbers = #tpu.dot_dimension_numbers<[1], [0], [0], [1], [0, 0, 1, 1], [], []>} : vector<16x4xf32>, vector<4x16xf32>, vector<16x16xf32> -> vector<16x16xf32>
    %188 = arith.addf %187, %38 : vector<16x16xf32>
    %cst_63 = arith.constant dense<0xFF800000> : vector<16xf32>
    %189 = vector.multi_reduction <maximumf>, %188, %cst_63 [1] : vector<16x16xf32> to vector<16xf32>
    %190 = vector.shape_cast %189 : vector<16xf32> to vector<16x1xf32>
    %191 = vector.broadcast %190 : vector<16x1xf32> to vector<16x16xf32>
    %192 = arith.subf %188, %191 : vector<16x16xf32>
    %193 = math.exp %192 : vector<16x16xf32>
    %cst_64 = arith.constant dense<0.000000e+00> : vector<16xf32>
    %194 = vector.multi_reduction <add>, %193, %cst_64 [1] : vector<16x16xf32> to vector<16xf32>
    %195 = vector.shape_cast %194 : vector<16xf32> to vector<16x1xf32>
    %196 = tpu.reciprocal %195 {approx = true} : vector<16x1xf32> -> vector<16x1xf32>
    %197 = vector.broadcast %196 : vector<16x1xf32> to vector<16x16xf32>
    %198 = arith.mulf %193, %197 : vector<16x16xf32>
    %cst_65 = arith.constant dense<0.000000e+00> : vector<16x4xf32>
    %199 = tpu.matmul %198, %185, %cst_65 {dimension_numbers = #tpu.dot_dimension_numbers<[1], [0], [0], [1], [0, 0, 1, 1], [], []>} : vector<16x16xf32>, vector<16x4xf32>, vector<16x4xf32> -> vector<16x4xf32>
    %c0_66 = arith.constant 0 : index
    %c32 = arith.constant 32 : index
    %200 = vector.load %arg21[%c0_66, %c32] : memref<16x48xf32, #tpu.memory_space<vmem>>, vector<16x4xf32>
    tpu.vector_store %arg21[%c0_66, %c32], %199 {strides = array<i32>} : memref<16x48xf32, #tpu.memory_space<vmem>>, vector<16x4xf32>,
    %201 = vector.extract_strided_slice %37 {offsets = [0, 36], sizes = [16, 4], strides = [1, 1]} : vector<16x144xf32> to vector<16x4xf32>
    %202 = vector.extract_strided_slice %37 {offsets = [0, 84], sizes = [16, 4], strides = [1, 1]} : vector<16x144xf32> to vector<16x4xf32>
    %203 = vector.extract_strided_slice %37 {offsets = [0, 132], sizes = [16, 4], strides = [1, 1]} : vector<16x144xf32> to vector<16x4xf32>
    %204 = tpu.transpose %202, [1, 0] : vector<16x4xf32> -> vector<4x16xf32>
    %cst_67 = arith.constant dense<0.000000e+00> : vector<16x16xf32>
    %205 = tpu.matmul %201, %204, %cst_67 {dimension_numbers = #tpu.dot_dimension_numbers<[1], [0], [0], [1], [0, 0, 1, 1], [], []>} : vector<16x4xf32>, vector<4x16xf32>, vector<16x16xf32> -> vector<16x16xf32>
    %206 = arith.addf %205, %38 : vector<16x16xf32>
    %cst_68 = arith.constant dense<0xFF800000> : vector<16xf32>
    %207 = vector.multi_reduction <maximumf>, %206, %cst_68 [1] : vector<16x16xf32> to vector<16xf32>
    %208 = vector.shape_cast %207 : vector<16xf32> to vector<16x1xf32>
    %209 = vector.broadcast %208 : vector<16x1xf32> to vector<16x16xf32>
    %210 = arith.subf %206, %209 : vector<16x16xf32>
    %211 = math.exp %210 : vector<16x16xf32>
    %cst_69 = arith.constant dense<0.000000e+00> : vector<16xf32>
    %212 = vector.multi_reduction <add>, %211, %cst_69 [1] : vector<16x16xf32> to vector<16xf32>
    %213 = vector.shape_cast %212 : vector<16xf32> to vector<16x1xf32>
    %214 = tpu.reciprocal %213 {approx = true} : vector<16x1xf32> -> vector<16x1xf32>
    %215 = vector.broadcast %214 : vector<16x1xf32> to vector<16x16xf32>
    %216 = arith.mulf %211, %215 : vector<16x16xf32>
    %cst_70 = arith.constant dense<0.000000e+00> : vector<16x4xf32>
    %217 = tpu.matmul %216, %203, %cst_70 {dimension_numbers = #tpu.dot_dimension_numbers<[1], [0], [0], [1], [0, 0, 1, 1], [], []>} : vector<16x16xf32>, vector<16x4xf32>, vector<16x4xf32> -> vector<16x4xf32>
    %c0_71 = arith.constant 0 : index
    %c36 = arith.constant 36 : index
    %218 = vector.load %arg21[%c0_71, %c36] : memref<16x48xf32, #tpu.memory_space<vmem>>, vector<16x4xf32>
    tpu.vector_store %arg21[%c0_71, %c36], %217 {strides = array<i32>} : memref<16x48xf32, #tpu.memory_space<vmem>>, vector<16x4xf32>,
    %219 = vector.extract_strided_slice %37 {offsets = [0, 40], sizes = [16, 4], strides = [1, 1]} : vector<16x144xf32> to vector<16x4xf32>
    %220 = vector.extract_strided_slice %37 {offsets = [0, 88], sizes = [16, 4], strides = [1, 1]} : vector<16x144xf32> to vector<16x4xf32>
    %221 = vector.extract_strided_slice %37 {offsets = [0, 136], sizes = [16, 4], strides = [1, 1]} : vector<16x144xf32> to vector<16x4xf32>
    %222 = tpu.transpose %220, [1, 0] : vector<16x4xf32> -> vector<4x16xf32>
    %cst_72 = arith.constant dense<0.000000e+00> : vector<16x16xf32>
    %223 = tpu.matmul %219, %222, %cst_72 {dimension_numbers = #tpu.dot_dimension_numbers<[1], [0], [0], [1], [0, 0, 1, 1], [], []>} : vector<16x4xf32>, vector<4x16xf32>, vector<16x16xf32> -> vector<16x16xf32>
    %224 = arith.addf %223, %38 : vector<16x16xf32>
    %cst_73 = arith.constant dense<0xFF800000> : vector<16xf32>
    %225 = vector.multi_reduction <maximumf>, %224, %cst_73 [1] : vector<16x16xf32> to vector<16xf32>
    %226 = vector.shape_cast %225 : vector<16xf32> to vector<16x1xf32>
    %227 = vector.broadcast %226 : vector<16x1xf32> to vector<16x16xf32>
    %228 = arith.subf %224, %227 : vector<16x16xf32>
    %229 = math.exp %228 : vector<16x16xf32>
    %cst_74 = arith.constant dense<0.000000e+00> : vector<16xf32>
    %230 = vector.multi_reduction <add>, %229, %cst_74 [1] : vector<16x16xf32> to vector<16xf32>
    %231 = vector.shape_cast %230 : vector<16xf32> to vector<16x1xf32>
    %232 = tpu.reciprocal %231 {approx = true} : vector<16x1xf32> -> vector<16x1xf32>
    %233 = vector.broadcast %232 : vector<16x1xf32> to vector<16x16xf32>
    %234 = arith.mulf %229, %233 : vector<16x16xf32>
    %cst_75 = arith.constant dense<0.000000e+00> : vector<16x4xf32>
    %235 = tpu.matmul %234, %221, %cst_75 {dimension_numbers = #tpu.dot_dimension_numbers<[1], [0], [0], [1], [0, 0, 1, 1], [], []>} : vector<16x16xf32>, vector<16x4xf32>, vector<16x4xf32> -> vector<16x4xf32>
    %c0_76 = arith.constant 0 : index
    %c40 = arith.constant 40 : index
    %236 = vector.load %arg21[%c0_76, %c40] : memref<16x48xf32, #tpu.memory_space<vmem>>, vector<16x4xf32>
    tpu.vector_store %arg21[%c0_76, %c40], %235 {strides = array<i32>} : memref<16x48xf32, #tpu.memory_space<vmem>>, vector<16x4xf32>,
    %237 = vector.extract_strided_slice %37 {offsets = [0, 44], sizes = [16, 4], strides = [1, 1]} : vector<16x144xf32> to vector<16x4xf32>
    %238 = vector.extract_strided_slice %37 {offsets = [0, 92], sizes = [16, 4], strides = [1, 1]} : vector<16x144xf32> to vector<16x4xf32>
    %239 = vector.extract_strided_slice %37 {offsets = [0, 140], sizes = [16, 4], strides = [1, 1]} : vector<16x144xf32> to vector<16x4xf32>
    %240 = tpu.transpose %238, [1, 0] : vector<16x4xf32> -> vector<4x16xf32>
    %cst_77 = arith.constant dense<0.000000e+00> : vector<16x16xf32>
    %241 = tpu.matmul %237, %240, %cst_77 {dimension_numbers = #tpu.dot_dimension_numbers<[1], [0], [0], [1], [0, 0, 1, 1], [], []>} : vector<16x4xf32>, vector<4x16xf32>, vector<16x16xf32> -> vector<16x16xf32>
    %242 = arith.addf %241, %38 : vector<16x16xf32>
    %cst_78 = arith.constant dense<0xFF800000> : vector<16xf32>
    %243 = vector.multi_reduction <maximumf>, %242, %cst_78 [1] : vector<16x16xf32> to vector<16xf32>
    %244 = vector.shape_cast %243 : vector<16xf32> to vector<16x1xf32>
    %245 = vector.broadcast %244 : vector<16x1xf32> to vector<16x16xf32>
    %246 = arith.subf %242, %245 : vector<16x16xf32>
    %247 = math.exp %246 : vector<16x16xf32>
    %cst_79 = arith.constant dense<0.000000e+00> : vector<16xf32>
    %248 = vector.multi_reduction <add>, %247, %cst_79 [1] : vector<16x16xf32> to vector<16xf32>
    %249 = vector.shape_cast %248 : vector<16xf32> to vector<16x1xf32>
    %250 = tpu.reciprocal %249 {approx = true} : vector<16x1xf32> -> vector<16x1xf32>
    %251 = vector.broadcast %250 : vector<16x1xf32> to vector<16x16xf32>
    %252 = arith.mulf %247, %251 : vector<16x16xf32>
    %cst_80 = arith.constant dense<0.000000e+00> : vector<16x4xf32>
    %253 = tpu.matmul %252, %239, %cst_80 {dimension_numbers = #tpu.dot_dimension_numbers<[1], [0], [0], [1], [0, 0, 1, 1], [], []>} : vector<16x16xf32>, vector<16x4xf32>, vector<16x4xf32> -> vector<16x4xf32>
    %c0_81 = arith.constant 0 : index
    %c44 = arith.constant 44 : index
    %254 = vector.load %arg21[%c0_81, %c44] : memref<16x48xf32, #tpu.memory_space<vmem>>, vector<16x4xf32>
    tpu.vector_store %arg21[%c0_81, %c44], %253 {strides = array<i32>} : memref<16x48xf32, #tpu.memory_space<vmem>>, vector<16x4xf32>,
    %c0_82 = arith.constant 0 : index
    %c0_83 = arith.constant 0 : index
    %255 = vector.load %arg21[%c0_82, %c0_83] : memref<16x48xf32, #tpu.memory_space<vmem>>, vector<16x48xf32>
    %256 = arith.truncf %255 : vector<16x48xf32> to vector<16x48xbf16>
    %c0_84 = arith.constant 0 : index
    %c0_85 = arith.constant 0 : index
    %c0_86 = arith.constant 0 : index
    %257 = vector.load %arg9[%c0_84, %c0_85, %c0_86] : memref<1x48x48xbf16, #tpu.memory_space<vmem>>, vector<1x48x48xbf16>
    %258 = vector.shape_cast %257 : vector<1x48x48xbf16> to vector<48x48xbf16>
    %cst_87 = arith.constant dense<0.000000e+00> : vector<16x48xf32>
    %259 = tpu.matmul %256, %258, %cst_87 {dimension_numbers = #tpu.dot_dimension_numbers<[1], [0], [0], [1], [0, 0, 1, 1], [], []>} : vector<16x48xbf16>, vector<48x48xbf16>, vector<16x48xf32> -> vector<16x48xf32>
    %c0_88 = arith.constant 0 : index
    %c0_89 = arith.constant 0 : index
    %c0_90 = arith.constant 0 : index
    %260 = vector.load %arg10[%c0_88, %c0_89, %c0_90] : memref<1x1x48xf32, #tpu.memory_space<vmem>>, vector<1x1x48xf32>
    %261 = vector.shape_cast %260 : vector<1x1x48xf32> to vector<1x48xf32>
    %262 = vector.broadcast %261 : vector<1x48xf32> to vector<16x48xf32>
    %263 = arith.addf %259, %262 : vector<16x48xf32>
    %264 = arith.addf %3, %263 : vector<16x48xf32>
    %c0_91 = arith.constant 0 : index
    %c0_92 = arith.constant 0 : index
    %c0_93 = arith.constant 0 : index
    %265 = vector.load %arg11[%c0_91, %c0_92, %c0_93] : memref<1x1x48xf32, #tpu.memory_space<vmem>>, vector<1x1x48xf32>
    %266 = vector.shape_cast %265 : vector<1x1x48xf32> to vector<1x48xf32>
    %c0_94 = arith.constant 0 : index
    %c0_95 = arith.constant 0 : index
    %c0_96 = arith.constant 0 : index
    %267 = vector.load %arg12[%c0_94, %c0_95, %c0_96] : memref<1x1x48xf32, #tpu.memory_space<vmem>>, vector<1x1x48xf32>
    %268 = vector.shape_cast %267 : vector<1x1x48xf32> to vector<1x48xf32>
    %cst_97 = arith.constant dense<0.000000e+00> : vector<16xf32>
    %269 = vector.multi_reduction <add>, %264, %cst_97 [1] : vector<16x48xf32> to vector<16xf32>
    %270 = vector.shape_cast %269 : vector<16xf32> to vector<16x1xf32>
    %cst_98 = arith.constant 4.800000e+01 : f32
    %271 = vector.broadcast %cst_98 : f32 to vector<16x1xf32>
    %272 = arith.divf %270, %271 : vector<16x1xf32>
    %273 = vector.broadcast %272 : vector<16x1xf32> to vector<16x48xf32>
    %274 = arith.subf %264, %273 : vector<16x48xf32>
    %275 = arith.mulf %274, %274 : vector<16x48xf32>
    %cst_99 = arith.constant dense<0.000000e+00> : vector<16xf32>
    %276 = vector.multi_reduction <add>, %275, %cst_99 [1] : vector<16x48xf32> to vector<16xf32>
    %277 = vector.shape_cast %276 : vector<16xf32> to vector<16x1xf32>
    %cst_100 = arith.constant 4.800000e+01 : f32
    %278 = vector.broadcast %cst_100 : f32 to vector<16x1xf32>
    %279 = arith.divf %277, %278 : vector<16x1xf32>
    %280 = vector.broadcast %272 : vector<16x1xf32> to vector<16x48xf32>
    %281 = arith.subf %264, %280 : vector<16x48xf32>
    %cst_101 = arith.constant 9.99999996E-13 : f32
    %282 = vector.broadcast %cst_101 : f32 to vector<16x1xf32>
    %283 = arith.addf %279, %282 : vector<16x1xf32>
    %284 = math.rsqrt %283 : vector<16x1xf32>
    %285 = vector.broadcast %284 : vector<16x1xf32> to vector<16x48xf32>
    %286 = arith.mulf %281, %285 : vector<16x48xf32>
    %287 = vector.broadcast %266 : vector<1x48xf32> to vector<16x48xf32>
    %288 = arith.mulf %286, %287 : vector<16x48xf32>
    %289 = vector.broadcast %268 : vector<1x48xf32> to vector<16x48xf32>
    %290 = arith.addf %288, %289 : vector<16x48xf32>
    %291 = arith.truncf %290 : vector<16x48xf32> to vector<16x48xbf16>
    %cst_102 = arith.constant 0.000000e+00 : f32
    %292 = vector.broadcast %cst_102 : f32 to vector<16x48xf32>
    %c0_103 = arith.constant 0 : index
    %c0_104 = arith.constant 0 : index
    %c0_105 = arith.constant 0 : index
    %293 = vector.load %arg13[%c0_103, %c0_104, %c0_105] : memref<1x48x3072xbf16, #tpu.memory_space<vmem>>, vector<1x48x512xbf16>
    %294 = vector.shape_cast %293 : vector<1x48x512xbf16> to vector<48x512xbf16>
    %cst_106 = arith.constant dense<0.000000e+00> : vector<16x512xf32>
    %295 = tpu.matmul %291, %294, %cst_106 {dimension_numbers = #tpu.dot_dimension_numbers<[1], [0], [0], [1], [0, 0, 1, 1], [], []>} : vector<16x48xbf16>, vector<48x512xbf16>, vector<16x512xf32> -> vector<16x512xf32>
    %c0_107 = arith.constant 0 : index
    %c0_108 = arith.constant 0 : index
    %c0_109 = arith.constant 0 : index
    %296 = vector.load %arg14[%c0_107, %c0_108, %c0_109] : memref<1x1x3072xf32, #tpu.memory_space<vmem>>, vector<1x1x512xf32>
    %297 = vector.shape_cast %296 : vector<1x1x512xf32> to vector<1x512xf32>
    %298 = vector.broadcast %297 : vector<1x512xf32> to vector<16x512xf32>
    %299 = arith.addf %295, %298 : vector<16x512xf32>
    %cst_110 = arith.constant 5.000000e-01 : f32
    %300 = vector.broadcast %cst_110 : f32 to vector<16x512xf32>
    %301 = arith.mulf %300, %299 : vector<16x512xf32>
    %cst_111 = arith.constant 0.707106769 : f32
    %302 = vector.broadcast %cst_111 : f32 to vector<16x512xf32>
    %303 = arith.mulf %299, %302 : vector<16x512xf32>
    %304 = math.absf %303 : vector<16x512xf32>
    %cst_112 = arith.constant 0.327591091 : f32
    %305 = vector.broadcast %cst_112 : f32 to vector<16x512xf32>
    %306 = arith.mulf %305, %304 : vector<16x512xf32>
    %cst_113 = arith.constant 1.000000e+00 : f32
    %307 = vector.broadcast %cst_113 : f32 to vector<16x512xf32>
    %308 = arith.addf %307, %306 : vector<16x512xf32>
    %cst_114 = arith.constant 1.000000e+00 : f32
    %309 = vector.broadcast %cst_114 : f32 to vector<16x512xf32>
    %310 = arith.divf %309, %308 : vector<16x512xf32>
    %cst_115 = arith.constant 1.06140542 : f32
    %311 = vector.broadcast %cst_115 : f32 to vector<16x512xf32>
    %312 = arith.mulf %311, %310 : vector<16x512xf32>
    %cst_116 = arith.constant -1.45315206 : f32
    %313 = vector.broadcast %cst_116 : f32 to vector<16x512xf32>
    %314 = arith.addf %312, %313 : vector<16x512xf32>
    %315 = arith.mulf %314, %310 : vector<16x512xf32>
    %cst_117 = arith.constant 1.42141378 : f32
    %316 = vector.broadcast %cst_117 : f32 to vector<16x512xf32>
    %317 = arith.addf %315, %316 : vector<16x512xf32>
    %318 = arith.mulf %317, %310 : vector<16x512xf32>
    %cst_118 = arith.constant -0.284496725 : f32
    %319 = vector.broadcast %cst_118 : f32 to vector<16x512xf32>
    %320 = arith.addf %318, %319 : vector<16x512xf32>
    %321 = arith.mulf %320, %310 : vector<16x512xf32>
    %cst_119 = arith.constant 0.254829586 : f32
    %322 = vector.broadcast %cst_119 : f32 to vector<16x512xf32>
    %323 = arith.addf %321, %322 : vector<16x512xf32>
    %324 = arith.mulf %323, %310 : vector<16x512xf32>
    %cst_120 = arith.constant 0.000000e+00 : f32
    %325 = vector.broadcast %cst_120 : f32 to vector<16x512xf32>
    %326 = arith.subf %325, %304 : vector<16x512xf32>
    %327 = arith.mulf %326, %304 : vector<16x512xf32>
    %328 = math.exp %327 : vector<16x512xf32>
    %329 = arith.mulf %324, %328 : vector<16x512xf32>
    %cst_121 = arith.constant 1.000000e+00 : f32
    %330 = vector.broadcast %cst_121 : f32 to vector<16x512xf32>
    %331 = arith.subf %330, %329 : vector<16x512xf32>
    %cst_122 = arith.constant 0.000000e+00 : f32
    %332 = vector.broadcast %cst_122 : f32 to vector<16x512xf32>
    %333 = arith.cmpf oge, %303, %332 : vector<16x512xf32>
    %cst_123 = arith.constant 0.000000e+00 : f32
    %334 = vector.broadcast %cst_123 : f32 to vector<16x512xf32>
    %335 = arith.subf %334, %331 : vector<16x512xf32>
    %336 = arith.select %333, %331, %335 : vector<16x512xi1>, vector<16x512xf32>
    %cst_124 = arith.constant 1.000000e+00 : f32
    %337 = vector.broadcast %cst_124 : f32 to vector<16x512xf32>
    %338 = arith.addf %337, %336 : vector<16x512xf32>
    %339 = arith.mulf %301, %338 : vector<16x512xf32>
    %340 = arith.truncf %339 : vector<16x512xf32> to vector<16x512xbf16>
    %c0_125 = arith.constant 0 : index
    %c0_126 = arith.constant 0 : index
    %c0_127 = arith.constant 0 : index
    %341 = vector.load %arg15[%c0_125, %c0_126, %c0_127] : memref<1x3072x48xbf16, #tpu.memory_space<vmem>>, vector<1x512x48xbf16>
    %342 = vector.shape_cast %341 : vector<1x512x48xbf16> to vector<512x48xbf16>
    %cst_128 = arith.constant dense<0.000000e+00> : vector<16x48xf32>
    %343 = tpu.matmul %340, %342, %cst_128 {dimension_numbers = #tpu.dot_dimension_numbers<[1], [0], [0], [1], [0, 0, 1, 1], [], []>} : vector<16x512xbf16>, vector<512x48xbf16>, vector<16x48xf32> -> vector<16x48xf32>
    %344 = arith.addf %292, %343 : vector<16x48xf32>
    %c0_129 = arith.constant 0 : index
    %c0_130 = arith.constant 0 : index
    %c512 = arith.constant 512 : index
    %345 = vector.load %arg13[%c0_129, %c0_130, %c512] : memref<1x48x3072xbf16, #tpu.memory_space<vmem>>, vector<1x48x512xbf16>
    %346 = vector.shape_cast %345 : vector<1x48x512xbf16> to vector<48x512xbf16>
    %cst_131 = arith.constant dense<0.000000e+00> : vector<16x512xf32>
    %347 = tpu.matmul %291, %346, %cst_131 {dimension_numbers = #tpu.dot_dimension_numbers<[1], [0], [0], [1], [0, 0, 1, 1], [], []>} : vector<16x48xbf16>, vector<48x512xbf16>, vector<16x512xf32> -> vector<16x512xf32>
    %c0_132 = arith.constant 0 : index
    %c0_133 = arith.constant 0 : index
    %c512_134 = arith.constant 512 : index
    %348 = vector.load %arg14[%c0_132, %c0_133, %c512_134] : memref<1x1x3072xf32, #tpu.memory_space<vmem>>, vector<1x1x512xf32>
    %349 = vector.shape_cast %348 : vector<1x1x512xf32> to vector<1x512xf32>
    %350 = vector.broadcast %349 : vector<1x512xf32> to vector<16x512xf32>
    %351 = arith.addf %347, %350 : vector<16x512xf32>
    %cst_135 = arith.constant 5.000000e-01 : f32
    %352 = vector.broadcast %cst_135 : f32 to vector<16x512xf32>
    %353 = arith.mulf %352, %351 : vector<16x512xf32>
    %cst_136 = arith.constant 0.707106769 : f32
    %354 = vector.broadcast %cst_136 : f32 to vector<16x512xf32>
    %355 = arith.mulf %351, %354 : vector<16x512xf32>
    %356 = math.absf %355 : vector<16x512xf32>
    %cst_137 = arith.constant 0.327591091 : f32
    %357 = vector.broadcast %cst_137 : f32 to vector<16x512xf32>
    %358 = arith.mulf %357, %356 : vector<16x512xf32>
    %cst_138 = arith.constant 1.000000e+00 : f32
    %359 = vector.broadcast %cst_138 : f32 to vector<16x512xf32>
    %360 = arith.addf %359, %358 : vector<16x512xf32>
    %cst_139 = arith.constant 1.000000e+00 : f32
    %361 = vector.broadcast %cst_139 : f32 to vector<16x512xf32>
    %362 = arith.divf %361, %360 : vector<16x512xf32>
    %cst_140 = arith.constant 1.06140542 : f32
    %363 = vector.broadcast %cst_140 : f32 to vector<16x512xf32>
    %364 = arith.mulf %363, %362 : vector<16x512xf32>
    %cst_141 = arith.constant -1.45315206 : f32
    %365 = vector.broadcast %cst_141 : f32 to vector<16x512xf32>
    %366 = arith.addf %364, %365 : vector<16x512xf32>
    %367 = arith.mulf %366, %362 : vector<16x512xf32>
    %cst_142 = arith.constant 1.42141378 : f32
    %368 = vector.broadcast %cst_142 : f32 to vector<16x512xf32>
    %369 = arith.addf %367, %368 : vector<16x512xf32>
    %370 = arith.mulf %369, %362 : vector<16x512xf32>
    %cst_143 = arith.constant -0.284496725 : f32
    %371 = vector.broadcast %cst_143 : f32 to vector<16x512xf32>
    %372 = arith.addf %370, %371 : vector<16x512xf32>
    %373 = arith.mulf %372, %362 : vector<16x512xf32>
    %cst_144 = arith.constant 0.254829586 : f32
    %374 = vector.broadcast %cst_144 : f32 to vector<16x512xf32>
    %375 = arith.addf %373, %374 : vector<16x512xf32>
    %376 = arith.mulf %375, %362 : vector<16x512xf32>
    %cst_145 = arith.constant 0.000000e+00 : f32
    %377 = vector.broadcast %cst_145 : f32 to vector<16x512xf32>
    %378 = arith.subf %377, %356 : vector<16x512xf32>
    %379 = arith.mulf %378, %356 : vector<16x512xf32>
    %380 = math.exp %379 : vector<16x512xf32>
    %381 = arith.mulf %376, %380 : vector<16x512xf32>
    %cst_146 = arith.constant 1.000000e+00 : f32
    %382 = vector.broadcast %cst_146 : f32 to vector<16x512xf32>
    %383 = arith.subf %382, %381 : vector<16x512xf32>
    %cst_147 = arith.constant 0.000000e+00 : f32
    %384 = vector.broadcast %cst_147 : f32 to vector<16x512xf32>
    %385 = arith.cmpf oge, %355, %384 : vector<16x512xf32>
    %cst_148 = arith.constant 0.000000e+00 : f32
    %386 = vector.broadcast %cst_148 : f32 to vector<16x512xf32>
    %387 = arith.subf %386, %383 : vector<16x512xf32>
    %388 = arith.select %385, %383, %387 : vector<16x512xi1>, vector<16x512xf32>
    %cst_149 = arith.constant 1.000000e+00 : f32
    %389 = vector.broadcast %cst_149 : f32 to vector<16x512xf32>
    %390 = arith.addf %389, %388 : vector<16x512xf32>
    %391 = arith.mulf %353, %390 : vector<16x512xf32>
    %392 = arith.truncf %391 : vector<16x512xf32> to vector<16x512xbf16>
    %c0_150 = arith.constant 0 : index
    %c512_151 = arith.constant 512 : index
    %c0_152 = arith.constant 0 : index
    %393 = vector.load %arg15[%c0_150, %c512_151, %c0_152] : memref<1x3072x48xbf16, #tpu.memory_space<vmem>>, vector<1x512x48xbf16>
    %394 = vector.shape_cast %393 : vector<1x512x48xbf16> to vector<512x48xbf16>
    %cst_153 = arith.constant dense<0.000000e+00> : vector<16x48xf32>
    %395 = tpu.matmul %392, %394, %cst_153 {dimension_numbers = #tpu.dot_dimension_numbers<[1], [0], [0], [1], [0, 0, 1, 1], [], []>} : vector<16x512xbf16>, vector<512x48xbf16>, vector<16x48xf32> -> vector<16x48xf32>
    %396 = arith.addf %344, %395 : vector<16x48xf32>
    %c0_154 = arith.constant 0 : index
    %c0_155 = arith.constant 0 : index
    %c1024 = arith.constant 1024 : index
    %397 = vector.load %arg13[%c0_154, %c0_155, %c1024] : memref<1x48x3072xbf16, #tpu.memory_space<vmem>>, vector<1x48x512xbf16>
    %398 = vector.shape_cast %397 : vector<1x48x512xbf16> to vector<48x512xbf16>
    %cst_156 = arith.constant dense<0.000000e+00> : vector<16x512xf32>
    %399 = tpu.matmul %291, %398, %cst_156 {dimension_numbers = #tpu.dot_dimension_numbers<[1], [0], [0], [1], [0, 0, 1, 1], [], []>} : vector<16x48xbf16>, vector<48x512xbf16>, vector<16x512xf32> -> vector<16x512xf32>
    %c0_157 = arith.constant 0 : index
    %c0_158 = arith.constant 0 : index
    %c1024_159 = arith.constant 1024 : index
    %400 = vector.load %arg14[%c0_157, %c0_158, %c1024_159] : memref<1x1x3072xf32, #tpu.memory_space<vmem>>, vector<1x1x512xf32>
    %401 = vector.shape_cast %400 : vector<1x1x512xf32> to vector<1x512xf32>
    %402 = vector.broadcast %401 : vector<1x512xf32> to vector<16x512xf32>
    %403 = arith.addf %399, %402 : vector<16x512xf32>
    %cst_160 = arith.constant 5.000000e-01 : f32
    %404 = vector.broadcast %cst_160 : f32 to vector<16x512xf32>
    %405 = arith.mulf %404, %403 : vector<16x512xf32>
    %cst_161 = arith.constant 0.707106769 : f32
    %406 = vector.broadcast %cst_161 : f32 to vector<16x512xf32>
    %407 = arith.mulf %403, %406 : vector<16x512xf32>
    %408 = math.absf %407 : vector<16x512xf32>
    %cst_162 = arith.constant 0.327591091 : f32
    %409 = vector.broadcast %cst_162 : f32 to vector<16x512xf32>
    %410 = arith.mulf %409, %408 : vector<16x512xf32>
    %cst_163 = arith.constant 1.000000e+00 : f32
    %411 = vector.broadcast %cst_163 : f32 to vector<16x512xf32>
    %412 = arith.addf %411, %410 : vector<16x512xf32>
    %cst_164 = arith.constant 1.000000e+00 : f32
    %413 = vector.broadcast %cst_164 : f32 to vector<16x512xf32>
    %414 = arith.divf %413, %412 : vector<16x512xf32>
    %cst_165 = arith.constant 1.06140542 : f32
    %415 = vector.broadcast %cst_165 : f32 to vector<16x512xf32>
    %416 = arith.mulf %415, %414 : vector<16x512xf32>
    %cst_166 = arith.constant -1.45315206 : f32
    %417 = vector.broadcast %cst_166 : f32 to vector<16x512xf32>
    %418 = arith.addf %416, %417 : vector<16x512xf32>
    %419 = arith.mulf %418, %414 : vector<16x512xf32>
    %cst_167 = arith.constant 1.42141378 : f32
    %420 = vector.broadcast %cst_167 : f32 to vector<16x512xf32>
    %421 = arith.addf %419, %420 : vector<16x512xf32>
    %422 = arith.mulf %421, %414 : vector<16x512xf32>
    %cst_168 = arith.constant -0.284496725 : f32
    %423 = vector.broadcast %cst_168 : f32 to vector<16x512xf32>
    %424 = arith.addf %422, %423 : vector<16x512xf32>
    %425 = arith.mulf %424, %414 : vector<16x512xf32>
    %cst_169 = arith.constant 0.254829586 : f32
    %426 = vector.broadcast %cst_169 : f32 to vector<16x512xf32>
    %427 = arith.addf %425, %426 : vector<16x512xf32>
    %428 = arith.mulf %427, %414 : vector<16x512xf32>
    %cst_170 = arith.constant 0.000000e+00 : f32
    %429 = vector.broadcast %cst_170 : f32 to vector<16x512xf32>
    %430 = arith.subf %429, %408 : vector<16x512xf32>
    %431 = arith.mulf %430, %408 : vector<16x512xf32>
    %432 = math.exp %431 : vector<16x512xf32>
    %433 = arith.mulf %428, %432 : vector<16x512xf32>
    %cst_171 = arith.constant 1.000000e+00 : f32
    %434 = vector.broadcast %cst_171 : f32 to vector<16x512xf32>
    %435 = arith.subf %434, %433 : vector<16x512xf32>
    %cst_172 = arith.constant 0.000000e+00 : f32
    %436 = vector.broadcast %cst_172 : f32 to vector<16x512xf32>
    %437 = arith.cmpf oge, %407, %436 : vector<16x512xf32>
    %cst_173 = arith.constant 0.000000e+00 : f32
    %438 = vector.broadcast %cst_173 : f32 to vector<16x512xf32>
    %439 = arith.subf %438, %435 : vector<16x512xf32>
    %440 = arith.select %437, %435, %439 : vector<16x512xi1>, vector<16x512xf32>
    %cst_174 = arith.constant 1.000000e+00 : f32
    %441 = vector.broadcast %cst_174 : f32 to vector<16x512xf32>
    %442 = arith.addf %441, %440 : vector<16x512xf32>
    %443 = arith.mulf %405, %442 : vector<16x512xf32>
    %444 = arith.truncf %443 : vector<16x512xf32> to vector<16x512xbf16>
    %c0_175 = arith.constant 0 : index
    %c1024_176 = arith.constant 1024 : index
    %c0_177 = arith.constant 0 : index
    %445 = vector.load %arg15[%c0_175, %c1024_176, %c0_177] : memref<1x3072x48xbf16, #tpu.memory_space<vmem>>, vector<1x512x48xbf16>
    %446 = vector.shape_cast %445 : vector<1x512x48xbf16> to vector<512x48xbf16>
    %cst_178 = arith.constant dense<0.000000e+00> : vector<16x48xf32>
    %447 = tpu.matmul %444, %446, %cst_178 {dimension_numbers = #tpu.dot_dimension_numbers<[1], [0], [0], [1], [0, 0, 1, 1], [], []>} : vector<16x512xbf16>, vector<512x48xbf16>, vector<16x48xf32> -> vector<16x48xf32>
    %448 = arith.addf %396, %447 : vector<16x48xf32>
    %c0_179 = arith.constant 0 : index
    %c0_180 = arith.constant 0 : index
    %c1536 = arith.constant 1536 : index
    %449 = vector.load %arg13[%c0_179, %c0_180, %c1536] : memref<1x48x3072xbf16, #tpu.memory_space<vmem>>, vector<1x48x512xbf16>
    %450 = vector.shape_cast %449 : vector<1x48x512xbf16> to vector<48x512xbf16>
    %cst_181 = arith.constant dense<0.000000e+00> : vector<16x512xf32>
    %451 = tpu.matmul %291, %450, %cst_181 {dimension_numbers = #tpu.dot_dimension_numbers<[1], [0], [0], [1], [0, 0, 1, 1], [], []>} : vector<16x48xbf16>, vector<48x512xbf16>, vector<16x512xf32> -> vector<16x512xf32>
    %c0_182 = arith.constant 0 : index
    %c0_183 = arith.constant 0 : index
    %c1536_184 = arith.constant 1536 : index
    %452 = vector.load %arg14[%c0_182, %c0_183, %c1536_184] : memref<1x1x3072xf32, #tpu.memory_space<vmem>>, vector<1x1x512xf32>
    %453 = vector.shape_cast %452 : vector<1x1x512xf32> to vector<1x512xf32>
    %454 = vector.broadcast %453 : vector<1x512xf32> to vector<16x512xf32>
    %455 = arith.addf %451, %454 : vector<16x512xf32>
    %cst_185 = arith.constant 5.000000e-01 : f32
    %456 = vector.broadcast %cst_185 : f32 to vector<16x512xf32>
    %457 = arith.mulf %456, %455 : vector<16x512xf32>
    %cst_186 = arith.constant 0.707106769 : f32
    %458 = vector.broadcast %cst_186 : f32 to vector<16x512xf32>
    %459 = arith.mulf %455, %458 : vector<16x512xf32>
    %460 = math.absf %459 : vector<16x512xf32>
    %cst_187 = arith.constant 0.327591091 : f32
    %461 = vector.broadcast %cst_187 : f32 to vector<16x512xf32>
    %462 = arith.mulf %461, %460 : vector<16x512xf32>
    %cst_188 = arith.constant 1.000000e+00 : f32
    %463 = vector.broadcast %cst_188 : f32 to vector<16x512xf32>
    %464 = arith.addf %463, %462 : vector<16x512xf32>
    %cst_189 = arith.constant 1.000000e+00 : f32
    %465 = vector.broadcast %cst_189 : f32 to vector<16x512xf32>
    %466 = arith.divf %465, %464 : vector<16x512xf32>
    %cst_190 = arith.constant 1.06140542 : f32
    %467 = vector.broadcast %cst_190 : f32 to vector<16x512xf32>
    %468 = arith.mulf %467, %466 : vector<16x512xf32>
    %cst_191 = arith.constant -1.45315206 : f32
    %469 = vector.broadcast %cst_191 : f32 to vector<16x512xf32>
    %470 = arith.addf %468, %469 : vector<16x512xf32>
    %471 = arith.mulf %470, %466 : vector<16x512xf32>
    %cst_192 = arith.constant 1.42141378 : f32
    %472 = vector.broadcast %cst_192 : f32 to vector<16x512xf32>
    %473 = arith.addf %471, %472 : vector<16x512xf32>
    %474 = arith.mulf %473, %466 : vector<16x512xf32>
    %cst_193 = arith.constant -0.284496725 : f32
    %475 = vector.broadcast %cst_193 : f32 to vector<16x512xf32>
    %476 = arith.addf %474, %475 : vector<16x512xf32>
    %477 = arith.mulf %476, %466 : vector<16x512xf32>
    %cst_194 = arith.constant 0.254829586 : f32
    %478 = vector.broadcast %cst_194 : f32 to vector<16x512xf32>
    %479 = arith.addf %477, %478 : vector<16x512xf32>
    %480 = arith.mulf %479, %466 : vector<16x512xf32>
    %cst_195 = arith.constant 0.000000e+00 : f32
    %481 = vector.broadcast %cst_195 : f32 to vector<16x512xf32>
    %482 = arith.subf %481, %460 : vector<16x512xf32>
    %483 = arith.mulf %482, %460 : vector<16x512xf32>
    %484 = math.exp %483 : vector<16x512xf32>
    %485 = arith.mulf %480, %484 : vector<16x512xf32>
    %cst_196 = arith.constant 1.000000e+00 : f32
    %486 = vector.broadcast %cst_196 : f32 to vector<16x512xf32>
    %487 = arith.subf %486, %485 : vector<16x512xf32>
    %cst_197 = arith.constant 0.000000e+00 : f32
    %488 = vector.broadcast %cst_197 : f32 to vector<16x512xf32>
    %489 = arith.cmpf oge, %459, %488 : vector<16x512xf32>
    %cst_198 = arith.constant 0.000000e+00 : f32
    %490 = vector.broadcast %cst_198 : f32 to vector<16x512xf32>
    %491 = arith.subf %490, %487 : vector<16x512xf32>
    %492 = arith.select %489, %487, %491 : vector<16x512xi1>, vector<16x512xf32>
    %cst_199 = arith.constant 1.000000e+00 : f32
    %493 = vector.broadcast %cst_199 : f32 to vector<16x512xf32>
    %494 = arith.addf %493, %492 : vector<16x512xf32>
    %495 = arith.mulf %457, %494 : vector<16x512xf32>
    %496 = arith.truncf %495 : vector<16x512xf32> to vector<16x512xbf16>
    %c0_200 = arith.constant 0 : index
    %c1536_201 = arith.constant 1536 : index
    %c0_202 = arith.constant 0 : index
    %497 = vector.load %arg15[%c0_200, %c1536_201, %c0_202] : memref<1x3072x48xbf16, #tpu.memory_space<vmem>>, vector<1x512x48xbf16>
    %498 = vector.shape_cast %497 : vector<1x512x48xbf16> to vector<512x48xbf16>
    %cst_203 = arith.constant dense<0.000000e+00> : vector<16x48xf32>
    %499 = tpu.matmul %496, %498, %cst_203 {dimension_numbers = #tpu.dot_dimension_numbers<[1], [0], [0], [1], [0, 0, 1, 1], [], []>} : vector<16x512xbf16>, vector<512x48xbf16>, vector<16x48xf32> -> vector<16x48xf32>
    %500 = arith.addf %448, %499 : vector<16x48xf32>
    %c0_204 = arith.constant 0 : index
    %c0_205 = arith.constant 0 : index
    %c2048 = arith.constant 2048 : index
    %501 = vector.load %arg13[%c0_204, %c0_205, %c2048] : memref<1x48x3072xbf16, #tpu.memory_space<vmem>>, vector<1x48x512xbf16>
    %502 = vector.shape_cast %501 : vector<1x48x512xbf16> to vector<48x512xbf16>
    %cst_206 = arith.constant dense<0.000000e+00> : vector<16x512xf32>
    %503 = tpu.matmul %291, %502, %cst_206 {dimension_numbers = #tpu.dot_dimension_numbers<[1], [0], [0], [1], [0, 0, 1, 1], [], []>} : vector<16x48xbf16>, vector<48x512xbf16>, vector<16x512xf32> -> vector<16x512xf32>
    %c0_207 = arith.constant 0 : index
    %c0_208 = arith.constant 0 : index
    %c2048_209 = arith.constant 2048 : index
    %504 = vector.load %arg14[%c0_207, %c0_208, %c2048_209] : memref<1x1x3072xf32, #tpu.memory_space<vmem>>, vector<1x1x512xf32>
    %505 = vector.shape_cast %504 : vector<1x1x512xf32> to vector<1x512xf32>
    %506 = vector.broadcast %505 : vector<1x512xf32> to vector<16x512xf32>
    %507 = arith.addf %503, %506 : vector<16x512xf32>
    %cst_210 = arith.constant 5.000000e-01 : f32
    %508 = vector.broadcast %cst_210 : f32 to vector<16x512xf32>
    %509 = arith.mulf %508, %507 : vector<16x512xf32>
    %cst_211 = arith.constant 0.707106769 : f32
    %510 = vector.broadcast %cst_211 : f32 to vector<16x512xf32>
    %511 = arith.mulf %507, %510 : vector<16x512xf32>
    %512 = math.absf %511 : vector<16x512xf32>
    %cst_212 = arith.constant 0.327591091 : f32
    %513 = vector.broadcast %cst_212 : f32 to vector<16x512xf32>
    %514 = arith.mulf %513, %512 : vector<16x512xf32>
    %cst_213 = arith.constant 1.000000e+00 : f32
    %515 = vector.broadcast %cst_213 : f32 to vector<16x512xf32>
    %516 = arith.addf %515, %514 : vector<16x512xf32>
    %cst_214 = arith.constant 1.000000e+00 : f32
    %517 = vector.broadcast %cst_214 : f32 to vector<16x512xf32>
    %518 = arith.divf %517, %516 : vector<16x512xf32>
    %cst_215 = arith.constant 1.06140542 : f32
    %519 = vector.broadcast %cst_215 : f32 to vector<16x512xf32>
    %520 = arith.mulf %519, %518 : vector<16x512xf32>
    %cst_216 = arith.constant -1.45315206 : f32
    %521 = vector.broadcast %cst_216 : f32 to vector<16x512xf32>
    %522 = arith.addf %520, %521 : vector<16x512xf32>
    %523 = arith.mulf %522, %518 : vector<16x512xf32>
    %cst_217 = arith.constant 1.42141378 : f32
    %524 = vector.broadcast %cst_217 : f32 to vector<16x512xf32>
    %525 = arith.addf %523, %524 : vector<16x512xf32>
    %526 = arith.mulf %525, %518 : vector<16x512xf32>
    %cst_218 = arith.constant -0.284496725 : f32
    %527 = vector.broadcast %cst_218 : f32 to vector<16x512xf32>
    %528 = arith.addf %526, %527 : vector<16x512xf32>
    %529 = arith.mulf %528, %518 : vector<16x512xf32>
    %cst_219 = arith.constant 0.254829586 : f32
    %530 = vector.broadcast %cst_219 : f32 to vector<16x512xf32>
    %531 = arith.addf %529, %530 : vector<16x512xf32>
    %532 = arith.mulf %531, %518 : vector<16x512xf32>
    %cst_220 = arith.constant 0.000000e+00 : f32
    %533 = vector.broadcast %cst_220 : f32 to vector<16x512xf32>
    %534 = arith.subf %533, %512 : vector<16x512xf32>
    %535 = arith.mulf %534, %512 : vector<16x512xf32>
    %536 = math.exp %535 : vector<16x512xf32>
    %537 = arith.mulf %532, %536 : vector<16x512xf32>
    %cst_221 = arith.constant 1.000000e+00 : f32
    %538 = vector.broadcast %cst_221 : f32 to vector<16x512xf32>
    %539 = arith.subf %538, %537 : vector<16x512xf32>
    %cst_222 = arith.constant 0.000000e+00 : f32
    %540 = vector.broadcast %cst_222 : f32 to vector<16x512xf32>
    %541 = arith.cmpf oge, %511, %540 : vector<16x512xf32>
    %cst_223 = arith.constant 0.000000e+00 : f32
    %542 = vector.broadcast %cst_223 : f32 to vector<16x512xf32>
    %543 = arith.subf %542, %539 : vector<16x512xf32>
    %544 = arith.select %541, %539, %543 : vector<16x512xi1>, vector<16x512xf32>
    %cst_224 = arith.constant 1.000000e+00 : f32
    %545 = vector.broadcast %cst_224 : f32 to vector<16x512xf32>
    %546 = arith.addf %545, %544 : vector<16x512xf32>
    %547 = arith.mulf %509, %546 : vector<16x512xf32>
    %548 = arith.truncf %547 : vector<16x512xf32> to vector<16x512xbf16>
    %c0_225 = arith.constant 0 : index
    %c2048_226 = arith.constant 2048 : index
    %c0_227 = arith.constant 0 : index
    %549 = vector.load %arg15[%c0_225, %c2048_226, %c0_227] : memref<1x3072x48xbf16, #tpu.memory_space<vmem>>, vector<1x512x48xbf16>
    %550 = vector.shape_cast %549 : vector<1x512x48xbf16> to vector<512x48xbf16>
    %cst_228 = arith.constant dense<0.000000e+00> : vector<16x48xf32>
    %551 = tpu.matmul %548, %550, %cst_228 {dimension_numbers = #tpu.dot_dimension_numbers<[1], [0], [0], [1], [0, 0, 1, 1], [], []>} : vector<16x512xbf16>, vector<512x48xbf16>, vector<16x48xf32> -> vector<16x48xf32>
    %552 = arith.addf %500, %551 : vector<16x48xf32>
    %c0_229 = arith.constant 0 : index
    %c0_230 = arith.constant 0 : index
    %c2560 = arith.constant 2560 : index
    %553 = vector.load %arg13[%c0_229, %c0_230, %c2560] : memref<1x48x3072xbf16, #tpu.memory_space<vmem>>, vector<1x48x512xbf16>
    %554 = vector.shape_cast %553 : vector<1x48x512xbf16> to vector<48x512xbf16>
    %cst_231 = arith.constant dense<0.000000e+00> : vector<16x512xf32>
    %555 = tpu.matmul %291, %554, %cst_231 {dimension_numbers = #tpu.dot_dimension_numbers<[1], [0], [0], [1], [0, 0, 1, 1], [], []>} : vector<16x48xbf16>, vector<48x512xbf16>, vector<16x512xf32> -> vector<16x512xf32>
    %c0_232 = arith.constant 0 : index
    %c0_233 = arith.constant 0 : index
    %c2560_234 = arith.constant 2560 : index
    %556 = vector.load %arg14[%c0_232, %c0_233, %c2560_234] : memref<1x1x3072xf32, #tpu.memory_space<vmem>>, vector<1x1x512xf32>
    %557 = vector.shape_cast %556 : vector<1x1x512xf32> to vector<1x512xf32>
    %558 = vector.broadcast %557 : vector<1x512xf32> to vector<16x512xf32>
    %559 = arith.addf %555, %558 : vector<16x512xf32>
    %cst_235 = arith.constant 5.000000e-01 : f32
    %560 = vector.broadcast %cst_235 : f32 to vector<16x512xf32>
    %561 = arith.mulf %560, %559 : vector<16x512xf32>
    %cst_236 = arith.constant 0.707106769 : f32
    %562 = vector.broadcast %cst_236 : f32 to vector<16x512xf32>
    %563 = arith.mulf %559, %562 : vector<16x512xf32>
    %564 = math.absf %563 : vector<16x512xf32>
    %cst_237 = arith.constant 0.327591091 : f32
    %565 = vector.broadcast %cst_237 : f32 to vector<16x512xf32>
    %566 = arith.mulf %565, %564 : vector<16x512xf32>
    %cst_238 = arith.constant 1.000000e+00 : f32
    %567 = vector.broadcast %cst_238 : f32 to vector<16x512xf32>
    %568 = arith.addf %567, %566 : vector<16x512xf32>
    %cst_239 = arith.constant 1.000000e+00 : f32
    %569 = vector.broadcast %cst_239 : f32 to vector<16x512xf32>
    %570 = arith.divf %569, %568 : vector<16x512xf32>
    %cst_240 = arith.constant 1.06140542 : f32
    %571 = vector.broadcast %cst_240 : f32 to vector<16x512xf32>
    %572 = arith.mulf %571, %570 : vector<16x512xf32>
    %cst_241 = arith.constant -1.45315206 : f32
    %573 = vector.broadcast %cst_241 : f32 to vector<16x512xf32>
    %574 = arith.addf %572, %573 : vector<16x512xf32>
    %575 = arith.mulf %574, %570 : vector<16x512xf32>
    %cst_242 = arith.constant 1.42141378 : f32
    %576 = vector.broadcast %cst_242 : f32 to vector<16x512xf32>
    %577 = arith.addf %575, %576 : vector<16x512xf32>
    %578 = arith.mulf %577, %570 : vector<16x512xf32>
    %cst_243 = arith.constant -0.284496725 : f32
    %579 = vector.broadcast %cst_243 : f32 to vector<16x512xf32>
    %580 = arith.addf %578, %579 : vector<16x512xf32>
    %581 = arith.mulf %580, %570 : vector<16x512xf32>
    %cst_244 = arith.constant 0.254829586 : f32
    %582 = vector.broadcast %cst_244 : f32 to vector<16x512xf32>
    %583 = arith.addf %581, %582 : vector<16x512xf32>
    %584 = arith.mulf %583, %570 : vector<16x512xf32>
    %cst_245 = arith.constant 0.000000e+00 : f32
    %585 = vector.broadcast %cst_245 : f32 to vector<16x512xf32>
    %586 = arith.subf %585, %564 : vector<16x512xf32>
    %587 = arith.mulf %586, %564 : vector<16x512xf32>
    %588 = math.exp %587 : vector<16x512xf32>
    %589 = arith.mulf %584, %588 : vector<16x512xf32>
    %cst_246 = arith.constant 1.000000e+00 : f32
    %590 = vector.broadcast %cst_246 : f32 to vector<16x512xf32>
    %591 = arith.subf %590, %589 : vector<16x512xf32>
    %cst_247 = arith.constant 0.000000e+00 : f32
    %592 = vector.broadcast %cst_247 : f32 to vector<16x512xf32>
    %593 = arith.cmpf oge, %563, %592 : vector<16x512xf32>
    %cst_248 = arith.constant 0.000000e+00 : f32
    %594 = vector.broadcast %cst_248 : f32 to vector<16x512xf32>
    %595 = arith.subf %594, %591 : vector<16x512xf32>
    %596 = arith.select %593, %591, %595 : vector<16x512xi1>, vector<16x512xf32>
    %cst_249 = arith.constant 1.000000e+00 : f32
    %597 = vector.broadcast %cst_249 : f32 to vector<16x512xf32>
    %598 = arith.addf %597, %596 : vector<16x512xf32>
    %599 = arith.mulf %561, %598 : vector<16x512xf32>
    %600 = arith.truncf %599 : vector<16x512xf32> to vector<16x512xbf16>
    %c0_250 = arith.constant 0 : index
    %c2560_251 = arith.constant 2560 : index
    %c0_252 = arith.constant 0 : index
    %601 = vector.load %arg15[%c0_250, %c2560_251, %c0_252] : memref<1x3072x48xbf16, #tpu.memory_space<vmem>>, vector<1x512x48xbf16>
    %602 = vector.shape_cast %601 : vector<1x512x48xbf16> to vector<512x48xbf16>
    %cst_253 = arith.constant dense<0.000000e+00> : vector<16x48xf32>
    %603 = tpu.matmul %600, %602, %cst_253 {dimension_numbers = #tpu.dot_dimension_numbers<[1], [0], [0], [1], [0, 0, 1, 1], [], []>} : vector<16x512xbf16>, vector<512x48xbf16>, vector<16x48xf32> -> vector<16x48xf32>
    %604 = arith.addf %552, %603 : vector<16x48xf32>
    %605 = arith.addf %264, %604 : vector<16x48xf32>
    %c0_254 = arith.constant 0 : index
    %c0_255 = arith.constant 0 : index
    %c0_256 = arith.constant 0 : index
    %606 = vector.load %arg16[%c0_254, %c0_255, %c0_256] : memref<1x1x48xf32, #tpu.memory_space<vmem>>, vector<1x1x48xf32>
    %607 = vector.shape_cast %606 : vector<1x1x48xf32> to vector<1x48xf32>
    %608 = vector.broadcast %607 : vector<1x48xf32> to vector<16x48xf32>
    %609 = arith.addf %605, %608 : vector<16x48xf32>
    %c0_257 = arith.constant 0 : index
    %c0_258 = arith.constant 0 : index
    %610 = vector.load %arg20[%c0_257, %c0_258] : memref<16x48xf32, #tpu.memory_space<vmem>>, vector<16x48xf32>
    tpu.vector_store %arg20[%c0_257, %c0_258], %609 {strides = array<i32>} : memref<16x48xf32, #tpu.memory_space<vmem>>, vector<16x48xf32>,
    %c11_i32 = arith.constant 11 : i32
    %611 = arith.cmpi eq, %arg0, %c11_i32 : i32
    %612 = arith.extui %611 : i1 to i32
    %c0_i32_259 = arith.constant 0 : i32
    %613 = arith.cmpi ne, %612, %c0_i32_259 : i32
    scf.if %613 {
      %c0_260 = arith.constant 0 : index
      %c0_261 = arith.constant 0 : index
      %614 = vector.load %arg17[%c0_260, %c0_261] : memref<1x48xf32, #tpu.memory_space<vmem>>, vector<1x48xf32>
      %c0_262 = arith.constant 0 : index
      %c0_263 = arith.constant 0 : index
      %615 = vector.load %arg18[%c0_262, %c0_263] : memref<1x48xf32, #tpu.memory_space<vmem>>, vector<1x48xf32>
      %cst_264 = arith.constant dense<0.000000e+00> : vector<16xf32>
      %616 = vector.multi_reduction <add>, %609, %cst_264 [1] : vector<16x48xf32> to vector<16xf32>
      %617 = vector.shape_cast %616 : vector<16xf32> to vector<16x1xf32>
      %cst_265 = arith.constant 4.800000e+01 : f32
      %618 = vector.broadcast %cst_265 : f32 to vector<16x1xf32>
      %619 = arith.divf %617, %618 : vector<16x1xf32>
      %620 = vector.broadcast %619 : vector<16x1xf32> to vector<16x48xf32>
      %621 = arith.subf %609, %620 : vector<16x48xf32>
      %622 = arith.mulf %621, %621 : vector<16x48xf32>
      %cst_266 = arith.constant dense<0.000000e+00> : vector<16xf32>
      %623 = vector.multi_reduction <add>, %622, %cst_266 [1] : vector<16x48xf32> to vector<16xf32>
      %624 = vector.shape_cast %623 : vector<16xf32> to vector<16x1xf32>
      %cst_267 = arith.constant 4.800000e+01 : f32
      %625 = vector.broadcast %cst_267 : f32 to vector<16x1xf32>
      %626 = arith.divf %624, %625 : vector<16x1xf32>
      %627 = vector.broadcast %619 : vector<16x1xf32> to vector<16x48xf32>
      %628 = arith.subf %609, %627 : vector<16x48xf32>
      %cst_268 = arith.constant 9.99999996E-13 : f32
      %629 = vector.broadcast %cst_268 : f32 to vector<16x1xf32>
      %630 = arith.addf %626, %629 : vector<16x1xf32>
      %631 = math.rsqrt %630 : vector<16x1xf32>
      %632 = vector.broadcast %631 : vector<16x1xf32> to vector<16x48xf32>
      %633 = arith.mulf %628, %632 : vector<16x48xf32>
      %634 = vector.broadcast %614 : vector<1x48xf32> to vector<16x48xf32>
      %635 = arith.mulf %633, %634 : vector<16x48xf32>
      %636 = vector.broadcast %615 : vector<1x48xf32> to vector<16x48xf32>
      %637 = arith.addf %635, %636 : vector<16x48xf32>
      %c0_269 = arith.constant 0 : index
      %c0_270 = arith.constant 0 : index
      %638 = vector.load %arg19[%c0_269, %c0_270] : memref<16x48xf32, #tpu.memory_space<vmem>>, vector<16x48xf32>
      tpu.vector_store %arg19[%c0_269, %c0_270], %637 {strides = array<i32>} : memref<16x48xf32, #tpu.memory_space<vmem>>, vector<16x48xf32>,
    } else {
    }
    return
  }
  func.func @transform_0(%arg0: i32) -> (i32, i32) {
    %c0_i32 = arith.constant 0 : i32
    %c0_i32_0 = arith.constant 0 : i32
    %c0_i32_1 = arith.constant 0 : i32
    return %c0_i32, %c0_i32_0 : i32, i32
  }
  func.func @transform_1(%arg0: i32) -> (i32, i32) {
    %c0_i32 = arith.constant 0 : i32
    %c0_i32_0 = arith.constant 0 : i32
    %c0_i32_1 = arith.constant 0 : i32
    return %c0_i32, %c0_i32_0 : i32, i32
  }
  func.func @transform_2(%arg0: i32) -> (i32, i32) {
    %c0_i32 = arith.constant 0 : i32
    %c0_i32_0 = arith.constant 0 : i32
    %c0_i32_1 = arith.constant 0 : i32
    return %c0_i32, %c0_i32_0 : i32, i32
  }
  func.func @transform_3(%arg0: i32) -> (i32, i32) {
    %c0_i32 = arith.constant 0 : i32
    %c0_i32_0 = arith.constant 0 : i32
    %c0_i32_1 = arith.constant 0 : i32
    return %c0_i32, %c0_i32_0 : i32, i32
  }
  func.func @transform_4(%arg0: i32) -> (i32, i32, i32) {
    %c0_i32 = arith.constant 0 : i32
    %c0_i32_0 = arith.constant 0 : i32
    %c0_i32_1 = arith.constant 0 : i32
    return %arg0, %c0_i32, %c0_i32_0 : i32, i32, i32
  }
  func.func @transform_5(%arg0: i32) -> (i32, i32, i32) {
    %c0_i32 = arith.constant 0 : i32
    %c0_i32_0 = arith.constant 0 : i32
    %c0_i32_1 = arith.constant 0 : i32
    return %arg0, %c0_i32, %c0_i32_0 : i32, i32, i32
  }
  func.func @transform_6(%arg0: i32) -> (i32, i32, i32) {
    %c0_i32 = arith.constant 0 : i32
    %c0_i32_0 = arith.constant 0 : i32
    %c0_i32_1 = arith.constant 0 : i32
    return %arg0, %c0_i32, %c0_i32_0 : i32, i32, i32
  }
  func.func @transform_7(%arg0: i32) -> (i32, i32, i32) {
    %c0_i32 = arith.constant 0 : i32
    %c0_i32_0 = arith.constant 0 : i32
    %c0_i32_1 = arith.constant 0 : i32
    return %arg0, %c0_i32, %c0_i32_0 : i32, i32, i32
  }
  func.func @transform_8(%arg0: i32) -> (i32, i32, i32) {
    %c0_i32 = arith.constant 0 : i32
    %c0_i32_0 = arith.constant 0 : i32
    %c0_i32_1 = arith.constant 0 : i32
    return %arg0, %c0_i32, %c0_i32_0 : i32, i32, i32
  }
  func.func @transform_9(%arg0: i32) -> (i32, i32, i32) {
    %c0_i32 = arith.constant 0 : i32
    %c0_i32_0 = arith.constant 0 : i32
    %c0_i32_1 = arith.constant 0 : i32
    return %arg0, %c0_i32, %c0_i32_0 : i32, i32, i32
  }
  func.func @transform_10(%arg0: i32) -> (i32, i32, i32) {
    %c0_i32 = arith.constant 0 : i32
    %c0_i32_0 = arith.constant 0 : i32
    %c0_i32_1 = arith.constant 0 : i32
    return %arg0, %c0_i32, %c0_i32_0 : i32, i32, i32
  }
  func.func @transform_11(%arg0: i32) -> (i32, i32, i32) {
    %c0_i32 = arith.constant 0 : i32
    %c0_i32_0 = arith.constant 0 : i32
    %c0_i32_1 = arith.constant 0 : i32
    return %arg0, %c0_i32, %c0_i32_0 : i32, i32, i32
  }
  func.func @transform_12(%arg0: i32) -> (i32, i32, i32) {
    %c0_i32 = arith.constant 0 : i32
    %c0_i32_0 = arith.constant 0 : i32
    %c0_i32_1 = arith.constant 0 : i32
    return %arg0, %c0_i32, %c0_i32_0 : i32, i32, i32
  }
  func.func @transform_13(%arg0: i32) -> (i32, i32, i32) {
    %c0_i32 = arith.constant 0 : i32
    %c0_i32_0 = arith.constant 0 : i32
    %c0_i32_1 = arith.constant 0 : i32
    return %arg0, %c0_i32, %c0_i32_0 : i32, i32, i32
  }
  func.func @transform_14(%arg0: i32) -> (i32, i32, i32) {
    %c0_i32 = arith.constant 0 : i32
    %c0_i32_0 = arith.constant 0 : i32
    %c0_i32_1 = arith.constant 0 : i32
    return %arg0, %c0_i32, %c0_i32_0 : i32, i32, i32
  }
  func.func @transform_15(%arg0: i32) -> (i32, i32, i32) {
    %c0_i32 = arith.constant 0 : i32
    %c0_i32_0 = arith.constant 0 : i32
    %c0_i32_1 = arith.constant 0 : i32
    return %arg0, %c0_i32, %c0_i32_0 : i32, i32, i32
  }
  func.func @transform_16(%arg0: i32) -> (i32, i32) {
    %c0_i32 = arith.constant 0 : i32
    %c0_i32_0 = arith.constant 0 : i32
    %c0_i32_1 = arith.constant 0 : i32
    return %c0_i32, %c0_i32_0 : i32, i32
  }
  func.func @transform_17(%arg0: i32) -> (i32, i32) {
    %c0_i32 = arith.constant 0 : i32
    %c0_i32_0 = arith.constant 0 : i32
    %c0_i32_1 = arith.constant 0 : i32
    return %c0_i32, %c0_i32_0 : i32, i32
  }
  func.func @transform_18(%arg0: i32) -> (i32, i32) {
    %c0_i32 = arith.constant 0 : i32
    %c0_i32_0 = arith.constant 0 : i32
    %c0_i32_1 = arith.constant 0 : i32
    return %c0_i32, %c0_i32_0 : i32, i32
  }
}

</mosaic_0001>

<bundles_post_ra>
// kernel: vit_encoder_forward.1
= control target key start
LH: loop header
LB: loop body
LE: loop exit
PB: predicated region body
PF: predicated region fallthrough
CT: control target
= control target key end

     0   :  { %s10259_s27 = smov 0   ;;  %s12197_s0 = inlined_call_operand.vmem [shape: f32[16,256], index: 0, kind: input, shape index: {}]   ;;  %s12198_s1 = inlined_call_operand.vmem [shape: bf16[256,48], index: 1, kind: input, shape index: {}]   ;;  %s12199_s2 = inlined_call_operand.vmem [shape: f32[16,48], index: 2, kind: input, shape index: {}]   ;;  %s12200_s3 = inlined_call_operand.vmem [shape: f32[16,16], index: 3, kind: input, shape index: {}]   ;;  %s12201_s4 = inlined_call_operand.vmem [shape: f32[12,1,48], index: 4, kind: input, shape index: {}]   ;;  %s12202_s5 = inlined_call_operand.vmem [shape: f32[12,1,48], index: 5, kind: input, shape index: {}]   ;;  %s12203_s6 = inlined_call_operand.vmem [shape: bf16[12,48,144], index: 6, kind: input, shape index: {}]   ;;  %s12204_s7 = inlined_call_operand.vmem [shape: f32[12,1,144], index: 7, kind: input, shape index: {}]   ;;  %s12205_s8 = inlined_call_operand.vmem [shape: bf16[12,48,48], index: 8, kind: input, shape index: {}]   ;;  %s12206_s9 = inlined_call_operand.vmem [shape: f32[12,1,48], index: 9, kind: input, shape index: {}]   ;;  %s12207_s10 = inlined_call_operand.vmem [shape: f32[12,1,48], index: 10, kind: input, shape index: {}]   ;;  %s12208_s11 = inlined_call_operand.vmem [shape: f32[12,1,48], index: 11, kind: input, shape index: {}]   ;;  %s12209_s12 = inlined_call_operand.vmem [shape: bf16[12,48,3072], index: 12, kind: input, shape index: {}]   ;;  %s12210_s13 = inlined_call_operand.vmem [shape: f32[12,1,3072], index: 13, kind: input, shape index: {}]   ;;  %s12211_s14 = inlined_call_operand.vmem [shape: bf16[12,3072,48], index: 14, kind: input, shape index: {}]   ;;  %s12212_s15 = inlined_call_operand.vmem [shape: f32[12,1,48], index: 15, kind: input, shape index: {}]   ;;  %s12213_s16 = inlined_call_operand.vmem [shape: f32[1,48], index: 16, kind: input, shape index: {}]   ;;  %s12214_s17 = inlined_call_operand.vmem [shape: f32[1,48], index: 17, kind: input, shape index: {}]   ;;  %s12215_s18 = inlined_call_operand.vmem [shape: f32[16,48], index: 18, kind: output, shape index: {}]  }
   0x1   :  { %12243 = sst [smem:[#allocation14_spill]] %s12197_s0 }
   0x2   :  { %12244 = sst [smem:[#allocation15_spill]] %s12198_s1 }
   0x3   :  { %12245 = sst [smem:[#allocation16_spill]] %s12199_s2 }
   0x4   :  { %12246 = sst [smem:[#allocation17_spill]] %s12200_s3 }
   0x5   :  { %12247 = sst [smem:[#allocation18_spill]] %s12203_s6 }
   0x6   :  { %12248 = sst [smem:[#allocation19_spill]] %s12204_s7 }
   0x7   :  { %12249 = sst [smem:[#allocation20_spill]] %s12205_s8 }
   0x8   :  { %12250 = sst [smem:[#allocation21_spill]] %s12213_s16 }
   0x9   :  { %12251 = sst [smem:[#allocation22_spill]] %s12214_s17 }
   0xa   :  { %12252 = sst [smem:[#allocation23_spill]] %s12215_s18 }
   0xb LB: > { %12253 = sst [smem:[#allocation4_spill]] %s10128_s27  ;;  %s10265_s28 = sadd.s32 4294967295, %s10128_s27   ;;  %s10128_s27 = sphi %s10259_s27, %s28_s27  }
   0xc   : > { %p8360_p0 = scmp.ge.s32.totalorder %s10128_s27, 1  ;;  %p603_p1 = scmp.lt.s32.totalorder %s10128_s27, 13 }
   0xe   : > { %p604_p2 = pnand %p8360_p0, %p603_p1 }
  0x10   : > { %607 = sbr.rel (%p604_p2) target bundleno = 9860 (0x2684), region = 92 }
  0x17   : > { %p693_p3 = scmp.lt.s32.totalorder %s10265_s28, 11  ;;  %s12254_s7 = sld [smem:[#allocation19_spill]] }
  0x18   : > { %s12255_s6 = sld [smem:[#allocation18_spill]]  ;;  %s12256_s8 = sld [smem:[#allocation20_spill]] }
  0x19   : > { %s10271_s29 = scalar_select %p693_p3, %s10265_s28, 11 }
  0x1a   : > { %p8366_p4 = scmp.ne.s32.totalorder %s10265_s28, 0 }
  0x1b   : > { %s9437_s22 = smul.u32 48, %s10271_s29  ;;  %s8362_s2 = sshll.u32 %s10271_s29, 1  ;;  %vm921_vm0 = vcmask (!%p8366_p4), 392192  }
  0x1c   : > { %s9438_s26 = smul.u32 24, %s10271_s29  ;;  %s12258_s0 = sld [smem:[#allocation14_spill]] (!%p8366_p4) }
  0x1d   : > { %s10286_s25 = scalar_lea.vmem %s12254_s7, %s8362_s2  ;;  %s9439_s30 = smul.u32 576, %s10271_s29 }
  0x1e   : > { %s10292_s27 = scalar_lea.vmem %s12255_s6, %s9437_s22  ;;  %s10301_s20 = scalar_lea.vmem %s12256_s8, %s9438_s26 }
  0x1f   : > { %s10315_s6 = scalar_lea.vmem %s12210_s13, %s9438_s26  ;;  %s9440_s17 = smul.u32 1536, %s10271_s29 }
  0x20   : > { %s10321_s16 = scalar_lea.vmem %s12209_s12, %s9439_s30  ;;  %743 = sbr.rel (%p8366_p4) target bundleno = 292 (0x124), region = 96 }
  0x21   : > { %s10330_s23 = scalar_lea.vmem %s12211_s14, %s9440_s17  ;;  %s12257_s22 = sld [smem:[#allocation15_spill]] (!%p8366_p4) }
  0x22   : > { %v745_v11 = vld [vmem:[%s12258_s0 + $0x8] sm:$0xff] (!%p8366_p4)  ;;  %v747_v12 = vld [vmem:[%s12258_s0 + $0x18] sm:$0xff] (!%p8366_p4)  ;;  %v744_v19 = vld [vmem:[%s12258_s0] sm:$0xff] (!%p8366_p4)  ;;  %s12259_s26 = sld [smem:[#allocation16_spill]] (!%p8366_p4) }
  0x23   : > { %v749_v13 = vpack.c.bf16 (!%p8366_p4), %v747_v12, %v745_v11  ;;  %v746_v20 = vld [vmem:[%s12258_s0 + $0x10] sm:$0xff] (!%p8366_p4) }
  0x24   : > { %v748_v21 = vpack.c.bf16 (!%p8366_p4), %v746_v20, %v744_v19 }
  0x25   : > { %912 = vmatprep.mubr.bf16.mxu0 (!%p8366_p4), %v749_v13 }
  0x27   : > { %v9483_v0 = vld [vmem:[%s12257_s22 + $0x40] sm:$0xff]   ;;  %v9485_v2 = vld [vmem:[%s12257_s22 + $0x48] sm:$0xff]   ;;  %v9487_v4 = vld [vmem:[%s12257_s22 + $0x50] sm:$0xff]  }
  0x28   : > { %v9484_v1 = vld [vmem:[%s12257_s22] sm:$0xff]   ;;  %8753 = vmatprep.subr.bf16.mxu0 %v9483_v0  ;;  %v9486_v3 = vld [vmem:[%s12257_s22 + $0x8] sm:$0xff]   ;;  %v9488_v5 = vld [vmem:[%s12257_s22 + $0x10] sm:$0xff]  }
  0x29   : > { %8754 = vmatpush3.bf16.msra.mxu0 %v9484_v1  ;;  %v9489_v6 = vld [vmem:[%s12257_s22 + $0x58] sm:$0xff]   ;;  %v9491_v8 = vld [vmem:[%s12257_s22 + $0x60] sm:$0xff]   ;;  %v9493_v10 = vld [vmem:[%s12257_s22 + $0x68] sm:$0xff]  }
  0x2a   : > { %8755 = vmatprep.subr.bf16.mxu0 %v9485_v2  ;;  %v9490_v7 = vld [vmem:[%s12257_s22 + $0x18] sm:$0xff]   ;;  %v9492_v9 = vld [vmem:[%s12257_s22 + $0x20] sm:$0xff]   ;;  %v9494_v14 = vld [vmem:[%s12257_s22 + $0x28] sm:$0xff]  }
  0x2b   : > { %v9495_v15 = vld [vmem:[%s12257_s22 + $0x70] sm:$0xff]   ;;  %v9497_v17 = vld [vmem:[%s12257_s22 + $0x78] sm:$0xff]   ;;  %v782_v23 = vld [vmem:[%s12259_s26] sm:$0xff] }
  0x2c   : > { %v9496_v16 = vld [vmem:[%s12257_s22 + $0x30] sm:$0xff]   ;;  %v9498_v18 = vld [vmem:[%s12257_s22 + $0x38] sm:$0xff]   ;;  %v783_v27 = vld [vmem:[%s12259_s26 + $0x8] sm:$0xff] }
  0x2d   : > { %8756 = vmatpush3.bf16.msra.mxu0 %v9486_v3 }
  0x2e   : > { %8757 = vmatprep.subr.bf16.mxu0 %v9487_v4 }
  0x31   : > { %8758 = vmatpush3.bf16.msra.mxu0 %v9488_v5 }
  0x32   : > { %8759 = vmatprep.subr.bf16.mxu0 %v9489_v6 }
  0x35   : > { %8760 = vmatpush3.bf16.msra.mxu0 %v9490_v7 }
  0x36   : > { %8761 = vmatprep.subr.bf16.mxu0 %v9491_v8 }
  0x39   : > { %8762 = vmatpush3.bf16.msra.mxu0 %v9492_v9 }
  0x3a   : > { %8763 = vmatprep.subr.bf16.mxu0 %v9493_v10 }
  0x3d   : > { %8764 = vmatpush3.bf16.msra.mxu0 %v9494_v14 }
  0x3e   : > { %8765 = vmatprep.subr.bf16.mxu0 %v9495_v15 }
  0x41   : > { %8766 = vmatpush3.bf16.msra.mxu0 %v9496_v16 }
  0x42   : > { %8767 = vmatprep.subr.bf16.mxu0 %v9497_v17 }
  0x45   : > { %8768 = vmatpush3.bf16.msra.mxu0 %v9498_v18 }
  0x48   : > { %913 = vmatmul.mubr.bf16.vlgmr.msra.gmra.mrb[0].mxu0 %v748_v21 }
 0x11b   : > { %v8769_v22 = vpop.f32.mrb[0].mxu0 }
 0x11c   : > { %v8770_v24 = vpop.f32.mrb[1].mxu0 }
 0x11d   : > { %v8771_v25 = vadd.f32 %v8770_v24, %v8769_v22  ;;  %v8772_v26 = vpop.f32.mrb[2].mxu0 }
 0x11e   : > { %v8773_v28 = vpop.f32.mrb[3].mxu0 }
 0x11f   : > { %v915_v29 = vadd.f32 %v8771_v25, %v782_v23  ;;  %v8774_v30 = vadd.f32 %v8773_v28, %v8772_v26 }
 0x121   : > { %922 = vst.msk [vmem:[#allocation2] sm:$0xff] %vm921_vm0, %v915_v29  ;;  %v918_v31 = vadd.f32 %v8774_v30, %v783_v27 }
 0x123   : > { %923 = vst.msk [vmem:[#allocation2 + $0x8] sm:$0xff] %vm921_vm0, %v918_v31 }
 0x124 PF: > { %vm928_vm1 = vcmask 392192   ;;  %v9614_v46 = vld [vmem:[%s10292_s27 + $0x4] ss:$8 sps:$4 sm:$0xff]   ;;  %v9616_v47 = vld [vmem:[%s10292_s27] ss:$8 sps:$4 sm:$0xff]   ;;  %v12229_v50 = vmov 0   ;;  %s12260_s2 = scalar_lea.vmem %s12201_s4, %s10271_s29  ;;  %s12261_s18 = scalar_lea.vmem %s12202_s5, %s10271_s29  ;;  %v981_v6 = vlaneseq }
 0x125   : > { %v9617_v48 = vld [vmem:[%s10292_s27 + $0x14] ss:$8 sps:$4 sm:$0xff]   ;;  %1024 = vmatprep.subr.bf16.mxu0 %v9614_v46  ;;  %v9619_v49 = vld [vmem:[%s10292_s27 + $0x10] ss:$8 sps:$4 sm:$0xff]   ;;  %1056 = vmatprep.mubr.bf16.mxu0 %v12229_v50  ;;  %v9620_v51 = vld [vmem:[%s10292_s27 + $0x24] ss:$8 sps:$4 sm:$0xff]  }
 0x126   : > { %1025 = vmatpush1.bf16.msra.mxu0 %v9616_v47  ;;  %v9622_v52 = vld [vmem:[%s10292_s27 + $0x20] ss:$8 sps:$4 sm:$0xff]   ;;  %v10421_v7 = vshrl.u32 %v981_v6, 7  ;;  %vm1075_vm2 = vcmask 31744   ;;  %s10132_s1 = smov 76   ;;  %s10133_s21 = smov 124  }
 0x127   : > { %1026 = vmatprep.subr.bf16.mxu0 %v9617_v48  ;;  %v8383_v61 = vld [vmem:[%s12260_s2] ss:$0 sm:$0xff]  ;;  %s10134_s24 = smov 72   ;;  %s10135_s19 = smov 120   ;;  %vm10455_vm3 = vmpackc.low %vm1075_vm2, %vm1075_vm2  ;;  %vm1159_vm4 = vcmask 130048   ;;  %vm1479_vm5 = vcmask 64544  }
 0x128   : > { %v924_v32 = vld [vmem:[#allocation2] sm:$0xff]  ;;  %v10424_v8 = vsub.s32 0, %v10421_v7  ;;  %v10429_v11 = vsub.s32 1, %v10421_v7  ;;  %s12266_s2 = sld [smem:[#allocation17_spill]]  ;;  %s12222_s30 = smov 116   ;;  %vm1690_vm6 = vcmask 97344  }
 0x129   : > { %v929_v34 = vsel %vm928_vm1, %v924_v32, 0.0  ;;  %v8384_v1 = vld [vmem:[%s12261_s18] ss:$0 sm:$0xff]  ;;  %s12227_s18 = smov 32   ;;  %s10141_s8 = smov 20   ;;  %vm1901_vm7 = vcmask 130144  }
 0x12a   : > { %v925_v33 = vld [vmem:[#allocation2 + $0x8] sm:$0xff]  ;;  %930 = vadd.xlane.f32.xlu0 %v929_v34  ;;  %1027 = vmatpush1.bf16.msra.mxu0 %v9619_v49  ;;  %12262 = vst [vmem:[#allocation5_spill] sm:$0xff] %v10424_v8  ;;  %v979_v9 = vld [vmem:[%s10286_s25] sm:$0x3]  ;;  %12263 = vst [vmem:[#allocation6_spill] sm:$0xff] %v10429_v11  ;;  %s10131_s25 = smov 80  }
 0x12b   : > { %v932_v35 = vsel %vm928_vm1, %v925_v33, 0.0  ;;  %1028 = vmatprep.subr.bf16.mxu0 %v9620_v51  ;;  %v984_v10 = vrot.slane %v979_v9, %v10424_v8  ;;  %v988_v15 = vrot.slane %v979_v9, %v10429_v11  ;;  %s10142_s27 = smov 112   ;;  %s10143_s17 = smov 64   ;;  %vm2112_vm8 = vcmask 162944  }
 0x12c   : > { %s10151_s3 = smov 100   ;;  %s10154_s7 = smov 96   ;;  %vm2323_vm9 = vcmask 195744   ;;  %vm2534_vm10 = vcmask 228544   ;;  %vm2745_vm11 = vcmask 261344   ;;  %vm2950_vm12 = vcmask 294144  }
 0x12d   : > { %vm3163_vm13 = vcmask 326944   ;;  %vm3374_vm14 = vcmask 359744   ;;  %vm10163_vm15 = vmmov 0   ;;  %vm3585_vm0 = vcmask 392544   ;;  %p8748_p5 = scmp.ne.s32.totalorder %s10265_s28, 11 }
 0x12e   : > { %933 = vadd.xlane.f32.xlu0 %v932_v35  ;;  %1029 = vmatpush1.bf16.msra.mxu0 %v9622_v52  ;;  %v10473_v34 = vld [vmem:[%s12266_s2] sm:$0xff] }
 0x1b7   : > { %v931_v36 = vpop.xlane.xlu0 %930 }
 0x1b8   : > { %v936_v37 = vmul.f32 0.020833334, %v931_v36  ;;  %v10478_v36 = vld [vmem:[%s12266_s2 + $0x8] sm:$0xff] }
 0x1ba   : > { %v938_v38 = vsub.f32 %v924_v32, %v936_v37 }
 0x1bb   : > { %v934_v39 = vpop.xlane.xlu0 %933 }
 0x1bc   : > { %v937_v40 = vmul.f32 0.020833334, %v934_v39  ;;  %v940_v41 = vmul.f32 %v938_v38, %v938_v38 }
 0x1be   : > { %v939_v42 = vsub.f32 %v925_v33, %v937_v40  ;;  %v942_v43 = vsel %vm928_vm1, %v940_v41, 0.0 }
 0x1bf   : > { %943 = vadd.xlane.f32.xlu1 %v942_v43 }
 0x1c0   : > { %v941_v44 = vmul.f32 %v939_v42, %v939_v42 }
 0x1c2   : > { %v945_v45 = vsel %vm928_vm1, %v941_v44, 0.0 }
 0x1c3   : > { %946 = vadd.xlane.f32.xlu1 %v945_v45 }
 0x24c   : > { %v944_v53 = vpop.xlane.xlu1 %943 }
 0x24d   : > { %v948_v54 = vmul.f32 0.020833334, %v944_v53 }
 0x24f   : > { %v950_v55 = vadd.f32 1e-12, %v948_v54 }
 0x250   : > { %v947_v56 = vpop.xlane.xlu1 %946 }
 0x251   : > { %9818 = vrsqrt.f32 %v950_v55  ;;  %v949_v57 = vmul.f32 0.020833334, %v947_v56 }
 0x253   : > { %v951_v58 = vadd.f32 1e-12, %v949_v57 }
 0x255   : > { %9820 = vrsqrt.f32 %v951_v58 }
 0x25b   : > { %v9819_v59 = vpop.eup %9818 }
 0x25c   : > { %v954_v60 = vmul.f32 %v9819_v59, %v938_v38 }
 0x25e   : > { %v962_v0 = vmul.f32 %v8383_v61, %v954_v60 }
 0x25f   : > { %v9821_v62 = vpop.eup %9820 }
 0x260   : > { %v955_v63 = vmul.f32 %v9821_v62, %v939_v42  ;;  %v970_v3 = vadd.f32 %v8384_v1, %v962_v0 }
 0x262   : > { %v963_v2 = vmul.f32 %v8383_v61, %v955_v63 }
 0x264   : > { %v971_v4 = vadd.f32 %v8384_v1, %v963_v2 }
 0x266   : > { %v972_v5 = vpack.c.bf16 %v971_v4, %v970_v3 }
 0x268   : > { %8391 = vmatmul.mubr.msk.bf16.vlgmr.msra.gmra.mrb[0].mxu0 %vm928_vm1, %v972_v5 }
 0x33b   : > { %v1058_v12 = vpop.f32.mrb[0].mxu0 }
 0x33c   : > { %v10431_v13 = vadd.f32 %v1058_v12, %v984_v10  ;;  %v1060_v14 = vpop.f32.mrb[1].mxu0 }
 0x33d   : > { %v1062_v16 = vpop.f32.mrb[2].mxu0  ;;  %v1061_v21 = vadd.f32 %v1060_v14, %v988_v15 }
 0x33e   : > { %v10434_v17 = vadd.f32 %v1062_v16, %v984_v10  ;;  %v1064_v18 = vpop.f32.mrb[3].mxu0  ;;  %9143 = vmatprep.mubr.msk.f32.mxu1 %vm1075_vm2, %v10431_v13 }
 0x33f   : > { %v1065_v19 = vadd.f32 %v1064_v18, %v988_v15 }
 0x340   : > { %v10440_v20 = vpack.i.bf16 %v10434_v17, %v10431_v13 }
 0x341   : > { %v10443_v22 = vpack.c.bf16 %v1065_v19, %v1061_v21  ;;  %v10445_v23 = vpack.i.bf16 %v1065_v19, %v1061_v21 }
 0x342   : > { %9500 = vrot.lane.b32.xlu0 %v10440_v20, %s10131_s25  ;;  %s10137_s25 = smov 24  }
 0x346   : > { %9510 = vrot.lane.b32.xlu0 %v10440_v20, %s10132_s1  ;;  %s10138_s1 = smov 28  }
 0x34a   : > { %1271 = vrot.lane.b32.xlu0 %v10431_v13, %s10133_s21 }
 0x34e   : > { %9515 = vrot.lane.b32.xlu0 %v10440_v20, %s10134_s24  ;;  %s10139_s24 = smov 68  }
 0x352   : > { %1482 = vrot.lane.b32.xlu0 %v10431_v13, %s10135_s19 }
 0x3b4   : > { %v9501_v24 = vpop.permute.xlu0 %9500 }
 0x3b5   : > { %v9503_v25 = vunpack.i.h.bf16 %v9501_v24  ;;  %v9502_v26 = vunpack.i.l.bf16 %v9501_v24 }
 0x3b7   : > { %v9317_v28 = vpack.c.bf16 %v9503_v25, %v9502_v26 }
 0x3b8   : > { %v9511_v29 = vpop.permute.xlu0 %9510 }
 0x3b9   : > { %v9513_v30 = vunpack.i.h.bf16 %v9511_v29  ;;  %v9512_v31 = vunpack.i.l.bf16 %v9511_v29  ;;  %9319 = vmatprep.subr.msk.bf16.mxu1 %vm10455_vm3, %v9317_v28 }
 0x3ba   : > { %9322 = vmatpush3.bf16.xpose.msk.msra.mxu1 %vm10455_vm3, %v9317_v28 }
 0x3bb   : > { %v9327_v32 = vpack.c.bf16 %v9513_v30, %v9512_v31 }
 0x3bc   : > { %v1272_v33 = vpop.permute.xlu0 %1271 }
 0x3bd   : > { %9329 = vmatprep.subr.msk.bf16.mxu0 %vm10455_vm3, %v9327_v32  ;;  %9157 = vmatprep.mubr.msk.f32.mxu0 %vm1075_vm2, %v1272_v33 }
 0x3be   : > { %9332 = vmatpush3.bf16.xpose.msk.msra.mxu0 %vm10455_vm3, %v9327_v32 }
 0x3c0   : > { %v9516_v45 = vpop.permute.xlu0 %9515 }
 0x3c1   : > { %9144 = vmatmul.mubr.msk.f32.vlgmr.msra.gmra.mrb[0].mxu1 %vm1075_vm2, %v10434_v17  ;;  %v9518_v49 = vunpack.i.h.bf16 %v9516_v45  ;;  %v9517_v52 = vunpack.i.l.bf16 %v9516_v45 }
 0x3c3   : > { %v9337_v57 = vpack.c.bf16 %v9518_v49, %v9517_v52 }
 0x3c4   : > { %v1483_v4 = vpop.permute.xlu0 %1482 }
 0x494   : > { %v9145_v35 = vpop.f32.mrb[0].mxu1 }
 0x495   : > { %v1150_v37 = vpop.f32.mrb[1].mxu1  ;;  %v1156_v39 = vadd.f32 %v9145_v35, %v10478_v36 }
 0x496   : > { %v1151_v38 = vadd.f32 %v1150_v37, %v10473_v34 }
 0x497   : > { %v1163_v41 = vsel %vm1159_vm4, %v1156_v39, -inf }
 0x498   : > { %v1160_v40 = vsel %vm1159_vm4, %v1151_v38, -inf }
 0x499   : > { %1161 = vmax.xlane.f32.xlu1 %v1160_v40 }
 0x49d   : > { %1164 = vmax.xlane.f32.xlu1 %v1163_v41 }
 0x4ae   : > { %9505 = vrot.lane.b32.xlu1 %v10440_v20, %s12227_s18  ;;  %s10161_s18 = smov 84  }
 0x4b2   : > { %1273 = vrot.lane.b32.xlu1 %v10434_v17, %s10133_s21 }
 0x526   : > { %v1162_v42 = vpop.xlane.xlu1 %1161 }
 0x527   : > { %v1166_v43 = vsub.f32 %v1151_v38, %v1162_v42 }
 0x529   : > { %v1168_v47 = vmul.f32 1.442695, %v1166_v43 }
 0x52a   : > { %v1165_v44 = vpop.xlane.xlu1 %1164 }
 0x52b   : > { %v1167_v46 = vsub.f32 %v1156_v39, %v1165_v44 }
 0x52d   : > { %v1170_v48 = vmul.f32 1.442695, %v1167_v46 }
 0x52e   : > { %v9506_v51 = vpop.permute.xlu1 %9505 }
 0x52f   : > { %9822 = vpow2.f32 %v1170_v48  ;;  %v9508_v53 = vunpack.i.h.bf16 %v9506_v51  ;;  %v9507_v54 = vunpack.i.l.bf16 %v9506_v51 }
 0x530   : > { %9824 = vpow2.f32 %v1168_v47 }
 0x531   : > { %v9323_v55 = vpack.c.bf16 %v9508_v53, %v9507_v54 }
 0x532   : > { %v1274_v56 = vpop.permute.xlu1 %1273 }
 0x533   : > { %9324 = vmatprep.subr.bf16.mxu1 %v9323_v55  ;;  %9158 = vmatmul.mubr.msk.f32.vlgmr.msra.gmra.mrb[4].mxu0 %vm1075_vm2, %v1274_v56 }
 0x534   : > { %9326 = vmatpush3.bf16.msra.mxu1 %v9323_v55 }
 0x535   : > { %9339 = vmatprep.subr.msk.bf16.mxu1 %vm10455_vm3, %v9337_v57 }
 0x539   : > { %v9823_v58 = vpop.eup %9822 }
 0x53a   : > { %v1175_v59 = vsel %vm1159_vm4, %v9823_v58, 0.0  ;;  %v9825_v60 = vpop.eup %9824 }
 0x53b   : > { %1176 = vadd.xlane.f32.xlu1 %v1175_v59  ;;  %v1172_v61 = vsel %vm1159_vm4, %v9825_v60, 0.0 }
 0x53f   : > { %1173 = vadd.xlane.f32.xlu1 %v1172_v61 }
 0x550   : > { %1484 = vrot.lane.b32.xlu1 %v10434_v17, %s10135_s19 }
 0x5c8   : > { %v1177_v62 = vpop.xlane.xlu1 %1176 }
 0x5c9   : > { %9826 = vrcp.f32 %v1177_v62 }
 0x5cc   : > { %v1174_v63 = vpop.xlane.xlu1 %1173 }
 0x5cd   : > { %9828 = vrcp.f32 %v1174_v63 }
 0x5d0   : > { %v1485_v5 = vpop.permute.xlu1 %1484 }
 0x5d3   : > { %v9827_v0 = vpop.eup %9826 }
 0x5d4   : > { %v1181_v3 = vmul.f32 %v9827_v0, %v9823_v58 }
 0x5d7   : > { %v9829_v1 = vpop.eup %9828 }
 0x5d8   : > { %v1180_v2 = vmul.f32 %v9829_v1, %v9825_v60 }
 0x5da   : > { %9150 = vmatprep.mubr.msk.f32.mxu1 %vm1159_vm4, %v1180_v2 }
 0x5db   : > { %9151 = vmatmul.mubr.msk.f32.vlgmr.msra.gmra.mrb[2].mxu1 %vm1159_vm4, %v1181_v3 }
 0x5dc   : > { %9342 = vmatpush3.bf16.xpose.msk.msra.mxu1 %vm10455_vm3, %v9337_v57  ;;  %9171 = vmatprep.mubr.msk.f32.mxu1 %vm1075_vm2, %v1483_v4 }
 0x5e3   : > { %9172 = vmatmul.mubr.msk.f32.vlgmr.msra.gmra.mrb[4].mxu1 %vm1075_vm2, %v1485_v5 }
 0x606   : > { %v9159_v6 = vpop.f32.mrb[4].mxu0 }
 0x607   : > { %v1359_v9 = vadd.f32 %v9159_v6, %v10478_v36  ;;  %v1353_v10 = vpop.f32.mrb[5].mxu0 }
 0x608   : > { %v1354_v12 = vadd.f32 %v1353_v10, %v10473_v34 }
 0x609   : > { %v1365_v14 = vsel %vm1159_vm4, %v1359_v9, -inf }
 0x60a   : > { %1366 = vmax.xlane.f32.xlu1 %v1365_v14  ;;  %v1362_v15 = vsel %vm1159_vm4, %v1354_v12, -inf }
 0x60b   : > { %1363 = vmax.xlane.f32.xlu0 %v1362_v15 }
 0x697   : > { %v1367_v16 = vpop.xlane.xlu1 %1366 }
 0x698   : > { %v1369_v18 = vsub.f32 %v1359_v9, %v1367_v16  ;;  %v1364_v25 = vpop.xlane.xlu0 %1363 }
 0x699   : > { %v1368_v26 = vsub.f32 %v1354_v12, %v1364_v25 }
 0x69a   : > { %v1372_v19 = vmul.f32 1.442695, %v1369_v18 }
 0x69b   : > { %v1370_v30 = vmul.f32 1.442695, %v1368_v26 }
 0x69c   : > { %9830 = vpow2.f32 %v1372_v19 }
 0x69d   : > { %9832 = vpow2.f32 %v1370_v30 }
 0x6a6   : > { %v10505_v21 = vpop.eup %9830 }
 0x6a7   : > { %v1377_v24 = vsel %vm1159_vm4, %v10505_v21, 0.0  ;;  %v9833_v39 = vpop.eup %9832 }
 0x6a8   : > { %1378 = vadd.xlane.f32.xlu1 %v1377_v24  ;;  %v1374_v40 = vsel %vm1159_vm4, %v9833_v39, 0.0 }
 0x6ae   : > { %v9152_v28 = vpop.f32.mrb[2].mxu1 }
 0x6af   : > { %1270 = vst.msk [vmem:[#allocation3 + $0x8] sm:$0xff] %vm1075_vm2, %v9152_v28  ;;  %v1260_v29 = vpop.f32.mrb[3].mxu1 }
 0x6b0   : > { %1269 = vst.msk [vmem:[#allocation3] sm:$0xff] %vm1075_vm2, %v1260_v29 }
 0x6b6   : > { %v9173_v31 = vpop.f32.mrb[4].mxu1 }
 0x6b7   : > { %v1564_v32 = vpop.f32.mrb[5].mxu1  ;;  %v1570_v35 = vadd.f32 %v9173_v31, %v10478_v36 }
 0x6b8   : > { %v1565_v33 = vadd.f32 %v1564_v32, %v10473_v34 }
 0x6b9   : > { %v1576_v38 = vsel %vm1159_vm4, %v1570_v35, -inf }
 0x6ba   : > { %v1573_v37 = vsel %vm1159_vm4, %v1565_v33, -inf }
 0x6bb   : > { %1574 = vmax.xlane.f32.xlu0 %v1573_v37 }
 0x6bf   : > { %1577 = vmax.xlane.f32.xlu0 %v1576_v38 }
 0x6c3   : > { %1375 = vadd.xlane.f32.xlu0 %v1374_v40 }
 0x735   : > { %v1379_v55 = vpop.xlane.xlu1 %1378 }
 0x748   : > { %v1575_v41 = vpop.xlane.xlu0 %1574 }
 0x749   : > { %v1579_v42 = vsub.f32 %v1565_v33, %v1575_v41 }
 0x74b   : > { %v1581_v43 = vmul.f32 1.442695, %v1579_v42 }
 0x74c   : > { %v1578_v44 = vpop.xlane.xlu0 %1577 }
 0x74d   : > { %9834 = vpow2.f32 %v1581_v43  ;;  %v1580_v45 = vsub.f32 %v1570_v35, %v1578_v44 }
 0x74f   : > { %v1583_v46 = vmul.f32 1.442695, %v1580_v45 }
 0x750   : > { %v1376_v47 = vpop.xlane.xlu0 %1375 }
 0x751   : > { %9836 = vpow2.f32 %v1583_v46 }
 0x752   : > { %9838 = vrcp.f32 %v1376_v47 }
 0x753   : > { %9840 = vrcp.f32 %v1379_v55 }
 0x757   : > { %v9835_v48 = vpop.eup %9834 }
 0x758   : > { %v1585_v49 = vsel %vm1159_vm4, %v9835_v48, 0.0 }
 0x759   : > { %1586 = vadd.xlane.f32.xlu0 %v1585_v49 }
 0x75b   : > { %v9837_v51 = vpop.eup %9836 }
 0x75c   : > { %v9839_v52 = vpop.eup %9838  ;;  %v1588_v53 = vsel %vm1159_vm4, %v9837_v51, 0.0 }
 0x75d   : > { %1589 = vadd.xlane.f32.xlu1 %v1588_v53  ;;  %v1382_v54 = vmul.f32 %v9839_v52, %v9833_v39  ;;  %v9841_v62 = vpop.eup %9840 }
 0x75e   : > { %v1383_v4 = vmul.f32 %v9841_v62, %v10505_v21 }
 0x75f   : > { %9164 = vmatprep.mubr.msk.f32.mxu0 %vm1159_vm4, %v1382_v54 }
 0x76e   : > { %9525 = vrot.lane.b32.xlu1 %v10440_v20, %s10137_s25 }
 0x76f   : > { %9520 = vrot.lane.b32.xlu0 %v10440_v20, %s10138_s1 }
 0x772   : > { %9530 = vrot.lane.b32.xlu1 %v10440_v20, %s10139_s24  ;;  %s10144_s24 = smov 16  }
 0x773   : > { %1695 = vrot.lane.b32.xlu0 %v10434_v17, %s12222_s30 }
 0x776   : > { %1693 = vrot.lane.b32.xlu1 %v10431_v13, %s12222_s30  ;;  %s10157_s30 = smov 92  }
 0x7e6   : > { %v1587_v56 = vpop.xlane.xlu0 %1586 }
 0x7e7   : > { %9842 = vrcp.f32 %v1587_v56 }
 0x7ea   : > { %v1590_v57 = vpop.xlane.xlu1 %1589  ;;  %v9521_v58 = vpop.permute.xlu0 %9520 }
 0x7eb   : > { %9844 = vrcp.f32 %v1590_v57  ;;  %v9523_v59 = vunpack.i.h.bf16 %v9521_v58  ;;  %v9522_v60 = vunpack.i.l.bf16 %v9521_v58 }
 0x7ed   : > { %v9333_v61 = vpack.c.bf16 %v9523_v59, %v9522_v60 }
 0x7ee   : > { %v9526_v63 = vpop.permute.xlu1 %9525  ;;  %v1696_v18 = vpop.permute.xlu0 %1695 }
 0x7ef   : > { %v9528_v0 = vunpack.i.h.bf16 %v9526_v63  ;;  %v9527_v1 = vunpack.i.l.bf16 %v9526_v63  ;;  %9334 = vmatprep.subr.bf16.mxu0 %v9333_v61 }
 0x7f0   : > { %9336 = vmatpush3.bf16.msra.mxu0 %v9333_v61 }
 0x7f1   : > { %v9843_v2 = vpop.eup %9842  ;;  %v9343_v3 = vpack.c.bf16 %v9528_v0, %v9527_v1 }
 0x7f2   : > { %v9531_v5 = vpop.permute.xlu1 %9530  ;;  %v1593_v6 = vmul.f32 %v9843_v2, %v9835_v48 }
 0x7f3   : > { %v9533_v9 = vunpack.i.h.bf16 %v9531_v5  ;;  %v9532_v10 = vunpack.i.l.bf16 %v9531_v5  ;;  %9165 = vmatmul.mubr.msk.f32.vlgmr.msra.gmra.mrb[6].mxu0 %vm1159_vm4, %v1383_v4  ;;  %9344 = vmatprep.subr.bf16.mxu0 %v9343_v3 }
 0x7f4   : > { %9346 = vmatpush3.bf16.msra.mxu0 %v9343_v3  ;;  %9178 = vmatprep.mubr.msk.f32.mxu0 %vm1159_vm4, %v1593_v6 }
 0x7f5   : > { %v9845_v12 = vpop.eup %9844  ;;  %v9347_v14 = vpack.c.bf16 %v9533_v9, %v9532_v10 }
 0x7f6   : > { %v1594_v15 = vmul.f32 %v9845_v12, %v9837_v51  ;;  %v1694_v16 = vpop.permute.xlu1 %1693 }
 0x7f7   : > { %9349 = vmatprep.subr.msk.bf16.mxu0 %vm10455_vm3, %v9347_v14 }
 0x7f8   : > { %9179 = vmatmul.mubr.msk.f32.vlgmr.msra.gmra.mrb[8].mxu0 %vm1159_vm4, %v1594_v15 }
 0x7f9   : > { %9185 = vmatprep.mubr.msk.f32.mxu0 %vm1075_vm2, %v1694_v16 }
 0x7fd   : > { %9352 = vmatpush3.bf16.xpose.msk.msra.mxu0 %vm10455_vm3, %v9347_v14 }
 0x804   : > { %9186 = vmatmul.mubr.msk.f32.vlgmr.msra.gmra.mrb[10].mxu0 %vm1075_vm2, %v1696_v18 }
 0x8c6   : > { %v10538_v19 = vpop.f32.mrb[6].mxu0 }
 0x8c7   : > { %v10540_v21 = vpop.f32.mrb[7].mxu0 }
 0x8cb   : > { %v10542_v24 = vpop.f32.mrb[8].mxu0 }
 0x8cc   : > { %v10544_v25 = vpop.f32.mrb[9].mxu0 }
 0x8d7   : > { %v9187_v26 = vpop.f32.mrb[10].mxu0 }
 0x8d8   : > { %v1781_v28 = vadd.f32 %v9187_v26, %v10478_v36  ;;  %v1775_v29 = vpop.f32.mrb[11].mxu0 }
 0x8d9   : > { %v1776_v30 = vadd.f32 %v1775_v29, %v10473_v34 }
 0x8da   : > { %v1787_v31 = vsel %vm1159_vm4, %v1781_v28, -inf }
 0x8db   : > { %1788 = vmax.xlane.f32.xlu0 %v1787_v31  ;;  %v1784_v32 = vsel %vm1159_vm4, %v1776_v30, -inf }
 0x8dc   : > { %1785 = vmax.xlane.f32.xlu1 %v1784_v32 }
 0x8ed   : > { %9535 = vrot.lane.b32.xlu1 %v10440_v20, %s10141_s8 }
 0x8f1   : > { %1904 = vrot.lane.b32.xlu1 %v10431_v13, %s10142_s27 }
 0x8f5   : > { %1906 = vrot.lane.b32.xlu1 %v10434_v17, %s10142_s27  ;;  %s10145_s27 = smov 108  }
 0x968   : > { %v1789_v33 = vpop.xlane.xlu0 %1788 }
 0x969   : > { %v1791_v35 = vsub.f32 %v1781_v28, %v1789_v33  ;;  %v1786_v37 = vpop.xlane.xlu1 %1785 }
 0x96a   : > { %v1790_v38 = vsub.f32 %v1776_v30, %v1786_v37 }
 0x96b   : > { %v1794_v39 = vmul.f32 1.442695, %v1791_v35 }
 0x96c   : > { %v1792_v40 = vmul.f32 1.442695, %v1790_v38 }
 0x96d   : > { %9846 = vpow2.f32 %v1794_v39  ;;  %v9536_v41 = vpop.permute.xlu1 %9535 }
 0x96e   : > { %v9538_v42 = vunpack.i.h.bf16 %v9536_v41  ;;  %v9537_v43 = vunpack.i.l.bf16 %v9536_v41  ;;  %9848 = vpow2.f32 %v1792_v40 }
 0x970   : > { %v9353_v44 = vpack.c.bf16 %v9538_v42, %v9537_v43 }
 0x971   : > { %v1905_v60 = vpop.permute.xlu1 %1904 }
 0x972   : > { %9354 = vmatprep.subr.bf16.mxu1 %v9353_v44 }
 0x973   : > { %9356 = vmatpush3.bf16.msra.mxu1 %v9353_v44 }
 0x975   : > { %v1907_v61 = vpop.permute.xlu1 %1906 }
 0x977   : > { %v9847_v45 = vpop.eup %9846 }
 0x978   : > { %v1799_v46 = vsel %vm1159_vm4, %v9847_v45, 0.0  ;;  %v9849_v47 = vpop.eup %9848 }
 0x979   : > { %1800 = vadd.xlane.f32.xlu0 %v1799_v46  ;;  %v1796_v48 = vsel %vm1159_vm4, %v9849_v47, 0.0 }
 0x97d   : > { %1797 = vadd.xlane.f32.xlu0 %v1796_v48 }
 0x993   : > { %9540 = vrot.lane.b32.xlu0 %v10440_v20, %s10143_s17  ;;  %s10146_s17 = smov 60  }
 0xa06   : > { %v1801_v49 = vpop.xlane.xlu0 %1800 }
 0xa07   : > { %9850 = vrcp.f32 %v1801_v49 }
 0xa0a   : > { %v1798_v51 = vpop.xlane.xlu0 %1797 }
 0xa0b   : > { %9852 = vrcp.f32 %v1798_v51 }
 0xa0e   : > { %v9541_v52 = vpop.permute.xlu0 %9540 }
 0xa0f   : > { %v9543_v53 = vunpack.i.h.bf16 %v9541_v52  ;;  %v9542_v54 = vunpack.i.l.bf16 %v9541_v52 }
 0xa11   : > { %v9357_v55 = vpack.c.bf16 %v9543_v53, %v9542_v54  ;;  %v9851_v56 = vpop.eup %9850 }
 0xa12   : > { %v1805_v59 = vmul.f32 %v9851_v56, %v9847_v45 }
 0xa13   : > { %9359 = vmatprep.subr.msk.bf16.mxu1 %vm10455_vm3, %v9357_v55 }
 0xa15   : > { %v9853_v57 = vpop.eup %9852 }
 0xa16   : > { %v1804_v58 = vmul.f32 %v9853_v57, %v9849_v47 }
 0xa18   : > { %9192 = vmatprep.mubr.msk.f32.mxu1 %vm1159_vm4, %v1804_v58 }
 0xa19   : > { %9193 = vmatmul.mubr.msk.f32.vlgmr.msra.gmra.mrb[6].mxu1 %vm1159_vm4, %v1805_v59 }
 0xa1a   : > { %9362 = vmatpush3.bf16.xpose.msk.msra.mxu1 %vm10455_vm3, %v9357_v55  ;;  %9199 = vmatprep.mubr.msk.f32.mxu1 %vm1075_vm2, %v1905_v60 }
 0xa21   : > { %9200 = vmatmul.mubr.msk.f32.vlgmr.msra.gmra.mrb[8].mxu1 %vm1075_vm2, %v1907_v61 }
 0xaec   : > { %v10565_v62 = vpop.f32.mrb[6].mxu1 }
 0xaed   : > { %v10567_v63 = vpop.f32.mrb[7].mxu1 }
 0xaf4   : > { %v9201_v0 = vpop.f32.mrb[8].mxu1 }
 0xaf5   : > { %v1992_v1 = vadd.f32 %v9201_v0, %v10478_v36  ;;  %v1986_v2 = vpop.f32.mrb[9].mxu1 }
 0xaf6   : > { %v1987_v3 = vadd.f32 %v1986_v2, %v10473_v34 }
 0xaf7   : > { %v1998_v4 = vsel %vm1159_vm4, %v1992_v1, -inf }
 0xaf8   : > { %1999 = vmax.xlane.f32.xlu0 %v1998_v4  ;;  %v1995_v5 = vsel %vm1159_vm4, %v1987_v3, -inf }
 0xaf9   : > { %1996 = vmax.xlane.f32.xlu1 %v1995_v5 }
 0xb0a   : > { %9545 = vrot.lane.b32.xlu1 %v10440_v20, %s10144_s24 }
 0xb0e   : > { %2115 = vrot.lane.b32.xlu1 %v10431_v13, %s10145_s27 }
 0xb12   : > { %2117 = vrot.lane.b32.xlu1 %v10434_v17, %s10145_s27  ;;  %s10147_s27 = smov 12  }
 0xb85   : > { %v2000_v6 = vpop.xlane.xlu0 %1999 }
 0xb86   : > { %v2002_v9 = vsub.f32 %v1992_v1, %v2000_v6  ;;  %v1997_v10 = vpop.xlane.xlu1 %1996 }
 0xb87   : > { %v2001_v12 = vsub.f32 %v1987_v3, %v1997_v10 }
 0xb88   : > { %v2005_v14 = vmul.f32 1.442695, %v2002_v9 }
 0xb89   : > { %v2003_v15 = vmul.f32 1.442695, %v2001_v12 }
 0xb8a   : > { %9854 = vpow2.f32 %v2005_v14  ;;  %v9546_v16 = vpop.permute.xlu1 %9545 }
 0xb8b   : > { %v9548_v18 = vunpack.i.h.bf16 %v9546_v16  ;;  %v9547_v26 = vunpack.i.l.bf16 %v9546_v16  ;;  %9856 = vpow2.f32 %v2003_v15 }
 0xb8d   : > { %v9363_v28 = vpack.c.bf16 %v9548_v18, %v9547_v26 }
 0xb8e   : > { %v2116_v45 = vpop.permute.xlu1 %2115 }
 0xb8f   : > { %9364 = vmatprep.subr.bf16.mxu0 %v9363_v28 }
 0xb90   : > { %9366 = vmatpush3.bf16.msra.mxu0 %v9363_v28 }
 0xb92   : > { %v2118_v46 = vpop.permute.xlu1 %2117 }
 0xb94   : > { %v9855_v29 = vpop.eup %9854 }
 0xb95   : > { %v2010_v30 = vsel %vm1159_vm4, %v9855_v29, 0.0  ;;  %v9857_v31 = vpop.eup %9856 }
 0xb96   : > { %2011 = vadd.xlane.f32.xlu0 %v2010_v30  ;;  %v2007_v32 = vsel %vm1159_vm4, %v9857_v31, 0.0 }
 0xb9a   : > { %2008 = vadd.xlane.f32.xlu0 %v2007_v32 }
 0xbb0   : > { %9550 = vrot.lane.b32.xlu0 %v10440_v20, %s10146_s17  ;;  %s10148_s17 = smov 104  }
 0xc23   : > { %v2012_v33 = vpop.xlane.xlu0 %2011 }
 0xc24   : > { %9858 = vrcp.f32 %v2012_v33 }
 0xc27   : > { %v2009_v35 = vpop.xlane.xlu0 %2008 }
 0xc28   : > { %9860 = vrcp.f32 %v2009_v35 }
 0xc2b   : > { %v9551_v37 = vpop.permute.xlu0 %9550 }
 0xc2c   : > { %v9553_v38 = vunpack.i.h.bf16 %v9551_v37  ;;  %v9552_v39 = vunpack.i.l.bf16 %v9551_v37 }
 0xc2e   : > { %v9367_v40 = vpack.c.bf16 %v9553_v38, %v9552_v39  ;;  %v9859_v41 = vpop.eup %9858 }
 0xc2f   : > { %v2016_v44 = vmul.f32 %v9859_v41, %v9855_v29 }
 0xc30   : > { %9369 = vmatprep.subr.msk.bf16.mxu0 %vm10455_vm3, %v9367_v40 }
 0xc32   : > { %v9861_v42 = vpop.eup %9860 }
 0xc33   : > { %v2015_v43 = vmul.f32 %v9861_v42, %v9857_v31 }
 0xc35   : > { %9206 = vmatprep.mubr.msk.f32.mxu0 %vm1159_vm4, %v2015_v43 }
 0xc36   : > { %9207 = vmatmul.mubr.msk.f32.vlgmr.msra.gmra.mrb[12].mxu0 %vm1159_vm4, %v2016_v44 }
 0xc37   : > { %9372 = vmatpush3.bf16.xpose.msk.msra.mxu0 %vm10455_vm3, %v9367_v40  ;;  %9213 = vmatprep.mubr.msk.f32.mxu0 %vm1075_vm2, %v2116_v45 }
 0xc3e   : > { %9214 = vmatmul.mubr.msk.f32.vlgmr.msra.gmra.mrb[14].mxu0 %vm1075_vm2, %v2118_v46 }
 0xd09   : > { %v10588_v47 = vpop.f32.mrb[12].mxu0 }
 0xd0a   : > { %v10590_v48 = vpop.f32.mrb[13].mxu0 }
 0xd11   : > { %v9215_v49 = vpop.f32.mrb[14].mxu0 }
 0xd12   : > { %v2203_v51 = vadd.f32 %v9215_v49, %v10478_v36  ;;  %v2197_v52 = vpop.f32.mrb[15].mxu0 }
 0xd13   : > { %v2198_v53 = vadd.f32 %v2197_v52, %v10473_v34 }
 0xd14   : > { %v2209_v54 = vsel %vm1159_vm4, %v2203_v51, -inf }
 0xd15   : > { %2210 = vmax.xlane.f32.xlu0 %v2209_v54  ;;  %v2206_v55 = vsel %vm1159_vm4, %v2198_v53, -inf }
 0xd16   : > { %2207 = vmax.xlane.f32.xlu1 %v2206_v55 }
 0xd27   : > { %9555 = vrot.lane.b32.xlu1 %v10440_v20, %s10147_s27 }
 0xd2b   : > { %2326 = vrot.lane.b32.xlu1 %v10431_v13, %s10148_s17 }
 0xd2f   : > { %2328 = vrot.lane.b32.xlu1 %v10434_v17, %s10148_s17  ;;  %s10149_s17 = smov 56  }
 0xda2   : > { %v2211_v56 = vpop.xlane.xlu0 %2210 }
 0xda3   : > { %v2213_v57 = vsub.f32 %v2203_v51, %v2211_v56  ;;  %v2208_v58 = vpop.xlane.xlu1 %2207 }
 0xda4   : > { %v2212_v59 = vsub.f32 %v2198_v53, %v2208_v58 }
 0xda5   : > { %v2216_v60 = vmul.f32 1.442695, %v2213_v57 }
 0xda6   : > { %v2214_v61 = vmul.f32 1.442695, %v2212_v59 }
 0xda7   : > { %9862 = vpow2.f32 %v2216_v60  ;;  %v9556_v0 = vpop.permute.xlu1 %9555 }
 0xda8   : > { %v9558_v1 = vunpack.i.h.bf16 %v9556_v0  ;;  %v9557_v2 = vunpack.i.l.bf16 %v9556_v0  ;;  %9864 = vpow2.f32 %v2214_v61 }
 0xdaa   : > { %v9373_v3 = vpack.c.bf16 %v9558_v1, %v9557_v2 }
 0xdab   : > { %v2327_v31 = vpop.permute.xlu1 %2326 }
 0xdac   : > { %9374 = vmatprep.subr.bf16.mxu1 %v9373_v3 }
 0xdad   : > { %9376 = vmatpush3.bf16.msra.mxu1 %v9373_v3 }
 0xdaf   : > { %v2329_v32 = vpop.permute.xlu1 %2328 }
 0xdb1   : > { %v9863_v4 = vpop.eup %9862 }
 0xdb2   : > { %v2221_v5 = vsel %vm1159_vm4, %v9863_v4, 0.0  ;;  %v9865_v6 = vpop.eup %9864 }
 0xdb3   : > { %2222 = vadd.xlane.f32.xlu0 %v2221_v5  ;;  %v2218_v9 = vsel %vm1159_vm4, %v9865_v6, 0.0 }
 0xdb7   : > { %2219 = vadd.xlane.f32.xlu0 %v2218_v9 }
 0xdcd   : > { %9560 = vrot.lane.b32.xlu0 %v10440_v20, %s10149_s17  ;;  %s10150_s17 = smov 8  }
 0xe40   : > { %v2223_v10 = vpop.xlane.xlu0 %2222 }
 0xe41   : > { %9866 = vrcp.f32 %v2223_v10 }
 0xe44   : > { %v2220_v12 = vpop.xlane.xlu0 %2219 }
 0xe45   : > { %9868 = vrcp.f32 %v2220_v12 }
 0xe48   : > { %v9561_v14 = vpop.permute.xlu0 %9560 }
 0xe49   : > { %v9563_v15 = vunpack.i.h.bf16 %v9561_v14  ;;  %v9562_v16 = vunpack.i.l.bf16 %v9561_v14 }
 0xe4b   : > { %v9377_v18 = vpack.c.bf16 %v9563_v15, %v9562_v16  ;;  %v9867_v26 = vpop.eup %9866 }
 0xe4c   : > { %v2227_v30 = vmul.f32 %v9867_v26, %v9863_v4 }
 0xe4d   : > { %9379 = vmatprep.subr.msk.bf16.mxu1 %vm10455_vm3, %v9377_v18 }
 0xe4f   : > { %v9869_v28 = vpop.eup %9868 }
 0xe50   : > { %v2226_v29 = vmul.f32 %v9869_v28, %v9865_v6 }
 0xe52   : > { %9220 = vmatprep.mubr.msk.f32.mxu1 %vm1159_vm4, %v2226_v29 }
 0xe53   : > { %9221 = vmatmul.mubr.msk.f32.vlgmr.msra.gmra.mrb[10].mxu1 %vm1159_vm4, %v2227_v30 }
 0xe54   : > { %9382 = vmatpush3.bf16.xpose.msk.msra.mxu1 %vm10455_vm3, %v9377_v18  ;;  %9227 = vmatprep.mubr.msk.f32.mxu1 %vm1075_vm2, %v2327_v31 }
 0xe5b   : > { %9228 = vmatmul.mubr.msk.f32.vlgmr.msra.gmra.mrb[12].mxu1 %vm1075_vm2, %v2329_v32 }
 0xf26   : > { %v10611_v33 = vpop.f32.mrb[10].mxu1 }
 0xf27   : > { %v10613_v35 = vpop.f32.mrb[11].mxu1 }
 0xf2e   : > { %v9229_v37 = vpop.f32.mrb[12].mxu1 }
 0xf2f   : > { %v2414_v38 = vadd.f32 %v9229_v37, %v10478_v36  ;;  %v2408_v39 = vpop.f32.mrb[13].mxu1 }
 0xf30   : > { %v2409_v40 = vadd.f32 %v2408_v39, %v10473_v34 }
 0xf31   : > { %v2420_v41 = vsel %vm1159_vm4, %v2414_v38, -inf }
 0xf32   : > { %2421 = vmax.xlane.f32.xlu0 %v2420_v41  ;;  %v2417_v42 = vsel %vm1159_vm4, %v2409_v40, -inf }
 0xf33   : > { %2418 = vmax.xlane.f32.xlu1 %v2417_v42 }
 0xf44   : > { %9565 = vrot.lane.b32.xlu1 %v10440_v20, %s10150_s17 }
 0xf48   : > { %2537 = vrot.lane.b32.xlu1 %v10431_v13, %s10151_s3 }
 0xf4c   : > { %2539 = vrot.lane.b32.xlu1 %v10434_v17, %s10151_s3  ;;  %s10152_s3 = smov 52  }
 0xfbf   : > { %v2422_v43 = vpop.xlane.xlu0 %2421 }
 0xfc0   : > { %v2424_v44 = vsub.f32 %v2414_v38, %v2422_v43  ;;  %v2419_v45 = vpop.xlane.xlu1 %2418 }
 0xfc1   : > { %v2423_v46 = vsub.f32 %v2409_v40, %v2419_v45 }
 0xfc2   : > { %v2427_v49 = vmul.f32 1.442695, %v2424_v44 }
 0xfc3   : > { %v2425_v51 = vmul.f32 1.442695, %v2423_v46 }
 0xfc4   : > { %9870 = vpow2.f32 %v2427_v49  ;;  %v9566_v52 = vpop.permute.xlu1 %9565 }
 0xfc5   : > { %v9568_v53 = vunpack.i.h.bf16 %v9566_v52  ;;  %v9567_v54 = vunpack.i.l.bf16 %v9566_v52  ;;  %9872 = vpow2.f32 %v2425_v51 }
 0xfc7   : > { %v9383_v55 = vpack.c.bf16 %v9568_v53, %v9567_v54 }
 0xfc8   : > { %v2538_v10 = vpop.permute.xlu1 %2537 }
 0xfc9   : > { %9384 = vmatprep.subr.bf16.mxu0 %v9383_v55 }
 0xfca   : > { %9386 = vmatpush3.bf16.msra.mxu0 %v9383_v55 }
 0xfcc   : > { %v2540_v12 = vpop.permute.xlu1 %2539 }
 0xfce   : > { %v9871_v56 = vpop.eup %9870 }
 0xfcf   : > { %v2432_v57 = vsel %vm1159_vm4, %v9871_v56, 0.0  ;;  %v9873_v58 = vpop.eup %9872 }
 0xfd0   : > { %2433 = vadd.xlane.f32.xlu0 %v2432_v57  ;;  %v2429_v59 = vsel %vm1159_vm4, %v9873_v58, 0.0 }
 0xfd4   : > { %2430 = vadd.xlane.f32.xlu0 %v2429_v59 }
 0xfea   : > { %9570 = vrot.lane.b32.xlu0 %v10440_v20, %s10152_s3  ;;  %s10153_s3 = smov 4  }
0x105d   : > { %v2434_v60 = vpop.xlane.xlu0 %2433 }
0x105e   : > { %9874 = vrcp.f32 %v2434_v60 }
0x1061   : > { %v2431_v61 = vpop.xlane.xlu0 %2430 }
0x1062   : > { %9876 = vrcp.f32 %v2431_v61 }
0x1065   : > { %v9571_v0 = vpop.permute.xlu0 %9570 }
0x1066   : > { %v9573_v1 = vunpack.i.h.bf16 %v9571_v0  ;;  %v9572_v2 = vunpack.i.l.bf16 %v9571_v0 }
0x1068   : > { %v9387_v3 = vpack.c.bf16 %v9573_v1, %v9572_v2  ;;  %v9875_v4 = vpop.eup %9874 }
0x1069   : > { %v2438_v9 = vmul.f32 %v9875_v4, %v9871_v56 }
0x106a   : > { %9389 = vmatprep.subr.msk.bf16.mxu0 %vm10455_vm3, %v9387_v3 }
0x106c   : > { %v9877_v5 = vpop.eup %9876 }
0x106d   : > { %v2437_v6 = vmul.f32 %v9877_v5, %v9873_v58 }
0x106f   : > { %9234 = vmatprep.mubr.msk.f32.mxu0 %vm1159_vm4, %v2437_v6 }
0x1070   : > { %9235 = vmatmul.mubr.msk.f32.vlgmr.msra.gmra.mrb[16].mxu0 %vm1159_vm4, %v2438_v9 }
0x1071   : > { %9392 = vmatpush3.bf16.xpose.msk.msra.mxu0 %vm10455_vm3, %v9387_v3  ;;  %9241 = vmatprep.mubr.msk.f32.mxu0 %vm1075_vm2, %v2538_v10 }
0x1072   : > { %9404 = vmatprep.subr.bf16.mxu0 %v10443_v22 }
0x1078   : > { %9242 = vmatmul.mubr.msk.f32.vlgmr.msra.gmra.mrb[18].mxu0 %vm1075_vm2, %v2540_v12 }
0x1079   : > { %9406 = vmatpush3.bf16.msra.mxu0 %v10443_v22 }
0x1143   : > { %v10636_v14 = vpop.f32.mrb[16].mxu0 }
0x1144   : > { %v10638_v15 = vpop.f32.mrb[17].mxu0 }
0x114b   : > { %v9243_v16 = vpop.f32.mrb[18].mxu0 }
0x114c   : > { %v2625_v18 = vadd.f32 %v9243_v16, %v10478_v36  ;;  %v2619_v26 = vpop.f32.mrb[19].mxu0 }
0x114d   : > { %v2620_v28 = vadd.f32 %v2619_v26, %v10473_v34 }
0x114e   : > { %v2631_v29 = vsel %vm1159_vm4, %v2625_v18, -inf }
0x114f   : > { %2632 = vmax.xlane.f32.xlu0 %v2631_v29  ;;  %v2628_v30 = vsel %vm1159_vm4, %v2620_v28, -inf }
0x1150   : > { %2629 = vmax.xlane.f32.xlu1 %v2628_v30 }
0x1161   : > { %9575 = vrot.lane.b32.xlu1 %v10440_v20, %s10153_s3 }
0x1165   : > { %2748 = vrot.lane.b32.xlu1 %v10431_v13, %s10154_s7 }
0x1169   : > { %2750 = vrot.lane.b32.xlu1 %v10434_v17, %s10154_s7  ;;  %s10155_s7 = smov 48  }
0x11dc   : > { %v2633_v22 = vpop.xlane.xlu0 %2632 }
0x11dd   : > { %v2635_v31 = vsub.f32 %v2625_v18, %v2633_v22  ;;  %v2630_v32 = vpop.xlane.xlu1 %2629 }
0x11de   : > { %v2634_v37 = vsub.f32 %v2620_v28, %v2630_v32 }
0x11df   : > { %v2638_v38 = vmul.f32 1.442695, %v2635_v31 }
0x11e0   : > { %v2636_v39 = vmul.f32 1.442695, %v2634_v37 }
0x11e1   : > { %9878 = vpow2.f32 %v2638_v38  ;;  %v9576_v40 = vpop.permute.xlu1 %9575 }
0x11e2   : > { %v9578_v41 = vunpack.i.h.bf16 %v9576_v40  ;;  %v9577_v42 = vunpack.i.l.bf16 %v9576_v40  ;;  %9880 = vpow2.f32 %v2636_v39 }
0x11e4   : > { %v9393_v43 = vpack.c.bf16 %v9578_v41, %v9577_v42 }
0x11e5   : > { %v2749_v61 = vpop.permute.xlu1 %2748 }
0x11e6   : > { %9394 = vmatprep.subr.bf16.mxu1 %v9393_v43 }
0x11e7   : > { %9396 = vmatpush3.bf16.msra.mxu1 %v9393_v43 }
0x11e9   : > { %v2751_v0 = vpop.permute.xlu1 %2750 }
0x11eb   : > { %v9879_v44 = vpop.eup %9878 }
0x11ec   : > { %v2643_v45 = vsel %vm1159_vm4, %v9879_v44, 0.0  ;;  %v9881_v46 = vpop.eup %9880 }
0x11ed   : > { %2644 = vadd.xlane.f32.xlu0 %v2643_v45  ;;  %v2640_v49 = vsel %vm1159_vm4, %v9881_v46, 0.0 }
0x11f1   : > { %2641 = vadd.xlane.f32.xlu0 %v2640_v49 }
0x1207   : > { %9580 = vrot.lane.b32.xlu0 %v10440_v20, %s10155_s7  ;;  %s12223_s7 = smov 44  }
0x127a   : > { %v2645_v51 = vpop.xlane.xlu0 %2644 }
0x127b   : > { %9882 = vrcp.f32 %v2645_v51 }
0x127e   : > { %v2642_v52 = vpop.xlane.xlu0 %2641 }
0x127f   : > { %9884 = vrcp.f32 %v2642_v52 }
0x1282   : > { %v9581_v53 = vpop.permute.xlu0 %9580 }
0x1283   : > { %v9583_v54 = vunpack.i.h.bf16 %v9581_v53  ;;  %v9582_v55 = vunpack.i.l.bf16 %v9581_v53 }
0x1285   : > { %v9397_v56 = vpack.c.bf16 %v9583_v54, %v9582_v55  ;;  %v9883_v57 = vpop.eup %9882 }
0x1286   : > { %v2649_v60 = vmul.f32 %v9883_v57, %v9879_v44 }
0x1287   : > { %9399 = vmatprep.subr.msk.bf16.mxu1 %vm10455_vm3, %v9397_v56 }
0x1289   : > { %v9885_v58 = vpop.eup %9884 }
0x128a   : > { %v2648_v59 = vmul.f32 %v9885_v58, %v9881_v46 }
0x128c   : > { %9248 = vmatprep.mubr.msk.f32.mxu1 %vm1159_vm4, %v2648_v59 }
0x128d   : > { %9249 = vmatmul.mubr.msk.f32.vlgmr.msra.gmra.mrb[14].mxu1 %vm1159_vm4, %v2649_v60 }
0x128e   : > { %9402 = vmatpush3.bf16.xpose.msk.msra.mxu1 %vm10455_vm3, %v9397_v56  ;;  %9255 = vmatprep.mubr.msk.f32.mxu1 %vm1075_vm2, %v2749_v61  ;;  %v10689_v56 = vld [vmem:[%s12266_s2] sm:$0xff] }
0x1295   : > { %9256 = vmatmul.mubr.msk.f32.vlgmr.msra.gmra.mrb[16].mxu1 %vm1075_vm2, %v2751_v0 }
0x1360   : > { %v10659_v1 = vpop.f32.mrb[14].mxu1 }
0x1361   : > { %v10661_v2 = vpop.f32.mrb[15].mxu1 }
0x1368   : > { %v9257_v3 = vpop.f32.mrb[16].mxu1 }
0x1369   : > { %v2836_v4 = vadd.f32 %v9257_v3, %v10478_v36  ;;  %v2830_v5 = vpop.f32.mrb[17].mxu1 }
0x136a   : > { %v2831_v6 = vadd.f32 %v2830_v5, %v10473_v34 }
0x136b   : > { %v2842_v9 = vsel %vm1159_vm4, %v2836_v4, -inf }
0x136c   : > { %2843 = vmax.xlane.f32.xlu0 %v2842_v9  ;;  %v2839_v10 = vsel %vm1159_vm4, %v2831_v6, -inf }
0x136d   : > { %2840 = vmax.xlane.f32.xlu1 %v2839_v10 }
0x137e   : > { %9585 = vrot.lane.b32.xlu1 %v10440_v20, %s12223_s7  ;;  %s12225_s7 = smov 40  }
0x1382   : > { %2955 = vrot.lane.b32.xlu1 %v10434_v17, %s10157_s30 }
0x13f9   : > { %v2844_v12 = vpop.xlane.xlu0 %2843 }
0x13fa   : > { %v2846_v16 = vsub.f32 %v2836_v4, %v2844_v12  ;;  %v2841_v18 = vpop.xlane.xlu1 %2840 }
0x13fb   : > { %v2845_v26 = vsub.f32 %v2831_v6, %v2841_v18 }
0x13fc   : > { %v2849_v28 = vmul.f32 1.442695, %v2846_v16 }
0x13fd   : > { %v2847_v29 = vmul.f32 1.442695, %v2845_v26 }
0x13fe   : > { %v9586_v34 = vpop.permute.xlu1 %9585 }
0x13ff   : > { %9886 = vpow2.f32 %v2847_v29  ;;  %v9588_v30 = vunpack.i.h.bf16 %v9586_v34  ;;  %v9587_v22 = vunpack.i.l.bf16 %v9586_v34 }
0x1400   : > { %9888 = vpow2.f32 %v2849_v28 }
0x1401   : > { %v9407_v31 = vpack.c.bf16 %v9588_v30, %v9587_v22 }
0x1402   : > { %v2956_v49 = vpop.permute.xlu1 %2955 }
0x1403   : > { %9409 = vmatprep.subr.msk.bf16.mxu0 %vm10455_vm3, %v9407_v31 }
0x1409   : > { %v9887_v32 = vpop.eup %9886 }
0x140a   : > { %v2851_v37 = vsel %vm1159_vm4, %v9887_v32, 0.0  ;;  %v9889_v38 = vpop.eup %9888 }
0x140b   : > { %2852 = vadd.xlane.f32.xlu0 %v2851_v37  ;;  %v2854_v39 = vsel %vm1159_vm4, %v9889_v38, 0.0 }
0x140f   : > { %2855 = vadd.xlane.f32.xlu0 %v2854_v39 }
0x1425   : > { %2953 = vrot.lane.b32.xlu0 %v10431_v13, %s10157_s30  ;;  %s10159_s30 = smov 88  }
0x1498   : > { %v2853_v40 = vpop.xlane.xlu0 %2852 }
0x1499   : > { %9890 = vrcp.f32 %v2853_v40 }
0x149c   : > { %v2856_v41 = vpop.xlane.xlu0 %2855 }
0x149d   : > { %9892 = vrcp.f32 %v2856_v41 }
0x14a0   : > { %v2954_v46 = vpop.permute.xlu0 %2953 }
0x14a3   : > { %v9891_v42 = vpop.eup %9890 }
0x14a4   : > { %v2859_v43 = vmul.f32 %v9891_v42, %v9887_v32 }
0x14a6   : > { %9262 = vmatprep.mubr.msk.f32.mxu0 %vm1159_vm4, %v2859_v43 }
0x14a7   : > { %v9893_v44 = vpop.eup %9892 }
0x14a8   : > { %v2860_v45 = vmul.f32 %v9893_v44, %v9889_v38 }
0x14aa   : > { %9263 = vmatmul.mubr.msk.f32.vlgmr.msra.gmra.mrb[20].mxu0 %vm1159_vm4, %v2860_v45  ;;  %v10115_v45 = vld [vmem:[%s12266_s2 + $0x8] sm:$0xff] }
0x14ab   : > { %9412 = vmatpush3.bf16.xpose.msk.msra.mxu0 %vm10455_vm3, %v9407_v31  ;;  %9269 = vmatprep.mubr.msk.f32.mxu0 %vm1075_vm2, %v2954_v46 }
0x14b2   : > { %9270 = vmatmul.mubr.msk.f32.vlgmr.msra.gmra.mrb[22].mxu0 %vm1075_vm2, %v2956_v49 }
0x157d   : > { %v10681_v51 = vpop.f32.mrb[20].mxu0 }
0x157e   : > { %v10683_v52 = vpop.f32.mrb[21].mxu0 }
0x1585   : > { %v9271_v53 = vpop.f32.mrb[22].mxu0 }
0x1586   : > { %v3041_v54 = vadd.f32 %v9271_v53, %v10478_v36  ;;  %v3035_v55 = vpop.f32.mrb[23].mxu0 }
0x1587   : > { %v3036_v57 = vadd.f32 %v10689_v56, %v3035_v55 }
0x1588   : > { %v3047_v58 = vsel %vm1159_vm4, %v3041_v54, -inf }
0x1589   : > { %3048 = vmax.xlane.f32.xlu0 %v3047_v58  ;;  %v3044_v59 = vsel %vm1159_vm4, %v3036_v57, -inf }
0x158a   : > { %3045 = vmax.xlane.f32.xlu1 %v3044_v59 }
0x1616   : > { %v3049_v60 = vpop.xlane.xlu0 %3048 }
0x1617   : > { %v3051_v61 = vsub.f32 %v3041_v54, %v3049_v60  ;;  %v3046_v0 = vpop.xlane.xlu1 %3045 }
0x1618   : > { %v3050_v3 = vsub.f32 %v3036_v57, %v3046_v0 }
0x1619   : > { %v3054_v4 = vmul.f32 1.442695, %v3051_v61 }
0x161a   : > { %v3052_v36 = vmul.f32 1.442695, %v3050_v3 }
0x161b   : > { %9894 = vpow2.f32 %v3054_v4 }
0x161c   : > { %9896 = vpow2.f32 %v3052_v36 }
0x1625   : > { %v9895_v5 = vpop.eup %9894 }
0x1626   : > { %v9897_v6 = vpop.eup %9896  ;;  %v3059_v9 = vsel %vm1159_vm4, %v9895_v5, 0.0 }
0x1627   : > { %3060 = vadd.xlane.f32.xlu1 %v3059_v9  ;;  %v3056_v10 = vsel %vm1159_vm4, %v9897_v6, 0.0 }
0x1628   : > { %3057 = vadd.xlane.f32.xlu0 %v3056_v10 }
0x1638   : > { %9595 = vrot.lane.b32.xlu1 %v10440_v20, %s12225_s7  ;;  %s10160_s7 = smov 36  }
0x163c   : > { %3166 = vrot.lane.b32.xlu1 %v10431_v13, %s10159_s30 }
0x163e   : > { %9590 = vrot.lane.b32.xlu0 %v10445_v23, %s10133_s21 }
0x1640   : > { %3168 = vrot.lane.b32.xlu1 %v10434_v17, %s10159_s30  ;;  %s12275_s30 = scalar_lea.vmem %s12208_s11, %s10271_s29 }
0x16b4   : > { %v3061_v12 = vpop.xlane.xlu1 %3060 }
0x16b5   : > { %9898 = vrcp.f32 %v3061_v12  ;;  %v3058_v16 = vpop.xlane.xlu0 %3057 }
0x16b6   : > { %9900 = vrcp.f32 %v3058_v16 }
0x16b8   : > { %v9596_v18 = vpop.permute.xlu1 %9595 }
0x16b9   : > { %v9591_v26 = vpop.permute.xlu0 %9590  ;;  %v9598_v28 = vunpack.i.h.bf16 %v9596_v18  ;;  %v9597_v29 = vunpack.i.l.bf16 %v9596_v18 }
0x16ba   : > { %v9593_v34 = vunpack.i.h.bf16 %v9591_v26  ;;  %v9592_v30 = vunpack.i.l.bf16 %v9591_v26 }
0x16bb   : > { %v9417_v31 = vpack.c.bf16 %v9598_v28, %v9597_v29 }
0x16bc   : > { %v9413_v22 = vpack.c.bf16 %v9593_v34, %v9592_v30  ;;  %v3167_v40 = vpop.permute.xlu1 %3166 }
0x16be   : > { %9414 = vmatprep.subr.bf16.mxu1 %v9413_v22 }
0x16bf   : > { %v9899_v32 = vpop.eup %9898  ;;  %9416 = vmatpush3.bf16.msra.mxu1 %v9413_v22 }
0x16c0   : > { %v9901_v37 = vpop.eup %9900  ;;  %9419 = vmatprep.subr.msk.bf16.mxu1 %vm10455_vm3, %v9417_v31  ;;  %v3065_v39 = vmul.f32 %v9899_v32, %v9895_v5  ;;  %v3169_v41 = vpop.permute.xlu1 %3168 }
0x16c1   : > { %v3064_v38 = vmul.f32 %v9901_v37, %v9897_v6 }
0x16c3   : > { %9276 = vmatprep.mubr.msk.f32.mxu1 %vm1159_vm4, %v3064_v38 }
0x16c4   : > { %9277 = vmatmul.mubr.msk.f32.vlgmr.msra.gmra.mrb[18].mxu1 %vm1159_vm4, %v3065_v39 }
0x16c5   : > { %9283 = vmatprep.mubr.msk.f32.mxu1 %vm1075_vm2, %v3167_v40 }
0x16c8   : > { %9422 = vmatpush3.bf16.xpose.msk.msra.mxu1 %vm10455_vm3, %v9417_v31 }
0x16cf   : > { %9284 = vmatmul.mubr.msk.f32.vlgmr.msra.gmra.mrb[20].mxu1 %vm1075_vm2, %v3169_v41 }
0x1797   : > { %v10710_v42 = vpop.f32.mrb[18].mxu1 }
0x1798   : > { %v10712_v43 = vpop.f32.mrb[19].mxu1 }
0x17a2   : > { %v9285_v44 = vpop.f32.mrb[20].mxu1 }
0x17a3   : > { %v3254_v46 = vadd.f32 %v10115_v45, %v9285_v44  ;;  %v3248_v49 = vpop.f32.mrb[21].mxu1 }
0x17a4   : > { %v3249_v53 = vadd.f32 %v10689_v56, %v3248_v49 }
0x17a5   : > { %v3260_v54 = vsel %vm1159_vm4, %v3254_v46, -inf }
0x17a6   : > { %3261 = vmax.xlane.f32.xlu1 %v3260_v54  ;;  %v3257_v55 = vsel %vm1159_vm4, %v3249_v53, -inf }
0x17a7   : > { %3258 = vmax.xlane.f32.xlu0 %v3257_v55 }
0x17b7   : > { %9605 = vrot.lane.b32.xlu1 %v10440_v20, %s10160_s7 }
0x17bb   : > { %3377 = vrot.lane.b32.xlu1 %v10431_v13, %s10161_s18 }
0x17bf   : > { %3379 = vrot.lane.b32.xlu1 %v10434_v17, %s10161_s18  ;;  %s12268_s18 = smov 40  }
0x1833   : > { %v3262_v57 = vpop.xlane.xlu1 %3261 }
0x1834   : > { %v3264_v58 = vsub.f32 %v3254_v46, %v3262_v57  ;;  %v3259_v59 = vpop.xlane.xlu0 %3258 }
0x1835   : > { %v3263_v60 = vsub.f32 %v3249_v53, %v3259_v59 }
0x1836   : > { %v3267_v61 = vmul.f32 1.442695, %v3264_v58 }
0x1837   : > { %v3265_v0 = vmul.f32 1.442695, %v3263_v60  ;;  %v9606_v5 = vpop.permute.xlu1 %9605 }
0x1838   : > { %9902 = vpow2.f32 %v3267_v61  ;;  %v9608_v9 = vunpack.i.h.bf16 %v9606_v5  ;;  %v9607_v10 = vunpack.i.l.bf16 %v9606_v5 }
0x1839   : > { %9904 = vpow2.f32 %v3265_v0 }
0x183a   : > { %v9427_v26 = vpack.c.bf16 %v9608_v9, %v9607_v10  ;;  %v10162_v9 = vmov 0.0   ;;  %v9623_v10 = vld [vmem:[%s10301_s20] sm:$0xff]  }
0x183b   : > { %v3378_v22 = vpop.permute.xlu1 %3377 }
0x183f   : > { %v3380_v31 = vpop.permute.xlu1 %3379 }
0x1842   : > { %v9903_v3 = vpop.eup %9902 }
0x1843   : > { %v3272_v4 = vsel %vm1159_vm4, %v9903_v3, 0.0  ;;  %v9905_v36 = vpop.eup %9904 }
0x1844   : > { %3273 = vadd.xlane.f32.xlu0 %v3272_v4  ;;  %v3269_v20 = vsel %vm1159_vm4, %v9905_v36, 0.0 }
0x1848   : > { %3270 = vadd.xlane.f32.xlu0 %v3269_v20 }
0x185e   : > { %9600 = vrot.lane.b32.xlu0 %v10445_v23, %s10135_s19  ;;  %s12267_s19 = smov 32  }
0x18d1   : > { %v3274_v13 = vpop.xlane.xlu0 %3273 }
0x18d2   : > { %9906 = vrcp.f32 %v3274_v13 }
0x18d5   : > { %v3271_v17 = vpop.xlane.xlu0 %3270 }
0x18d6   : > { %9908 = vrcp.f32 %v3271_v17 }
0x18d9   : > { %v9601_v6 = vpop.permute.xlu0 %9600 }
0x18da   : > { %v9603_v12 = vunpack.i.h.bf16 %v9601_v6  ;;  %v9602_v16 = vunpack.i.l.bf16 %v9601_v6 }
0x18dc   : > { %v9423_v18 = vpack.c.bf16 %v9603_v12, %v9602_v16  ;;  %v9907_v28 = vpop.eup %9906  ;;  %v9624_v12 = vld [vmem:[%s10301_s20 + $0x8] sm:$0xff]   ;;  %v9625_v16 = vld [vmem:[%s10301_s20 + $0x10] sm:$0xff]  }
0x18dd   : > { %v3278_v30 = vmul.f32 %v9907_v28, %v9903_v3 }
0x18de   : > { %9424 = vmatprep.subr.bf16.mxu0 %v9423_v18 }
0x18df   : > { %9426 = vmatpush3.bf16.msra.mxu0 %v9423_v18 }
0x18e0   : > { %v9909_v29 = vpop.eup %9908  ;;  %9429 = vmatprep.subr.msk.bf16.mxu0 %vm10455_vm3, %v9427_v26 }
0x18e1   : > { %v3277_v34 = vmul.f32 %v9909_v29, %v9905_v36 }
0x18e3   : > { %9290 = vmatprep.mubr.msk.f32.mxu0 %vm1159_vm4, %v3277_v34 }
0x18e4   : > { %9291 = vmatmul.mubr.msk.f32.vlgmr.msra.gmra.mrb[24].mxu0 %vm1159_vm4, %v3278_v30 }
0x18e5   : > { %9297 = vmatprep.mubr.msk.f32.mxu0 %vm1075_vm2, %v3378_v22 }
0x18e8   : > { %9432 = vmatpush3.bf16.xpose.msk.msra.mxu0 %vm10455_vm3, %v9427_v26 }
0x18ef   : > { %9298 = vmatmul.mubr.msk.f32.vlgmr.msra.gmra.mrb[26].mxu0 %vm1075_vm2, %v3380_v31 }
0x18f0   : > { %3842 = vmatprep.mubr.bf16.mxu0 %v12229_v50 }
0x19b7   : > { %v10737_v32 = vpop.f32.mrb[24].mxu0 }
0x19b8   : > { %v3357_v37 = vpop.f32.mrb[25].mxu0 }
0x19c2   : > { %v9299_v38 = vpop.f32.mrb[26].mxu0 }
0x19c3   : > { %v3465_v39 = vadd.f32 %v10115_v45, %v9299_v38  ;;  %v3459_v40 = vpop.f32.mrb[27].mxu0 }
0x19c4   : > { %v3460_v41 = vadd.f32 %v10689_v56, %v3459_v40  ;;  %v10116_v40 = vld [vmem:[#allocation2] sm:$0xff] }
0x19c5   : > { %v3471_v44 = vsel %vm1159_vm4, %v3465_v39, -inf }
0x19c6   : > { %3472 = vmax.xlane.f32.xlu1 %v3471_v44  ;;  %v3468_v46 = vsel %vm1159_vm4, %v3460_v41, -inf }
0x19c7   : > { %3469 = vmax.xlane.f32.xlu0 %v3468_v46 }
0x19d7   : > { %1473 = vrot.lane.b32.xlu1 %v10540_v21, %s10153_s3 }
0x19db   : > { %1475 = vrot.lane.b32.xlu1 %v10538_v19, %s10153_s3  ;;  %s12269_s3 = smov 116  }
0x19df   : > { %1684 = vrot.lane.b32.xlu1 %v10544_v25, %s10150_s17 }
0x19e3   : > { %1895 = vrot.lane.b32.xlu1 %v10567_v63, %s10147_s27 }
0x19e7   : > { %2106 = vrot.lane.b32.xlu1 %v10590_v48, %s10144_s24 }
0x19eb   : > { %2317 = vrot.lane.b32.xlu1 %v10613_v35, %s10141_s8 }
0x19ef   : > { %2528 = vrot.lane.b32.xlu1 %v10638_v15, %s10137_s25 }
0x19f3   : > { %2739 = vrot.lane.b32.xlu1 %v10661_v2, %s10138_s1 }
0x19f7   : > { %2944 = vrot.lane.b32.xlu1 %v10683_v52, %s12267_s19 }
0x19fb   : > { %3157 = vrot.lane.b32.xlu1 %v10712_v43, %s10160_s7 }
0x19ff   : > { %3368 = vrot.lane.b32.xlu1 %v3357_v37, %s12268_s18 }
0x1a53   : > { %v3473_v27 = vpop.xlane.xlu1 %3472 }
0x1a54   : > { %v3475_v19 = vsub.f32 %v3465_v39, %v3473_v27  ;;  %v3470_v21 = vpop.xlane.xlu0 %3469  ;;  %v10117_v27 = vld [vmem:[#allocation2 + $0x8] sm:$0xff] }
0x1a55   : > { %v3474_v25 = vsub.f32 %v3460_v41, %v3470_v21 }
0x1a56   : > { %v3478_v63 = vmul.f32 1.442695, %v3475_v19 }
0x1a57   : > { %v3476_v48 = vmul.f32 1.442695, %v3474_v25  ;;  %v1474_v35 = vpop.permute.xlu1 %1473 }
0x1a58   : > { %9910 = vpow2.f32 %v3478_v63  ;;  %1480 = vst.msk [vmem:[#allocation3] sm:$0xff] %vm1479_vm5, %v1474_v35 }
0x1a59   : > { %9912 = vpow2.f32 %v3476_v48 }
0x1a5b   : > { %v1476_v15 = vpop.permute.xlu1 %1475 }
0x1a5c   : > { %1481 = vst.msk [vmem:[#allocation3 + $0x8] sm:$0xff] %vm1479_vm5, %v1476_v15 }
0x1a5f   : > { %v1685_v2 = vpop.permute.xlu1 %1684 }
0x1a60   : > { %1691 = vst.msk [vmem:[#allocation3] sm:$0xff] %vm1690_vm6, %v1685_v2 }
0x1a62   : > { %v9911_v52 = vpop.eup %9910 }
0x1a63   : > { %v1896_v56 = vpop.permute.xlu1 %1895  ;;  %v3483_v43 = vsel %vm1159_vm4, %v9911_v52, 0.0  ;;  %v9913_v45 = vpop.eup %9912 }
0x1a64   : > { %1902 = vst.msk [vmem:[#allocation3] sm:$0xff] %vm1901_vm7, %v1896_v56  ;;  %3484 = vadd.xlane.f32.xlu0 %v3483_v43  ;;  %v3480_v53 = vsel %vm1159_vm4, %v9913_v45, 0.0 }
0x1a67   : > { %v2107_v49 = vpop.permute.xlu1 %2106 }
0x1a68   : > { %2113 = vst.msk [vmem:[#allocation3] sm:$0xff] %vm2112_vm8, %v2107_v49  ;;  %3481 = vadd.xlane.f32.xlu0 %v3480_v53  ;;  %v3713_v53 = vld [vmem:[%s10321_s16] sm:$0xff] }
0x1a6b   : > { %v2318_v54 = vpop.permute.xlu1 %2317 }
0x1a6c   : > { %2324 = vst.msk [vmem:[#allocation3] sm:$0xff] %vm2323_vm9, %v2318_v54  ;;  %v3715_v54 = vld [vmem:[%s10321_s16 + $0x60] sm:$0xff] }
0x1a6f   : > { %v2529_v55 = vpop.permute.xlu1 %2528 }
0x1a70   : > { %2535 = vst.msk [vmem:[#allocation3] sm:$0xff] %vm2534_vm10, %v2529_v55  ;;  %v3714_v55 = vld [vmem:[%s10321_s16 + $0x8] sm:$0xff] }
0x1a73   : > { %v2740_v57 = vpop.permute.xlu1 %2739 }
0x1a74   : > { %2746 = vst.msk [vmem:[#allocation3] sm:$0xff] %vm2745_vm11, %v2740_v57  ;;  %v8472_v57 = vcombine.high %v3713_v53, %v3715_v54 }
0x1a76   : > { %3810 = vmatprep.subr.bf16.mxu0 %v8472_v57 }
0x1a77   : > { %v2945_v58 = vpop.permute.xlu1 %2944 }
0x1a78   : > { %2951 = vst.msk [vmem:[#allocation3] sm:$0xff] %vm2950_vm12, %v2945_v58  ;;  %v3716_v58 = vld [vmem:[%s10321_s16 + $0x68] sm:$0xff] }
0x1a7b   : > { %v3158_v59 = vpop.permute.xlu1 %3157 }
0x1a7c   : > { %3164 = vst.msk [vmem:[#allocation3] sm:$0xff] %vm3163_vm13, %v3158_v59  ;;  %v8471_v59 = vcombine.low %v3713_v53, %v3715_v54  ;;  %v4189_v53 = vld [vmem:[%s10321_s16 + $0x198] sm:$0xff] }
0x1a7e   : > { %9610 = vrot.lane.b32.xlu0 %v10445_v23, %s12269_s3  ;;  %3811 = vmatpush1.bf16.msra.mxu0 %v8471_v59 }
0x1a7f   : > { %v3369_v60 = vpop.permute.xlu1 %3368 }
0x1a80   : > { %3375 = vst.msk [vmem:[#allocation3] sm:$0xff] %vm3374_vm14, %v3369_v60  ;;  %v8473_v60 = vcombine.low %v3714_v55, %v3716_v58 }
0x1a82   : > { %1686 = vrot.lane.b32.xlu0 %v10542_v24, %s10150_s17  ;;  %s12274_s17 = scalar_lea.vmem %s12207_s10, %s10271_s29 }
0x1a86   : > { %1897 = vrot.lane.b32.xlu0 %v10565_v62, %s10147_s27 }
0x1a8a   : > { %2108 = vrot.lane.b32.xlu0 %v10588_v47, %s10144_s24 }
0x1a8e   : > { %2319 = vrot.lane.b32.xlu0 %v10611_v33, %s10141_s8  ;;  %s12271_s8 = scalar_lea.vmem %s12206_s9, %s10271_s29 }
0x1a8f   : > { %v8464_v31 = vld [vmem:[%s12271_s8] ss:$0 sm:$0xff]  ;;  %s12294_s8 = sld [smem:[#allocation23_spill]] (!%p8748_p5) }
0x1a92   : > { %2530 = vrot.lane.b32.xlu0 %v10636_v14, %s10137_s25  ;;  %s12270_s25 = smov 44  }
0x1a96   : > { %2741 = vrot.lane.b32.xlu0 %v10659_v1, %s10138_s1 }
0x1a9a   : > { %2946 = vrot.lane.b32.xlu0 %v10681_v51, %s12267_s19  ;;  %s12292_s19 = sld [smem:[#allocation21_spill]] (!%p8748_p5) }
0x1a9e   : > { %3159 = vrot.lane.b32.xlu0 %v10710_v42, %s10160_s7 }
0x1aa2   : > { %3370 = vrot.lane.b32.xlu0 %v10737_v32, %s12268_s18 }
0x1af1   : > { %v3485_v23 = vpop.xlane.xlu0 %3484 }
0x1af2   : > { %9914 = vrcp.f32 %v3485_v23  ;;  %v8474_v23 = vcombine.high %v3714_v55, %v3716_v58 }
0x1af5   : > { %v3482_v24 = vpop.xlane.xlu0 %3481 }
0x1af6   : > { %9916 = vrcp.f32 %v3482_v24  ;;  %v3717_v24 = vld [vmem:[%s10321_s16 + $0xc0] sm:$0xff] }
0x1af9   : > { %v9611_v62 = vpop.permute.xlu0 %9610 }
0x1afa   : > { %v9613_v47 = vunpack.i.h.bf16 %v9611_v62  ;;  %v9612_v33 = vunpack.i.l.bf16 %v9611_v62  ;;  %v3719_v62 = vld [vmem:[%s10321_s16 + $0x120] sm:$0xff] }
0x1afc   : > { %v9433_v14 = vpack.c.bf16 %v9613_v47, %v9612_v33  ;;  %v9915_v1 = vpop.eup %9914  ;;  %v3718_v47 = vld [vmem:[%s10321_s16 + $0xc8] sm:$0xff]  ;;  %v8476_v33 = vcombine.high %v3717_v24, %v3719_v62 }
0x1afd   : > { %v1687_v61 = vpop.permute.xlu0 %1686  ;;  %v3489_v3 = vmul.f32 %v9915_v1, %v9911_v52 }
0x1afe   : > { %1692 = vst.msk [vmem:[#allocation3 + $0x8] sm:$0xff] %vm1690_vm6, %v1687_v61  ;;  %9434 = vmatprep.subr.bf16.mxu1 %v9433_v14  ;;  %v8475_v61 = vcombine.low %v3717_v24, %v3719_v62  ;;  %3812 = vmatprep.subr.bf16.mxu0 %v8476_v33  ;;  %v9627_v24 = vld [vmem:[%s10330_s23 + $0x1c0] sm:$0xff]   ;;  %v9630_v33 = vld [vmem:[%s10330_s23 + $0x148] sm:$0xff]  }
0x1aff   : > { %9436 = vmatpush3.bf16.msra.mxu1 %v9433_v14  ;;  %v3720_v14 = vld [vmem:[%s10321_s16 + $0x128] sm:$0xff]  ;;  %v9628_v62 = vld [vmem:[%s10330_s23 + $0x100] sm:$0xff]  }
0x1b00   : > { %v9917_v51 = vpop.eup %9916  ;;  %9307 = vmatprep.subr.bf16.mxu1 %v10162_v9  ;;  %v8477_v1 = vcombine.low %v3718_v47, %v3720_v14  ;;  %3813 = vmatpush1.bf16.msra.mxu0 %v8475_v61  ;;  %v9632_v61 = vld [vmem:[%s10330_s23 + $0x108] sm:$0xff]  }
0x1b01   : > { %v1898_v0 = vpop.permute.xlu0 %1897  ;;  %v3488_v42 = vmul.f32 %v9917_v51, %v9913_v45  ;;  %v8478_v51 = vcombine.high %v3718_v47, %v3720_v14  ;;  %v9629_v47 = vld [vmem:[%s10330_s23 + $0x180] sm:$0xff]   ;;  %v9631_v14 = vld [vmem:[%s10330_s23 + $0x1c8] sm:$0xff]  }
0x1b02   : > { %1903 = vst.msk [vmem:[#allocation3 + $0x8] sm:$0xff] %vm1901_vm7, %v1898_v0  ;;  %v3721_v0 = vld [vmem:[%s10321_s16 + $0x180] sm:$0xff] }
0x1b03   : > { %9304 = vmatprep.mubr.msk.f32.mxu1 %vm1159_vm4, %v3488_v42  ;;  %v3723_v42 = vld [vmem:[%s10321_s16 + $0x1e0] sm:$0xff] }
0x1b04   : > { %9305 = vmatmul.mubr.msk.f32.vlgmr.msra.gmra.mrb[22].mxu1 %vm1159_vm4, %v3489_v3  ;;  %v3722_v3 = vld [vmem:[%s10321_s16 + $0x188] sm:$0xff] }
0x1b05   : > { %v2109_v4 = vpop.permute.xlu0 %2108  ;;  %9308 = vmatpush3.bf16.msra.mxu1 %v9623_v10  ;;  %9313 = vmatprep.mubr.msk.bf16.mxu1 %vm10163_vm15, %v10162_v9 }
0x1b06   : > { %2114 = vst.msk [vmem:[#allocation3 + $0x8] sm:$0xff] %vm2112_vm8, %v2109_v4  ;;  %9309 = vmatprep.subr.bf16.mxu1 %v10162_v9  ;;  %v8480_v4 = vcombine.high %v3721_v0, %v3723_v42 }
0x1b08   : > { %3814 = vmatprep.subr.bf16.mxu0 %v8480_v4  ;;  %v9638_v4 = vld [vmem:[%s10330_s23 + $0x158] sm:$0xff]  }
0x1b09   : > { %v2320_v36 = vpop.permute.xlu0 %2319  ;;  %9310 = vmatpush3.bf16.msra.mxu1 %v9624_v12  ;;  %v4183_v12 = vld [vmem:[%s10321_s16 + $0x78] sm:$0xff] }
0x1b0a   : > { %2325 = vst.msk [vmem:[#allocation3 + $0x8] sm:$0xff] %vm2323_vm9, %v2320_v36  ;;  %9311 = vmatprep.subr.bf16.mxu1 %v10162_v9  ;;  %v3724_v36 = vld [vmem:[%s10321_s16 + $0x1e8] sm:$0xff]  ;;  %v4181_v9 = vld [vmem:[%s10321_s16 + $0x18] sm:$0xff] }
0x1b0d   : > { %v2531_v20 = vpop.permute.xlu0 %2530  ;;  %9312 = vmatpush3.bf16.msra.mxu1 %v9625_v16 }
0x1b0e   : > { %2536 = vst.msk [vmem:[#allocation3 + $0x8] sm:$0xff] %vm2534_vm10, %v2531_v20  ;;  %3853 = vmatprep.subr.bf16.mxu1 %v8474_v23  ;;  %v8479_v20 = vcombine.low %v3721_v0, %v3723_v42  ;;  %v9626_v23 = vld [vmem:[%s10330_s23 + $0x140] sm:$0xff]   ;;  %v9635_v0 = vld [vmem:[%s10330_s23 + $0x1d0] sm:$0xff]  }
0x1b0f   : > { %v9636_v42 = vld [vmem:[%s10330_s23 + $0x110] sm:$0xff]  }
0x1b10   : > { %3815 = vmatpush1.bf16.msra.mxu0 %v8479_v20  ;;  %v9640_v20 = vld [vmem:[%s10330_s23 + $0x118] sm:$0xff]  }
0x1b11   : > { %v2742_v13 = vpop.permute.xlu0 %2741 }
0x1b12   : > { %2747 = vst.msk [vmem:[#allocation3 + $0x8] sm:$0xff] %vm2745_vm11, %v2742_v13  ;;  %v8481_v13 = vcombine.low %v3722_v3, %v3724_v36 }
0x1b15   : > { %v2947_v17 = vpop.permute.xlu0 %2946 }
0x1b16   : > { %2952 = vst.msk [vmem:[#allocation3 + $0x8] sm:$0xff] %vm2950_vm12, %v2947_v17  ;;  %v8482_v17 = vcombine.high %v3722_v3, %v3724_v36  ;;  %v9637_v3 = vld [vmem:[%s10330_s23 + $0x190] sm:$0xff]   ;;  %v9639_v36 = vld [vmem:[%s10330_s23 + $0x1d8] sm:$0xff]  }
0x1b19   : > { %v3160_v5 = vpop.permute.xlu0 %3159 }
0x1b1a   : > { %3165 = vst.msk [vmem:[#allocation3 + $0x8] sm:$0xff] %vm3163_vm13, %v3160_v5  ;;  %v4180_v5 = vld [vmem:[%s10321_s16 + $0x10] sm:$0xff] }
0x1b1d   : > { %v3371_v6 = vpop.permute.xlu0 %3370 }
0x1b1e   : > { %3376 = vst.msk [vmem:[#allocation3 + $0x8] sm:$0xff] %vm3374_vm14, %v3371_v6  ;;  %v4182_v6 = vld [vmem:[%s10321_s16 + $0x70] sm:$0xff] }
0x1b1f   : > { %v8486_v10 = vcombine.high %v4180_v5, %v4182_v6  ;;  %v8485_v16 = vcombine.low %v4180_v5, %v4182_v6  ;;  %v9643_v5 = vld [vmem:[%s10330_s23 + $0x1e0] sm:$0xff]  }
0x1b20   : > { %v9644_v6 = vld [vmem:[%s10330_s23 + $0x120] sm:$0xff]  }
0x1b21   : > { %4274 = vmatprep.subr.bf16.mxu0 %v8486_v10  ;;  %v9646_v10 = vld [vmem:[%s10330_s23 + $0x168] sm:$0xff]  }
0x1bd7   : > { %v9306_v18 = vpop.f32.mrb[22].mxu1 }
0x1bd8   : > { %3581 = vrot.lane.b32.xlu0 %v9306_v18, %s12270_s25  ;;  %v3568_v26 = vpop.f32.mrb[23].mxu1  ;;  %v8487_v18 = vcombine.low %v4181_v9, %v4183_v12 }
0x1bd9   : > { %3579 = vrot.lane.b32.xlu1 %v3568_v26, %s12270_s25  ;;  %v8488_v26 = vcombine.high %v4181_v9, %v4183_v12  ;;  %v9645_v9 = vld [vmem:[%s10330_s23 + $0x1a0] sm:$0xff]   ;;  %v9647_v12 = vld [vmem:[%s10330_s23 + $0x1e8] sm:$0xff]   ;;  %s12293_s25 = sld [smem:[#allocation22_spill]] (!%p8748_p5) }
0x1c4a   : > { %v3582_v28 = vpop.permute.xlu0 %3581 }
0x1c4b   : > { %3587 = vst.msk [vmem:[#allocation3 + $0x8] sm:$0xff] %vm3585_vm0, %v3582_v28  ;;  %v3580_v29 = vpop.permute.xlu1 %3579 }
0x1c4c   : > { %3586 = vst.msk [vmem:[#allocation3] sm:$0xff] %vm3585_vm0, %v3580_v29 }
0x1c52   : > { %v3589_v34 = vld [vmem:[#allocation3 + $0x8] sm:$0xff] }
0x1c53   : > { %v3588_v30 = vld [vmem:[#allocation3] sm:$0xff] }
0x1c54   : > { %v3590_v22 = vpack.c.bf16 %v3589_v34, %v3588_v30 }
0x1c56   : > { %9314 = vmatmul.mubr.msk.bf16.vlgmr.msra.gmra.mrb[24].mxu1 %vm928_vm1, %v3590_v22 }
0x1c57   : > { %3885 = vmatprep.mubr.bf16.mxu1 %v12229_v50  ;;  %3854 = vmatpush1.bf16.msra.mxu1 %v8473_v60 }
0x1c58   : > { %3855 = vmatprep.subr.bf16.mxu1 %v8478_v51  ;;  %v9634_v51 = vld [vmem:[%s10330_s23 + $0x150] sm:$0xff]  }
0x1c5b   : > { %3856 = vmatpush1.bf16.msra.mxu1 %v8477_v1  ;;  %v9633_v1 = vld [vmem:[%s10330_s23 + $0x188] sm:$0xff]  }
0x1c5c   : > { %3857 = vmatprep.subr.bf16.mxu1 %v8482_v17  ;;  %v9642_v17 = vld [vmem:[%s10330_s23 + $0x160] sm:$0xff]  }
0x1c5f   : > { %3858 = vmatpush1.bf16.msra.mxu1 %v8481_v13  ;;  %v9641_v13 = vld [vmem:[%s10330_s23 + $0x198] sm:$0xff]  }
0x1c60   : > { %4317 = vmatprep.subr.bf16.mxu1 %v8488_v26  ;;  %v10910_v26 = vsub.s32 2, %v10421_v7 }
0x1c62   : > { %12277 = vst [vmem:[#allocation10_spill] sm:$0xff] %v10910_v26 }
0x1d29   : > { %v3659_v32 = vpop.f32.mrb[24].mxu1 }
0x1d2a   : > { %v3660_v37 = vadd.f32 %v8464_v31, %v3659_v32  ;;  %v9315_v38 = vpop.f32.mrb[25].mxu1 }
0x1d2b   : > { %v3662_v39 = vpop.f32.mrb[26].mxu1  ;;  %v8469_v38 = vld [vmem:[%s12274_s17] ss:$0 sm:$0xff] }
0x1d2c   : > { %v10817_v41 = vadd.f32 %v10116_v40, %v3660_v37  ;;  %v3663_v44 = vadd.f32 %v8464_v31, %v3662_v39  ;;  %v9316_v46 = vpop.f32.mrb[27].mxu1 }
0x1d2d   : > { %v8470_v46 = vld [vmem:[%s12275_s30] ss:$0 sm:$0xff] }
0x1d2e   : > { %12272 = vst [vmem:[#allocation7_spill] sm:$0xff] %v10817_v41  ;;  %v10819_v19 = vadd.f32 %v10117_v27, %v3663_v44  ;;  %v3670_v21 = vsel %vm928_vm1, %v10817_v41, 0.0 }
0x1d2f   : > { %3671 = vadd.xlane.f32.xlu1 %v3670_v21  ;;  %v4184_v21 = vld [vmem:[%s10321_s16 + $0xd0] sm:$0xff] }
0x1d30   : > { %12273 = vst [vmem:[#allocation8_spill] sm:$0xff] %v10819_v19  ;;  %v3673_v25 = vsel %vm928_vm1, %v10819_v19, 0.0 }
0x1d31   : > { %3674 = vadd.xlane.f32.xlu0 %v3673_v25  ;;  %v4186_v25 = vld [vmem:[%s10321_s16 + $0x130] sm:$0xff] }
0x1d32   : > { %v8489_v54 = vcombine.low %v4184_v21, %v4186_v25 }
0x1dbc   : > { %v3672_v63 = vpop.xlane.xlu1 %3671 }
0x1dbd   : > { %v3676_v48 = vmul.f32 0.020833334, %v3672_v63  ;;  %v4185_v63 = vld [vmem:[%s10321_s16 + $0xd8] sm:$0xff] }
0x1dbe   : > { %v3675_v35 = vpop.xlane.xlu0 %3674 }
0x1dbf   : > { %v10826_v15 = vsub.f32 %v10817_v41, %v3676_v48  ;;  %v3677_v2 = vmul.f32 0.020833334, %v3675_v35  ;;  %v4187_v48 = vld [vmem:[%s10321_s16 + $0x138] sm:$0xff] }
0x1dc0   : > { %v8491_v55 = vcombine.low %v4185_v63, %v4187_v48 }
0x1dc1   : > { %v10829_v52 = vsub.f32 %v10819_v19, %v3677_v2  ;;  %v3680_v56 = vmul.f32 %v10826_v15, %v10826_v15 }
0x1dc3   : > { %v3682_v43 = vsel %vm928_vm1, %v3680_v56, 0.0  ;;  %v3681_v45 = vmul.f32 %v10829_v52, %v10829_v52  ;;  %v8490_v56 = vcombine.high %v4184_v21, %v4186_v25 }
0x1dc4   : > { %3683 = vadd.xlane.f32.xlu0 %v3682_v43  ;;  %v8492_v43 = vcombine.high %v4185_v63, %v4187_v48 }
0x1dc5   : > { %v3685_v49 = vsel %vm928_vm1, %v3681_v45, 0.0  ;;  %v4188_v45 = vld [vmem:[%s10321_s16 + $0x190] sm:$0xff] }
0x1dc8   : > { %3686 = vadd.xlane.f32.xlu0 %v3685_v49  ;;  %v4190_v49 = vld [vmem:[%s10321_s16 + $0x1f0] sm:$0xff] }
0x1dc9   : > { %v8494_v57 = vcombine.high %v4188_v45, %v4190_v49  ;;  %v8493_v59 = vcombine.low %v4188_v45, %v4190_v49 }
0x1e51   : > { %v3684_v28 = vpop.xlane.xlu0 %3683 }
0x1e52   : > { %v3688_v29 = vmul.f32 0.020833334, %v3684_v28  ;;  %v9650_v28 = vld [vmem:[%s10330_s23 + $0x170] sm:$0xff]  }
0x1e54   : > { %v3690_v34 = vadd.f32 1e-12, %v3688_v29  ;;  %v9651_v29 = vld [vmem:[%s10330_s23 + $0x1f0] sm:$0xff]  }
0x1e55   : > { %v3687_v30 = vpop.xlane.xlu0 %3686 }
0x1e56   : > { %9918 = vrsqrt.f32 %v3690_v34  ;;  %v3689_v22 = vmul.f32 0.020833334, %v3687_v30  ;;  %v3725_v34 = vld [vmem:[%s10315_s6] sm:$0xf]  ;;  %v10916_v30 = vsub.s32 3, %v10421_v7  ;;  %v9656_v7 = vld [vmem:[%s10330_s23 + $0x138] sm:$0xff]  }
0x1e58   : > { %v3691_v31 = vadd.f32 1e-12, %v3689_v22  ;;  %v9652_v22 = vld [vmem:[%s10330_s23 + $0x130] sm:$0xff]  }
0x1e5a   : > { %9920 = vrsqrt.f32 %v3691_v31  ;;  %v9653_v31 = vld [vmem:[%s10330_s23 + $0x1b0] sm:$0xff]  }
0x1e60   : > { %v9919_v32 = vpop.eup %9918 }
0x1e61   : > { %v3694_v37 = vmul.f32 %v9919_v32, %v10826_v15  ;;  %v3730_v32 = vrot.slane %v3725_v34, %v10424_v8 }
0x1e63   : > { %v3702_v40 = vmul.f32 %v8469_v38, %v3694_v37  ;;  %v3738_v37 = vrot.slane %v3725_v34, %v10910_v26 }
0x1e64   : > { %v9921_v39 = vpop.eup %9920 }
0x1e65   : > { %v3695_v44 = vmul.f32 %v9921_v39, %v10829_v52  ;;  %v3710_v35 = vadd.f32 %v8470_v46, %v3702_v40  ;;  %v4191_v52 = vld [vmem:[%s10321_s16 + $0x1f8] sm:$0xff]  ;;  %v3734_v40 = vrot.slane %v3725_v34, %v10429_v11 }
0x1e66   : > { %v8496_v58 = vcombine.high %v4189_v53, %v4191_v52  ;;  %v8495_v60 = vcombine.low %v4189_v53, %v4191_v52  ;;  %v9655_v39 = vld [vmem:[%s10330_s23 + $0x1f8] sm:$0xff]  }
0x1e67   : > { %v3703_v27 = vmul.f32 %v8469_v38, %v3695_v44  ;;  %v9654_v38 = vld [vmem:[%s10330_s23 + $0x178] sm:$0xff]   ;;  %v3742_v44 = vrot.slane %v3725_v34, %v10916_v30 }
0x1e69   : > { %v3711_v15 = vadd.f32 %v8470_v46, %v3703_v27  ;;  %v9657_v46 = vld [vmem:[%s10330_s23 + $0x1b8] sm:$0xff]  }
0x1e6b   : > { %v10869_v2 = vpack.c.bf16 %v3711_v15, %v3710_v35  ;;  %v9658_v15 = vld [vmem:[%s10330_s23 + $0x40] sm:$0xff]  }
0x1e6d   : > { %12276 = vst [vmem:[#allocation9_spill] sm:$0xff] %v10869_v2  ;;  %8483 = vmatmul.mubr.msk.bf16.vlgmr.msra.gmra.mrb[28].mxu0 %vm928_vm1, %v10869_v2  ;;  %8484 = vmatmul.mubr.msk.bf16.vlgmr.msra.gmra.mrb[28].mxu1 %vm928_vm1, %v10869_v2 }
0x1e6e   : > { %4275 = vmatpush1.bf16.msra.mxu0 %v8485_v16  ;;  %4318 = vmatpush1.bf16.msra.mxu1 %v8487_v18  ;;  %v9648_v16 = vld [vmem:[%s10330_s23 + $0x128] sm:$0xff]  }
0x1e6f   : > { %4276 = vmatprep.subr.bf16.mxu0 %v8490_v56  ;;  %4319 = vmatprep.subr.bf16.mxu1 %v8492_v43  ;;  %v9649_v18 = vld [vmem:[%s10330_s23 + $0x1a8] sm:$0xff]   ;;  %v9659_v56 = vld [vmem:[%s10330_s23 + $0xc0] sm:$0xff]  }
0x1e70   : > { %4306 = vmatprep.mubr.bf16.mxu0 %v12229_v50  ;;  %4349 = vmatprep.mubr.bf16.mxu1 %v12229_v50 }
0x1e72   : > { %4277 = vmatpush1.bf16.msra.mxu0 %v8489_v54  ;;  %4320 = vmatpush1.bf16.msra.mxu1 %v8491_v55 }
0x1e73   : > { %4278 = vmatprep.subr.bf16.mxu0 %v8494_v57  ;;  %4321 = vmatprep.subr.bf16.mxu1 %v8496_v58 }
0x1e76   : > { %4279 = vmatpush1.bf16.msra.mxu0 %v8493_v59  ;;  %4322 = vmatpush1.bf16.msra.mxu1 %v8495_v60 }
0x1e77   : > { %8875 = vmatprep.subr.bf16.mxu0 %v9626_v23  ;;  %8897 = vmatprep.subr.bf16.mxu1 %v9627_v24 }
0x1e79   : > { %8497 = vmatmul.mubr.msk.bf16.vlgmr.msra.gmra.mrb[32].mxu0 %vm928_vm1, %v10869_v2  ;;  %8498 = vmatmul.mubr.msk.bf16.vlgmr.msra.gmra.mrb[32].mxu1 %vm928_vm1, %v10869_v2 }
0x1e7a   : > { %8876 = vmatpush3.bf16.msra.mxu0 %v9628_v62  ;;  %8898 = vmatpush3.bf16.msra.mxu1 %v9629_v47 }
0x1e7b   : > { %8877 = vmatprep.subr.bf16.mxu0 %v9630_v33  ;;  %8899 = vmatprep.subr.bf16.mxu1 %v9631_v14 }
0x1e7e   : > { %8878 = vmatpush3.bf16.msra.mxu0 %v9632_v61  ;;  %8900 = vmatpush3.bf16.msra.mxu1 %v9633_v1 }
0x1e7f   : > { %8879 = vmatprep.subr.bf16.mxu0 %v9634_v51  ;;  %8901 = vmatprep.subr.bf16.mxu1 %v9635_v0 }
0x1e82   : > { %8880 = vmatpush3.bf16.msra.mxu0 %v9636_v42  ;;  %8902 = vmatpush3.bf16.msra.mxu1 %v9637_v3 }
0x1e83   : > { %8881 = vmatprep.subr.bf16.mxu0 %v9638_v4  ;;  %8903 = vmatprep.subr.bf16.mxu1 %v9639_v36 }
0x1e86   : > { %8882 = vmatpush3.bf16.msra.mxu0 %v9640_v20  ;;  %8904 = vmatpush3.bf16.msra.mxu1 %v9641_v13 }
0x1e87   : > { %8883 = vmatprep.subr.bf16.mxu0 %v9642_v17  ;;  %8905 = vmatprep.subr.bf16.mxu1 %v9643_v5 }
0x1e8a   : > { %8884 = vmatpush3.bf16.msra.mxu0 %v9644_v6  ;;  %8906 = vmatpush3.bf16.msra.mxu1 %v9645_v9 }
0x1e8b   : > { %8885 = vmatprep.subr.bf16.mxu0 %v9646_v10  ;;  %8907 = vmatprep.subr.bf16.mxu1 %v9647_v12 }
0x1e8e   : > { %8886 = vmatpush3.bf16.msra.mxu0 %v9648_v16  ;;  %8908 = vmatpush3.bf16.msra.mxu1 %v9649_v18 }
0x1e8f   : > { %8887 = vmatprep.subr.bf16.mxu0 %v9650_v28  ;;  %8909 = vmatprep.subr.bf16.mxu1 %v9651_v29 }
0x1e92   : > { %8888 = vmatpush3.bf16.msra.mxu0 %v9652_v22  ;;  %8910 = vmatpush3.bf16.msra.mxu1 %v9653_v31 }
0x1e93   : > { %8889 = vmatprep.subr.bf16.mxu0 %v9654_v38  ;;  %8911 = vmatprep.subr.bf16.mxu1 %v9655_v39  ;;  %v10994_v38 = vld [vmem:[%s10315_s6 + $0x4] sm:$0xf] }
0x1e96   : > { %8890 = vmatpush3.bf16.msra.mxu0 %v9656_v7  ;;  %8912 = vmatpush3.bf16.msra.mxu1 %v9657_v46 }
0x1e97   : > { %8919 = vmatprep.subr.bf16.mxu0 %v9658_v15  ;;  %8941 = vmatprep.subr.bf16.mxu1 %v9659_v56 }
0x1f40   : > { %v3844_v27 = vpop.f32.mrb[28].mxu0  ;;  %v3887_v21 = vpop.f32.mrb[28].mxu1 }
0x1f41   : > { %v10928_v25 = vadd.f32 %v3844_v27, %v3730_v32  ;;  %v10930_v63 = vadd.f32 %v3887_v21, %v3738_v37  ;;  %v3846_v48 = vpop.f32.mrb[29].mxu0  ;;  %v3889_v35 = vpop.f32.mrb[29].mxu1 }
0x1f42   : > { %v10934_v43 = vadd.f32 %v3846_v48, %v3734_v40  ;;  %v10936_v45 = vadd.f32 %v3889_v35, %v3742_v44  ;;  %v3848_v49 = vpop.f32.mrb[30].mxu0  ;;  %v3891_v53 = vpop.f32.mrb[30].mxu1  ;;  %v11005_v35 = vrot.slane %v10994_v38, %v10424_v8 }
0x1f43   : > { %v10939_v52 = vmul.f32 0.70710677, %v10928_v25  ;;  %v10942_v54 = vmul.f32 0.70710677, %v10930_v63  ;;  %v3850_v1 = vpop.f32.mrb[31].mxu0  ;;  %v3893_v51 = vpop.f32.mrb[31].mxu1  ;;  %v10960_v42 = vadd.f32 %v3848_v49, %v3730_v32  ;;  %v10962_v3 = vadd.f32 %v3891_v53, %v3738_v37 }
0x1f44   : > { %v10945_v55 = vmul.f32 0.70710677, %v10934_v43  ;;  %v10948_v57 = vmul.f32 0.70710677, %v10936_v45  ;;  %v10969_v17 = vadd.f32 %v3850_v1, %v3734_v40  ;;  %v10983_v28 = vadd.f32 %v3893_v51, %v3742_v44 }
0x1f45   : > { %v3912_v58 = vand.u32 2147483647, %v10939_v52  ;;  %v3914_v59 = vand.u32 2147483647, %v10942_v54  ;;  %v10967_v13 = vmul.f32 0.70710677, %v10960_v42  ;;  %v11014_v53 = vrot.slane %v10994_v38, %v10910_v26 }
0x1f46   : > { %v10953_v60 = vand.u32 2147483647, %v10945_v55  ;;  %v10956_v23 = vand.u32 2147483647, %v10948_v57  ;;  %v10976_v10 = vmul.f32 0.70710677, %v10962_v3 }
0x1f47   : > { %v3920_v24 = vmul.f32 0.3275911, %v3912_v58  ;;  %v3922_v62 = vmul.f32 0.3275911, %v3914_v59  ;;  %v4024_v9 = vsub.f32 0.0, %v3912_v58  ;;  %v4026_v22 = vsub.f32 0.0, %v3914_v59 }
0x1f48   : > { %v3921_v47 = vmul.f32 0.3275911, %v10953_v60  ;;  %v3923_v61 = vmul.f32 0.3275911, %v10956_v23  ;;  %v3916_v18 = vand.u32 2147483647, %v10967_v13 }
0x1f49   : > { %v3928_v33 = vadd.f32 1.0, %v3920_v24  ;;  %v3930_v14 = vadd.f32 1.0, %v3922_v62  ;;  %v3918_v31 = vand.u32 2147483647, %v10976_v10  ;;  %v10991_v32 = vmul.f32 0.70710677, %v10969_v17 }
0x1f4a   : > { %v3929_v0 = vadd.f32 1.0, %v3921_v47  ;;  %v3931_v20 = vadd.f32 1.0, %v3923_v61  ;;  %v3924_v37 = vmul.f32 0.3275911, %v3916_v18  ;;  %v4032_v39 = vmul.f32 %v4024_v9, %v3912_v58 }
0x1f4b   : > { %9922 = vrcp.f32 %v3928_v33  ;;  %v3926_v40 = vmul.f32 0.3275911, %v3918_v31  ;;  %v10997_v7 = vand.u32 2147483647, %v10991_v32  ;;  %v11000_v46 = vmul.f32 0.70710677, %v10983_v28 }
0x1f4c   : > { %9924 = vrcp.f32 %v3930_v14  ;;  %v4308_v4 = vpop.f32.mrb[32].mxu0  ;;  %v10964_v36 = vpop.f32.mrb[32].mxu1  ;;  %v3932_v44 = vadd.f32 1.0, %v3924_v37  ;;  %v4034_v27 = vmul.f32 %v4026_v22, %v3914_v59  ;;  %v4028_v56 = vsub.f32 0.0, %v3916_v18 }
0x1f4d   : > { %v10971_v5 = vpop.f32.mrb[33].mxu0  ;;  %v10973_v6 = vpop.f32.mrb[33].mxu1  ;;  %9926 = vrcp.f32 %v3929_v0  ;;  %v3934_v21 = vadd.f32 1.0, %v3926_v40  ;;  %v3925_v48 = vmul.f32 0.3275911, %v10997_v7  ;;  %v4030_v33 = vsub.f32 0.0, %v3918_v31 }
0x1f4e   : > { %v10978_v12 = vpop.f32.mrb[34].mxu0  ;;  %v10980_v16 = vpop.f32.mrb[34].mxu1  ;;  %9928 = vrcp.f32 %v3931_v20  ;;  %v11010_v49 = vand.u32 2147483647, %v11000_v46  ;;  %v4040_v24 = vmul.f32 1.442695, %v4032_v39  ;;  %v11023_v61 = vrot.slane %v10994_v38, %v10429_v11 }
0x1f4f   : > { %v10985_v29 = vpop.f32.mrb[35].mxu0  ;;  %v10987_v34 = vpop.f32.mrb[35].mxu1  ;;  %9930 = vrcp.f32 %v3932_v44  ;;  %v3933_v62 = vadd.f32 1.0, %v3925_v48  ;;  %v11026_v1 = vmul.f32 0.5, %v10928_v25  ;;  %v4044_v0 = vmul.f32 1.442695, %v4034_v27 }
0x1f50   : > { %12278 = vst [vmem:[#allocation11_spill] sm:$0xff] %v10987_v34  ;;  %9932 = vrcp.f32 %v3934_v21  ;;  %v3927_v14 = vmul.f32 0.3275911, %v11010_v49  ;;  %v11029_v20 = vadd.f32 %v4308_v4, %v11005_v35  ;;  %v4036_v37 = vmul.f32 %v4028_v56, %v3916_v18 }
0x1f51   : > { %9934 = vrcp.f32 %v3933_v62  ;;  %v11035_v44 = vmul.f32 0.5, %v10930_v63  ;;  %v4025_v25 = vsub.f32 0.0, %v10953_v60  ;;  %v4038_v27 = vmul.f32 %v4030_v33, %v3918_v31 }
0x1f52   : > { %12279 = vst [vmem:[#allocation12_spill] sm:$0xff] %v11029_v20  ;;  %v3935_v39 = vadd.f32 1.0, %v3927_v14  ;;  %9936 = vpow2.f32 %v4040_v24  ;;  %v4029_v14 = vsub.f32 0.0, %v10997_v7  ;;  %vm4072_vm2 = vcmp.ge.f32.partialorder %v10939_v52, 0.0 }
0x1f53   : > { %vm4074_vm3 = vcmp.ge.f32.partialorder %v10942_v54, 0.0  ;;  %vm4076_vm4 = vcmp.ge.f32.partialorder %v10967_v13, 0.0  ;;  %vm4078_vm5 = vcmp.ge.f32.partialorder %v10976_v10, 0.0  ;;  %v11118_v13 = vadd.f32 %v10971_v5, %v11023_v61 }
0x1f54   : > { %9938 = vrcp.f32 %v3935_v39  ;;  %v4027_v39 = vsub.f32 0.0, %v10956_v23  ;;  %v4037_v41 = vmul.f32 %v4029_v14, %v10997_v7  ;;  %vm4077_vm6 = vcmp.ge.f32.partialorder %v10991_v32, 0.0 }
0x1f55   : > { %v11007_v15 = vpop.eup %9922  ;;  %9940 = vpow2.f32 %v4044_v0  ;;  %v4052_v0 = vmul.f32 1.442695, %v4038_v27  ;;  %vm4073_vm7 = vcmp.ge.f32.partialorder %v10945_v55, 0.0  ;;  %vm4075_vm8 = vcmp.ge.f32.partialorder %v10948_v57, 0.0 }
0x1f56   : > { %v11016_v58 = vpop.eup %9924  ;;  %v3952_v59 = vmul.f32 1.0614054, %v11007_v15  ;;  %v4050_v2 = vmul.f32 1.442695, %v4037_v41  ;;  %vm4079_vm9 = vcmp.ge.f32.partialorder %v11000_v46, 0.0 }
0x1f57   : > { %v3954_v47 = vmul.f32 1.0614054, %v11016_v58  ;;  %v11031_v9 = vpop.eup %9926 }
0x1f58   : > { %v3960_v51 = vadd.f32 -1.4531521, %v3952_v59  ;;  %v3953_v21 = vmul.f32 1.0614054, %v11031_v9  ;;  %v11039_v48 = vpop.eup %9928  ;;  %v11043_v59 = vmul.f32 0.70710677, %v11029_v20 }
0x1f59   : > { %v3962_v22 = vadd.f32 -1.4531521, %v3954_v47  ;;  %v3955_v62 = vmul.f32 1.0614054, %v11039_v48  ;;  %v4048_v47 = vmul.f32 1.442695, %v4036_v37  ;;  %v11052_v33 = vpop.eup %9930 }
0x1f5a   : > { %v3968_v40 = vmul.f32 %v11007_v15, %v3960_v51  ;;  %12280 = vst [vmem:[#allocation13_spill] sm:$0xff] %v11043_v59  ;;  %v3961_v56 = vadd.f32 -1.4531521, %v3953_v21  ;;  %v11050_v31 = vand.u32 2147483647, %v11043_v59  ;;  %v11057_v37 = vpop.eup %9932 }
0x1f5b   : > { %v3970_v4 = vmul.f32 %v11016_v58, %v3962_v22  ;;  %v3963_v50 = vadd.f32 -1.4531521, %v3955_v62  ;;  %9942 = vpow2.f32 %v4048_v47  ;;  %v3958_v19 = vmul.f32 1.0614054, %v11057_v37  ;;  %v11066_v26 = vpop.eup %9934 }
0x1f5c   : > { %v3976_v18 = vadd.f32 1.4214138, %v3968_v40  ;;  %v3969_v24 = vmul.f32 %v11031_v9, %v3961_v56  ;;  %v4033_v40 = vmul.f32 %v4025_v25, %v10953_v60  ;;  %v3956_v56 = vmul.f32 1.0614054, %v11052_v33  ;;  %v9937_v14 = vpop.eup %9936 }
0x1f5d   : > { %v3978_v63 = vadd.f32 1.4214138, %v3970_v4  ;;  %v4031_v25 = vsub.f32 0.0, %v11010_v49  ;;  %v4384_v27 = vmul.f32 0.3275911, %v11050_v31  ;;  %9944 = vpow2.f32 %v4052_v0 }
0x1f5e   : > { %v3984_v51 = vmul.f32 %v11007_v15, %v3976_v18  ;;  %v3977_v4 = vadd.f32 1.4214138, %v3969_v24  ;;  %v3971_v18 = vmul.f32 %v11039_v48, %v3963_v50  ;;  %v3964_v60 = vadd.f32 -1.4531521, %v3956_v56  ;;  %v11074_v59 = vpop.eup %9938 }
0x1f5f   : > { %v3986_v22 = vmul.f32 %v11016_v58, %v3978_v63  ;;  %v4035_v50 = vmul.f32 %v4027_v39, %v10956_v23  ;;  %v3966_v24 = vadd.f32 -1.4531521, %v3958_v19  ;;  %v3957_v8 = vmul.f32 1.0614054, %v11066_v26  ;;  %v9941_v0 = vpop.eup %9940 }
0x1f60   : > { %v3992_v21 = vadd.f32 -0.28449672, %v3984_v51  ;;  %v3979_v11 = vadd.f32 1.4214138, %v3971_v18  ;;  %v3972_v7 = vmul.f32 %v11052_v33, %v3964_v60  ;;  %v4039_v19 = vmul.f32 %v4031_v25, %v11010_v49 }
0x1f61   : > { %v3994_v62 = vadd.f32 -0.28449672, %v3986_v22  ;;  %v3985_v22 = vmul.f32 %v11031_v9, %v3977_v4  ;;  %v3974_v56 = vmul.f32 %v11057_v37, %v3966_v24  ;;  %v4392_v39 = vadd.f32 1.0, %v4384_v27 }
0x1f62   : > { %v4000_v63 = vmul.f32 %v11007_v15, %v3992_v21  ;;  %v3980_v23 = vadd.f32 1.4214138, %v3972_v7  ;;  %v3959_v60 = vmul.f32 1.0614054, %v11074_v59  ;;  %v3987_v20 = vmul.f32 %v11039_v48, %v3979_v11 }
0x1f63   : > { %v4002_v51 = vmul.f32 %v11016_v58, %v3994_v62  ;;  %v3982_v18 = vadd.f32 1.4214138, %v3974_v56  ;;  %v3993_v24 = vadd.f32 -0.28449672, %v3985_v22  ;;  %v4042_v25 = vmul.f32 1.442695, %v4033_v40 }
0x1f64   : > { %v4008_v47 = vadd.f32 0.2548296, %v4000_v63  ;;  %v3965_v63 = vadd.f32 -1.4531521, %v3957_v8  ;;  %v3988_v41 = vmul.f32 %v11052_v33, %v3980_v23  ;;  %v3967_v49 = vadd.f32 -1.4531521, %v3959_v60 }
0x1f65   : > { %v4010_v21 = vadd.f32 0.2548296, %v4002_v51  ;;  %9946 = vpow2.f32 %v4050_v2  ;;  %v9943_v7 = vpop.eup %9942  ;;  %v4001_v56 = vmul.f32 %v11031_v9, %v3993_v24 }
0x1f66   : > { %v4016_v62 = vmul.f32 %v11007_v15, %v4008_v47  ;;  %v3990_v15 = vmul.f32 %v11057_v37, %v3982_v18  ;;  %v3973_v47 = vmul.f32 %v11066_v26, %v3965_v63  ;;  %v3996_v27 = vadd.f32 -0.28449672, %v3988_v41 }
0x1f67   : > { %v4018_v4 = vmul.f32 %v11016_v58, %v4010_v21  ;;  %v4054_v58 = vmul.f32 1.442695, %v4039_v19  ;;  %9948 = vrcp.f32 %v4392_v39  ;;  %v9945_v23 = vpop.eup %9944  ;;  %v4046_v19 = vmul.f32 1.442695, %v4035_v50 }
0x1f68   : > { %v4056_v51 = vmul.f32 %v9937_v14, %v4016_v62  ;;  %v3998_v8 = vadd.f32 -0.28449672, %v3990_v15  ;;  %v3981_v21 = vadd.f32 1.4214138, %v3973_v47  ;;  %v3975_v14 = vmul.f32 %v11074_v59, %v3967_v49 }
0x1f69   : > { %v4058_v34 = vmul.f32 %v9941_v0, %v4018_v4  ;;  %v4004_v62 = vmul.f32 %v11052_v33, %v3996_v27  ;;  %v3995_v0 = vadd.f32 -0.28449672, %v3987_v20  ;;  %9950 = vpow2.f32 %v4042_v25 }
0x1f6a   : > { %v4064_v22 = vsub.f32 1.0, %v4056_v51  ;;  %v4006_v4 = vmul.f32 %v11057_v37, %v3998_v8  ;;  %v3989_v40 = vmul.f32 %v11066_v26, %v3981_v21  ;;  %v3983_v2 = vadd.f32 1.4214138, %v3975_v14 }
0x1f6b   : > { %v4066_v11 = vsub.f32 1.0, %v4058_v34  ;;  %v4012_v18 = vadd.f32 0.2548296, %v4004_v62  ;;  %9952 = vpow2.f32 %v4054_v58  ;;  %v4009_v51 = vadd.f32 0.2548296, %v4001_v56 }
0x1f6c   : > { %v4014_v39 = vadd.f32 0.2548296, %v4006_v4  ;;  %v3997_v34 = vadd.f32 -0.28449672, %v3989_v40  ;;  %v4080_v63 = vsub.f32 0.0, %v4064_v22  ;;  %v4003_v24 = vmul.f32 %v11039_v48, %v3995_v0 }
0x1f6d   : > { %v4082_v60 = vsub.f32 0.0, %v4066_v11  ;;  %v4020_v20 = vmul.f32 %v11052_v33, %v4012_v18  ;;  %v3991_v47 = vmul.f32 %v11074_v59, %v3983_v2  ;;  %9954 = vpow2.f32 %v4046_v19 }
0x1f6e   : > { %v4022_v41 = vmul.f32 %v11057_v37, %v4014_v39  ;;  %v4005_v15 = vmul.f32 %v11066_v26, %v3997_v34  ;;  %v3900_v50 = vmul.f32 0.5, %v10960_v42  ;;  %v11099_v25 = vadd.f32 %v10964_v36, %v11014_v53 }
0x1f6f   : > { %v4060_v49 = vmul.f32 %v9943_v7, %v4020_v20  ;;  %v3902_v27 = vmul.f32 0.5, %v10962_v3  ;;  %v3999_v8 = vadd.f32 -0.28449672, %v3991_v47  ;;  %v9947_v21 = vpop.eup %9946  ;;  %v4088_v37 = vsel %vm4072_vm2, %v4064_v22, %v4080_v63 }
0x1f70   : > { %v4062_v58 = vmul.f32 %v9945_v23, %v4022_v41  ;;  %v4013_v33 = vadd.f32 0.2548296, %v4005_v15  ;;  %v4090_v14 = vsel %vm4074_vm3, %v4066_v11, %v4082_v60  ;;  %v4017_v36 = vmul.f32 %v11031_v9, %v4009_v51 }
0x1f71   : > { %v4068_v56 = vsub.f32 1.0, %v4060_v49  ;;  %v11107_v42 = vpop.eup %9948  ;;  %v4011_v7 = vadd.f32 0.2548296, %v4003_v24  ;;  %v4007_v52 = vmul.f32 %v11074_v59, %v3999_v8  ;;  %v11114_v22 = vmul.f32 0.70710677, %v11099_v25 }
0x1f72   : > { %v4070_v62 = vsub.f32 1.0, %v4062_v58  ;;  %v4021_v3 = vmul.f32 %v11066_v26, %v4013_v33  ;;  %v4096_v54 = vadd.f32 1.0, %v4088_v37  ;;  %v4098_v11 = vadd.f32 1.0, %v4090_v14 }
0x1f73   : > { %v4084_v23 = vsub.f32 0.0, %v4068_v56  ;;  %v9951_v9 = vpop.eup %9950  ;;  %v4015_v2 = vadd.f32 0.2548296, %v4007_v52  ;;  %v11121_v26 = vand.u32 2147483647, %v11114_v22  ;;  %v4019_v39 = vmul.f32 %v11039_v48, %v4011_v7 }
0x1f74   : > { %v4086_v0 = vsub.f32 0.0, %v4070_v62  ;;  %v4061_v40 = vmul.f32 %v9947_v21, %v4021_v3  ;;  %v4057_v18 = vmul.f32 %v9951_v9, %v4017_v36  ;;  %v4416_v5 = vmul.f32 1.0614054, %v11107_v42 }
0x1f75   : > { %v4092_v4 = vsel %vm4076_vm4, %v4068_v56, %v4084_v23  ;;  %v9953_v19 = vpop.eup %9952  ;;  %v4023_v51 = vmul.f32 %v11074_v59, %v4015_v2  ;;  %v4386_v20 = vmul.f32 0.3275911, %v11121_v26  ;;  %v11130_v24 = vmul.f32 %v4096_v54, %v11026_v1 }
0x1f76   : > { %v4100_v34 = vadd.f32 1.0, %v4092_v4  ;;  %v4094_v63 = vsel %vm4078_vm5, %v4070_v62, %v4086_v0  ;;  %v11133_v41 = vmul.f32 %v4098_v11, %v11035_v44  ;;  %v11138_v48 = vmul.f32 0.70710677, %v11118_v13 }
0x1f77   : > { %v4102_v60 = vadd.f32 1.0, %v4094_v63  ;;  %v9955_v10 = vpop.eup %9954  ;;  %v4069_v49 = vsub.f32 1.0, %v4061_v40  ;;  %v4063_v59 = vmul.f32 %v9953_v19, %v4023_v51  ;;  %v4394_v58 = vadd.f32 1.0, %v4386_v20 }
0x1f78   : > { %v11135_v15 = vmul.f32 %v4100_v34, %v3900_v50  ;;  %v4059_v33 = vmul.f32 %v9955_v10, %v4019_v39  ;;  %v11145_v1 = vand.u32 2147483647, %v11138_v48  ;;  %v11149_v44 = vrot.slane %v10994_v38, %v10916_v30 }
0x1f79   : > { %v11140_v47 = vmul.f32 %v4102_v60, %v3902_v27  ;;  %v4065_v50 = vsub.f32 1.0, %v4057_v18  ;;  %v4424_v27 = vadd.f32 -1.4531521, %v4416_v5  ;;  %9956 = vrcp.f32 %v4394_v58 }
0x1f7a   : > { %v4112_v8 = vpack.c.bf16 %v11135_v15, %v11130_v24  ;;  %v4385_v37 = vmul.f32 0.3275911, %v11145_v1  ;;  %v4085_v14 = vsub.f32 0.0, %v4069_v49  ;;  %v4071_v56 = vsub.f32 1.0, %v4063_v59 }
0x1f7b   : > { %v4114_v21 = vpack.c.bf16 %v11140_v47, %v11133_v41  ;;  %v4067_v36 = vsub.f32 1.0, %v4059_v33  ;;  %v11156_v62 = vadd.f32 %v10973_v6, %v11149_v44  ;;  %v4081_v3 = vsub.f32 0.0, %v4065_v50  ;;  %v12285_v41 = vld [vmem:[#allocation9_spill] sm:$0xff] }
0x1f7c   : > { %v4393_v7 = vadd.f32 1.0, %v4385_v37  ;;  %v4432_v38 = vmul.f32 %v11107_v42, %v4424_v27  ;;  %v11161_v23 = vadd.f32 %v10978_v12, %v11005_v35  ;;  %v11165_v52 = vadd.f32 %v10980_v16, %v11014_v53  ;;  %v9690_v47 = vld [vmem:[%s10330_s23 + $0x240] sm:$0xff]  }
0x1f7d   : > { %v3897_v54 = vmul.f32 0.5, %v10934_v43  ;;  %v3899_v11 = vmul.f32 0.5, %v10936_v45  ;;  %v4093_v6 = vsel %vm4077_vm6, %v4069_v49, %v4085_v14  ;;  %v4087_v0 = vsub.f32 0.0, %v4071_v56 }
0x1f7e   : > { %9958 = vrcp.f32 %v4393_v7  ;;  %v11171_v9 = vmul.f32 0.70710677, %v11156_v62  ;;  %v11174_v4 = vmul.f32 0.70710677, %v11161_v23  ;;  %v4083_v12 = vsub.f32 0.0, %v4067_v36 }
0x1f7f   : > { %v4488_v16 = vsub.f32 0.0, %v11050_v31  ;;  %v11179_v43 = vmul.f32 0.70710677, %v11165_v52  ;;  %v4089_v45 = vsel %vm4073_vm7, %v4065_v50, %v4081_v3  ;;  %v4440_v35 = vadd.f32 1.4214138, %v4432_v38  ;;  %v12281_v38 = vld [vmem:[#allocation11_spill] sm:$0xff] }
0x1f80   : > { %v11182_v32 = vand.u32 2147483647, %v11171_v9  ;;  %v11185_v53 = vand.u32 2147483647, %v11174_v4  ;;  %v4101_v40 = vadd.f32 1.0, %v4093_v6  ;;  %v3901_v2 = vmul.f32 0.5, %v10969_v17 }
0x1f81   : > { %v11190_v55 = vand.u32 2147483647, %v11179_v43  ;;  %v4095_v19 = vsel %vm4079_vm9, %v4071_v56, %v4087_v0  ;;  %v4097_v63 = vadd.f32 1.0, %v4089_v45  ;;  %v4091_v60 = vsel %vm4075_vm8, %v4067_v36, %v4083_v12 }
0x1f82   : > { %v4387_v18 = vmul.f32 0.3275911, %v11182_v32  ;;  %v4388_v39 = vmul.f32 0.3275911, %v11185_v53  ;;  %v4496_v51 = vmul.f32 %v4488_v16, %v11050_v31  ;;  %v4448_v46 = vmul.f32 %v11107_v42, %v4440_v35 }
0x1f83   : > { %v11195_v34 = vpop.eup %9956  ;;  %v4390_v57 = vmul.f32 0.3275911, %v11190_v55  ;;  %v11203_v17 = vadd.f32 %v10985_v29, %v11023_v61  ;;  %v11205_v10 = vmul.f32 %v4101_v40, %v3901_v2  ;;  %v4103_v49 = vadd.f32 1.0, %v4095_v19 }
0x1f84   : > { %v4418_v5 = vmul.f32 1.0614054, %v11195_v34  ;;  %v4395_v20 = vadd.f32 1.0, %v4387_v18  ;;  %v4490_v59 = vsub.f32 0.0, %v11121_v26  ;;  %v4396_v58 = vadd.f32 1.0, %v4388_v39 }
0x1f85   : > { %v3903_v33 = vmul.f32 0.5, %v10983_v28  ;;  %v4398_v50 = vadd.f32 1.0, %v4390_v57  ;;  %v11211_v37 = vmul.f32 %v4097_v63, %v3897_v54  ;;  %v4099_v14 = vadd.f32 1.0, %v4091_v60 }
0x1f86   : > { %v4426_v31 = vadd.f32 -1.4531521, %v4418_v5  ;;  %9960 = vrcp.f32 %v4395_v20  ;;  %v4504_v56 = vmul.f32 1.442695, %v4496_v51  ;;  %v4456_v29 = vadd.f32 -0.28449672, %v4448_v46 }
0x1f87   : > { %9962 = vrcp.f32 %v4396_v58  ;;  %v11216_v7 = vmul.f32 0.70710677, %v11203_v17  ;;  %v11218_v3 = vmul.f32 %v4103_v49, %v3903_v33  ;;  %v4498_v28 = vmul.f32 %v4490_v59, %v11121_v26 }
0x1f88   : > { %v11209_v27 = vpop.eup %9958  ;;  %v4434_v61 = vmul.f32 %v11195_v34, %v4426_v31  ;;  %v11223_v6 = vadd.f32 %v12281_v38, %v11149_v44  ;;  %v4113_v54 = vpack.c.bf16 %v11205_v10, %v11211_v37  ;;  %9964 = vrcp.f32 %v4398_v50  ;;  %v9667_v10 = vld [vmem:[%s10330_s23 + $0xd0] sm:$0xff]  }
0x1f89   : > { %v4417_v36 = vmul.f32 1.0614054, %v11209_v27  ;;  %v11228_v16 = vand.u32 2147483647, %v11216_v7  ;;  %v11230_v45 = vmul.f32 %v4099_v14, %v3899_v11  ;;  %9966 = vpow2.f32 %v4504_v56  ;;  %v9668_v37 = vld [vmem:[%s10330_s23 + $0x10] sm:$0xff]  }
0x1f8a   : > { %v4442_v0 = vadd.f32 1.4214138, %v4434_v61  ;;  %v4489_v35 = vsub.f32 0.0, %v11145_v1  ;;  %v11234_v26 = vmul.f32 0.70710677, %v11223_v6  ;;  %v4464_v44 = vmul.f32 %v11107_v42, %v4456_v29 }
0x1f8b   : > { %v4425_v12 = vadd.f32 -1.4531521, %v4417_v36  ;;  %v4389_v19 = vmul.f32 0.3275911, %v11228_v16  ;;  %v4508_v18 = vmul.f32 1.442695, %v4498_v28  ;;  %v4115_v63 = vpack.c.bf16 %v11218_v3, %v11230_v45 }
0x1f8c   : > { %v4450_v40 = vmul.f32 %v11195_v34, %v4442_v0  ;;  %v4492_v39 = vsub.f32 0.0, %v11185_v53  ;;  %v4383_v11 = vand.u32 2147483647, %v11234_v26  ;;  %v4497_v46 = vmul.f32 %v4489_v35, %v11145_v1  ;;  %v9672_v3 = vld [vmem:[%s10330_s23 + $0x18] sm:$0xff]   ;;  %v9674_v45 = vld [vmem:[%s10330_s23 + $0x60] sm:$0xff]  }
0x1f8d   : > { %v4433_v2 = vmul.f32 %v11209_v27, %v4425_v12  ;;  %v4397_v57 = vadd.f32 1.0, %v4389_v19  ;;  %v4491_v5 = vsub.f32 0.0, %v11182_v32  ;;  %v4472_v59 = vadd.f32 0.2548296, %v4464_v44 }
0x1f8e   : > { %v4458_v60 = vadd.f32 -0.28449672, %v4450_v40  ;;  %v4391_v20 = vmul.f32 0.3275911, %v4383_v11  ;;  %v4494_v33 = vsub.f32 0.0, %v11190_v55  ;;  %v4500_v56 = vmul.f32 %v4492_v39, %v11185_v53 }
0x1f8f   : > { %v4441_v51 = vadd.f32 1.4214138, %v4433_v2  ;;  %9968 = vrcp.f32 %v4397_v57  ;;  %v4506_v36 = vmul.f32 1.442695, %v4497_v46  ;;  %v4499_v38 = vmul.f32 %v4491_v5, %v11182_v32 }
0x1f90   : > { %v11246_v49 = vpop.eup %9960  ;;  %v4466_v50 = vmul.f32 %v11195_v34, %v4458_v60  ;;  %v4399_v1 = vadd.f32 1.0, %v4391_v20  ;;  %9970 = vpow2.f32 %v4508_v18  ;;  %v4480_v12 = vmul.f32 %v11107_v42, %v4472_v59 }
0x1f91   : > { %v4449_v58 = vmul.f32 %v11209_v27, %v4441_v51  ;;  %v11250_v31 = vpop.eup %9962  ;;  %v4419_v14 = vmul.f32 1.0614054, %v11246_v49  ;;  %v4502_v44 = vmul.f32 %v4494_v33, %v11190_v55  ;;  %v4512_v19 = vmul.f32 1.442695, %v4500_v56 }
0x1f92   : > { %v4420_v61 = vmul.f32 1.0614054, %v11250_v31  ;;  %9972 = vrcp.f32 %v4399_v1  ;;  %v11257_v0 = vpop.eup %9964  ;;  %v4474_v2 = vadd.f32 0.2548296, %v4466_v50  ;;  %v4493_v32 = vsub.f32 0.0, %v11228_v16 }
0x1f93   : > { %v4457_v29 = vadd.f32 -0.28449672, %v4449_v58  ;;  %v4427_v28 = vadd.f32 -1.4531521, %v4419_v14  ;;  %v9967_v40 = vpop.eup %9966  ;;  %v4422_v18 = vmul.f32 1.0614054, %v11257_v0  ;;  %9974 = vpow2.f32 %v4506_v36 }
0x1f94   : > { %v4428_v35 = vadd.f32 -1.4531521, %v4420_v61  ;;  %v4510_v57 = vmul.f32 1.442695, %v4499_v38  ;;  %v4520_v46 = vmul.f32 %v9967_v40, %v4480_v12  ;;  %v4516_v55 = vmul.f32 1.442695, %v4502_v44 }
0x1f95   : > { %v4435_v53 = vmul.f32 %v11246_v49, %v4427_v28  ;;  %v4465_v39 = vmul.f32 %v11209_v27, %v4457_v29  ;;  %v4430_v42 = vadd.f32 -1.4531521, %v4422_v18  ;;  %v4495_v20 = vsub.f32 0.0, %v4383_v11 }
0x1f96   : > { %v4436_v60 = vmul.f32 %v11250_v31, %v4428_v35  ;;  %v4482_v59 = vmul.f32 %v11195_v34, %v4474_v2  ;;  %9976 = vpow2.f32 %v4512_v19  ;;  %v4501_v1 = vmul.f32 %v4493_v32, %v11228_v16 }
0x1f97   : > { %v4443_v51 = vadd.f32 1.4214138, %v4435_v53  ;;  %v4438_v33 = vmul.f32 %v11257_v0, %v4430_v42  ;;  %v4473_v14 = vadd.f32 0.2548296, %v4465_v39  ;;  %9978 = vpow2.f32 %v4510_v57 }
0x1f98   : > { %v4444_v5 = vadd.f32 1.4214138, %v4436_v60  ;;  %v4528_v38 = vsub.f32 1.0, %v4520_v46  ;;  %9980 = vpow2.f32 %v4516_v55  ;;  %v4503_v12 = vmul.f32 %v4495_v20, %v4383_v11 }
0x1f99   : > { %v4451_v58 = vmul.f32 %v11246_v49, %v4443_v51  ;;  %v11269_v50 = vpop.eup %9968  ;;  %v4446_v61 = vadd.f32 1.4214138, %v4438_v33  ;;  %v4514_v19 = vmul.f32 1.442695, %v4501_v1  ;;  %v4481_v39 = vmul.f32 %v11209_v27, %v4473_v14 }
0x1f9a   : > { %v4452_v56 = vmul.f32 %v11250_v31, %v4444_v5  ;;  %v4421_v36 = vmul.f32 1.0614054, %v11269_v50  ;;  %v9971_v28 = vpop.eup %9970  ;;  %v4544_v11 = vsub.f32 0.0, %v4528_v38  ;;  %vm4538_vm11 = vcmp.ge.f32.partialorder %v11114_v22, 0.0 }
0x1f9b   : > { %v4459_v29 = vadd.f32 -0.28449672, %v4451_v58  ;;  %v4522_v44 = vmul.f32 %v9971_v28, %v4482_v59  ;;  %v4454_v2 = vmul.f32 %v11257_v0, %v4446_v61  ;;  %v4518_v59 = vmul.f32 1.442695, %v4503_v12  ;;  %v12282_v61 = vld [vmem:[#allocation12_spill] sm:$0xff]  ;;  %v12283_v28 = vld [vmem:[#allocation13_spill] sm:$0xff] }
0x1f9c   : > { %v4460_v34 = vadd.f32 -0.28449672, %v4452_v56  ;;  %v11274_v35 = vpop.eup %9972  ;;  %v4429_v53 = vadd.f32 -1.4531521, %v4421_v36  ;;  %9982 = vpow2.f32 %v4514_v19  ;;  %v4360_v36 = vmul.f32 0.5, %v12282_v61 }
0x1f9d   : > { %v4467_v40 = vmul.f32 %v11246_v49, %v4459_v29  ;;  %v4423_v18 = vmul.f32 1.0614054, %v11274_v35  ;;  %v4462_v32 = vadd.f32 -0.28449672, %v4454_v2  ;;  %v9975_v46 = vpop.eup %9974  ;;  %v4530_v5 = vsub.f32 1.0, %v4522_v44 }
0x1f9e   : > { %v4468_v16 = vmul.f32 %v11250_v31, %v4460_v34  ;;  %v4437_v51 = vmul.f32 %v11269_v50, %v4429_v53  ;;  %v4521_v56 = vmul.f32 %v9975_v46, %v4481_v39  ;;  %vm4536_vm10 = vcmp.ge.f32.partialorder %v12283_v28, 0.0 }
0x1f9f   : > { %v4475_v60 = vadd.f32 0.2548296, %v4467_v40  ;;  %v4431_v42 = vadd.f32 -1.4531521, %v4423_v18  ;;  %v4470_v55 = vmul.f32 %v11257_v0, %v4462_v32  ;;  %v4546_v12 = vsub.f32 0.0, %v4530_v5 }
0x1fa0   : > { %v4476_v57 = vadd.f32 0.2548296, %v4468_v16  ;;  %v4445_v20 = vadd.f32 1.4214138, %v4437_v51  ;;  %v9977_v14 = vpop.eup %9976  ;;  %9984 = vpow2.f32 %v4518_v59  ;;  %v4552_v53 = vsel %vm4536_vm10, %v4528_v38, %v4544_v11 }
0x1fa1   : > { %v4483_v58 = vmul.f32 %v11246_v49, %v4475_v60  ;;  %v4439_v27 = vmul.f32 %v11274_v35, %v4431_v42  ;;  %v4478_v1 = vadd.f32 0.2548296, %v4470_v55  ;;  %v9979_v40 = vpop.eup %9978  ;;  %v4362_v39 = vmul.f32 0.5, %v11099_v25 }
0x1fa2   : > { %v4484_v33 = vmul.f32 %v11250_v31, %v4476_v57  ;;  %v4453_v29 = vmul.f32 %v11269_v50, %v4445_v20  ;;  %v9981_v31 = vpop.eup %9980  ;;  %v4529_v60 = vsub.f32 1.0, %v4521_v56  ;;  %vm4540_vm12 = vcmp.ge.f32.partialorder %v11174_v4, 0.0 }
0x1fa3   : > { %v4447_v44 = vadd.f32 1.4214138, %v4439_v27  ;;  %v4486_v49 = vmul.f32 %v11257_v0, %v4478_v1  ;;  %v4523_v16 = vmul.f32 %v9979_v40, %v4483_v58  ;;  %v4560_v42 = vadd.f32 1.0, %v4552_v53 }
0x1fa4   : > { %v4524_v34 = vmul.f32 %v9977_v14, %v4484_v33  ;;  %v4461_v2 = vadd.f32 -0.28449672, %v4453_v29  ;;  %v4554_v46 = vsel %vm4538_vm11, %v4530_v5, %v4546_v12  ;;  %v4364_v20 = vmul.f32 0.5, %v11161_v23 }
0x1fa5   : > { %v4455_v18 = vmul.f32 %v11274_v35, %v4447_v44  ;;  %v4526_v32 = vmul.f32 %v9981_v31, %v4486_v49  ;;  %v4531_v11 = vsub.f32 1.0, %v4523_v16  ;;  %v4545_v58 = vsub.f32 0.0, %v4529_v60 }
0x1fa6   : > { %v4532_v19 = vsub.f32 1.0, %v4524_v34  ;;  %v4469_v51 = vmul.f32 %v11269_v50, %v4461_v2  ;;  %v9983_v22 = vpop.eup %9982  ;;  %v4562_v56 = vadd.f32 1.0, %v4554_v46  ;;  %vm4537_vm13 = vcmp.ge.f32.partialorder %v11138_v48, 0.0  ;;  %v9660_v46 = vld [vmem:[%s10330_s23] sm:$0xff]  }
0x1fa7   : > { %v4463_v0 = vadd.f32 -0.28449672, %v4455_v18  ;;  %v4534_v55 = vsub.f32 1.0, %v4526_v32  ;;  %vm4542_vm14 = vcmp.ge.f32.partialorder %v11179_v43, 0.0  ;;  %v4568_v5 = vmul.f32 %v4560_v42, %v4360_v36 }
0x1fa8   : > { %v4548_v57 = vsub.f32 0.0, %v4532_v19  ;;  %v4477_v38 = vadd.f32 0.2548296, %v4469_v51  ;;  %v4547_v23 = vsub.f32 0.0, %v4531_v11  ;;  %v4366_v28 = vmul.f32 0.5, %v11165_v52 }
0x1fa9   : > { %v4471_v25 = vmul.f32 %v11274_v35, %v4463_v0  ;;  %v4550_v27 = vsub.f32 0.0, %v4534_v55  ;;  %v4553_v12 = vsel %vm4537_vm13, %v4529_v60, %v4545_v58  ;;  %v4570_v2 = vmul.f32 %v4562_v56, %v4362_v39  ;;  %v9671_v58 = vld [vmem:[%s10330_s23 + $0xd8] sm:$0xff]   ;;  %v9679_v56 = vld [vmem:[%s10330_s23 + $0xe8] sm:$0xff]  }
0x1faa   : > { %v4556_v59 = vsel %vm4540_vm12, %v4532_v19, %v4548_v57  ;;  %v4485_v14 = vmul.f32 %v11269_v50, %v4477_v38  ;;  %v9985_v40 = vpop.eup %9984  ;;  %vm4539_vm15 = vcmp.ge.f32.partialorder %v11171_v9, 0.0  ;;  %vm4541_vm0 = vcmp.ge.f32.partialorder %v11216_v7, 0.0  ;;  %v9662_v38 = vld [vmem:[%s10330_s23 + $0x48] sm:$0xff]  }
0x1fab   : > { %v4564_v33 = vadd.f32 1.0, %v4556_v59  ;;  %v4479_v4 = vadd.f32 0.2548296, %v4471_v25  ;;  %v4558_v29 = vsel %vm4542_vm14, %v4534_v55, %v4550_v27  ;;  %v4561_v36 = vadd.f32 1.0, %v4553_v12  ;;  %v9665_v59 = vld [vmem:[%s10330_s23 + $0x88] sm:$0xff]   ;;  %v9669_v25 = vld [vmem:[%s10330_s23 + $0x90] sm:$0xff]  }
0x1fac   : > { %v4525_v61 = vmul.f32 %v9983_v22, %v4485_v14  ;;  %v4566_v34 = vadd.f32 1.0, %v4558_v29  ;;  %v4555_v53 = vsel %vm4539_vm15, %v4531_v11, %v4547_v23  ;;  %v4365_v18 = vmul.f32 0.5, %v11203_v17  ;;  %v9676_v27 = vld [vmem:[%s10330_s23 + $0x20] sm:$0xff]   ;;  %v9678_v14 = vld [vmem:[%s10330_s23 + $0x68] sm:$0xff]   ;;  %v9683_v29 = vld [vmem:[%s10330_s23 + $0xf0] sm:$0xff]  }
0x1fad   : > { %v4572_v1 = vmul.f32 %v4564_v33, %v4364_v20  ;;  %v4487_v44 = vmul.f32 %v11274_v35, %v4479_v4  ;;  %v4361_v35 = vmul.f32 0.5, %v11118_v13  ;;  %v4563_v32 = vadd.f32 1.0, %v4555_v53  ;;  %v9666_v20 = vld [vmem:[%s10330_s23 + $0x50] sm:$0xff]   ;;  %v9675_v33 = vld [vmem:[%s10330_s23 + $0xe0] sm:$0xff]   ;;  %v9680_v4 = vld [vmem:[%s10330_s23 + $0x28] sm:$0xff]  }
0x1fae   : > { %v4533_v49 = vsub.f32 1.0, %v4525_v61  ;;  %v4574_v31 = vmul.f32 %v4566_v34, %v4366_v28  ;;  %vm4543_vm2 = vcmp.ge.f32.partialorder %v11234_v26, 0.0  ;;  %v4363_v57 = vmul.f32 0.5, %v11156_v62  ;;  %v9661_v26 = vld [vmem:[%s10330_s23 + $0x80] sm:$0xff]   ;;  %v9663_v62 = vld [vmem:[%s10330_s23 + $0xc8] sm:$0xff]   ;;  %v9684_v61 = vld [vmem:[%s10330_s23 + $0x30] sm:$0xff]  }
0x1faf   : > { %v4576_v50 = vpack.c.bf16 %v4572_v1, %v4568_v5  ;;  %v4527_v48 = vmul.f32 %v9985_v40, %v4487_v44  ;;  %v4569_v9 = vmul.f32 %v4561_v36, %v4361_v35  ;;  %v4367_v0 = vmul.f32 0.5, %v11223_v6  ;;  %v9664_v6 = vld [vmem:[%s10330_s23 + $0x8] sm:$0xff]   ;;  %v9677_v22 = vld [vmem:[%s10330_s23 + $0xa0] sm:$0xff]   ;;  %v9682_v5 = vld [vmem:[%s10330_s23 + $0x70] sm:$0xff]  }
0x1fb0   : > { %v4549_v43 = vsub.f32 0.0, %v4533_v49  ;;  %v4578_v16 = vpack.c.bf16 %v4574_v31, %v4570_v2  ;;  %v4571_v17 = vmul.f32 %v4563_v32, %v4363_v57  ;;  %v9681_v1 = vld [vmem:[%s10330_s23 + $0xa8] sm:$0xff]   ;;  %v9686_v23 = vld [vmem:[%s10330_s23 + $0x78] sm:$0xff]   ;;  %v5192_v28 = vld [vmem:[%s10321_s16 + $0x20] sm:$0xff]  ;;  %v12284_v57 = vmov 0  }
0x1fb1   : > { %v4535_v52 = vsub.f32 1.0, %v4527_v48  ;;  %v5194_v34 = vld [vmem:[%s10321_s16 + $0x80] sm:$0xff]  ;;  %v9685_v44 = vld [vmem:[%s10330_s23 + $0xb0] sm:$0xff]   ;;  %v9687_v40 = vld [vmem:[%s10330_s23 + $0xf8] sm:$0xff]  }
0x1fb2   : > { %v4557_v19 = vsel %vm4541_vm0, %v4533_v49, %v4549_v43  ;;  %v9688_v12 = vld [vmem:[%s10330_s23 + $0x38] sm:$0xff]   ;;  %v5193_v49 = vld [vmem:[%s10321_s16 + $0x28] sm:$0xff]  ;;  %v5196_v31 = vld [vmem:[%s10321_s16 + $0xe0] sm:$0xff]  ;;  %v8563_v36 = vcombine.low %v5192_v28, %v5194_v34 }
0x1fb3   : > { %v4565_v60 = vadd.f32 1.0, %v4557_v19  ;;  %v4551_v39 = vsub.f32 0.0, %v4535_v52  ;;  %v5195_v2 = vld [vmem:[%s10321_s16 + $0x88] sm:$0xff]  ;;  %v5198_v48 = vld [vmem:[%s10321_s16 + $0x140] sm:$0xff]  ;;  %v9689_v43 = vld [vmem:[%s10330_s23 + $0xb8] sm:$0xff]  }
0x1fb4   : > { %v8566_v53 = vcombine.high %v5193_v49, %v5195_v2  ;;  %v5199_v19 = vld [vmem:[%s10321_s16 + $0x148] sm:$0xff]  ;;  %v5200_v35 = vld [vmem:[%s10321_s16 + $0x1a0] sm:$0xff] }
0x1fb5   : > { %v4573_v7 = vmul.f32 %v4565_v60, %v4365_v18  ;;  %v4559_v51 = vsel %vm4543_vm2, %v4535_v52, %v4551_v39  ;;  %v5197_v52 = vld [vmem:[%s10321_s16 + $0xe8] sm:$0xff]  ;;  %v5202_v18 = vld [vmem:[%s10321_s16 + $0x200] sm:$0xff]  ;;  %v8565_v60 = vcombine.low %v5193_v49, %v5195_v2  ;;  %v8567_v39 = vcombine.low %v5196_v31, %v5198_v48 }
0x1fb6   : > { %v4567_v42 = vadd.f32 1.0, %v4559_v51  ;;  %v8570_v32 = vcombine.high %v5197_v52, %v5199_v19  ;;  %v5203_v51 = vld [vmem:[%s10321_s16 + $0x208] sm:$0xff]  ;;  %v8569_v24 = vcombine.low %v5197_v52, %v5199_v19  ;;  %v8571_v15 = vcombine.low %v5200_v35, %v5202_v18 }
0x1fb7   : > { %v4577_v13 = vpack.c.bf16 %v4573_v7, %v4569_v9  ;;  %v8572_v9 = vcombine.high %v5200_v35, %v5202_v18  ;;  %v5201_v7 = vld [vmem:[%s10321_s16 + $0x1a8] sm:$0xff] }
0x1fb8   : > { %v4575_v55 = vmul.f32 %v4567_v42, %v4367_v0  ;;  %v8573_v0 = vcombine.low %v5201_v7, %v5203_v51  ;;  %v9692_v42 = vld [vmem:[%s10330_s23 + $0x200] sm:$0xff]  }
0x1fb9   : > { %4868 = vmatprep.mubr.bf16.mxu0 %v4577_v13  ;;  %v9693_v13 = vld [vmem:[%s10330_s23 + $0x280] sm:$0xff]  }
0x1fba   : > { %v4579_v11 = vpack.c.bf16 %v4575_v55, %v4571_v17  ;;  %4869 = vmatmul.mubr.bf16.vlgmr.msra.gmra.mrb[36].mxu0 %v4576_v50  ;;  %v8564_v50 = vcombine.high %v5192_v28, %v5194_v34  ;;  %v9695_v17 = vld [vmem:[%s10330_s23 + $0x2c8] sm:$0xff]   ;;  %v11405_v28 = vld [vmem:[%s10321_s16 + $0x90] sm:$0xff]  ;;  %v11408_v34 = vld [vmem:[%s10321_s16 + $0x38] sm:$0xff] }
0x1fbb   : > { %8920 = vmatpush3.bf16.msra.mxu0 %v9660_v46  ;;  %5142 = vmatprep.mubr.bf16.mxu0 %v4113_v54  ;;  %v9670_v54 = vld [vmem:[%s10330_s23 + $0x58] sm:$0xff]   ;;  %v9694_v46 = vld [vmem:[%s10330_s23 + $0x248] sm:$0xff]  }
0x1fbc   : > { %4909 = vmatprep.mubr.bf16.mxu1 %v4579_v11  ;;  %8921 = vmatprep.subr.bf16.mxu0 %v9662_v38  ;;  %v9696_v55 = vld [vmem:[%s10330_s23 + $0x208] sm:$0xff]   ;;  %v9698_v11 = vld [vmem:[%s10330_s23 + $0x250] sm:$0xff]  }
0x1fbd   : > { %4910 = vmatmul.mubr.bf16.vlgmr.msra.gmra.mrb[36].mxu1 %v4578_v16  ;;  %v8568_v16 = vcombine.high %v5196_v31, %v5198_v48  ;;  %v9697_v38 = vld [vmem:[%s10330_s23 + $0x288] sm:$0xff]  }
0x1fbe   : > { %8942 = vmatpush3.bf16.msra.mxu1 %v9661_v26  ;;  %5183 = vmatprep.mubr.bf16.mxu1 %v4115_v63  ;;  %v9673_v63 = vld [vmem:[%s10330_s23 + $0x98] sm:$0xff]   ;;  %v9699_v26 = vld [vmem:[%s10330_s23 + $0x2d0] sm:$0xff]  }
0x1fbf   : > { %8943 = vmatprep.subr.bf16.mxu1 %v9663_v62  ;;  %8922 = vmatpush3.bf16.msra.mxu0 %v9664_v6  ;;  %v9700_v62 = vld [vmem:[%s10330_s23 + $0x210] sm:$0xff]  }
0x1fc0   : > { %8923 = vmatprep.subr.bf16.mxu0 %v9666_v20  ;;  %v9701_v6 = vld [vmem:[%s10330_s23 + $0x290] sm:$0xff]   ;;  %v9702_v20 = vld [vmem:[%s10330_s23 + $0x258] sm:$0xff]  }
0x1fc2   : > { %8944 = vmatpush3.bf16.msra.mxu1 %v9665_v59  ;;  %v9703_v59 = vld [vmem:[%s10330_s23 + $0x2d8] sm:$0xff]  }
0x1fc3   : > { %8945 = vmatprep.subr.bf16.mxu1 %v9667_v10  ;;  %8924 = vmatpush3.bf16.msra.mxu0 %v9668_v37  ;;  %v9704_v10 = vld [vmem:[%s10330_s23 + $0x218] sm:$0xff]  }
0x1fc4   : > { %8925 = vmatprep.subr.bf16.mxu0 %v9670_v54  ;;  %v9705_v37 = vld [vmem:[%s10330_s23 + $0x298] sm:$0xff]   ;;  %v9706_v54 = vld [vmem:[%s10330_s23 + $0x260] sm:$0xff]  }
0x1fc6   : > { %8946 = vmatpush3.bf16.msra.mxu1 %v9669_v25  ;;  %v9707_v25 = vld [vmem:[%s10330_s23 + $0x2e0] sm:$0xff]  }
0x1fc7   : > { %8947 = vmatprep.subr.bf16.mxu1 %v9671_v58  ;;  %8926 = vmatpush3.bf16.msra.mxu0 %v9672_v3  ;;  %v9708_v58 = vld [vmem:[%s10330_s23 + $0x220] sm:$0xff]  }
0x1fc8   : > { %8927 = vmatprep.subr.bf16.mxu0 %v9674_v45  ;;  %v9709_v3 = vld [vmem:[%s10330_s23 + $0x2a0] sm:$0xff]   ;;  %v9710_v45 = vld [vmem:[%s10330_s23 + $0x268] sm:$0xff]  }
0x1fca   : > { %8948 = vmatpush3.bf16.msra.mxu1 %v9673_v63  ;;  %v9711_v63 = vld [vmem:[%s10330_s23 + $0x2e8] sm:$0xff]  }
0x1fcb   : > { %8949 = vmatprep.subr.bf16.mxu1 %v9675_v33  ;;  %8928 = vmatpush3.bf16.msra.mxu0 %v9676_v27  ;;  %v9712_v33 = vld [vmem:[%s10330_s23 + $0x228] sm:$0xff]  }
0x1fcc   : > { %8929 = vmatprep.subr.bf16.mxu0 %v9678_v14  ;;  %v9713_v27 = vld [vmem:[%s10330_s23 + $0x2a8] sm:$0xff]   ;;  %v9714_v14 = vld [vmem:[%s10330_s23 + $0x270] sm:$0xff]  }
0x1fce   : > { %8950 = vmatpush3.bf16.msra.mxu1 %v9677_v22  ;;  %v9715_v22 = vld [vmem:[%s10330_s23 + $0x2f0] sm:$0xff]  }
0x1fcf   : > { %8951 = vmatprep.subr.bf16.mxu1 %v9679_v56  ;;  %8930 = vmatpush3.bf16.msra.mxu0 %v9680_v4  ;;  %v9716_v56 = vld [vmem:[%s10330_s23 + $0x230] sm:$0xff]  }
0x1fd0   : > { %8931 = vmatprep.subr.bf16.mxu0 %v9682_v5  ;;  %v9717_v4 = vld [vmem:[%s10330_s23 + $0x2b0] sm:$0xff]   ;;  %v9718_v5 = vld [vmem:[%s10330_s23 + $0x278] sm:$0xff]  }
0x1fd2   : > { %8952 = vmatpush3.bf16.msra.mxu1 %v9681_v1  ;;  %v9719_v1 = vld [vmem:[%s10330_s23 + $0x2f8] sm:$0xff]  }
0x1fd3   : > { %8953 = vmatprep.subr.bf16.mxu1 %v9683_v29  ;;  %8932 = vmatpush3.bf16.msra.mxu0 %v9684_v61  ;;  %v9720_v29 = vld [vmem:[%s10330_s23 + $0x238] sm:$0xff]  }
0x1fd4   : > { %8933 = vmatprep.subr.bf16.mxu0 %v9686_v23  ;;  %v9721_v61 = vld [vmem:[%s10330_s23 + $0x2b8] sm:$0xff]   ;;  %v11402_v23 = vld [vmem:[%s10321_s16 + $0x30] sm:$0xff] }
0x1fd6   : > { %8954 = vmatpush3.bf16.msra.mxu1 %v9685_v44  ;;  %v8610_v44 = vcombine.high %v11402_v23, %v11405_v28 }
0x1fd7   : > { %8955 = vmatprep.subr.bf16.mxu1 %v9687_v40  ;;  %8934 = vmatpush3.bf16.msra.mxu0 %v9688_v12  ;;  %v11413_v40 = vld [vmem:[%s10321_s16 + $0x98] sm:$0xff]  ;;  %v8609_v12 = vcombine.low %v11402_v23, %v11405_v28 }
0x1fd8   : > { %5286 = vmatprep.subr.bf16.mxu0 %v8564_v50  ;;  %v8611_v50 = vcombine.low %v11408_v34, %v11413_v40  ;;  %v8612_v49 = vcombine.high %v11408_v34, %v11413_v40  ;;  %v9722_v34 = vld [vmem:[%s10330_s23 + $0x340] sm:$0xff]  }
0x1fd9   : > { %v9723_v40 = vld [vmem:[%s10330_s23 + $0x3c0] sm:$0xff]  }
0x1fda   : > { %8956 = vmatpush3.bf16.msra.mxu1 %v9689_v43  ;;  %5143 = vmatmul.mubr.bf16.vlgmr.msra.gmra.mrb[40].mxu0 %v4112_v8  ;;  %v8574_v8 = vcombine.high %v5201_v7, %v5203_v51 }
0x1fdb   : > { %5329 = vmatprep.subr.bf16.mxu1 %v8566_v53  ;;  %5287 = vmatpush1.bf16.msra.mxu0 %v8563_v36 }
0x1fdc   : > { %5288 = vmatprep.subr.bf16.mxu0 %v8568_v16  ;;  %5318 = vmatprep.mubr.bf16.mxu0 %v12284_v57 }
0x1fdd   : > { %5184 = vmatmul.mubr.bf16.vlgmr.msra.gmra.mrb[40].mxu1 %v4114_v21  ;;  %v9691_v21 = vld [vmem:[%s10330_s23 + $0x2c0] sm:$0xff]  }
0x1fde   : > { %5330 = vmatpush1.bf16.msra.mxu1 %v8565_v60  ;;  %5361 = vmatprep.mubr.bf16.mxu1 %v12284_v57 }
0x1fdf   : > { %5331 = vmatprep.subr.bf16.mxu1 %v8570_v32  ;;  %5289 = vmatpush1.bf16.msra.mxu0 %v8567_v39 }
0x1fe0   : > { %5290 = vmatprep.subr.bf16.mxu0 %v8572_v9 }
0x1fe2   : > { %5332 = vmatpush1.bf16.msra.mxu1 %v8569_v24 }
0x1fe3   : > { %5333 = vmatprep.subr.bf16.mxu1 %v8574_v8  ;;  %5291 = vmatpush1.bf16.msra.mxu0 %v8571_v15 }
0x1fe4   : > { %8963 = vmatprep.subr.bf16.mxu0 %v9690_v47 }
0x1fe6   : > { %5334 = vmatpush1.bf16.msra.mxu1 %v8573_v0  ;;  %8575 = vmatmul.mubr.msk.bf16.vlgmr.msra.gmra.mrb[44].mxu0 %vm928_vm1, %v12285_v41 }
0x1fe7   : > { %8985 = vmatprep.subr.bf16.mxu1 %v9691_v21  ;;  %8964 = vmatpush3.bf16.msra.mxu0 %v9692_v42 }
0x1fe8   : > { %8965 = vmatprep.subr.bf16.mxu0 %v9694_v46 }
0x1fe9   : > { %8576 = vmatmul.mubr.msk.bf16.vlgmr.msra.gmra.mrb[44].mxu1 %vm928_vm1, %v12285_v41 }
0x1fea   : > { %8986 = vmatpush3.bf16.msra.mxu1 %v9693_v13 }
0x1feb   : > { %8987 = vmatprep.subr.bf16.mxu1 %v9695_v17  ;;  %8966 = vmatpush3.bf16.msra.mxu0 %v9696_v55  ;;  %v5204_v55 = vld [vmem:[%s10315_s6 + $0x8] sm:$0xf] }
0x1fec   : > { %8967 = vmatprep.subr.bf16.mxu0 %v9698_v11 }
0x1fee   : > { %8988 = vmatpush3.bf16.msra.mxu1 %v9697_v38 }
0x1fef   : > { %8989 = vmatprep.subr.bf16.mxu1 %v9699_v26  ;;  %8968 = vmatpush3.bf16.msra.mxu0 %v9700_v62  ;;  %v12286_v62 = vld [vmem:[#allocation5_spill] sm:$0xff] }
0x1ff0   : > { %8969 = vmatprep.subr.bf16.mxu0 %v9702_v20  ;;  %v12287_v20 = vld [vmem:[#allocation6_spill] sm:$0xff] }
0x1ff2   : > { %8990 = vmatpush3.bf16.msra.mxu1 %v9701_v6  ;;  %v5209_v6 = vrot.slane %v5204_v55, %v12286_v62 }
0x1ff3   : > { %8991 = vmatprep.subr.bf16.mxu1 %v9703_v59  ;;  %8970 = vmatpush3.bf16.msra.mxu0 %v9704_v10  ;;  %v5213_v59 = vrot.slane %v5204_v55, %v12287_v20 }
0x1ff4   : > { %8971 = vmatprep.subr.bf16.mxu0 %v9706_v54 }
0x1ff6   : > { %8992 = vmatpush3.bf16.msra.mxu1 %v9705_v37  ;;  %v12288_v37 = vld [vmem:[#allocation10_spill] sm:$0xff] }
0x1ff7   : > { %8993 = vmatprep.subr.bf16.mxu1 %v9707_v25  ;;  %8972 = vmatpush3.bf16.msra.mxu0 %v9708_v58  ;;  %v5217_v54 = vrot.slane %v5204_v55, %v12288_v37 }
0x1ff8   : > { %8973 = vmatprep.subr.bf16.mxu0 %v9710_v45 }
0x1ffa   : > { %8994 = vmatpush3.bf16.msra.mxu1 %v9709_v3  ;;  %v5221_v3 = vrot.slane %v5204_v55, %v10916_v30 }
0x1ffb   : > { %8995 = vmatprep.subr.bf16.mxu1 %v9711_v63  ;;  %8974 = vmatpush3.bf16.msra.mxu0 %v9712_v33 }
0x1ffc   : > { %8975 = vmatprep.subr.bf16.mxu0 %v9714_v14 }
0x1ffe   : > { %8996 = vmatpush3.bf16.msra.mxu1 %v9713_v27 }
0x1fff   : > { %8997 = vmatprep.subr.bf16.mxu1 %v9715_v22  ;;  %8976 = vmatpush3.bf16.msra.mxu0 %v9716_v56 }
0x2000   : > { %8977 = vmatprep.subr.bf16.mxu0 %v9718_v5 }
0x2002   : > { %8998 = vmatpush3.bf16.msra.mxu1 %v9717_v4 }
0x2003   : > { %8999 = vmatprep.subr.bf16.mxu1 %v9719_v1  ;;  %8978 = vmatpush3.bf16.msra.mxu0 %v9720_v29 }
0x2004   : > { %6026 = vmatprep.subr.bf16.mxu0 %v8610_v44 }
0x2006   : > { %9000 = vmatpush3.bf16.msra.mxu1 %v9721_v61 }
0x2007   : > { %6069 = vmatprep.subr.bf16.mxu1 %v8612_v49 }
0x208d   : > { %v8891_v2 = vpop.f32.mrb[36].mxu0 }
0x208e   : > { %v8892_v31 = vpop.f32.mrb[37].mxu0 }
0x208f   : > { %v8893_v48 = vadd.f32 %v8892_v31, %v8891_v2  ;;  %v8894_v43 = vpop.f32.mrb[38].mxu0 }
0x2090   : > { %v8913_v36 = vpop.f32.mrb[36].mxu1  ;;  %v8895_v53 = vpop.f32.mrb[39].mxu0 }
0x2091   : > { %v8914_v16 = vpop.f32.mrb[37].mxu1  ;;  %v8896_v52 = vadd.f32 %v8895_v53, %v8894_v43 }
0x2092   : > { %v8915_v19 = vadd.f32 %v8914_v16, %v8913_v36  ;;  %v8916_v35 = vpop.f32.mrb[38].mxu1 }
0x2093   : > { %v8917_v18 = vpop.f32.mrb[39].mxu1 }
0x2094   : > { %v4912_v60 = vadd.f32 %v8915_v19, %v8893_v48  ;;  %v8918_v39 = vadd.f32 %v8917_v18, %v8916_v35 }
0x2096   : > { %v4915_v32 = vadd.f32 %v8918_v39, %v8896_v52 }
0x20ad   : > { %v8935_v9 = vpop.f32.mrb[40].mxu0 }
0x20ae   : > { %v8936_v7 = vpop.f32.mrb[41].mxu0 }
0x20af   : > { %v8937_v51 = vadd.f32 %v8936_v7, %v8935_v9  ;;  %v8938_v24 = vpop.f32.mrb[42].mxu0 }
0x20b0   : > { %v8957_v15 = vpop.f32.mrb[40].mxu1  ;;  %v8939_v8 = vpop.f32.mrb[43].mxu0 }
0x20b1   : > { %v5145_v0 = vadd.f32 %v8937_v51, %v4912_v60  ;;  %v8958_v47 = vpop.f32.mrb[41].mxu1  ;;  %v8940_v21 = vadd.f32 %v8939_v8, %v8938_v24 }
0x20b2   : > { %v8959_v42 = vadd.f32 %v8958_v47, %v8957_v15  ;;  %v8960_v13 = vpop.f32.mrb[42].mxu1 }
0x20b3   : > { %v5148_v46 = vadd.f32 %v8940_v21, %v4915_v32  ;;  %v8961_v17 = vpop.f32.mrb[43].mxu1 }
0x20b4   : > { %v11422_v38 = vadd.f32 %v8959_v42, %v5145_v0  ;;  %v8962_v11 = vadd.f32 %v8961_v17, %v8960_v13 }
0x20b6   : > { %v11424_v26 = vadd.f32 %v8962_v11, %v5148_v46 }
0x20b9   : > { %v5320_v10 = vpop.f32.mrb[44].mxu0 }
0x20ba   : > { %v11429_v25 = vadd.f32 %v5320_v10, %v5209_v6  ;;  %v5322_v58 = vpop.f32.mrb[45].mxu0 }
0x20bb   : > { %v11432_v45 = vadd.f32 %v5322_v58, %v5213_v59  ;;  %v5324_v63 = vpop.f32.mrb[46].mxu0 }
0x20bc   : > { %v11435_v33 = vmul.f32 0.70710677, %v11429_v25  ;;  %v5363_v27 = vpop.f32.mrb[44].mxu1  ;;  %v5326_v14 = vpop.f32.mrb[47].mxu0  ;;  %v11454_v53 = vadd.f32 %v5324_v63, %v5209_v6 }
0x20bd   : > { %v11437_v22 = vadd.f32 %v5363_v27, %v5217_v54  ;;  %v11440_v56 = vmul.f32 0.70710677, %v11432_v45  ;;  %v5365_v4 = vpop.f32.mrb[45].mxu1  ;;  %v11456_v60 = vadd.f32 %v5326_v14, %v5213_v59 }
0x20be   : > { %v5388_v5 = vand.u32 2147483647, %v11435_v33  ;;  %v11443_v1 = vadd.f32 %v5365_v4, %v5221_v3  ;;  %v5367_v29 = vpop.f32.mrb[46].mxu1  ;;  %v11459_v32 = vmul.f32 0.70710677, %v11454_v53  ;;  %vm5548_vm3 = vcmp.ge.f32.partialorder %v11435_v33, 0.0 }
0x20bf   : > { %v11446_v61 = vmul.f32 0.70710677, %v11437_v22  ;;  %v5389_v44 = vand.u32 2147483647, %v11440_v56  ;;  %v5369_v16 = vpop.f32.mrb[47].mxu1  ;;  %v11461_v7 = vadd.f32 %v5367_v29, %v5217_v54  ;;  %vm5549_vm6 = vcmp.ge.f32.partialorder %v11440_v56, 0.0 }
0x20c0   : > { %v5396_v49 = vmul.f32 0.3275911, %v5388_v5  ;;  %v11450_v2 = vmul.f32 0.70710677, %v11443_v1  ;;  %v5500_v9 = vsub.f32 0.0, %v5388_v5  ;;  %v11470_v47 = vadd.f32 %v5369_v16, %v5221_v3 }
0x20c1   : > { %v5390_v31 = vand.u32 2147483647, %v11446_v61  ;;  %v5397_v48 = vmul.f32 0.3275911, %v5389_v44  ;;  %v5392_v51 = vand.u32 2147483647, %v11459_v32 }
0x20c2   : > { %v5404_v43 = vadd.f32 1.0, %v5396_v49  ;;  %v5391_v36 = vand.u32 2147483647, %v11450_v2  ;;  %v5501_v24 = vsub.f32 0.0, %v5389_v44  ;;  %v11465_v15 = vmul.f32 0.70710677, %v11461_v7 }
0x20c3   : > { %v5398_v52 = vmul.f32 0.3275911, %v5390_v31  ;;  %v5405_v19 = vadd.f32 1.0, %v5397_v48  ;;  %v11468_v8 = vmul.f32 0.70710677, %v11456_v60  ;;  %v5508_v21 = vmul.f32 %v5500_v9, %v5388_v5 }
0x20c4   : > { %9986 = vrcp.f32 %v5404_v43  ;;  %v5399_v35 = vmul.f32 0.3275911, %v5391_v36  ;;  %v5400_v0 = vmul.f32 0.3275911, %v5392_v51  ;;  %v5394_v42 = vand.u32 2147483647, %v11465_v15 }
0x20c5   : > { %v5406_v18 = vadd.f32 1.0, %v5398_v52  ;;  %9988 = vrcp.f32 %v5405_v19  ;;  %v11474_v13 = vand.u32 2147483647, %v11468_v8  ;;  %v5502_v46 = vsub.f32 0.0, %v5390_v31 }
0x20c6   : > { %v5407_v39 = vadd.f32 1.0, %v5399_v35  ;;  %v5503_v17 = vsub.f32 0.0, %v5391_v36  ;;  %v5408_v55 = vadd.f32 1.0, %v5400_v0  ;;  %v5509_v11 = vmul.f32 %v5501_v24, %v5389_v44 }
0x20c7   : > { %9990 = vrcp.f32 %v5406_v18  ;;  %v5402_v6 = vmul.f32 0.3275911, %v5394_v42  ;;  %v5401_v59 = vmul.f32 0.3275911, %v11474_v13  ;;  %v5504_v54 = vsub.f32 0.0, %v5392_v51 }
0x20c8   : > { %9992 = vrcp.f32 %v5407_v39  ;;  %v11480_v58 = vmul.f32 0.70710677, %v11470_v47  ;;  %v5516_v27 = vmul.f32 1.442695, %v5508_v21  ;;  %v5510_v5 = vmul.f32 %v5502_v46, %v5390_v31 }
0x20c9   : > { %9994 = vrcp.f32 %v5408_v55  ;;  %v5410_v14 = vadd.f32 1.0, %v5402_v6  ;;  %v5409_v4 = vadd.f32 1.0, %v5401_v59  ;;  %v5511_v44 = vmul.f32 %v5503_v17, %v5391_v36 }
0x20ca   : > { %v11487_v49 = vand.u32 2147483647, %v11480_v58  ;;  %v5518_v16 = vmul.f32 1.442695, %v5509_v11  ;;  %v5512_v35 = vmul.f32 %v5504_v54, %v5392_v51  ;;  %v5520_v9 = vmul.f32 1.442695, %v5510_v5 }
0x20cb   : > { %9996 = vrcp.f32 %v5410_v14  ;;  %v5522_v0 = vmul.f32 1.442695, %v5511_v44  ;;  %v5506_v6 = vsub.f32 0.0, %v5394_v42  ;;  %vm5550_vm4 = vcmp.ge.f32.partialorder %v11446_v61, 0.0 }
0x20cc   : > { %9998 = vrcp.f32 %v5409_v4  ;;  %v5403_v31 = vmul.f32 0.3275911, %v11487_v49  ;;  %v5524_v11 = vmul.f32 1.442695, %v5512_v35  ;;  %vm5552_vm5 = vcmp.ge.f32.partialorder %v11459_v32, 0.0 }
0x20cd   : > { %10000 = vpow2.f32 %v5516_v27  ;;  %vm5554_vm7 = vcmp.ge.f32.partialorder %v11465_v15, 0.0  ;;  %v5374_v56 = vmul.f32 0.5, %v11437_v22  ;;  %vm5551_vm8 = vcmp.ge.f32.partialorder %v11450_v2, 0.0 }
0x20ce   : > { %v11477_v10 = vpop.eup %9986  ;;  %10002 = vpow2.f32 %v5518_v16  ;;  %v5411_v17 = vadd.f32 1.0, %v5403_v31  ;;  %vm5553_vm9 = vcmp.ge.f32.partialorder %v11468_v8, 0.0  ;;  %v5373_v22 = vmul.f32 0.5, %v11432_v45  ;;  %v5936_v8 = vld [vmem:[%s10321_s16 + $0xf0] sm:$0xff] }
0x20cf   : > { %v11482_v3 = vpop.eup %9988  ;;  %v5428_v63 = vmul.f32 1.0614054, %v11477_v10  ;;  %vm5555_vm10 = vcmp.ge.f32.partialorder %v11480_v58, 0.0  ;;  %v5379_v45 = vmul.f32 0.5, %v11470_v47 }
0x20d0   : > { %v5429_v29 = vmul.f32 1.0614054, %v11482_v3  ;;  %10004 = vrcp.f32 %v5411_v17 }
0x20d1   : > { %v11489_v48 = vpop.eup %9990  ;;  %v5436_v43 = vadd.f32 -1.4531521, %v5428_v63  ;;  %v5505_v63 = vsub.f32 0.0, %v11474_v13  ;;  %10006 = vpow2.f32 %v5520_v9 }
0x20d2   : > { %v5430_v52 = vmul.f32 1.0614054, %v11489_v48  ;;  %v5437_v19 = vadd.f32 -1.4531521, %v5429_v29  ;;  %v11494_v39 = vpop.eup %9992  ;;  %10008 = vpow2.f32 %v5522_v0 }
0x20d3   : > { %v5444_v18 = vmul.f32 %v11477_v10, %v5436_v43  ;;  %v5431_v46 = vmul.f32 1.0614054, %v11494_v39  ;;  %v11501_v27 = vpop.eup %9994  ;;  %10010 = vpow2.f32 %v5524_v11 }
0x20d4   : > { %v5438_v36 = vadd.f32 -1.4531521, %v5430_v52  ;;  %v5445_v24 = vmul.f32 %v11482_v3, %v5437_v19  ;;  %v5432_v44 = vmul.f32 1.0614054, %v11501_v27  ;;  %v5514_v52 = vmul.f32 %v5506_v6, %v5394_v42 }
0x20d5   : > { %v5452_v21 = vadd.f32 1.4214138, %v5444_v18  ;;  %v5439_v54 = vadd.f32 -1.4531521, %v5431_v46  ;;  %v11507_v19 = vpop.eup %9996  ;;  %v5507_v46 = vsub.f32 0.0, %v11487_v49 }
0x20d6   : > { %v5446_v51 = vmul.f32 %v11489_v48, %v5438_v36  ;;  %v5453_v55 = vadd.f32 1.4214138, %v5445_v24  ;;  %v5440_v31 = vadd.f32 -1.4531521, %v5432_v44  ;;  %v5513_v36 = vmul.f32 %v5505_v63, %v11474_v13  ;;  %v11511_v9 = vpop.eup %9998 }
0x20d7   : > { %v5460_v59 = vmul.f32 %v11477_v10, %v5452_v21  ;;  %v5447_v29 = vmul.f32 %v11494_v39, %v5439_v54  ;;  %v5434_v21 = vmul.f32 1.0614054, %v11507_v19  ;;  %v10001_v17 = vpop.eup %10000  ;;  %v5433_v11 = vmul.f32 1.0614054, %v11511_v9 }
0x20d8   : > { %v5454_v14 = vadd.f32 1.4214138, %v5446_v51  ;;  %v5461_v4 = vmul.f32 %v11482_v3, %v5453_v55  ;;  %v5448_v55 = vmul.f32 %v11501_v27, %v5440_v31  ;;  %v5528_v54 = vmul.f32 1.442695, %v5514_v52  ;;  %v10003_v63 = vpop.eup %10002 }
0x20d9   : > { %v5468_v5 = vadd.f32 -0.28449672, %v5460_v59  ;;  %v5455_v18 = vadd.f32 1.4214138, %v5447_v29  ;;  %v5442_v59 = vadd.f32 -1.4531521, %v5434_v21 }
0x20da   : > { %v5462_v43 = vmul.f32 %v11489_v48, %v5454_v14  ;;  %v5469_v16 = vadd.f32 -0.28449672, %v5461_v4  ;;  %v5441_v29 = vadd.f32 -1.4531521, %v5433_v11  ;;  %10012 = vpow2.f32 %v5528_v54 }
0x20db   : > { %v5476_v35 = vmul.f32 %v11477_v10, %v5468_v5  ;;  %v5463_v42 = vmul.f32 %v11494_v39, %v5455_v18  ;;  %v5456_v5 = vadd.f32 1.4214138, %v5448_v55  ;;  %v11523_v18 = vpop.eup %10004 }
0x20dc   : > { %v5470_v24 = vadd.f32 -0.28449672, %v5462_v43  ;;  %v5477_v0 = vmul.f32 %v11482_v3, %v5469_v16  ;;  %v5450_v43 = vmul.f32 %v11507_v19, %v5442_v59  ;;  %v5526_v16 = vmul.f32 1.442695, %v5513_v36  ;;  %v10007_v21 = vpop.eup %10006 }
0x20dd   : > { %v5484_v51 = vadd.f32 0.2548296, %v5476_v35  ;;  %v5471_v4 = vadd.f32 -0.28449672, %v5463_v42  ;;  %v5515_v35 = vmul.f32 %v5507_v46, %v11487_v49  ;;  %v5449_v52 = vmul.f32 %v11511_v9, %v5441_v29  ;;  %v10009_v36 = vpop.eup %10008 }
0x20de   : > { %v5478_v6 = vmul.f32 %v11489_v48, %v5470_v24  ;;  %v5485_v13 = vadd.f32 0.2548296, %v5477_v0  ;;  %v5464_v0 = vmul.f32 %v11501_v27, %v5456_v5  ;;  %v5458_v42 = vadd.f32 1.4214138, %v5450_v43 }
0x20df   : > { %v5492_v14 = vmul.f32 %v11477_v10, %v5484_v51  ;;  %v5479_v24 = vmul.f32 %v11494_v39, %v5471_v4  ;;  %v5435_v55 = vmul.f32 1.0614054, %v11523_v18  ;;  %10014 = vpow2.f32 %v5526_v16 }
0x20e0   : > { %v5486_v44 = vadd.f32 0.2548296, %v5478_v6  ;;  %v5493_v51 = vmul.f32 %v11482_v3, %v5485_v13  ;;  %v5472_v46 = vadd.f32 -0.28449672, %v5464_v0  ;;  %v5466_v59 = vmul.f32 %v11507_v19, %v5458_v42 }
0x20e1   : > { %v5532_v31 = vmul.f32 %v10001_v17, %v5492_v14  ;;  %v5487_v49 = vadd.f32 0.2548296, %v5479_v24  ;;  %v10011_v17 = vpop.eup %10010  ;;  %v5457_v14 = vadd.f32 1.4214138, %v5449_v52  ;;  %v5443_v5 = vadd.f32 -1.4531521, %v5435_v55 }
0x20e2   : > { %v5494_v10 = vmul.f32 %v11489_v48, %v5486_v44  ;;  %v5480_v4 = vmul.f32 %v11501_v27, %v5472_v46  ;;  %v5533_v48 = vmul.f32 %v10003_v63, %v5493_v51  ;;  %v5474_v29 = vadd.f32 -0.28449672, %v5466_v59 }
0x20e3   : > { %v5540_v11 = vsub.f32 1.0, %v5532_v31  ;;  %v5465_v3 = vmul.f32 %v11511_v9, %v5457_v14  ;;  %v5530_v13 = vmul.f32 1.442695, %v5515_v35  ;;  %v5495_v43 = vmul.f32 %v11494_v39, %v5487_v49 }
0x20e4   : > { %v5534_v6 = vmul.f32 %v10007_v21, %v5494_v10  ;;  %v5488_v31 = vadd.f32 0.2548296, %v5480_v4  ;;  %v5451_v54 = vmul.f32 %v11523_v18, %v5443_v5  ;;  %v5482_v0 = vmul.f32 %v11507_v19, %v5474_v29 }
0x20e5   : > { %v5556_v44 = vsub.f32 0.0, %v5540_v11  ;;  %v5473_v21 = vadd.f32 -0.28449672, %v5465_v3  ;;  %10016 = vpow2.f32 %v5530_v13  ;;  %v5541_v51 = vsub.f32 1.0, %v5533_v48 }
0x20e6   : > { %v5542_v24 = vsub.f32 1.0, %v5534_v6  ;;  %v5496_v52 = vmul.f32 %v11501_v27, %v5488_v31  ;;  %v5490_v16 = vadd.f32 0.2548296, %v5482_v0  ;;  %v5459_v63 = vadd.f32 1.4214138, %v5451_v54  ;;  %v10013_v6 = vpop.eup %10012 }
0x20e7   : > { %v5564_v10 = vsel %vm5548_vm3, %v5540_v11, %v5556_v44  ;;  %v5535_v35 = vmul.f32 %v10009_v36, %v5495_v43  ;;  %v5481_v49 = vmul.f32 %v11511_v9, %v5473_v21  ;;  %v5372_v27 = vmul.f32 0.5, %v11429_v25 }
0x20e8   : > { %v5536_v42 = vmul.f32 %v10011_v17, %v5496_v52  ;;  %v5558_v55 = vsub.f32 0.0, %v5542_v24  ;;  %v5498_v39 = vmul.f32 %v11507_v19, %v5490_v16  ;;  %v5467_v46 = vmul.f32 %v11523_v18, %v5459_v63 }
0x20e9   : > { %v5489_v11 = vadd.f32 0.2548296, %v5481_v49  ;;  %v10015_v36 = vpop.eup %10014  ;;  %v5572_v17 = vadd.f32 1.0, %v5564_v10  ;;  %v5557_v4 = vsub.f32 0.0, %v5541_v51  ;;  %v5543_v5 = vsub.f32 1.0, %v5535_v35 }
0x20ea   : > { %v5544_v33 = vsub.f32 1.0, %v5536_v42  ;;  %v5538_v59 = vmul.f32 %v10013_v6, %v5498_v39  ;;  %v5475_v14 = vadd.f32 -0.28449672, %v5467_v46  ;;  %v5566_v48 = vsel %vm5550_vm4, %v5542_v24, %v5558_v55 }
0x20eb   : > { %v5497_v3 = vmul.f32 %v11511_v9, %v5489_v11  ;;  %v5376_v25 = vmul.f32 0.5, %v11454_v53  ;;  %v5580_v54 = vmul.f32 %v5572_v17, %v5372_v27  ;;  %v5574_v0 = vadd.f32 1.0, %v5566_v48  ;;  %v5937_v48 = vld [vmem:[%s10321_s16 + $0xf8] sm:$0xff] }
0x20ec   : > { %v5560_v19 = vsub.f32 0.0, %v5544_v33  ;;  %v5546_v29 = vsub.f32 1.0, %v5538_v59  ;;  %v5483_v13 = vmul.f32 %v11523_v18, %v5475_v14  ;;  %v5565_v52 = vsel %vm5549_vm6, %v5541_v51, %v5557_v4 }
0x20ed   : > { %v5537_v43 = vmul.f32 %v10015_v36, %v5497_v3  ;;  %v5559_v24 = vsub.f32 0.0, %v5543_v5  ;;  %v5378_v53 = vmul.f32 0.5, %v11461_v7  ;;  %v5582_v39 = vmul.f32 %v5574_v0, %v5374_v56  ;;  %v5938_v36 = vld [vmem:[%s10321_s16 + $0x150] sm:$0xff]  ;;  %v9726_v0 = vld [vmem:[%s10330_s23 + $0x348] sm:$0xff]   ;;  %v9734_v56 = vld [vmem:[%s10330_s23 + $0x358] sm:$0xff]  }
0x20ee   : > { %v5568_v61 = vsel %vm5552_vm5, %v5544_v33, %v5560_v19  ;;  %v5562_v44 = vsub.f32 0.0, %v5546_v29  ;;  %v5491_v31 = vadd.f32 0.2548296, %v5483_v13  ;;  %v5573_v51 = vadd.f32 1.0, %v5565_v52  ;;  %v5939_v13 = vld [vmem:[%s10321_s16 + $0x158] sm:$0xff]  ;;  %v9727_v52 = vld [vmem:[%s10330_s23 + $0x3c8] sm:$0xff]  }
0x20ef   : > { %v5576_v32 = vadd.f32 1.0, %v5568_v61  ;;  %v10017_v21 = vpop.eup %10016  ;;  %v5545_v63 = vsub.f32 1.0, %v5537_v43  ;;  %v5567_v46 = vsel %vm5551_vm8, %v5543_v5, %v5559_v24  ;;  %v5377_v7 = vmul.f32 0.5, %v11456_v60  ;;  %v5942_v61 = vld [vmem:[%s10321_s16 + $0x210] sm:$0xff]  ;;  %v5943_v43 = vld [vmem:[%s10321_s16 + $0x218] sm:$0xff]  ;;  %v9728_v24 = vld [vmem:[%s10330_s23 + $0x308] sm:$0xff]  }
0x20f0   : > { %v5570_v9 = vsel %vm5554_vm7, %v5546_v29, %v5562_v44  ;;  %v5499_v10 = vmul.f32 %v11523_v18, %v5491_v31  ;;  %v5581_v59 = vmul.f32 %v5573_v51, %v5373_v22  ;;  %v5575_v11 = vadd.f32 1.0, %v5567_v46  ;;  %v5941_v44 = vld [vmem:[%s10321_s16 + $0x1b8] sm:$0xff]  ;;  %v9741_v51 = vld [vmem:[%s10330_s23 + $0x3a0] sm:$0xff]   ;;  %v9743_v46 = vld [vmem:[%s10330_s23 + $0x3e8] sm:$0xff]  }
0x20f1   : > { %v5584_v16 = vmul.f32 %v5576_v32, %v5376_v25  ;;  %v5578_v35 = vadd.f32 1.0, %v5570_v9  ;;  %v5561_v42 = vsub.f32 0.0, %v5545_v63  ;;  %v5375_v4 = vmul.f32 0.5, %v11443_v1  ;;  %v5940_v25 = vld [vmem:[%s10321_s16 + $0x1b0] sm:$0xff] }
0x20f2   : > { %v5539_v55 = vmul.f32 %v10017_v21, %v5499_v10  ;;  %v8614_v60 = vcombine.high %v5936_v8, %v5938_v36  ;;  %v8613_v1 = vcombine.low %v5936_v8, %v5938_v36  ;;  %v8616_v47 = vcombine.high %v5937_v48, %v5939_v13  ;;  %v9729_v21 = vld [vmem:[%s10330_s23 + $0x388] sm:$0xff]   ;;  %v9731_v9 = vld [vmem:[%s10330_s23 + $0x3d0] sm:$0xff]   ;;  %v11613_v8 = vld [vmem:[%s10321_s16 + $0x40] sm:$0xff] }
0x20f3   : > { %v5588_v15 = vpack.c.bf16 %v5584_v16, %v5580_v54  ;;  %v5586_v49 = vmul.f32 %v5578_v35, %v5378_v53  ;;  %v5569_v6 = vsel %vm5553_vm9, %v5545_v63, %v5561_v42  ;;  %v5583_v29 = vmul.f32 %v5575_v11, %v5375_v4  ;;  %v9725_v54 = vld [vmem:[%s10330_s23 + $0x380] sm:$0xff]   ;;  %v9730_v16 = vld [vmem:[%s10330_s23 + $0x350] sm:$0xff]   ;;  %v9735_v53 = vld [vmem:[%s10330_s23 + $0x3d8] sm:$0xff]  }
0x20f4   : > { %v5547_v18 = vsub.f32 1.0, %v5539_v55  ;;  %v5577_v2 = vadd.f32 1.0, %v5569_v6  ;;  %v8618_v32 = vcombine.high %v5940_v25, %v5942_v61  ;;  %v8615_v31 = vcombine.low %v5937_v48, %v5939_v13  ;;  %v9732_v63 = vld [vmem:[%s10330_s23 + $0x310] sm:$0xff]   ;;  %v9736_v35 = vld [vmem:[%s10330_s23 + $0x318] sm:$0xff]   ;;  %v9738_v42 = vld [vmem:[%s10330_s23 + $0x360] sm:$0xff]  }
0x20f5   : > { %v5590_v27 = vpack.c.bf16 %v5586_v49, %v5582_v39  ;;  %v8617_v23 = vcombine.low %v5940_v25, %v5942_v61  ;;  %v8620_v28 = vcombine.high %v5941_v44, %v5943_v43  ;;  %v9733_v10 = vld [vmem:[%s10330_s23 + $0x390] sm:$0xff]   ;;  %v9739_v55 = vld [vmem:[%s10330_s23 + $0x3e0] sm:$0xff]   ;;  %v9742_v49 = vld [vmem:[%s10330_s23 + $0x368] sm:$0xff]  }
0x20f6   : > { %v5563_v33 = vsub.f32 0.0, %v5547_v18  ;;  %v5585_v14 = vmul.f32 %v5577_v2, %v5377_v7  ;;  %v9740_v39 = vld [vmem:[%s10330_s23 + $0x320] sm:$0xff]   ;;  %v9744_v6 = vld [vmem:[%s10330_s23 + $0x328] sm:$0xff]   ;;  %v9746_v22 = vld [vmem:[%s10330_s23 + $0x370] sm:$0xff]  }
0x20f7   : > { %v9748_v7 = vld [vmem:[%s10330_s23 + $0x330] sm:$0xff]   ;;  %v9752_v11 = vld [vmem:[%s10330_s23 + $0x338] sm:$0xff]   ;;  %v11616_v36 = vld [vmem:[%s10321_s16 + $0xa0] sm:$0xff] }
0x20f8   : > { %v5571_v17 = vsel %vm5555_vm10, %v5547_v18, %v5563_v33  ;;  %v5589_v19 = vpack.c.bf16 %v5585_v14, %v5581_v59  ;;  %v9745_v18 = vld [vmem:[%s10330_s23 + $0x3a8] sm:$0xff]   ;;  %v9749_v2 = vld [vmem:[%s10330_s23 + $0x3b0] sm:$0xff]   ;;  %v9750_v33 = vld [vmem:[%s10330_s23 + $0x378] sm:$0xff]   ;;  %v8656_v4 = vcombine.high %v11613_v8, %v11616_v36 }
0x20f9   : > { %v5579_v5 = vadd.f32 1.0, %v5571_v17  ;;  %v9751_v59 = vld [vmem:[%s10330_s23 + $0x3f8] sm:$0xff]   ;;  %v11619_v17 = vld [vmem:[%s10321_s16 + $0x48] sm:$0xff] }
0x20fa   : > { %5880 = vmatprep.mubr.bf16.mxu0 %v5589_v19  ;;  %v9753_v14 = vld [vmem:[%s10330_s23 + $0x3b8] sm:$0xff]  }
0x20fb   : > { %v5587_v3 = vmul.f32 %v5579_v5, %v5379_v45  ;;  %5881 = vmatmul.mubr.bf16.vlgmr.msra.gmra.mrb[48].mxu0 %v5588_v15  ;;  %v9737_v15 = vld [vmem:[%s10330_s23 + $0x398] sm:$0xff]   ;;  %v11624_v45 = vld [vmem:[%s10321_s16 + $0xa8] sm:$0xff]  ;;  %v8655_v5 = vcombine.low %v11613_v8, %v11616_v36 }
0x20fc   : > { %6027 = vmatpush1.bf16.msra.mxu0 %v8609_v12  ;;  %6058 = vmatprep.mubr.bf16.mxu0 %v12284_v57  ;;  %v8619_v12 = vcombine.low %v5941_v44, %v5943_v43  ;;  %v8657_v19 = vcombine.low %v11619_v17, %v11624_v45  ;;  %v5944_v44 = vld [vmem:[%s10315_s6 + $0xc] sm:$0xf] }
0x20fd   : > { %v5591_v58 = vpack.c.bf16 %v5587_v3, %v5583_v29  ;;  %6028 = vmatprep.subr.bf16.mxu0 %v8614_v60  ;;  %v8658_v60 = vcombine.high %v11619_v17, %v11624_v45  ;;  %v9754_v17 = vld [vmem:[%s10330_s23 + $0x440] sm:$0xff]  }
0x20fe   : > { %v9755_v45 = vld [vmem:[%s10330_s23 + $0x4c0] sm:$0xff]  }
0x20ff   : > { %5921 = vmatprep.mubr.bf16.mxu1 %v5591_v58 }
0x2100   : > { %5922 = vmatmul.mubr.bf16.vlgmr.msra.gmra.mrb[48].mxu1 %v5590_v27  ;;  %6029 = vmatpush1.bf16.msra.mxu0 %v8613_v1  ;;  %v9747_v27 = vld [vmem:[%s10330_s23 + $0x3f0] sm:$0xff]  }
0x2101   : > { %6070 = vmatpush1.bf16.msra.mxu1 %v8611_v50  ;;  %6030 = vmatprep.subr.bf16.mxu0 %v8618_v32  ;;  %v9724_v50 = vld [vmem:[%s10330_s23 + $0x300] sm:$0xff]  }
0x2102   : > { %6071 = vmatprep.subr.bf16.mxu1 %v8616_v47  ;;  %6101 = vmatprep.mubr.bf16.mxu1 %v12284_v57 }
0x2104   : > { %6031 = vmatpush1.bf16.msra.mxu0 %v8617_v23 }
0x2105   : > { %6072 = vmatpush1.bf16.msra.mxu1 %v8615_v31  ;;  %9007 = vmatprep.subr.bf16.mxu0 %v9722_v34 }
0x2106   : > { %6073 = vmatprep.subr.bf16.mxu1 %v8620_v28  ;;  %v5949_v28 = vrot.slane %v5944_v44, %v12286_v62 }
0x2107   : > { %8621 = vmatmul.mubr.msk.bf16.vlgmr.msra.gmra.mrb[52].mxu0 %vm928_vm1, %v12285_v41 }
0x2108   : > { %9008 = vmatpush3.bf16.msra.mxu0 %v9724_v50 }
0x2109   : > { %6074 = vmatpush1.bf16.msra.mxu1 %v8619_v12  ;;  %9009 = vmatprep.subr.bf16.mxu0 %v9726_v0 }
0x210a   : > { %9029 = vmatprep.subr.bf16.mxu1 %v9723_v40  ;;  %v5953_v40 = vrot.slane %v5944_v44, %v12287_v20 }
0x210c   : > { %8622 = vmatmul.mubr.msk.bf16.vlgmr.msra.gmra.mrb[52].mxu1 %vm928_vm1, %v12285_v41  ;;  %9010 = vmatpush3.bf16.msra.mxu0 %v9728_v24 }
0x210d   : > { %9030 = vmatpush3.bf16.msra.mxu1 %v9725_v54  ;;  %9011 = vmatprep.subr.bf16.mxu0 %v9730_v16  ;;  %v5961_v16 = vrot.slane %v5944_v44, %v10916_v30 }
0x210e   : > { %9031 = vmatprep.subr.bf16.mxu1 %v9727_v52  ;;  %v5957_v52 = vrot.slane %v5944_v44, %v12288_v37 }
0x2110   : > { %9012 = vmatpush3.bf16.msra.mxu0 %v9732_v63 }
0x2111   : > { %9032 = vmatpush3.bf16.msra.mxu1 %v9729_v21  ;;  %9013 = vmatprep.subr.bf16.mxu0 %v9734_v56 }
0x2112   : > { %9033 = vmatprep.subr.bf16.mxu1 %v9731_v9 }
0x2114   : > { %9014 = vmatpush3.bf16.msra.mxu0 %v9736_v35 }
0x2115   : > { %9034 = vmatpush3.bf16.msra.mxu1 %v9733_v10  ;;  %9015 = vmatprep.subr.bf16.mxu0 %v9738_v42 }
0x2116   : > { %9035 = vmatprep.subr.bf16.mxu1 %v9735_v53 }
0x2118   : > { %9016 = vmatpush3.bf16.msra.mxu0 %v9740_v39 }
0x2119   : > { %9036 = vmatpush3.bf16.msra.mxu1 %v9737_v15  ;;  %9017 = vmatprep.subr.bf16.mxu0 %v9742_v49 }
0x211a   : > { %9037 = vmatprep.subr.bf16.mxu1 %v9739_v55 }
0x211c   : > { %9018 = vmatpush3.bf16.msra.mxu0 %v9744_v6 }
0x211d   : > { %9038 = vmatpush3.bf16.msra.mxu1 %v9741_v51  ;;  %9019 = vmatprep.subr.bf16.mxu0 %v9746_v22 }
0x211e   : > { %9039 = vmatprep.subr.bf16.mxu1 %v9743_v46 }
0x2120   : > { %9020 = vmatpush3.bf16.msra.mxu0 %v9748_v7 }
0x2121   : > { %9040 = vmatpush3.bf16.msra.mxu1 %v9745_v18  ;;  %9021 = vmatprep.subr.bf16.mxu0 %v9750_v33 }
0x2122   : > { %9041 = vmatprep.subr.bf16.mxu1 %v9747_v27 }
0x2124   : > { %9022 = vmatpush3.bf16.msra.mxu0 %v9752_v11 }
0x2125   : > { %9042 = vmatpush3.bf16.msra.mxu1 %v9749_v2  ;;  %6766 = vmatprep.subr.bf16.mxu0 %v8656_v4 }
0x2126   : > { %9043 = vmatprep.subr.bf16.mxu1 %v9751_v59 }
0x2129   : > { %9044 = vmatpush3.bf16.msra.mxu1 %v9753_v14 }
0x212a   : > { %6809 = vmatprep.subr.bf16.mxu1 %v8658_v60 }
0x21ce   : > { %v8979_v48 = vpop.f32.mrb[48].mxu0 }
0x21cf   : > { %v8980_v29 = vpop.f32.mrb[49].mxu0 }
0x21d0   : > { %v8981_v3 = vadd.f32 %v8980_v29, %v8979_v48  ;;  %v8982_v13 = vpop.f32.mrb[50].mxu0 }
0x21d1   : > { %v8983_v25 = vpop.f32.mrb[51].mxu0 }
0x21d2   : > { %v8984_v58 = vadd.f32 %v8983_v25, %v8982_v13 }
0x21d3   : > { %v9001_v61 = vpop.f32.mrb[48].mxu1 }
0x21d4   : > { %v9002_v1 = vpop.f32.mrb[49].mxu1 }
0x21d5   : > { %v9003_v47 = vadd.f32 %v9002_v1, %v9001_v61  ;;  %v9004_v32 = vpop.f32.mrb[50].mxu1 }
0x21d6   : > { %v9005_v43 = vpop.f32.mrb[51].mxu1 }
0x21d7   : > { %v5924_v31 = vadd.f32 %v9003_v47, %v8981_v3  ;;  %v9006_v23 = vadd.f32 %v9005_v43, %v9004_v32 }
0x21d9   : > { %v11635_v12 = vadd.f32 %v5924_v31, %v11422_v38  ;;  %v5927_v34 = vadd.f32 %v9006_v23, %v8984_v58 }
0x21da   : > { %v6060_v54 = vpop.f32.mrb[52].mxu0 }
0x21db   : > { %v11639_v50 = vadd.f32 %v5927_v34, %v11424_v26  ;;  %v11641_v0 = vadd.f32 %v6060_v54, %v5949_v28  ;;  %v6062_v24 = vpop.f32.mrb[53].mxu0 }
0x21dc   : > { %v11644_v21 = vadd.f32 %v6062_v24, %v5953_v40  ;;  %v6064_v9 = vpop.f32.mrb[54].mxu0 }
0x21dd   : > { %v11648_v38 = vmul.f32 0.70710677, %v11641_v0  ;;  %v6066_v63 = vpop.f32.mrb[55].mxu0  ;;  %v11656_v15 = vadd.f32 %v6064_v9, %v5949_v28 }
0x21de   : > { %v11651_v56 = vmul.f32 0.70710677, %v11644_v21  ;;  %v11673_v60 = vadd.f32 %v6066_v63, %v5953_v40 }
0x21df   : > { %v6103_v10 = vpop.f32.mrb[52].mxu1  ;;  %v6128_v26 = vand.u32 2147483647, %v11648_v38  ;;  %v11669_v27 = vmul.f32 0.70710677, %v11656_v15  ;;  %vm6288_vm11 = vcmp.ge.f32.partialorder %v11648_v38, 0.0 }
0x21e0   : > { %v11654_v53 = vadd.f32 %v6103_v10, %v5957_v52  ;;  %v6105_v35 = vpop.f32.mrb[53].mxu1  ;;  %v6129_v42 = vand.u32 2147483647, %v11651_v56  ;;  %v11678_v61 = vmul.f32 0.70710677, %v11673_v60  ;;  %vm6289_vm14 = vcmp.ge.f32.partialorder %v11651_v56, 0.0 }
0x21e1   : > { %v11659_v55 = vadd.f32 %v6105_v35, %v5961_v16  ;;  %v6107_v39 = vpop.f32.mrb[54].mxu1  ;;  %v6136_v51 = vmul.f32 0.3275911, %v6128_v26  ;;  %v6132_v4 = vand.u32 2147483647, %v11669_v27  ;;  %v6240_v3 = vsub.f32 0.0, %v6128_v26 }
0x21e2   : > { %v11662_v49 = vmul.f32 0.70710677, %v11654_v53  ;;  %v6137_v46 = vmul.f32 0.3275911, %v6129_v42  ;;  %v6109_v7 = vpop.f32.mrb[55].mxu1  ;;  %v11675_v13 = vadd.f32 %v6107_v39, %v5957_v52  ;;  %v6241_v58 = vsub.f32 0.0, %v6129_v42 }
0x21e3   : > { %v11665_v6 = vmul.f32 0.70710677, %v11659_v55  ;;  %v6144_v18 = vadd.f32 1.0, %v6136_v51  ;;  %v6140_v29 = vmul.f32 0.3275911, %v6132_v4  ;;  %v11683_v47 = vadd.f32 %v6109_v7, %v5961_v16 }
0x21e4   : > { %v6130_v22 = vand.u32 2147483647, %v11662_v49  ;;  %v6145_v2 = vadd.f32 1.0, %v6137_v46  ;;  %v11681_v1 = vmul.f32 0.70710677, %v11675_v13  ;;  %v6248_v44 = vmul.f32 %v6240_v3, %v6128_v26 }
0x21e5   : > { %v6131_v33 = vand.u32 2147483647, %v11665_v6  ;;  %10018 = vrcp.f32 %v6144_v18  ;;  %v6148_v25 = vadd.f32 1.0, %v6140_v29  ;;  %v6133_v32 = vand.u32 2147483647, %v11678_v61 }
0x21e6   : > { %v6138_v59 = vmul.f32 0.3275911, %v6130_v22  ;;  %10020 = vrcp.f32 %v6145_v2  ;;  %v6242_v43 = vsub.f32 0.0, %v6130_v22  ;;  %v6134_v31 = vand.u32 2147483647, %v11681_v1 }
0x21e7   : > { %v6139_v11 = vmul.f32 0.3275911, %v6131_v33  ;;  %v11688_v23 = vmul.f32 0.70710677, %v11683_v47  ;;  %v6141_v34 = vmul.f32 0.3275911, %v6133_v32  ;;  %v6249_v52 = vmul.f32 %v6241_v58, %v6129_v42 }
0x21e8   : > { %v6146_v14 = vadd.f32 1.0, %v6138_v59  ;;  %v6142_v24 = vmul.f32 0.3275911, %v6134_v31  ;;  %v6243_v9 = vsub.f32 0.0, %v6131_v33  ;;  %v6256_v35 = vmul.f32 1.442695, %v6248_v44 }
0x21e9   : > { %v6147_v48 = vadd.f32 1.0, %v6139_v11  ;;  %v6149_v63 = vadd.f32 1.0, %v6141_v34  ;;  %v11697_v10 = vand.u32 2147483647, %v11688_v23  ;;  %v6250_v39 = vmul.f32 %v6242_v43, %v6130_v22 }
0x21ea   : > { %10022 = vrcp.f32 %v6146_v14  ;;  %v6150_v51 = vadd.f32 1.0, %v6142_v24  ;;  %v6244_v7 = vsub.f32 0.0, %v6132_v4  ;;  %v6258_v14 = vmul.f32 1.442695, %v6249_v52 }
0x21eb   : > { %10024 = vrcp.f32 %v6147_v48  ;;  %v6143_v2 = vmul.f32 0.3275911, %v11697_v10  ;;  %v6251_v29 = vmul.f32 %v6243_v9, %v6131_v33  ;;  %v6260_v44 = vmul.f32 1.442695, %v6250_v39 }
0x21ec   : > { %10026 = vrcp.f32 %v6148_v25  ;;  %v6252_v24 = vmul.f32 %v6244_v7, %v6132_v4  ;;  %vm6292_vm12 = vcmp.ge.f32.partialorder %v11669_v27, 0.0  ;;  %vm6290_vm13 = vcmp.ge.f32.partialorder %v11662_v49, 0.0 }
0x21ed   : > { %10028 = vrcp.f32 %v6149_v63  ;;  %v6151_v3 = vadd.f32 1.0, %v6143_v2  ;;  %vm6294_vm15 = vcmp.ge.f32.partialorder %v11681_v1, 0.0  ;;  %vm6293_vm0 = vcmp.ge.f32.partialorder %v11678_v61, 0.0 }
0x21ee   : > { %10030 = vrcp.f32 %v6150_v51  ;;  %v6246_v51 = vsub.f32 0.0, %v6134_v31  ;;  %vm6291_vm2 = vcmp.ge.f32.partialorder %v11665_v6, 0.0  ;;  %vm6295_vm3 = vcmp.ge.f32.partialorder %v11688_v23, 0.0 }
0x21ef   : > { %v11690_v28 = vpop.eup %10018  ;;  %10032 = vpow2.f32 %v6256_v35  ;;  %v6262_v35 = vmul.f32 1.442695, %v6251_v29 }
0x21f0   : > { %v11692_v40 = vpop.eup %10020  ;;  %v6168_v54 = vmul.f32 1.0614054, %v11690_v28  ;;  %10034 = vrcp.f32 %v6151_v3 }
0x21f1   : > { %v6169_v16 = vmul.f32 1.0614054, %v11692_v40  ;;  %10036 = vpow2.f32 %v6258_v14  ;;  %v6247_v14 = vsub.f32 0.0, %v11697_v10 }
0x21f2   : > { %v6176_v26 = vadd.f32 -1.4531521, %v6168_v54  ;;  %10038 = vpow2.f32 %v6260_v44 }
0x21f3   : > { %v6177_v18 = vadd.f32 -1.4531521, %v6169_v16  ;;  %10040 = vpow2.f32 %v6262_v35 }
0x21f4   : > { %v11699_v46 = vpop.eup %10022  ;;  %v6184_v59 = vmul.f32 %v11690_v28, %v6176_v26  ;;  %v6245_v26 = vsub.f32 0.0, %v6133_v32 }
0x21f5   : > { %v11702_v42 = vpop.eup %10024  ;;  %v6170_v11 = vmul.f32 1.0614054, %v11699_v46  ;;  %v6185_v48 = vmul.f32 %v11692_v40, %v6177_v18 }
0x21f6   : > { %v6171_v22 = vmul.f32 1.0614054, %v11702_v42  ;;  %v6192_v25 = vadd.f32 1.4214138, %v6184_v59  ;;  %v11708_v43 = vpop.eup %10026  ;;  %v6264_v59 = vmul.f32 1.442695, %v6252_v24  ;;  %v6253_v3 = vmul.f32 %v6245_v26, %v6133_v32 }
0x21f7   : > { %v6178_v58 = vadd.f32 -1.4531521, %v6170_v11  ;;  %v6193_v34 = vadd.f32 1.4214138, %v6185_v48  ;;  %v6172_v63 = vmul.f32 1.0614054, %v11708_v43 }
0x21f8   : > { %v6179_v54 = vadd.f32 -1.4531521, %v6171_v22  ;;  %v6200_v16 = vmul.f32 %v11690_v28, %v6192_v25  ;;  %v11718_v25 = vpop.eup %10028  ;;  %10042 = vpow2.f32 %v6264_v59 }
0x21f9   : > { %v6186_v52 = vmul.f32 %v11699_v46, %v6178_v58  ;;  %v6201_v33 = vmul.f32 %v11692_v40, %v6193_v34  ;;  %v6180_v2 = vadd.f32 -1.4531521, %v6172_v63  ;;  %v6254_v34 = vmul.f32 %v6246_v51, %v6134_v31  ;;  %v11723_v44 = vpop.eup %10030 }
0x21fa   : > { %v6187_v9 = vmul.f32 %v11702_v42, %v6179_v54  ;;  %v6208_v39 = vadd.f32 -0.28449672, %v6200_v16  ;;  %v6174_v32 = vmul.f32 1.0614054, %v11723_v44  ;;  %v10033_v26 = vpop.eup %10032  ;;  %v6173_v51 = vmul.f32 1.0614054, %v11718_v25 }
0x21fb   : > { %v6194_v18 = vadd.f32 1.4214138, %v6186_v52  ;;  %v6209_v4 = vadd.f32 -0.28449672, %v6201_v33  ;;  %v6188_v22 = vmul.f32 %v11708_v43, %v6180_v2  ;;  %v6268_v2 = vmul.f32 1.442695, %v6254_v34 }
0x21fc   : > { %v6195_v7 = vadd.f32 1.4214138, %v6187_v9  ;;  %v6216_v11 = vmul.f32 %v11690_v28, %v6208_v39  ;;  %v11730_v39 = vpop.eup %10034  ;;  %v6182_v35 = vadd.f32 -1.4531521, %v6174_v32 }
0x21fd   : > { %v6202_v48 = vmul.f32 %v11699_v46, %v6194_v18  ;;  %v6217_v29 = vmul.f32 %v11692_v40, %v6209_v4  ;;  %v6196_v16 = vadd.f32 1.4214138, %v6188_v22  ;;  %v6266_v4 = vmul.f32 1.442695, %v6253_v3 }
0x21fe   : > { %v6203_v58 = vmul.f32 %v11702_v42, %v6195_v7  ;;  %v6224_v54 = vadd.f32 0.2548296, %v6216_v11 }
0x21ff   : > { %v6210_v24 = vadd.f32 -0.28449672, %v6202_v48  ;;  %v6225_v52 = vadd.f32 0.2548296, %v6217_v29  ;;  %v6204_v31 = vmul.f32 %v11708_v43, %v6196_v16  ;;  %v6181_v48 = vadd.f32 -1.4531521, %v6173_v51 }
0x2200   : > { %v6211_v63 = vadd.f32 -0.28449672, %v6203_v58  ;;  %v6232_v33 = vmul.f32 %v11690_v28, %v6224_v54  ;;  %v6190_v28 = vmul.f32 %v11723_v44, %v6182_v35  ;;  %v6175_v29 = vmul.f32 1.0614054, %v11730_v39  ;;  %v10037_v54 = vpop.eup %10036 }
0x2201   : > { %v6218_v9 = vmul.f32 %v11699_v46, %v6210_v24  ;;  %v6212_v11 = vadd.f32 -0.28449672, %v6204_v31  ;;  %v6233_v22 = vmul.f32 %v11692_v40, %v6225_v52  ;;  %v6255_v58 = vmul.f32 %v6247_v14, %v11697_v10  ;;  %v10039_v34 = vpop.eup %10038 }
0x2202   : > { %v6219_v18 = vmul.f32 %v11702_v42, %v6211_v63  ;;  %v6272_v7 = vmul.f32 %v10033_v26, %v6232_v33  ;;  %v6189_v3 = vmul.f32 %v11718_v25, %v6181_v48  ;;  %v6198_v26 = vadd.f32 1.4214138, %v6190_v28  ;;  %v10041_v51 = vpop.eup %10040 }
0x2203   : > { %v6226_v59 = vadd.f32 0.2548296, %v6218_v9  ;;  %v6220_v63 = vmul.f32 %v11708_v43, %v6212_v11  ;;  %10044 = vpow2.f32 %v6266_v4  ;;  %v6183_v33 = vadd.f32 -1.4531521, %v6175_v29 }
0x2204   : > { %v6280_v24 = vsub.f32 1.0, %v6272_v7  ;;  %v6227_v32 = vadd.f32 0.2548296, %v6219_v18  ;;  %10046 = vpow2.f32 %v6268_v2  ;;  %v6197_v52 = vadd.f32 1.4214138, %v6189_v3  ;;  %v10043_v18 = vpop.eup %10042 }
0x2205   : > { %v6234_v16 = vmul.f32 %v11699_v46, %v6226_v59  ;;  %v6228_v40 = vadd.f32 0.2548296, %v6220_v63  ;;  %v6206_v10 = vmul.f32 %v11723_v44, %v6198_v26  ;;  %v6191_v14 = vmul.f32 %v11730_v39, %v6183_v33 }
0x2206   : > { %v6296_v9 = vsub.f32 0.0, %v6280_v24  ;;  %v6273_v46 = vmul.f32 %v10037_v54, %v6233_v22  ;;  %v6205_v7 = vmul.f32 %v11718_v25, %v6197_v52  ;;  %v6270_v59 = vmul.f32 1.442695, %v6255_v58 }
0x2207   : > { %v6274_v31 = vmul.f32 %v10039_v34, %v6234_v16  ;;  %v6236_v35 = vmul.f32 %v11708_v43, %v6228_v40  ;;  %v6235_v4 = vmul.f32 %v11702_v42, %v6227_v32  ;;  %v6214_v11 = vadd.f32 -0.28449672, %v6206_v10 }
0x2208   : > { %v6213_v48 = vadd.f32 -0.28449672, %v6205_v7  ;;  %v6304_v28 = vsel %vm6288_vm11, %v6280_v24, %v6296_v9  ;;  %v6199_v63 = vadd.f32 1.4214138, %v6191_v14  ;;  %v6281_v3 = vsub.f32 1.0, %v6273_v46 }
0x2209   : > { %v6276_v2 = vmul.f32 %v10043_v18, %v6236_v35  ;;  %v6282_v29 = vsub.f32 1.0, %v6274_v31  ;;  %v6222_v16 = vmul.f32 %v11723_v44, %v6214_v11  ;;  %10048 = vpow2.f32 %v6270_v59 }
0x220a   : > { %v6221_v43 = vmul.f32 %v11718_v25, %v6213_v48  ;;  %v6275_v54 = vmul.f32 %v10041_v51, %v6235_v4  ;;  %v6207_v34 = vmul.f32 %v11730_v39, %v6199_v63  ;;  %v6112_v42 = vmul.f32 0.5, %v11641_v0 }
0x220b   : > { %v6284_v22 = vsub.f32 1.0, %v6276_v2  ;;  %v6230_v58 = vadd.f32 0.2548296, %v6222_v16  ;;  %v6312_v32 = vadd.f32 1.0, %v6304_v28  ;;  %v6298_v24 = vsub.f32 0.0, %v6282_v29 }
0x220c   : > { %v6229_v26 = vadd.f32 0.2548296, %v6221_v43  ;;  %v6215_v52 = vadd.f32 -0.28449672, %v6207_v34  ;;  %v6297_v31 = vsub.f32 0.0, %v6281_v3  ;;  %v6116_v10 = vmul.f32 0.5, %v11656_v15 }
0x220d   : > { %v6300_v38 = vsub.f32 0.0, %v6284_v22  ;;  %v10045_v33 = vpop.eup %10044  ;;  %v6238_v40 = vmul.f32 %v11723_v44, %v6230_v58  ;;  %v6283_v46 = vsub.f32 1.0, %v6275_v54  ;;  %v6320_v59 = vmul.f32 %v6312_v32, %v6112_v42 }
0x220e   : > { %v10047_v9 = vpop.eup %10046  ;;  %v6237_v51 = vmul.f32 %v11718_v25, %v6229_v26  ;;  %v6223_v7 = vmul.f32 %v11730_v39, %v6215_v52  ;;  %v6306_v44 = vsel %vm6290_vm13, %v6282_v29, %v6298_v24  ;;  %v6113_v15 = vmul.f32 0.5, %v11644_v21  ;;  %v6676_v24 = vld [vmem:[%s10321_s16 + $0x100] sm:$0xff] }
0x220f   : > { %v6308_v14 = vsel %vm6292_vm12, %v6284_v22, %v6300_v38  ;;  %v6278_v0 = vmul.f32 %v10047_v9, %v6238_v40  ;;  %v6305_v2 = vsel %vm6289_vm14, %v6281_v3, %v6297_v31  ;;  %v6299_v25 = vsub.f32 0.0, %v6283_v46  ;;  %v6678_v40 = vld [vmem:[%s10321_s16 + $0x160] sm:$0xff] }
0x2210   : > { %v6316_v35 = vadd.f32 1.0, %v6308_v14  ;;  %v6277_v27 = vmul.f32 %v10045_v33, %v6237_v51  ;;  %v6231_v11 = vadd.f32 0.2548296, %v6223_v7  ;;  %v6114_v43 = vmul.f32 0.5, %v11654_v53  ;;  %v6680_v51 = vld [vmem:[%s10321_s16 + $0x1c0] sm:$0xff]  ;;  %v6677_v7 = vld [vmem:[%s10321_s16 + $0x108] sm:$0xff] }
0x2211   : > { %v6286_v4 = vsub.f32 1.0, %v6278_v0  ;;  %v6314_v49 = vadd.f32 1.0, %v6306_v44  ;;  %v6313_v29 = vadd.f32 1.0, %v6305_v2  ;;  %v6118_v3 = vmul.f32 0.5, %v11675_v13  ;;  %v6681_v44 = vld [vmem:[%s10321_s16 + $0x1c8] sm:$0xff] }
0x2212   : > { %v6324_v18 = vmul.f32 %v6316_v35, %v6116_v10  ;;  %v6285_v48 = vsub.f32 1.0, %v6277_v27  ;;  %v6239_v63 = vmul.f32 %v11730_v39, %v6231_v11  ;;  %v6307_v34 = vsel %vm6291_vm2, %v6283_v46, %v6299_v25  ;;  %v6682_v46 = vld [vmem:[%s10321_s16 + $0x220] sm:$0xff]  ;;  %v9759_v2 = vld [vmem:[%s10330_s23 + $0x4c8] sm:$0xff]  }
0x2213   : > { %v6302_v16 = vsub.f32 0.0, %v6286_v4  ;;  %v10049_v22 = vpop.eup %10048  ;;  %v6117_v53 = vmul.f32 0.5, %v11673_v60  ;;  %v6322_v1 = vmul.f32 %v6314_v49, %v6114_v43  ;;  %v6321_v26 = vmul.f32 %v6313_v29, %v6113_v15  ;;  %v9757_v11 = vld [vmem:[%s10330_s23 + $0x480] sm:$0xff]   ;;  %v9758_v15 = vld [vmem:[%s10330_s23 + $0x448] sm:$0xff]   ;;  %v9766_v43 = vld [vmem:[%s10330_s23 + $0x458] sm:$0xff]  }
0x2214   : > { %v6328_v28 = vpack.c.bf16 %v6324_v18, %v6320_v59  ;;  %v6301_v56 = vsub.f32 0.0, %v6285_v48  ;;  %v6279_v21 = vmul.f32 %v10049_v22, %v6239_v63  ;;  %v6315_v6 = vadd.f32 1.0, %v6307_v34  ;;  %v6679_v59 = vld [vmem:[%s10321_s16 + $0x168] sm:$0xff]  ;;  %v9764_v63 = vld [vmem:[%s10330_s23 + $0x410] sm:$0xff]   ;;  %v9767_v49 = vld [vmem:[%s10330_s23 + $0x4d8] sm:$0xff]  }
0x2215   : > { %v6310_v54 = vsel %vm6294_vm15, %v6286_v4, %v6302_v16  ;;  %v6115_v60 = vmul.f32 0.5, %v11659_v55  ;;  %v6119_v31 = vmul.f32 0.5, %v11683_v47  ;;  %v8660_v14 = vcombine.high %v6676_v24, %v6678_v40  ;;  %v6683_v18 = vld [vmem:[%s10321_s16 + $0x228] sm:$0xff]  ;;  %v9763_v16 = vld [vmem:[%s10330_s23 + $0x4d0] sm:$0xff]   ;;  %v9769_v29 = vld [vmem:[%s10330_s23 + $0x498] sm:$0xff]  }
0x2216   : > { %v6318_v58 = vadd.f32 1.0, %v6310_v54  ;;  %v6309_v39 = vsel %vm6293_vm0, %v6285_v48, %v6301_v56  ;;  %v6287_v32 = vsub.f32 1.0, %v6279_v21  ;;  %v8659_v23 = vcombine.low %v6676_v24, %v6678_v40  ;;  %v9760_v48 = vld [vmem:[%s10330_s23 + $0x408] sm:$0xff]   ;;  %v9765_v22 = vld [vmem:[%s10330_s23 + $0x490] sm:$0xff]   ;;  %v9768_v56 = vld [vmem:[%s10330_s23 + $0x418] sm:$0xff]  }
0x2217   : > { %v6317_v42 = vadd.f32 1.0, %v6309_v39  ;;  %v6323_v35 = vmul.f32 %v6315_v6, %v6115_v60  ;;  %v8664_v47 = vcombine.high %v6680_v51, %v6682_v46  ;;  %v8662_v27 = vcombine.high %v6677_v7, %v6679_v59  ;;  %v9761_v25 = vld [vmem:[%s10330_s23 + $0x488] sm:$0xff]   ;;  %v9770_v54 = vld [vmem:[%s10330_s23 + $0x460] sm:$0xff]   ;;  %v9784_v24 = vld [vmem:[%s10330_s23 + $0x438] sm:$0xff]  }
0x2218   : > { %v6326_v38 = vmul.f32 %v6318_v58, %v6118_v3  ;;  %v6303_v61 = vsub.f32 0.0, %v6287_v32  ;;  %v8663_v4 = vcombine.low %v6680_v51, %v6682_v46  ;;  %v8661_v8 = vcombine.low %v6677_v7, %v6679_v59  ;;  %v9771_v21 = vld [vmem:[%s10330_s23 + $0x4e0] sm:$0xff]   ;;  %v9774_v39 = vld [vmem:[%s10330_s23 + $0x468] sm:$0xff]   ;;  %v9785_v40 = vld [vmem:[%s10330_s23 + $0x4b8] sm:$0xff]  }
0x2219   : > { %v6325_v33 = vmul.f32 %v6317_v42, %v6117_v53  ;;  %v8666_v36 = vcombine.high %v6681_v44, %v6683_v18  ;;  %v9772_v3 = vld [vmem:[%s10330_s23 + $0x420] sm:$0xff]   ;;  %v9775_v34 = vld [vmem:[%s10330_s23 + $0x4e8] sm:$0xff]   ;;  %v11821_v6 = vld [vmem:[%s10321_s16 + $0x50] sm:$0xff] }
0x221a   : > { %v6330_v13 = vpack.c.bf16 %v6326_v38, %v6322_v1  ;;  %v6311_v52 = vsel %vm6295_vm3, %v6287_v32, %v6303_v61  ;;  %v9773_v58 = vld [vmem:[%s10330_s23 + $0x4a0] sm:$0xff]   ;;  %v9776_v53 = vld [vmem:[%s10330_s23 + $0x428] sm:$0xff]   ;;  %v9778_v32 = vld [vmem:[%s10330_s23 + $0x470] sm:$0xff]  }
0x221b   : > { %v6329_v9 = vpack.c.bf16 %v6325_v33, %v6321_v26  ;;  %v6319_v10 = vadd.f32 1.0, %v6311_v52  ;;  %v9777_v42 = vld [vmem:[%s10330_s23 + $0x4a8] sm:$0xff]   ;;  %v9779_v1 = vld [vmem:[%s10330_s23 + $0x4f0] sm:$0xff]   ;;  %v9782_v33 = vld [vmem:[%s10330_s23 + $0x478] sm:$0xff]  }
0x221c   : > { %v9780_v38 = vld [vmem:[%s10330_s23 + $0x430] sm:$0xff]   ;;  %v9783_v61 = vld [vmem:[%s10330_s23 + $0x4f8] sm:$0xff]  }
0x221d   : > { %6620 = vmatprep.mubr.bf16.mxu0 %v6329_v9  ;;  %v6327_v0 = vmul.f32 %v6319_v10, %v6119_v31  ;;  %v9781_v26 = vld [vmem:[%s10330_s23 + $0x4b0] sm:$0xff]   ;;  %v11827_v52 = vld [vmem:[%s10321_s16 + $0x58] sm:$0xff] }
0x221e   : > { %6621 = vmatmul.mubr.bf16.vlgmr.msra.gmra.mrb[56].mxu0 %v6328_v28  ;;  %v9762_v28 = vld [vmem:[%s10330_s23 + $0x450] sm:$0xff]   ;;  %v11832_v60 = vld [vmem:[%s10321_s16 + $0xb8] sm:$0xff] }
0x221f   : > { %6767 = vmatpush1.bf16.msra.mxu0 %v8655_v5  ;;  %6798 = vmatprep.mubr.bf16.mxu0 %v12284_v57  ;;  %v6331_v55 = vpack.c.bf16 %v6327_v0, %v6323_v35  ;;  %v8665_v5 = vcombine.low %v6681_v44, %v6683_v18  ;;  %v8703_v10 = vcombine.low %v11827_v52, %v11832_v60 }
0x2220   : > { %6768 = vmatprep.subr.bf16.mxu0 %v8660_v14  ;;  %v8704_v14 = vcombine.high %v11827_v52, %v11832_v60  ;;  %v9786_v52 = vld [vmem:[%s10330_s23 + $0x540] sm:$0xff]  }
0x2221   : > { %6661 = vmatprep.mubr.bf16.mxu1 %v6331_v55  ;;  %v9788_v60 = vld [vmem:[%s10330_s23 + $0x500] sm:$0xff]  }
0x2222   : > { %6662 = vmatmul.mubr.bf16.vlgmr.msra.gmra.mrb[56].mxu1 %v6330_v13  ;;  %v11824_v13 = vld [vmem:[%s10321_s16 + $0xb0] sm:$0xff] }
0x2223   : > { %6769 = vmatpush1.bf16.msra.mxu0 %v8659_v23  ;;  %6810 = vmatpush1.bf16.msra.mxu1 %v8657_v19  ;;  %v9756_v19 = vld [vmem:[%s10330_s23 + $0x400] sm:$0xff]   ;;  %v8702_v9 = vcombine.high %v11821_v6, %v11824_v13  ;;  %v8701_v31 = vcombine.low %v11821_v6, %v11824_v13  ;;  %v7421_v6 = vld [vmem:[%s10321_s16 + $0x1d8] sm:$0xff] }
0x2224   : > { %6770 = vmatprep.subr.bf16.mxu0 %v8664_v47  ;;  %6811 = vmatprep.subr.bf16.mxu1 %v8662_v27  ;;  %v6684_v47 = vld [vmem:[%s10315_s6 + $0x10] sm:$0xf]  ;;  %v7423_v13 = vld [vmem:[%s10321_s16 + $0x238] sm:$0xff] }
0x2225   : > { %6841 = vmatprep.mubr.bf16.mxu1 %v12284_v57 }
0x2227   : > { %6771 = vmatpush1.bf16.msra.mxu0 %v8663_v4  ;;  %6812 = vmatpush1.bf16.msra.mxu1 %v8661_v8 }
0x2228   : > { %6813 = vmatprep.subr.bf16.mxu1 %v8666_v36  ;;  %9051 = vmatprep.subr.bf16.mxu0 %v9754_v17  ;;  %v6689_v36 = vrot.slane %v6684_v47, %v12286_v62 }
0x222a   : > { %8667 = vmatmul.mubr.msk.bf16.vlgmr.msra.gmra.mrb[60].mxu0 %vm928_vm1, %v12285_v41 }
0x222b   : > { %6814 = vmatpush1.bf16.msra.mxu1 %v8665_v5  ;;  %9052 = vmatpush3.bf16.msra.mxu0 %v9756_v19  ;;  %v6693_v5 = vrot.slane %v6684_v47, %v12287_v20 }
0x222c   : > { %9073 = vmatprep.subr.bf16.mxu1 %v9755_v45  ;;  %9053 = vmatprep.subr.bf16.mxu0 %v9758_v15 }
0x222e   : > { %8668 = vmatmul.mubr.msk.bf16.vlgmr.msra.gmra.mrb[60].mxu1 %vm928_vm1, %v12285_v41 }
0x222f   : > { %9074 = vmatpush3.bf16.msra.mxu1 %v9757_v11  ;;  %9054 = vmatpush3.bf16.msra.mxu0 %v9760_v48  ;;  %v6697_v48 = vrot.slane %v6684_v47, %v12288_v37 }
0x2230   : > { %9075 = vmatprep.subr.bf16.mxu1 %v9759_v2  ;;  %9055 = vmatprep.subr.bf16.mxu0 %v9762_v28 }
0x2233   : > { %9076 = vmatpush3.bf16.msra.mxu1 %v9761_v25  ;;  %9056 = vmatpush3.bf16.msra.mxu0 %v9764_v63  ;;  %v6701_v63 = vrot.slane %v6684_v47, %v10916_v30 }
0x2234   : > { %9077 = vmatprep.subr.bf16.mxu1 %v9763_v16  ;;  %9057 = vmatprep.subr.bf16.mxu0 %v9766_v43 }
0x2237   : > { %9078 = vmatpush3.bf16.msra.mxu1 %v9765_v22  ;;  %9058 = vmatpush3.bf16.msra.mxu0 %v9768_v56 }
0x2238   : > { %9079 = vmatprep.subr.bf16.mxu1 %v9767_v49  ;;  %9059 = vmatprep.subr.bf16.mxu0 %v9770_v54 }
0x223b   : > { %9080 = vmatpush3.bf16.msra.mxu1 %v9769_v29  ;;  %9060 = vmatpush3.bf16.msra.mxu0 %v9772_v3 }
0x223c   : > { %9081 = vmatprep.subr.bf16.mxu1 %v9771_v21  ;;  %9061 = vmatprep.subr.bf16.mxu0 %v9774_v39 }
0x223f   : > { %9082 = vmatpush3.bf16.msra.mxu1 %v9773_v58  ;;  %9062 = vmatpush3.bf16.msra.mxu0 %v9776_v53 }
0x2240   : > { %9083 = vmatprep.subr.bf16.mxu1 %v9775_v34  ;;  %9063 = vmatprep.subr.bf16.mxu0 %v9778_v32 }
0x2243   : > { %9084 = vmatpush3.bf16.msra.mxu1 %v9777_v42  ;;  %9064 = vmatpush3.bf16.msra.mxu0 %v9780_v38 }
0x2244   : > { %9085 = vmatprep.subr.bf16.mxu1 %v9779_v1  ;;  %9065 = vmatprep.subr.bf16.mxu0 %v9782_v33 }
0x2247   : > { %9086 = vmatpush3.bf16.msra.mxu1 %v9781_v26  ;;  %9066 = vmatpush3.bf16.msra.mxu0 %v9784_v24 }
0x2248   : > { %9087 = vmatprep.subr.bf16.mxu1 %v9783_v61  ;;  %7506 = vmatprep.subr.bf16.mxu0 %v8702_v9 }
0x224b   : > { %9088 = vmatpush3.bf16.msra.mxu1 %v9785_v40 }
0x224c   : > { %7549 = vmatprep.subr.bf16.mxu1 %v8704_v14 }
0x22f1   : > { %v9023_v51 = vpop.f32.mrb[56].mxu0 }
0x22f2   : > { %v9024_v46 = vpop.f32.mrb[57].mxu0 }
0x22f3   : > { %v9025_v35 = vadd.f32 %v9024_v46, %v9023_v51  ;;  %v9026_v0 = vpop.f32.mrb[58].mxu0 }
0x22f4   : > { %v9027_v7 = vpop.f32.mrb[59].mxu0 }
0x22f5   : > { %v9028_v59 = vadd.f32 %v9027_v7, %v9026_v0  ;;  %v9045_v23 = vpop.f32.mrb[56].mxu1 }
0x22f6   : > { %v9046_v55 = vpop.f32.mrb[57].mxu1 }
0x22f7   : > { %v9047_v27 = vadd.f32 %v9046_v55, %v9045_v23  ;;  %v9048_v44 = vpop.f32.mrb[58].mxu1 }
0x22f8   : > { %v9049_v18 = vpop.f32.mrb[59].mxu1 }
0x22f9   : > { %v6664_v4 = vadd.f32 %v9047_v27, %v9025_v35  ;;  %v9050_v8 = vadd.f32 %v9049_v18, %v9048_v44 }
0x22fb   : > { %v11844_v17 = vadd.f32 %v6664_v4, %v11635_v12  ;;  %v6667_v45 = vadd.f32 %v9050_v8, %v9028_v59 }
0x22fd   : > { %v6800_v19 = vpop.f32.mrb[60].mxu0  ;;  %v11847_v11 = vadd.f32 %v6667_v45, %v11639_v50 }
0x22fe   : > { %v11849_v15 = vadd.f32 %v6800_v19, %v6689_v36  ;;  %v6802_v2 = vpop.f32.mrb[61].mxu0 }
0x22ff   : > { %v11852_v25 = vadd.f32 %v6802_v2, %v6693_v5  ;;  %v6804_v28 = vpop.f32.mrb[62].mxu0 }
0x2300   : > { %v11855_v16 = vmul.f32 0.70710677, %v11849_v15  ;;  %v6806_v12 = vpop.f32.mrb[63].mxu0  ;;  %v11862_v49 = vadd.f32 %v6804_v28, %v6689_v36 }
0x2301   : > { %v11859_v22 = vmul.f32 0.70710677, %v11852_v25  ;;  %v6843_v43 = vpop.f32.mrb[60].mxu1  ;;  %v11880_v24 = vadd.f32 %v6806_v12, %v6693_v5 }
0x2302   : > { %v6868_v50 = vand.u32 2147483647, %v11855_v16  ;;  %v11864_v56 = vadd.f32 %v6843_v43, %v6697_v48  ;;  %v6845_v54 = vpop.f32.mrb[61].mxu1  ;;  %v11876_v32 = vmul.f32 0.70710677, %v11862_v49  ;;  %vm7028_vm4 = vcmp.ge.f32.partialorder %v11855_v16, 0.0 }
0x2303   : > { %v6869_v29 = vand.u32 2147483647, %v11859_v22  ;;  %v11867_v3 = vadd.f32 %v6845_v54, %v6701_v63  ;;  %v6847_v58 = vpop.f32.mrb[62].mxu1  ;;  %v11886_v7 = vmul.f32 0.70710677, %v11880_v24  ;;  %vm7029_vm5 = vcmp.ge.f32.partialorder %v11859_v22, 0.0 }
0x2304   : > { %v6876_v21 = vmul.f32 0.3275911, %v6868_v50  ;;  %v11870_v39 = vmul.f32 0.70710677, %v11864_v56  ;;  %v6849_v1 = vpop.f32.mrb[63].mxu1  ;;  %v6980_v40 = vsub.f32 0.0, %v6868_v50  ;;  %v11883_v0 = vadd.f32 %v6847_v58, %v6697_v48 }
0x2305   : > { %v6877_v34 = vmul.f32 0.3275911, %v6869_v29  ;;  %v11873_v42 = vmul.f32 0.70710677, %v11867_v3  ;;  %v6872_v14 = vand.u32 2147483647, %v11876_v32  ;;  %v11892_v44 = vadd.f32 %v6849_v1, %v6701_v63 }
0x2306   : > { %v6884_v53 = vadd.f32 1.0, %v6876_v21  ;;  %v6870_v38 = vand.u32 2147483647, %v11870_v39  ;;  %v6988_v59 = vmul.f32 %v6980_v40, %v6868_v50  ;;  %v6981_v23 = vsub.f32 0.0, %v6869_v29 }
0x2307   : > { %v6885_v26 = vadd.f32 1.0, %v6877_v34  ;;  %v6871_v33 = vand.u32 2147483647, %v11873_v42  ;;  %v6880_v35 = vmul.f32 0.3275911, %v6872_v14  ;;  %v6984_v43 = vsub.f32 0.0, %v6872_v14 }
0x2308   : > { %10050 = vrcp.f32 %v6884_v53  ;;  %v6878_v61 = vmul.f32 0.3275911, %v6870_v38  ;;  %v11889_v47 = vmul.f32 0.70710677, %v11883_v0  ;;  %v6873_v27 = vand.u32 2147483647, %v11886_v7 }
0x2309   : > { %10052 = vrcp.f32 %v6885_v26  ;;  %v6879_v9 = vmul.f32 0.3275911, %v6871_v33  ;;  %v6888_v55 = vadd.f32 1.0, %v6880_v35  ;;  %v6996_v36 = vmul.f32 1.442695, %v6988_v59 }
0x230a   : > { %v6886_v51 = vadd.f32 1.0, %v6878_v61  ;;  %v6874_v18 = vand.u32 2147483647, %v11889_v47  ;;  %v6881_v4 = vmul.f32 0.3275911, %v6873_v27  ;;  %v6982_v5 = vsub.f32 0.0, %v6870_v38 }
0x230b   : > { %v6887_v46 = vadd.f32 1.0, %v6879_v9  ;;  %v6989_v45 = vmul.f32 %v6981_v23, %v6869_v29  ;;  %v11898_v19 = vmul.f32 0.70710677, %v11892_v44  ;;  %v6983_v28 = vsub.f32 0.0, %v6871_v33 }
0x230c   : > { %10054 = vrcp.f32 %v6886_v51  ;;  %v6882_v12 = vmul.f32 0.3275911, %v6874_v18  ;;  %v6889_v63 = vadd.f32 1.0, %v6881_v4  ;;  %v6990_v29 = vmul.f32 %v6982_v5, %v6870_v38 }
0x230d   : > { %10056 = vrcp.f32 %v6887_v46  ;;  %v11905_v54 = vand.u32 2147483647, %v11898_v19  ;;  %v6998_v61 = vmul.f32 1.442695, %v6989_v45  ;;  %v6991_v40 = vmul.f32 %v6983_v28, %v6871_v33 }
0x230e   : > { %10058 = vrcp.f32 %v6888_v55  ;;  %v6890_v58 = vadd.f32 1.0, %v6882_v12  ;;  %v6992_v35 = vmul.f32 %v6984_v43, %v6872_v14  ;;  %v6986_v55 = vsub.f32 0.0, %v6874_v18 }
0x230f   : > { %10060 = vrcp.f32 %v6889_v63  ;;  %v6883_v53 = vmul.f32 0.3275911, %v11905_v54  ;;  %v6985_v4 = vsub.f32 0.0, %v6873_v27  ;;  %v7000_v5 = vmul.f32 1.442695, %v6990_v29 }
0x2310   : > { %10062 = vpow2.f32 %v6996_v36  ;;  %v7002_v12 = vmul.f32 1.442695, %v6991_v40  ;;  %v7004_v43 = vmul.f32 1.442695, %v6992_v35  ;;  %v6994_v29 = vmul.f32 %v6986_v55, %v6874_v18 }
0x2311   : > { %10064 = vrcp.f32 %v6890_v58  ;;  %v6891_v59 = vadd.f32 1.0, %v6883_v53  ;;  %vm7032_vm6 = vcmp.ge.f32.partialorder %v11876_v32, 0.0  ;;  %vm7030_vm7 = vcmp.ge.f32.partialorder %v11870_v39, 0.0 }
0x2312   : > { %v11895_v8 = vpop.eup %10050  ;;  %vm7033_vm8 = vcmp.ge.f32.partialorder %v11886_v7, 0.0  ;;  %vm7034_vm9 = vcmp.ge.f32.partialorder %v11889_v47, 0.0  ;;  %vm7031_vm10 = vcmp.ge.f32.partialorder %v11873_v42, 0.0  ;;  %vm7035_vm11 = vcmp.ge.f32.partialorder %v11898_v19, 0.0 }
0x2313   : > { %v11900_v2 = vpop.eup %10052  ;;  %v6908_v48 = vmul.f32 1.0614054, %v11895_v8  ;;  %10066 = vrcp.f32 %v6891_v59  ;;  %v6987_v59 = vsub.f32 0.0, %v11905_v54 }
0x2314   : > { %v6909_v50 = vmul.f32 1.0614054, %v11900_v2  ;;  %10068 = vpow2.f32 %v6998_v61 }
0x2315   : > { %v6916_v21 = vadd.f32 -1.4531521, %v6908_v48  ;;  %10070 = vpow2.f32 %v7000_v5  ;;  %v7008_v5 = vmul.f32 1.442695, %v6994_v29  ;;  %v6995_v29 = vmul.f32 %v6987_v59, %v11905_v54 }
0x2316   : > { %v6917_v34 = vadd.f32 -1.4531521, %v6909_v50  ;;  %v11908_v1 = vpop.eup %10054  ;;  %10072 = vpow2.f32 %v7002_v12 }
0x2317   : > { %v6924_v26 = vmul.f32 %v11895_v8, %v6916_v21  ;;  %v11911_v9 = vpop.eup %10056  ;;  %v6910_v51 = vmul.f32 1.0614054, %v11908_v1  ;;  %10074 = vpow2.f32 %v7004_v43 }
0x2318   : > { %v6925_v46 = vmul.f32 %v11900_v2, %v6917_v34  ;;  %v6911_v38 = vmul.f32 1.0614054, %v11911_v9  ;;  %v11916_v45 = vpop.eup %10058  ;;  %v6993_v34 = vmul.f32 %v6985_v4, %v6873_v27 }
0x2319   : > { %v6932_v23 = vadd.f32 1.4214138, %v6924_v26  ;;  %v6918_v36 = vadd.f32 -1.4531521, %v6910_v51  ;;  %v6912_v50 = vmul.f32 1.0614054, %v11916_v45 }
0x231a   : > { %v6933_v48 = vadd.f32 1.4214138, %v6925_v46  ;;  %v6919_v28 = vadd.f32 -1.4531521, %v6911_v38  ;;  %v11923_v46 = vpop.eup %10060 }
0x231b   : > { %v6940_v33 = vmul.f32 %v11895_v8, %v6932_v23  ;;  %v6926_v63 = vmul.f32 %v11908_v1, %v6918_v36  ;;  %v6920_v51 = vadd.f32 -1.4531521, %v6912_v50  ;;  %v10063_v23 = vpop.eup %10062  ;;  %v6913_v27 = vmul.f32 1.0614054, %v11923_v46 }
0x231c   : > { %v6941_v14 = vmul.f32 %v11900_v2, %v6933_v48  ;;  %v6927_v58 = vmul.f32 %v11911_v9, %v6919_v28  ;;  %v11931_v55 = vpop.eup %10064  ;;  %v7006_v48 = vmul.f32 1.442695, %v6993_v34 }
0x231d   : > { %v6948_v21 = vadd.f32 -0.28449672, %v6940_v33  ;;  %v6934_v53 = vadd.f32 1.4214138, %v6926_v63  ;;  %v6928_v18 = vmul.f32 %v11916_v45, %v6920_v51  ;;  %v6914_v50 = vmul.f32 1.0614054, %v11931_v55 }
0x231e   : > { %v6949_v26 = vadd.f32 -0.28449672, %v6941_v14  ;;  %v6935_v40 = vadd.f32 1.4214138, %v6927_v58  ;;  %v11936_v58 = vpop.eup %10066  ;;  %10076 = vpow2.f32 %v7006_v48 }
0x231f   : > { %v6956_v61 = vmul.f32 %v11895_v8, %v6948_v21  ;;  %v6942_v35 = vmul.f32 %v11908_v1, %v6934_v53  ;;  %v6936_v12 = vadd.f32 1.4214138, %v6928_v18  ;;  %v6921_v21 = vadd.f32 -1.4531521, %v6913_v27  ;;  %v10069_v34 = vpop.eup %10068 }
0x2320   : > { %v6957_v38 = vmul.f32 %v11900_v2, %v6949_v26  ;;  %v6943_v36 = vmul.f32 %v11911_v9, %v6935_v40  ;;  %v6922_v40 = vadd.f32 -1.4531521, %v6914_v50  ;;  %v6915_v27 = vmul.f32 1.0614054, %v11936_v58 }
0x2321   : > { %v6964_v4 = vadd.f32 0.2548296, %v6956_v61  ;;  %v6950_v33 = vadd.f32 -0.28449672, %v6942_v35  ;;  %v6944_v51 = vmul.f32 %v11916_v45, %v6936_v12  ;;  %10078 = vpow2.f32 %v7008_v5 }
0x2322   : > { %v6965_v28 = vadd.f32 0.2548296, %v6957_v38  ;;  %v6951_v14 = vadd.f32 -0.28449672, %v6943_v36  ;;  %v6930_v36 = vmul.f32 %v11931_v55, %v6922_v40 }
0x2323   : > { %v6972_v63 = vmul.f32 %v11895_v8, %v6964_v4  ;;  %v6958_v53 = vmul.f32 %v11908_v1, %v6950_v33  ;;  %v6929_v8 = vmul.f32 %v11923_v46, %v6921_v21  ;;  %v6952_v18 = vadd.f32 -0.28449672, %v6944_v51  ;;  %v10071_v33 = vpop.eup %10070 }
0x2324   : > { %v6973_v26 = vmul.f32 %v11900_v2, %v6965_v28  ;;  %v6959_v43 = vmul.f32 %v11911_v9, %v6951_v14  ;;  %v6923_v28 = vadd.f32 -1.4531521, %v6915_v27  ;;  %v10073_v12 = vpop.eup %10072 }
0x2325   : > { %v7012_v61 = vmul.f32 %v10063_v23, %v6972_v63  ;;  %v6966_v35 = vadd.f32 0.2548296, %v6958_v53  ;;  %v6937_v2 = vadd.f32 1.4214138, %v6929_v8  ;;  %v6960_v23 = vmul.f32 %v11916_v45, %v6952_v18 }
0x2326   : > { %v7013_v38 = vmul.f32 %v10069_v34, %v6973_v26  ;;  %v6967_v59 = vadd.f32 0.2548296, %v6959_v43  ;;  %v6938_v63 = vadd.f32 1.4214138, %v6930_v36  ;;  %v6931_v53 = vmul.f32 %v11936_v58, %v6923_v28 }
0x2327   : > { %v7020_v4 = vsub.f32 1.0, %v7012_v61  ;;  %v6974_v54 = vmul.f32 %v11908_v1, %v6966_v35  ;;  %v6945_v14 = vmul.f32 %v11923_v46, %v6937_v2  ;;  %v6968_v21 = vadd.f32 0.2548296, %v6960_v23  ;;  %v10075_v1 = vpop.eup %10074 }
0x2328   : > { %v7021_v50 = vsub.f32 1.0, %v7013_v38  ;;  %v7010_v26 = vmul.f32 1.442695, %v6995_v29  ;;  %v6946_v48 = vmul.f32 %v11931_v55, %v6938_v63  ;;  %v6975_v43 = vmul.f32 %v11911_v9, %v6967_v59  ;;  %v10077_v59 = vpop.eup %10076 }
0x2329   : > { %v7036_v51 = vsub.f32 0.0, %v7020_v4  ;;  %v7014_v34 = vmul.f32 %v10071_v33, %v6974_v54  ;;  %v6953_v61 = vadd.f32 -0.28449672, %v6945_v14  ;;  %v6976_v40 = vmul.f32 %v11916_v45, %v6968_v21 }
0x232a   : > { %v6954_v5 = vadd.f32 -0.28449672, %v6946_v48  ;;  %v7037_v35 = vsub.f32 0.0, %v7021_v50  ;;  %v6939_v18 = vadd.f32 1.4214138, %v6931_v53  ;;  %10080 = vpow2.f32 %v7010_v26 }
0x232b   : > { %v6961_v8 = vmul.f32 %v11923_v46, %v6953_v61  ;;  %v7016_v38 = vmul.f32 %v10075_v1, %v6976_v40  ;;  %v7044_v29 = vsel %vm7028_vm4, %v7020_v4, %v7036_v51  ;;  %v7022_v27 = vsub.f32 1.0, %v7014_v34  ;;  %v10079_v14 = vpop.eup %10078 }
0x232c   : > { %v6962_v36 = vmul.f32 %v11931_v55, %v6954_v5  ;;  %v7015_v33 = vmul.f32 %v10073_v12, %v6975_v43  ;;  %v6947_v9 = vmul.f32 %v11936_v58, %v6939_v18  ;;  %v6852_v45 = vmul.f32 0.5, %v11849_v15 }
0x232d   : > { %v6969_v2 = vadd.f32 0.2548296, %v6961_v8  ;;  %v7024_v54 = vsub.f32 1.0, %v7016_v38  ;;  %v7052_v28 = vadd.f32 1.0, %v7044_v29  ;;  %v7038_v21 = vsub.f32 0.0, %v7022_v27 }
0x232e   : > { %v6970_v16 = vadd.f32 0.2548296, %v6962_v36  ;;  %v6955_v63 = vadd.f32 -0.28449672, %v6947_v9  ;;  %v7045_v53 = vsel %vm7029_vm5, %v7021_v50, %v7037_v35  ;;  %v6853_v51 = vmul.f32 0.5, %v11852_v25 }
0x232f   : > { %v6977_v23 = vmul.f32 %v11923_v46, %v6969_v2  ;;  %v7040_v4 = vsub.f32 0.0, %v7024_v54  ;;  %v7023_v34 = vsub.f32 1.0, %v7015_v33  ;;  %v6856_v48 = vmul.f32 0.5, %v11862_v49 }
0x2330   : > { %v6978_v12 = vmul.f32 %v11931_v55, %v6970_v16  ;;  %v6963_v22 = vmul.f32 %v11936_v58, %v6955_v63  ;;  %v7060_v32 = vmul.f32 %v7052_v28, %v6852_v45  ;;  %v7053_v43 = vadd.f32 1.0, %v7045_v53  ;;  %v7416_v45 = vld [vmem:[%s10321_s16 + $0x110] sm:$0xff] }
0x2331   : > { %v7017_v26 = vmul.f32 %v10077_v59, %v6977_v23  ;;  %v7048_v15 = vsel %vm7032_vm6, %v7024_v54, %v7040_v4  ;;  %v7046_v50 = vsel %vm7030_vm7, %v7022_v27, %v7038_v21  ;;  %v7039_v25 = vsub.f32 0.0, %v7023_v34  ;;  %v7418_v16 = vld [vmem:[%s10321_s16 + $0x170] sm:$0xff] }
0x2332   : > { %v7056_v46 = vadd.f32 1.0, %v7048_v15  ;;  %v7018_v61 = vmul.f32 %v10079_v14, %v6978_v12  ;;  %v6971_v40 = vadd.f32 0.2548296, %v6963_v22  ;;  %v6857_v38 = vmul.f32 0.5, %v11880_v24  ;;  %v7420_v21 = vld [vmem:[%s10321_s16 + $0x1d0] sm:$0xff]  ;;  %v7417_v22 = vld [vmem:[%s10321_s16 + $0x118] sm:$0xff] }
0x2333   : > { %v7025_v1 = vsub.f32 1.0, %v7017_v26  ;;  %v6854_v18 = vmul.f32 0.5, %v11864_v56  ;;  %v7054_v2 = vadd.f32 1.0, %v7046_v50  ;;  %v7061_v54 = vmul.f32 %v7053_v43, %v6853_v51  ;;  %v7422_v53 = vld [vmem:[%s10321_s16 + $0x230] sm:$0xff]  ;;  %v9790_v43 = vld [vmem:[%s10330_s23 + $0x548] sm:$0xff]  }
0x2334   : > { %v7064_v5 = vmul.f32 %v7056_v46, %v6856_v48  ;;  %v7026_v55 = vsub.f32 1.0, %v7018_v61  ;;  %v10081_v35 = vpop.eup %10080  ;;  %v6979_v49 = vmul.f32 %v11936_v58, %v6971_v40  ;;  %v6858_v24 = vmul.f32 0.5, %v11883_v0  ;;  %v7419_v48 = vld [vmem:[%s10321_s16 + $0x178] sm:$0xff]  ;;  %v9791_v40 = vld [vmem:[%s10330_s23 + $0x5c8] sm:$0xff]  }
0x2335   : > { %v7041_v8 = vsub.f32 0.0, %v7025_v1  ;;  %v7047_v9 = vsel %vm7031_vm10, %v7023_v34, %v7039_v25  ;;  %v7062_v23 = vmul.f32 %v7054_v2, %v6854_v18  ;;  %v8706_v14 = vcombine.high %v7416_v45, %v7418_v16  ;;  %v9792_v50 = vld [vmem:[%s10330_s23 + $0x508] sm:$0xff]   ;;  %v9798_v25 = vld [vmem:[%s10330_s23 + $0x558] sm:$0xff]   ;;  %v9805_v2 = vld [vmem:[%s10330_s23 + $0x5a0] sm:$0xff]  }
0x2336   : > { %v7068_v29 = vpack.c.bf16 %v7064_v5, %v7060_v32  ;;  %v7042_v39 = vsub.f32 0.0, %v7026_v55  ;;  %v7019_v33 = vmul.f32 %v10081_v35, %v6979_v49  ;;  %v7055_v63 = vadd.f32 1.0, %v7047_v9  ;;  %v9793_v5 = vld [vmem:[%s10330_s23 + $0x588] sm:$0xff]   ;;  %v9797_v35 = vld [vmem:[%s10330_s23 + $0x590] sm:$0xff]   ;;  %v9800_v49 = vld [vmem:[%s10330_s23 + $0x518] sm:$0xff]  }
0x2337   : > { %v7049_v36 = vsel %vm7033_vm8, %v7025_v1, %v7041_v8  ;;  %v6855_v12 = vmul.f32 0.5, %v11867_v3  ;;  %v6859_v26 = vmul.f32 0.5, %v11892_v44  ;;  %v8705_v19 = vcombine.low %v7416_v45, %v7418_v16  ;;  %v9796_v8 = vld [vmem:[%s10330_s23 + $0x510] sm:$0xff]   ;;  %v9801_v18 = vld [vmem:[%s10330_s23 + $0x598] sm:$0xff]  }
0x2338   : > { %v7057_v27 = vadd.f32 1.0, %v7049_v36  ;;  %v7050_v7 = vsel %vm7034_vm9, %v7026_v55, %v7042_v39  ;;  %v7027_v59 = vsub.f32 1.0, %v7019_v33  ;;  %v8710_v46 = vcombine.high %v7420_v21, %v7422_v53  ;;  %v9795_v55 = vld [vmem:[%s10330_s23 + $0x5d0] sm:$0xff]   ;;  %v9803_v39 = vld [vmem:[%s10330_s23 + $0x5e0] sm:$0xff]   ;;  %v9807_v33 = vld [vmem:[%s10330_s23 + $0x5e8] sm:$0xff]  }
0x2339   : > { %v7058_v58 = vadd.f32 1.0, %v7050_v7  ;;  %v7063_v34 = vmul.f32 %v7055_v63, %v6855_v12  ;;  %v8708_v61 = vcombine.high %v7417_v22, %v7419_v48  ;;  %v8709_v44 = vcombine.low %v7420_v21, %v7422_v53  ;;  %v9804_v36 = vld [vmem:[%s10330_s23 + $0x520] sm:$0xff]   ;;  %v9810_v7 = vld [vmem:[%s10330_s23 + $0x570] sm:$0xff]   ;;  %v9815_v45 = vld [vmem:[%s10330_s23 + $0x5f8] sm:$0xff]  }
0x233a   : > { %v7065_v56 = vmul.f32 %v7057_v27, %v6857_v38  ;;  %v7043_v4 = vsub.f32 0.0, %v7027_v59  ;;  %v8712_v1 = vcombine.high %v7421_v6, %v7423_v13  ;;  %v8711_v32 = vcombine.low %v7421_v6, %v7423_v13  ;;  %v9799_v38 = vld [vmem:[%s10330_s23 + $0x5d8] sm:$0xff]   ;;  %v9806_v27 = vld [vmem:[%s10330_s23 + $0x568] sm:$0xff]   ;;  %v9811_v9 = vld [vmem:[%s10330_s23 + $0x5f0] sm:$0xff]  }
0x233b   : > { %v7066_v28 = vmul.f32 %v7058_v58, %v6858_v24  ;;  %v9809_v24 = vld [vmem:[%s10330_s23 + $0x5a8] sm:$0xff]   ;;  %v9812_v58 = vld [vmem:[%s10330_s23 + $0x530] sm:$0xff]   ;;  %v9816_v16 = vld [vmem:[%s10330_s23 + $0x538] sm:$0xff]  }
0x233c   : > { %v7069_v47 = vpack.c.bf16 %v7065_v56, %v7061_v54  ;;  %v7051_v0 = vsel %vm7035_vm11, %v7027_v59, %v7043_v4  ;;  %v9808_v54 = vld [vmem:[%s10330_s23 + $0x528] sm:$0xff]   ;;  %v9813_v56 = vld [vmem:[%s10330_s23 + $0x5b0] sm:$0xff]   ;;  %v9814_v59 = vld [vmem:[%s10330_s23 + $0x578] sm:$0xff]  }
0x233d   : > { %v7070_v42 = vpack.c.bf16 %v7066_v28, %v7062_v23  ;;  %v7059_v51 = vadd.f32 1.0, %v7051_v0  ;;  %v9817_v23 = vld [vmem:[%s10330_s23 + $0x5b8] sm:$0xff]   ;;  %v7424_v0 = vld [vmem:[%s10315_s6 + $0x14] sm:$0xf] }
0x233e   : > { %7360 = vmatprep.mubr.bf16.mxu0 %v7069_v47 }
0x233f   : > { %7361 = vmatmul.mubr.bf16.vlgmr.msra.gmra.mrb[64].mxu0 %v7068_v29  ;;  %v7067_v15 = vmul.f32 %v7059_v51, %v6859_v26  ;;  %v9802_v29 = vld [vmem:[%s10330_s23 + $0x560] sm:$0xff]   ;;  %v7429_v51 = vrot.slane %v7424_v0, %v12286_v62 }
0x2340   : > { %7507 = vmatpush1.bf16.msra.mxu0 %v8701_v31  ;;  %7538 = vmatprep.mubr.bf16.mxu0 %v12284_v57  ;;  %v8707_v31 = vcombine.low %v7417_v22, %v7419_v48 }
0x2341   : > { %7508 = vmatprep.subr.bf16.mxu0 %v8706_v14  ;;  %v7071_v3 = vpack.c.bf16 %v7067_v15, %v7063_v34  ;;  %v7433_v34 = vrot.slane %v7424_v0, %v12287_v20 }
0x2343   : > { %7401 = vmatprep.mubr.bf16.mxu1 %v7071_v3 }
0x2344   : > { %7509 = vmatpush1.bf16.msra.mxu0 %v8705_v19  ;;  %7402 = vmatmul.mubr.bf16.vlgmr.msra.gmra.mrb[64].mxu1 %v7070_v42 }
0x2345   : > { %7510 = vmatprep.subr.bf16.mxu0 %v8710_v46  ;;  %7550 = vmatpush1.bf16.msra.mxu1 %v8703_v10  ;;  %v9789_v10 = vld [vmem:[%s10330_s23 + $0x580] sm:$0xff]  }
0x2346   : > { %7581 = vmatprep.mubr.bf16.mxu1 %v12284_v57  ;;  %7551 = vmatprep.subr.bf16.mxu1 %v8708_v61  ;;  %v9787_v57 = vld [vmem:[%s10330_s23 + $0x5c0] sm:$0xff]  }
0x2348   : > { %7511 = vmatpush1.bf16.msra.mxu0 %v8709_v44 }
0x2349   : > { %7552 = vmatpush1.bf16.msra.mxu1 %v8707_v31  ;;  %9095 = vmatprep.subr.bf16.mxu0 %v9786_v52 }
0x234a   : > { %7553 = vmatprep.subr.bf16.mxu1 %v8712_v1 }
0x234b   : > { %8713 = vmatmul.mubr.msk.bf16.vlgmr.msra.gmra.mrb[68].mxu0 %vm928_vm1, %v12285_v41 }
0x234c   : > { %9096 = vmatpush3.bf16.msra.mxu0 %v9788_v60 }
0x234d   : > { %7554 = vmatpush1.bf16.msra.mxu1 %v8711_v32  ;;  %9097 = vmatprep.subr.bf16.mxu0 %v9790_v43  ;;  %v7437_v32 = vrot.slane %v7424_v0, %v12288_v37 }
0x234e   : > { %9117 = vmatprep.subr.bf16.mxu1 %v9787_v57  ;;  %v7441_v57 = vrot.slane %v7424_v0, %v10916_v30 }
0x2350   : > { %8714 = vmatmul.mubr.msk.bf16.vlgmr.msra.gmra.mrb[68].mxu1 %vm928_vm1, %v12285_v41  ;;  %9098 = vmatpush3.bf16.msra.mxu0 %v9792_v50  ;;  %v9794_v41 = vld [vmem:[%s10330_s23 + $0x550] sm:$0xff]   ;;  %s12289_s23 = scalar_lea.vmem %s12212_s15, %s10271_s29 }
0x2351   : > { %9118 = vmatpush3.bf16.msra.mxu1 %v9789_v10  ;;  %9099 = vmatprep.subr.bf16.mxu0 %v9794_v41 }
0x2352   : > { %9119 = vmatprep.subr.bf16.mxu1 %v9791_v40 }
0x2354   : > { %9100 = vmatpush3.bf16.msra.mxu0 %v9796_v8 }
0x2355   : > { %9120 = vmatpush3.bf16.msra.mxu1 %v9793_v5  ;;  %9101 = vmatprep.subr.bf16.mxu0 %v9798_v25 }
0x2356   : > { %9121 = vmatprep.subr.bf16.mxu1 %v9795_v55 }
0x2358   : > { %9102 = vmatpush3.bf16.msra.mxu0 %v9800_v49 }
0x2359   : > { %9122 = vmatpush3.bf16.msra.mxu1 %v9797_v35  ;;  %9103 = vmatprep.subr.bf16.mxu0 %v9802_v29 }
0x235a   : > { %9123 = vmatprep.subr.bf16.mxu1 %v9799_v38 }
0x235c   : > { %9104 = vmatpush3.bf16.msra.mxu0 %v9804_v36 }
0x235d   : > { %9124 = vmatpush3.bf16.msra.mxu1 %v9801_v18  ;;  %9105 = vmatprep.subr.bf16.mxu0 %v9806_v27 }
0x235e   : > { %9125 = vmatprep.subr.bf16.mxu1 %v9803_v39 }
0x2360   : > { %9106 = vmatpush3.bf16.msra.mxu0 %v9808_v54 }
0x2361   : > { %9126 = vmatpush3.bf16.msra.mxu1 %v9805_v2  ;;  %9107 = vmatprep.subr.bf16.mxu0 %v9810_v7 }
0x2362   : > { %9127 = vmatprep.subr.bf16.mxu1 %v9807_v33 }
0x2364   : > { %9108 = vmatpush3.bf16.msra.mxu0 %v9812_v58 }
0x2365   : > { %9128 = vmatpush3.bf16.msra.mxu1 %v9809_v24  ;;  %9109 = vmatprep.subr.bf16.mxu0 %v9814_v59 }
0x2366   : > { %9129 = vmatprep.subr.bf16.mxu1 %v9811_v9 }
0x2368   : > { %9110 = vmatpush3.bf16.msra.mxu0 %v9816_v16 }
0x2369   : > { %9130 = vmatpush3.bf16.msra.mxu1 %v9813_v56 }
0x236a   : > { %9131 = vmatprep.subr.bf16.mxu1 %v9815_v45 }
0x236d   : > { %9132 = vmatpush3.bf16.msra.mxu1 %v9817_v23 }
0x2412   : > { %v9067_v28 = vpop.f32.mrb[64].mxu0 }
0x2413   : > { %v9068_v4 = vpop.f32.mrb[65].mxu0 }
0x2414   : > { %v9069_v47 = vadd.f32 %v9068_v4, %v9067_v28  ;;  %v9070_v63 = vpop.f32.mrb[66].mxu0 }
0x2415   : > { %v9071_v14 = vpop.f32.mrb[67].mxu0 }
0x2416   : > { %v9072_v42 = vadd.f32 %v9071_v14, %v9070_v63 }
0x2417   : > { %v9089_v21 = vpop.f32.mrb[64].mxu1 }
0x2418   : > { %v9090_v53 = vpop.f32.mrb[65].mxu1 }
0x2419   : > { %v9091_v12 = vadd.f32 %v9090_v53, %v9089_v21  ;;  %v9092_v26 = vpop.f32.mrb[66].mxu1 }
0x241a   : > { %v9093_v19 = vpop.f32.mrb[67].mxu1 }
0x241b   : > { %v7404_v15 = vadd.f32 %v9091_v12, %v9069_v47  ;;  %v9094_v22 = vadd.f32 %v9093_v19, %v9092_v26 }
0x241d   : > { %v12032_v46 = vadd.f32 %v7404_v15, %v11844_v17  ;;  %v7407_v3 = vadd.f32 %v9094_v22, %v9072_v42 }
0x241e   : > { %v7540_v48 = vpop.f32.mrb[68].mxu0 }
0x241f   : > { %v12034_v61 = vadd.f32 %v7540_v48, %v7429_v51  ;;  %v7542_v44 = vpop.f32.mrb[69].mxu0  ;;  %v12039_v31 = vadd.f32 %v7407_v3, %v11847_v11 }
0x2420   : > { %v12036_v6 = vadd.f32 %v7542_v44, %v7433_v34  ;;  %v7544_v13 = vpop.f32.mrb[70].mxu0 }
0x2421   : > { %v12042_v62 = vmul.f32 0.70710677, %v12034_v61  ;;  %v12044_v20 = vadd.f32 %v7544_v13, %v7429_v51  ;;  %v7546_v1 = vpop.f32.mrb[71].mxu0 }
0x2422   : > { %v12048_v17 = vmul.f32 0.70710677, %v12036_v6  ;;  %v12059_v41 = vadd.f32 %v7546_v1, %v7433_v34 }
0x2423   : > { %v7608_v52 = vand.u32 2147483647, %v12042_v62  ;;  %v12053_v60 = vmul.f32 0.70710677, %v12044_v20  ;;  %v7583_v43 = vpop.f32.mrb[68].mxu1  ;;  %vm7768_vm12 = vcmp.ge.f32.partialorder %v12042_v62, 0.0 }
0x2424   : > { %v7609_v11 = vand.u32 2147483647, %v12048_v17  ;;  %v12057_v50 = vadd.f32 %v7583_v43, %v7437_v32  ;;  %v7585_v37 = vpop.f32.mrb[69].mxu1  ;;  %v12071_v39 = vmul.f32 0.70710677, %v12059_v41  ;;  %vm7769_vm14 = vcmp.ge.f32.partialorder %v12048_v17, 0.0 }
0x2425   : > { %v7616_v10 = vmul.f32 0.3275911, %v7608_v52  ;;  %v7612_v40 = vand.u32 2147483647, %v12053_v60  ;;  %v12061_v8 = vadd.f32 %v7585_v37, %v7441_v57  ;;  %v7587_v30 = vpop.f32.mrb[70].mxu1  ;;  %v7720_v27 = vsub.f32 0.0, %v7608_v52 }
0x2426   : > { %v7617_v5 = vmul.f32 0.3275911, %v7609_v11  ;;  %v12064_v25 = vmul.f32 0.70710677, %v12057_v50  ;;  %v7589_v49 = vpop.f32.mrb[71].mxu1  ;;  %v12074_v24 = vadd.f32 %v7587_v30, %v7437_v32  ;;  %v7721_v9 = vsub.f32 0.0, %v7609_v11 }
0x2427   : > { %v7624_v55 = vadd.f32 1.0, %v7616_v10  ;;  %v7620_v35 = vmul.f32 0.3275911, %v7612_v40  ;;  %v12067_v18 = vmul.f32 0.70710677, %v12061_v8  ;;  %v7728_v16 = vmul.f32 %v7720_v27, %v7608_v52 }
0x2428   : > { %v7625_v38 = vadd.f32 1.0, %v7617_v5  ;;  %v7610_v29 = vand.u32 2147483647, %v12064_v25  ;;  %v7613_v58 = vand.u32 2147483647, %v12071_v39  ;;  %v7724_v28 = vsub.f32 0.0, %v7612_v40 }
0x2429   : > { %10082 = vrcp.f32 %v7624_v55  ;;  %v7611_v36 = vand.u32 2147483647, %v12067_v18  ;;  %v7628_v2 = vadd.f32 1.0, %v7620_v35  ;;  %v12078_v45 = vmul.f32 0.70710677, %v12074_v24 }
0x242a   : > { %10084 = vrcp.f32 %v7625_v38  ;;  %v7618_v33 = vmul.f32 0.3275911, %v7610_v29  ;;  %v7722_v56 = vsub.f32 0.0, %v7610_v29  ;;  %v7621_v23 = vmul.f32 0.3275911, %v7613_v58 }
0x242b   : > { %v7619_v54 = vmul.f32 0.3275911, %v7611_v36  ;;  %10086 = vrcp.f32 %v7628_v2  ;;  %v7614_v4 = vand.u32 2147483647, %v12078_v45  ;;  %v7729_v47 = vmul.f32 %v7721_v9, %v7609_v11 }
0x242c   : > { %v7626_v7 = vadd.f32 1.0, %v7618_v33  ;;  %v7723_v63 = vsub.f32 0.0, %v7611_v36  ;;  %v7629_v14 = vadd.f32 1.0, %v7621_v23  ;;  %v7730_v0 = vmul.f32 %v7722_v56, %v7610_v29 }
0x242d   : > { %v7627_v59 = vadd.f32 1.0, %v7619_v54  ;;  %v7622_v21 = vmul.f32 0.3275911, %v7614_v4  ;;  %v12083_v53 = vadd.f32 %v7589_v49, %v7441_v57  ;;  %v7736_v51 = vmul.f32 1.442695, %v7728_v16 }
0x242e   : > { %10088 = vrcp.f32 %v7626_v7  ;;  %v7732_v34 = vmul.f32 %v7724_v28, %v7612_v40  ;;  %v7738_v48 = vmul.f32 1.442695, %v7729_v47  ;;  %v7731_v3 = vmul.f32 %v7723_v63, %v7611_v36 }
0x242f   : > { %10090 = vrcp.f32 %v7627_v59  ;;  %v7630_v15 = vadd.f32 1.0, %v7622_v21  ;;  %v7740_v13 = vmul.f32 1.442695, %v7730_v0  ;;  %v12092_v32 = vmul.f32 0.70710677, %v12083_v53 }
0x2430   : > { %10092 = vrcp.f32 %v7629_v14  ;;  %v7725_v11 = vsub.f32 0.0, %v7613_v58  ;;  %v7744_v43 = vmul.f32 1.442695, %v7732_v34  ;;  %v7726_v40 = vsub.f32 0.0, %v7614_v4 }
0x2431   : > { %10094 = vrcp.f32 %v7630_v15  ;;  %v12098_v5 = vand.u32 2147483647, %v12092_v32  ;;  %v7742_v35 = vmul.f32 1.442695, %v7731_v3  ;;  %vm7772_vm13 = vcmp.ge.f32.partialorder %v12053_v60, 0.0 }
0x2432   : > { %10096 = vpow2.f32 %v7736_v51  ;;  %v7733_v54 = vmul.f32 %v7725_v11, %v7613_v58  ;;  %v7734_v56 = vmul.f32 %v7726_v40, %v7614_v4  ;;  %vm7770_vm15 = vcmp.ge.f32.partialorder %v12064_v25, 0.0 }
0x2433   : > { %v12081_v42 = vpop.eup %10082  ;;  %10098 = vpow2.f32 %v7738_v48  ;;  %v7623_v36 = vmul.f32 0.3275911, %v12098_v5  ;;  %vm7773_vm0 = vcmp.ge.f32.partialorder %v12071_v39, 0.0  ;;  %vm7774_vm2 = vcmp.ge.f32.partialorder %v12078_v45, 0.0 }
0x2434   : > { %v12085_v12 = vpop.eup %10084  ;;  %v7648_v26 = vmul.f32 1.0614054, %v12081_v42  ;;  %10100 = vpow2.f32 %v7740_v13  ;;  %v7748_v34 = vmul.f32 1.442695, %v7734_v56  ;;  %v7746_v15 = vmul.f32 1.442695, %v7733_v54 }
0x2435   : > { %v7649_v19 = vmul.f32 1.0614054, %v12085_v12  ;;  %v12089_v44 = vpop.eup %10086  ;;  %v7631_v59 = vadd.f32 1.0, %v7623_v36  ;;  %10102 = vpow2.f32 %v7744_v43  ;;  %v7597_v25 = vmul.f32 0.5, %v12059_v41 }
0x2436   : > { %v7656_v22 = vadd.f32 -1.4531521, %v7648_v26  ;;  %v7652_v57 = vmul.f32 1.0614054, %v12089_v44  ;;  %vm7771_vm3 = vcmp.ge.f32.partialorder %v12067_v18, 0.0  ;;  %vm7775_vm4 = vcmp.ge.f32.partialorder %v12092_v32, 0.0 }
0x2437   : > { %v7657_v1 = vadd.f32 -1.4531521, %v7649_v19  ;;  %10104 = vrcp.f32 %v7631_v59 }
0x2438   : > { %v7664_v52 = vmul.f32 %v12081_v42, %v7656_v22  ;;  %v12100_v37 = vpop.eup %10088  ;;  %v7660_v30 = vadd.f32 -1.4531521, %v7652_v57  ;;  %10106 = vpow2.f32 %v7742_v35 }
0x2439   : > { %v7665_v10 = vmul.f32 %v12085_v12, %v7657_v1  ;;  %v12102_v38 = vpop.eup %10090  ;;  %v7650_v49 = vmul.f32 1.0614054, %v12100_v37  ;;  %10108 = vpow2.f32 %v7746_v15 }
0x243a   : > { %v7672_v55 = vadd.f32 1.4214138, %v7664_v52  ;;  %v7651_v27 = vmul.f32 1.0614054, %v12102_v38  ;;  %v7668_v33 = vmul.f32 %v12089_v44, %v7660_v30  ;;  %v12110_v47 = vpop.eup %10092  ;;  %v7727_v30 = vsub.f32 0.0, %v12098_v5 }
0x243b   : > { %v7673_v29 = vadd.f32 1.4214138, %v7665_v10  ;;  %v7658_v7 = vadd.f32 -1.4531521, %v7650_v49  ;;  %v7653_v26 = vmul.f32 1.0614054, %v12110_v47  ;;  %v12117_v4 = vpop.eup %10094  ;;  %10110 = vpow2.f32 %v7748_v34 }
0x243c   : > { %v7680_v2 = vmul.f32 %v12081_v42, %v7672_v55  ;;  %v7659_v23 = vadd.f32 -1.4531521, %v7651_v27  ;;  %v7676_v28 = vadd.f32 1.4214138, %v7668_v33  ;;  %v10097_v22 = vpop.eup %10096  ;;  %v7654_v57 = vmul.f32 1.0614054, %v12117_v4 }
0x243d   : > { %v7681_v9 = vmul.f32 %v12085_v12, %v7673_v29  ;;  %v7666_v63 = vmul.f32 %v12100_v37, %v7658_v7  ;;  %v7661_v11 = vadd.f32 -1.4531521, %v7653_v26  ;;  %v10099_v10 = vpop.eup %10098 }
0x243e   : > { %v7688_v16 = vadd.f32 -0.28449672, %v7680_v2  ;;  %v7667_v21 = vmul.f32 %v12102_v38, %v7659_v23  ;;  %v7684_v58 = vmul.f32 %v12089_v44, %v7676_v28  ;;  %v10101_v49 = vpop.eup %10100  ;;  %v7662_v36 = vadd.f32 -1.4531521, %v7654_v57 }
0x243f   : > { %v7689_v14 = vadd.f32 -0.28449672, %v7681_v9  ;;  %v7674_v51 = vadd.f32 1.4214138, %v7666_v63  ;;  %v7669_v2 = vmul.f32 %v12110_v47, %v7661_v11  ;;  %v10103_v56 = vpop.eup %10102 }
0x2440   : > { %v7696_v0 = vmul.f32 %v12081_v42, %v7688_v16  ;;  %v7675_v3 = vadd.f32 1.4214138, %v7667_v21  ;;  %v7692_v13 = vadd.f32 -0.28449672, %v7684_v58 }
0x2441   : > { %v7697_v19 = vmul.f32 %v12085_v12, %v7689_v14  ;;  %v7682_v1 = vmul.f32 %v12100_v37, %v7674_v51  ;;  %v7677_v9 = vadd.f32 1.4214138, %v7669_v2  ;;  %v12133_v28 = vpop.eup %10104 }
0x2442   : > { %v7704_v48 = vadd.f32 0.2548296, %v7696_v0  ;;  %v7683_v40 = vmul.f32 %v12102_v38, %v7675_v3  ;;  %v7700_v55 = vmul.f32 %v12089_v44, %v7692_v13 }
0x2443   : > { %v7705_v52 = vadd.f32 0.2548296, %v7697_v19  ;;  %v7690_v29 = vadd.f32 -0.28449672, %v7682_v1  ;;  %v7685_v21 = vmul.f32 %v12110_v47, %v7677_v9  ;;  %v7655_v19 = vmul.f32 1.0614054, %v12133_v28 }
0x2444   : > { %v7712_v43 = vmul.f32 %v12081_v42, %v7704_v48  ;;  %v7691_v33 = vadd.f32 -0.28449672, %v7683_v40  ;;  %v7708_v54 = vadd.f32 0.2548296, %v7700_v55  ;;  %v7670_v42 = vmul.f32 %v12117_v4, %v7662_v36 }
0x2445   : > { %v7713_v35 = vmul.f32 %v12085_v12, %v7705_v52  ;;  %v7698_v7 = vmul.f32 %v12100_v37, %v7690_v29  ;;  %v7735_v12 = vmul.f32 %v7727_v30, %v12098_v5  ;;  %v7693_v15 = vadd.f32 -0.28449672, %v7685_v21  ;;  %v10107_v5 = vpop.eup %10106 }
0x2446   : > { %v7752_v27 = vmul.f32 %v10097_v22, %v7712_v43  ;;  %v7699_v16 = vmul.f32 %v12102_v38, %v7691_v33  ;;  %v7716_v23 = vmul.f32 %v12089_v44, %v7708_v54  ;;  %v7678_v0 = vadd.f32 1.4214138, %v7670_v42  ;;  %v10109_v30 = vpop.eup %10108 }
0x2447   : > { %v7706_v63 = vadd.f32 0.2548296, %v7698_v7  ;;  %v7753_v14 = vmul.f32 %v10099_v10, %v7713_v35  ;;  %v7663_v3 = vadd.f32 -1.4531521, %v7655_v19  ;;  %v7750_v57 = vmul.f32 1.442695, %v7735_v12  ;;  %v10111_v2 = vpop.eup %10110 }
0x2448   : > { %v7760_v59 = vsub.f32 1.0, %v7752_v27  ;;  %v7707_v26 = vadd.f32 0.2548296, %v7699_v16  ;;  %v7756_v51 = vmul.f32 %v10103_v56, %v7716_v23  ;;  %v7686_v44 = vmul.f32 %v12117_v4, %v7678_v0 }
0x2449   : > { %v7714_v34 = vmul.f32 %v12100_v37, %v7706_v63  ;;  %v7761_v1 = vsub.f32 1.0, %v7753_v14  ;;  %v7701_v40 = vmul.f32 %v12110_v47, %v7693_v15  ;;  %v7671_v55 = vmul.f32 %v12133_v28, %v7663_v3 }
0x244a   : > { %v7776_v58 = vsub.f32 0.0, %v7760_v59  ;;  %v7764_v48 = vsub.f32 1.0, %v7756_v51  ;;  %v7694_v52 = vadd.f32 -0.28449672, %v7686_v44  ;;  %v7715_v10 = vmul.f32 %v12102_v38, %v7707_v26 }
0x244b   : > { %v7754_v13 = vmul.f32 %v10101_v49, %v7714_v34  ;;  %v7592_v29 = vmul.f32 0.5, %v12034_v61  ;;  %v7596_v49 = vmul.f32 0.5, %v12044_v20  ;;  %v7709_v36 = vadd.f32 0.2548296, %v7701_v40 }
0x244c   : > { %v7784_v22 = vsel %vm7768_vm12, %v7760_v59, %v7776_v58  ;;  %v7780_v43 = vsub.f32 0.0, %v7764_v48  ;;  %v7702_v37 = vmul.f32 %v12117_v4, %v7694_v52  ;;  %v7679_v33 = vadd.f32 1.4214138, %v7671_v55 }
0x244d   : > { %v7792_v11 = vadd.f32 1.0, %v7784_v22  ;;  %v7762_v62 = vsub.f32 1.0, %v7754_v13  ;;  %10112 = vpow2.f32 %v7750_v57  ;;  %v7777_v7 = vsub.f32 0.0, %v7761_v1 }
0x244e   : > { %v7788_v35 = vsel %vm7772_vm13, %v7764_v48, %v7780_v43  ;;  %v7710_v38 = vadd.f32 0.2548296, %v7702_v37  ;;  %v7755_v42 = vmul.f32 %v10107_v5, %v7715_v10  ;;  %v7717_v60 = vmul.f32 %v12110_v47, %v7709_v36 }
0x244f   : > { %v7796_v27 = vadd.f32 1.0, %v7788_v35  ;;  %v7800_v54 = vmul.f32 %v7792_v11, %v7592_v29  ;;  %v7778_v9 = vsub.f32 0.0, %v7762_v62  ;;  %v7687_v61 = vmul.f32 %v12133_v28, %v7679_v33 }
0x2450   : > { %v7718_v59 = vmul.f32 %v12117_v4, %v7710_v38  ;;  %v7757_v16 = vmul.f32 %v10109_v30, %v7717_v60  ;;  %v7785_v63 = vsel %vm7769_vm14, %v7761_v1, %v7777_v7  ;;  %v7763_v21 = vsub.f32 1.0, %v7755_v42 }
0x2451   : > { %v7804_v56 = vmul.f32 %v7796_v27, %v7596_v49  ;;  %v7695_v12 = vadd.f32 -0.28449672, %v7687_v61  ;;  %v7786_v0 = vsel %vm7770_vm15, %v7762_v62, %v7778_v9  ;;  %v7593_v26 = vmul.f32 0.5, %v12036_v6 }
0x2452   : > { %v7758_v23 = vmul.f32 %v10111_v2, %v7718_v59  ;;  %v7765_v14 = vsub.f32 1.0, %v7757_v16  ;;  %v7793_v51 = vadd.f32 1.0, %v7785_v63  ;;  %v7794_v34 = vadd.f32 1.0, %v7786_v0  ;;  %v12290_v59 = vld [vmem:[#allocation7_spill] sm:$0xff] }
0x2453   : > { %v7808_v20 = vpack.c.bf16 %v7804_v56, %v7800_v54  ;;  %v7703_v47 = vmul.f32 %v12133_v28, %v7695_v12  ;;  %v7779_v5 = vsub.f32 0.0, %v7763_v21  ;;  %v7594_v6 = vmul.f32 0.5, %v12057_v50  ;;  %v8747_v56 = vld [vmem:[%s12289_s23] ss:$0 sm:$0xff] }
0x2454   : > { %v7766_v58 = vsub.f32 1.0, %v7758_v23  ;;  %v7781_v4 = vsub.f32 0.0, %v7765_v14  ;;  %v7598_v13 = vmul.f32 0.5, %v12074_v24  ;;  %v7801_v52 = vmul.f32 %v7793_v51, %v7593_v26  ;;  %v12291_v23 = vld [vmem:[#allocation8_spill] sm:$0xff] }
0x2455   : > { %v7711_v17 = vadd.f32 0.2548296, %v7703_v47  ;;  %v7802_v11 = vmul.f32 %v7794_v34, %v7594_v6  ;;  %v7787_v41 = vsel %vm7771_vm3, %v7763_v21, %v7779_v5  ;;  %v7595_v24 = vmul.f32 0.5, %v12061_v8 }
0x2456   : > { %v7782_v19 = vsub.f32 0.0, %v7766_v58  ;;  %v7789_v44 = vsel %vm7773_vm0, %v7765_v14, %v7781_v4  ;;  %v7795_v37 = vadd.f32 1.0, %v7787_v41 }
0x2457   : > { %v10113_v15 = vpop.eup %10112  ;;  %v7797_v48 = vadd.f32 1.0, %v7789_v44  ;;  %v7719_v3 = vmul.f32 %v12133_v28, %v7711_v17  ;;  %v7599_v28 = vmul.f32 0.5, %v12083_v53 }
0x2458   : > { %v7790_v22 = vsel %vm7774_vm2, %v7766_v58, %v7782_v19  ;;  %v7803_v30 = vmul.f32 %v7795_v37, %v7595_v24 }
0x2459   : > { %v7798_v1 = vadd.f32 1.0, %v7790_v22  ;;  %v7805_v39 = vmul.f32 %v7797_v48, %v7597_v25  ;;  %v7759_v57 = vmul.f32 %v10113_v15, %v7719_v3  ;;  %v8749_v3 = vld [vmem:[%s12292_s19] ss:$0 sm:$0xff] (!%p8748_p5) }
0x245b   : > { %v7806_v45 = vmul.f32 %v7798_v1, %v7598_v13  ;;  %v7767_v10 = vsub.f32 1.0, %v7759_v57  ;;  %v7809_v43 = vpack.c.bf16 %v7805_v39, %v7801_v52  ;;  %v8750_v13 = vld [vmem:[%s12293_s25] ss:$0 sm:$0xff] (!%p8748_p5) }
0x245d   : > { %v7810_v40 = vpack.c.bf16 %v7806_v45, %v7802_v11  ;;  %v7783_v62 = vsub.f32 0.0, %v7767_v10  ;;  %8100 = vmatprep.mubr.bf16.mxu0 %v7809_v43 }
0x245e   : > { %8101 = vmatmul.mubr.bf16.vlgmr.msra.gmra.mrb[72].mxu0 %v7808_v20 }
0x245f   : > { %v7791_v50 = vsel %vm7775_vm4, %v7767_v10, %v7783_v62 }
0x2460   : > { %v7799_v55 = vadd.f32 1.0, %v7791_v50 }
0x2462   : > { %v7807_v29 = vmul.f32 %v7799_v55, %v7599_v28 }
0x2464   : > { %v7811_v18 = vpack.c.bf16 %v7807_v29, %v7803_v30 }
0x2466   : > { %8141 = vmatprep.mubr.bf16.mxu1 %v7811_v18 }
0x2467   : > { %8142 = vmatmul.mubr.bf16.vlgmr.msra.gmra.mrb[72].mxu1 %v7810_v40 }
0x2531   : > { %v9111_v49 = vpop.f32.mrb[72].mxu0 }
0x2532   : > { %v9112_v35 = vpop.f32.mrb[73].mxu0 }
0x2533   : > { %v9113_v36 = vadd.f32 %v9112_v35, %v9111_v49  ;;  %v9114_v2 = vpop.f32.mrb[74].mxu0 }
0x2534   : > { %v9115_v27 = vpop.f32.mrb[75].mxu0 }
0x2535   : > { %v9116_v38 = vadd.f32 %v9115_v27, %v9114_v2 }
0x253a   : > { %v9133_v32 = vpop.f32.mrb[72].mxu1 }
0x253b   : > { %v9134_v33 = vpop.f32.mrb[73].mxu1 }
0x253c   : > { %v9135_v54 = vadd.f32 %v9134_v33, %v9133_v32  ;;  %v9136_v7 = vpop.f32.mrb[74].mxu1 }
0x253d   : > { %v9137_v8 = vpop.f32.mrb[75].mxu1 }
0x253e   : > { %v8144_v42 = vadd.f32 %v9135_v54, %v9113_v36  ;;  %v9138_v53 = vadd.f32 %v9137_v8, %v9136_v7 }
0x2540   : > { %v8150_v60 = vadd.f32 %v8144_v42, %v12032_v46  ;;  %v8147_v9 = vadd.f32 %v9138_v53, %v9116_v38 }
0x2542   : > { %v8152_v61 = vadd.f32 %v8150_v60, %v12290_v59  ;;  %v8151_v16 = vadd.f32 %v8147_v9, %v12039_v31  ;;  %8168 = sbr.rel (%p8748_p5) target bundleno = 9860 (0x2684), region = 100 }
0x2544   : > { %v8161_v20 = vadd.f32 %v8747_v56, %v8152_v61  ;;  %v8153_v12 = vadd.f32 %v8151_v16, %v12291_v23 }
0x2546   : > { %8163 = vst.msk [vmem:[#allocation2] sm:$0xff] %vm928_vm1, %v8161_v20  ;;  %v8162_v63 = vadd.f32 %v8747_v56, %v8153_v12  ;;  %v8171_v46 = vsel (!%p8748_p5), %vm928_vm1, %v8161_v20, 0.0 }
0x2547   : > { %8172 = vadd.xlane.f32.xlu0 (!%p8748_p5), %v8171_v46 }
0x2548   : > { %8164 = vst.msk [vmem:[#allocation2 + $0x8] sm:$0xff] %vm928_vm1, %v8162_v63  ;;  %v8174_v14 = vsel (!%p8748_p5), %vm928_vm1, %v8162_v63, 0.0 }
0x254b   : > { %8175 = vadd.xlane.f32.xlu0 %v8174_v14 }
0x25d4   : > { %v8173_v0 = vpop.xlane.xlu0 %8172 }
0x25d5   : > { %v8177_v21 = vmul.f32 0.020833334, %v8173_v0 }
0x25d7   : > { %v8179_v31 = vsub.f32 %v8161_v20, %v8177_v21 }
0x25d8   : > { %v8176_v58 = vpop.xlane.xlu0 %8175 }
0x25d9   : > { %v8178_v47 = vmul.f32 0.020833334, %v8176_v58  ;;  %v8181_v26 = vmul.f32 %v8179_v31, %v8179_v31 }
0x25db   : > { %v8180_v4 = vsub.f32 %v8162_v63, %v8178_v47  ;;  %v8183_v51 = vsel %vm928_vm1, %v8181_v26, 0.0 }
0x25dc   : > { %8184 = vadd.xlane.f32.xlu1 %v8183_v51 }
0x25dd   : > { %v8182_v19 = vmul.f32 %v8180_v4, %v8180_v4 }
0x25df   : > { %v8186_v17 = vsel %vm928_vm1, %v8182_v19, 0.0 }
0x25e0   : > { %8187 = vadd.xlane.f32.xlu1 %v8186_v17 }
0x2669   : > { %v8185_v34 = vpop.xlane.xlu1 %8184 }
0x266a   : > { %v8189_v25 = vmul.f32 0.020833334, %v8185_v34 }
0x266c   : > { %v8191_v44 = vadd.f32 1e-12, %v8189_v25 }
0x266d   : > { %v8188_v15 = vpop.xlane.xlu1 %8187 }
0x266e   : > { %10118 = vrsqrt.f32 %v8191_v44  ;;  %v8190_v5 = vmul.f32 0.020833334, %v8188_v15 }
0x2670   : > { %v8192_v22 = vadd.f32 1e-12, %v8190_v5 }
0x2672   : > { %10120 = vrsqrt.f32 %v8192_v22 }
0x2678   : > { %v10119_v48 = vpop.eup %10118 }
0x2679   : > { %v8195_v6 = vmul.f32 %v10119_v48, %v8179_v31 }
0x267b   : > { %v8203_v1 = vmul.f32 %v8749_v3, %v8195_v6 }
0x267c   : > { %v10121_v52 = vpop.eup %10120 }
0x267d   : > { %v8211_v39 = vadd.f32 %v8750_v13, %v8203_v1  ;;  %v8196_v57 = vmul.f32 %v10121_v52, %v8180_v4 }
0x267f   : > { %8213 = vst.msk [vmem:[%s12294_s8] sm:$0xff] %vm928_vm1, %v8211_v39  ;;  %v8204_v11 = vmul.f32 %v8749_v3, %v8196_v57 }
0x2681   : > { %v8212_v45 = vadd.f32 %v8750_v13, %v8204_v11 }
0x2683   : > { %8214 = vst.msk [vmem:[%s12294_s8 + $0x8] sm:$0xff] %vm928_vm1, %v8212_v45 }
0x2684 PF: > { %s12295_s17 = sld [smem:[#allocation4_spill]] }
0x268a   : > { %s28_s27 = sadd.s32 1, %s12295_s17  }
0x268b   : > { %p25_p6 = scmp.ge.s32.totalorder %s28_s27, 14  }
0x268d   :  { %27 = sbr.rel (!%p25_p6) target bundleno = 11 (0xb), region = 159 }

</bundles_post_ra>
